<compile_context>
chip_gen: v7x
topology: tpu7x:2x2x1
jax: 0.10.0
libtpu: 0.0.40
codegen_flags: <defaults>
</compile_context>

<pallas_src>
import functools

import jax
import jax.numpy as jnp
from jax import lax
from jax.experimental import pallas as pl
from jax.experimental.pallas import tpu as pltpu


# -----------------------------------------------------------------------------
# Model configuration (from config.part_segmentation / transformer_config)
# -----------------------------------------------------------------------------
TRANS_DIM = 32                                   # config.transformer_config.trans_dim
CLASS_NUM = 8                                    # config.class_num
CHANNEL_LIST = [32, 32, 32, 32]                  # channels of [f4, f3, f2, f1]
DE_IN_LIST = [64, 64, 64, 32]                    # de_inchannel_list
DE_OUT_LIST = [32, 32, 32, 32]                   # de_outchannel_list (last == trans_dim)


# -----------------------------------------------------------------------------
# The single fused head kernel
# -----------------------------------------------------------------------------

def _head_kernel(*refs, slope):
  (xc0, xc1, xc2, xc3,            # coarse xyz, point-major (S_i, 3)
   xf0, xf1, xf2, xf3,            # fine xyz, channel-major (3, N_i)
   f4_ref, f3_ref, f2_ref, f1_ref,  # backbone features, channel-major (32, N_k)
   dw0, db0, dw1, db1, dw2, db2, dw3, db3,   # decoder weight packs / bias packs
   gdw, gdb, gfw,                 # global_down weights (5,64,32), biases (6,64,1), fuse (64,320)
   cwx, cwg, cb,                  # folded classifier (C,32) (C,64) (C,1)
   o_ref,                         # output log-probs, channel-major (C, N)
   gscr) = refs                   # (320,1) f32 VMEM scratch for pooled global vectors

  def lrelu(y):
    return jnp.where(y >= 0, y, slope * y)

  def mm(w_bf16, a_f32):
    # bf16 MXU operands, f32 accumulation
    return jnp.dot(w_bf16, a_f32.astype(jnp.bfloat16),
                   preferred_element_type=jnp.float32)

  def fp_level(xc_ref, xf_ref, p2, p1, w_ref, b_ref):
    """PointNetFeaturePropagation: 3-NN IDW interpolation + fuse/net1..net4 chain."""
    x2 = xc_ref[...]                       # (S, 3) coarse, point-major
    x1 = xf_ref[...]                       # (3, N) fine, channel-major (lane-dense)
    S = x2.shape[0]
    N = x1.shape[1]

    # squared pairwise distances via |a|^2 + |b|^2 - 2 a.b (same as torch square_distance).
    cross = jnp.dot(x2, x1, preferred_element_type=jnp.float32)          # (S, N) MXU
    d = jnp.maximum(jnp.sum(x2 * x2, axis=1, keepdims=True)
                    + jnp.sum(x1 * x1, axis=0, keepdims=True)
                    - 2.0 * cross, 0.0)

    # 3 nearest neighbours by iterative min with smallest-index tie-break (== torch.sort).
    sub = lax.broadcasted_iota(jnp.int32, (S, N), 0)
    recip_sum = jnp.zeros((1, N), jnp.float32)
    wsel = jnp.zeros((S, N), jnp.float32)  # unnormalized IDW weights (scatter-free)
    for _ in range(3):
      m = jnp.min(d, axis=0, keepdims=True)                    # (1, N)
      sel = jnp.min(jnp.where(d == m, sub, S), axis=0, keepdims=True)
      onehot = sub == sel
      r = pl.reciprocal(m + 1e-8, approx=True)                 # EUP slot, off the VPU
      recip_sum = recip_sum + r
      wsel = wsel + jnp.where(onehot, r, 0.0)
      d = jnp.where(onehot, jnp.float32(1e30), d)

    # interpolated features directly channel-major (D2, N); normalization folded into a
    # cheap (D2, N) multiply instead of an (S, N) divide.
    interp = jnp.dot(p2.astype(jnp.bfloat16), wsel.astype(jnp.bfloat16),
                     preferred_element_type=jnp.float32)
    interp = interp * pl.reciprocal(recip_sum, approx=True)

    # fuse conv on the (implicit) channel concat [points1, interp] via split weight tiles.
    if p1 is not None:
      y = mm(w_ref[0], p1) + mm(w_ref[1], interp) + b_ref[0]
      k = 2
    else:
      y = mm(w_ref[0], interp) + b_ref[0]
      k = 1
    h = lrelu(y)                                      # fuse + LeakyReLU
    t = lrelu(mm(w_ref[k], h) + b_ref[1])             # net1 + LeakyReLU
    h = lrelu(mm(w_ref[k + 1], t) + b_ref[2] + h)     # LeakyReLU(net2 + residual)
    t = lrelu(mm(w_ref[k + 2], h) + b_ref[3])         # net3 + LeakyReLU
    h = lrelu(mm(w_ref[k + 3], t) + b_ref[4] + h)     # LeakyReLU(net4 + residual)
    return h

  f4 = f4_ref[...]
  f3 = f3_ref[...]
  f2 = f2_ref[...]
  f1 = f1_ref[...]

  # --- decoder chain (coarse -> fine), all intermediates stay in VMEM ---
  x = fp_level(xc0, xf0, f4, f3, dw0, db0)
  x = fp_level(xc1, xf1, x, f2, dw1, db1)
  x = fp_level(xc2, xf2, x, f1, dw2, db2)
  x = fp_level(xc3, xf3, x, None, dw3, db3)           # (32, N)

  # --- global feature: 5x (conv1x1 + LeakyReLU + global max-pool), pooled vectors are
  # stacked into a (320,1) scratch -> single 320->64 fuse matmul (no weight splitting) ---
  xs = (f4, f3, f2, f1, x)
  for kk in range(5):
    y = lrelu(mm(gdw[kk], xs[kk]) + gdb[kk])          # (64, N_k)
    gscr[64 * kk:64 * (kk + 1), :] = jnp.max(y, axis=1, keepdims=True)
  g = lrelu(jnp.dot(gfw[...], gscr[...].astype(jnp.bfloat16),
                    preferred_element_type=jnp.float32) + gdb[5])      # (64, 1)

  # --- classifier: cls2 @ cls1 folded offline (Dropout == identity, no activation
  # between them) + log_softmax over channels ---
  logits = (mm(cwx[...], x)
            + jnp.dot(cwg[...], g.astype(jnp.bfloat16),
                      preferred_element_type=jnp.float32)
            + cb[...])                                                 # (C, N)
  zmax = jnp.max(logits, axis=0, keepdims=True)
  z = logits - zmax
  lse = jnp.log(jnp.sum(jnp.exp(z), axis=0, keepdims=True))
  o_ref[...] = z - lse


def fused_head(prep, xyz_c, xyz_f, feats, *, slope=0.01):
  """Whole segmentation head as one pallas_call.

  xyz_c: list of 4 coarse xyz [B, S_i, 3]; xyz_f: list of 4 fine xyz [B, 3, N_i];
  feats: [f4, f3, f2, f1] each [B, 32, N_k].  Returns channel-major log-probs [B, C, N].
  """
  B = feats[0].shape[0]
  N = xyz_f[-1].shape[2]

  ops, specs = [], []

  def add_batched(a):                       # per-sample operand, batch dim squeezed
    _, d1, d2 = a.shape
    ops.append(a)
    specs.append(pl.BlockSpec((None, d1, d2), lambda i: (i, 0, 0)))

  def add_shared(a):                        # weights: same block for every grid step
    ops.append(a)
    if a.ndim == 2:
      specs.append(pl.BlockSpec(a.shape, lambda i: (0, 0)))
    else:
      specs.append(pl.BlockSpec(a.shape, lambda i: (0, 0, 0)))

  for a in xyz_c:
    add_batched(a)
  for a in xyz_f:
    add_batched(a)
  for a in feats:
    add_batched(a)
  for i in range(4):
    add_shared(prep["dec_w"][i])
    add_shared(prep["dec_b"][i])
  add_shared(prep["gd_w"])
  add_shared(prep["gd_b"])
  add_shared(prep["gf_w"])
  add_shared(prep["cls_wx"])
  add_shared(prep["cls_wg"])
  add_shared(prep["cls_b"])

  return pl.pallas_call(
      functools.partial(_head_kernel, slope=slope),
      out_shape=jax.ShapeDtypeStruct((B, CLASS_NUM, N), jnp.float32),
      grid=(B,),
      in_specs=specs,
      out_specs=pl.BlockSpec((None, CLASS_NUM, N), lambda i: (i, 0, 0)),
      scratch_shapes=[pltpu.VMEM((320, 1), jnp.float32)],
      compiler_params=pltpu.CompilerParams(
          dimension_semantics=("parallel",),
          vmem_limit_bytes=32 * 1024 * 1024),
  )(*ops)


# -----------------------------------------------------------------------------
# Parameters: torch-like init + one-time prep (fold / pack / bf16-cast, outside jit)
# -----------------------------------------------------------------------------

def _conv_param(key, cout, cin, scale=0.1):
  kw, kb = jax.random.split(key)
  w = scale * jax.random.normal(kw, (cout, cin), jnp.float32)
  b = scale * jax.random.normal(kb, (cout, 1), jnp.float32)
  return w, b


def init_params(key):
  keys = jax.random.split(key, 64)
  ki = iter(range(64))
  params = {}

  # stubbed PCTAdapter feature projections (3 -> channel_list[i]) for f4..f1
  params["backbone_proj"] = [
      _conv_param(keys[next(ki)], CHANNEL_LIST[i], 3) for i in range(4)
  ]

  # PointNetFeaturePropagation decoders
  decs = []
  for i in range(4):
    cin, cout = DE_IN_LIST[i], DE_OUT_LIST[i]
    decs.append({
        "fuse": _conv_param(keys[next(ki)], cout, cin),
        "net1": _conv_param(keys[next(ki)], cout, cout),
        "net2": _conv_param(keys[next(ki)], cout, cout),
        "net3": _conv_param(keys[next(ki)], cout, cout),
        "net4": _conv_param(keys[next(ki)], cout, cout),
    })
  params["decoders"] = decs

  # global_feature_list: 4 from channel_list + 1 from trans_dim, all -> 64
  gd_in = CHANNEL_LIST + [TRANS_DIM]
  params["global_down"] = [_conv_param(keys[next(ki)], 64, c) for c in gd_in]

  params["global_fuse"] = _conv_param(keys[next(ki)], 64, 320)         # 5*64 -> 64
  params["cls1"] = _conv_param(keys[next(ki)], 128, TRANS_DIM + 64)    # classifier conv1
  params["cls2"] = _conv_param(keys[next(ki)], CLASS_NUM, 128)         # classifier conv2
  return params


def prepare_params(params):
  """One-time (eager) fold/pack/cast so the jitted forward sees kernel-ready operands."""
  bf16 = lambda a: a.astype(jnp.bfloat16)
  prep = {"backbone_proj": params["backbone_proj"]}

  dec_w, dec_b = [], []
  for i, dec in enumerate(params["decoders"]):
    wf, bfus = dec["fuse"]
    if i < 3:
      d1 = DE_OUT_LIST[i]                       # points1 channel count (== 32)
      ws = [wf[:, :d1], wf[:, d1:]]             # [w_points1, w_interp]
    else:
      ws = [wf]                                  # points1 is None at the last level
    bs = [bfus]
    for name in ("net1", "net2", "net3", "net4"):
      w, b = dec[name]
      ws.append(w)
      bs.append(b)
    dec_w.append(bf16(jnp.stack(ws, axis=0)))    # (6|5, 32, 32) bf16
    dec_b.append(jnp.stack(bs, axis=0))          # (5, 32, 1)   f32
  prep["dec_w"] = dec_w
  prep["dec_b"] = dec_b

  prep["gd_w"] = bf16(jnp.stack([w for (w, _) in params["global_down"]], axis=0))  # (5,64,32)
  prep["gd_b"] = jnp.stack([b for (_, b) in params["global_down"]]
                           + [params["global_fuse"][1]], axis=0)                   # (6,64,1)
  prep["gf_w"] = bf16(params["global_fuse"][0])                                    # (64,320)

  # fold cls1 into cls2 (no activation between them; Dropout == identity in eval)
  w1, b1 = params["cls1"]
  w2, b2 = params["cls2"]
  wc = w2 @ w1                                   # (C, 32+64)
  prep["cls_wx"] = bf16(wc[:, :TRANS_DIM])       # (C, 32)
  prep["cls_wg"] = bf16(wc[:, TRANS_DIM:])       # (C, 64)
  prep["cls_b"] = w2 @ b1 + b2                   # (C, 1)
  return prep


# -----------------------------------------------------------------------------
# Forward pass (wrapper glue)
# -----------------------------------------------------------------------------

def pct_adapter_stub(proj_params, pts):
  """TODO(synk): PCTAdapter not provided; deterministic subsample + projection stub."""
  # xyz_list[0] is the coarsest level (paired with f4); xyz_list[4] is full `pts`.
  xyz_list = [pts[:, :, ::16], pts[:, :, ::8], pts[:, :, ::4], pts[:, :, ::2], pts]
  feats = []
  for lvl in range(4):
    w, b = proj_params[lvl]
    f = jnp.einsum("oc,bcn->bon", w, xyz_list[lvl]) + b[None]
    f = jnp.where(f >= 0, f, 0.01 * f)
    feats.append(f)
  f4, f3, f2, f1 = feats
  return f1, f2, f3, f4, xyz_list


def semantic_forward(prep, x):
  """get_semantic_model.forward.  x: [B, 6, N] -> [B, N, class_num] (log-probs)."""
  pts = x[:, :3, :]
  # norm = x[:, 3:6, :]  # backbone stub does not consume normals

  f1, f2, f3, f4, xyz_list = pct_adapter_stub(prep["backbone_proj"], pts)

  xyz_c = [jnp.transpose(xyz_list[i], (0, 2, 1)) for i in range(4)]   # coarse, [B, S_i, 3]
  xyz_f = [xyz_list[i + 1] for i in range(4)]                          # fine,   [B, 3, N_i]

  out_cn = fused_head(prep, xyz_c, xyz_f, [f4, f3, f2, f1])            # [B, C, N] log-probs
  # keep the module's [B, N, class_num] contract (tiny at these shapes; at real N the
  # channel-major log-probs should be consumed directly to avoid this HBM round trip).
  return jnp.transpose(out_cn, (0, 2, 1))


if __name__ == "__main__":
  key = jax.random.PRNGKey(0)
  k_in, k_par = jax.random.split(key)

  B, N = 2, 256
  x = jax.random.normal(k_in, (B, 6, N), jnp.float32)    # [B, 6(xyz+norm), N]

  params = init_params(k_par)
  prep = prepare_params(params)                          # fold/pack/bf16-cast once, outside jit

  fwd = jax.jit(semantic_forward)
  out = jax.block_until_ready(fwd(prep, x))

  assert out.shape == (B, N, CLASS_NUM), out.shape
  assert bool(jnp.all(jnp.isfinite(out)))
  # rows of log-probs should sum to ~1 after exp
  assert bool(jnp.allclose(jnp.sum(jnp.exp(out), axis=-1), 1.0, atol=1e-4))
  print("KERNEL_OK")
</pallas_src>

<mosaic_0001>
module attributes {stable_mosaic.version = 11 : i64} {
  func.func @_head_kernel(%arg0: i32, %arg1: memref<1x16x3xf32, #tpu.memory_space<vmem>>, %arg2: memref<1x32x3xf32, #tpu.memory_space<vmem>>, %arg3: memref<1x64x3xf32, #tpu.memory_space<vmem>>, %arg4: memref<1x128x3xf32, #tpu.memory_space<vmem>>, %arg5: memref<1x3x32xf32, #tpu.memory_space<vmem>>, %arg6: memref<1x3x64xf32, #tpu.memory_space<vmem>>, %arg7: memref<1x3x128xf32, #tpu.memory_space<vmem>>, %arg8: memref<1x3x256xf32, #tpu.memory_space<vmem>>, %arg9: memref<1x32x16xf32, #tpu.memory_space<vmem>>, %arg10: memref<1x32x32xf32, #tpu.memory_space<vmem>>, %arg11: memref<1x32x64xf32, #tpu.memory_space<vmem>>, %arg12: memref<1x32x128xf32, #tpu.memory_space<vmem>>, %arg13: memref<6x32x32xbf16, #tpu.memory_space<vmem>>, %arg14: memref<5x32x1xf32, #tpu.memory_space<vmem>>, %arg15: memref<6x32x32xbf16, #tpu.memory_space<vmem>>, %arg16: memref<5x32x1xf32, #tpu.memory_space<vmem>>, %arg17: memref<6x32x32xbf16, #tpu.memory_space<vmem>>, %arg18: memref<5x32x1xf32, #tpu.memory_space<vmem>>, %arg19: memref<5x32x32xbf16, #tpu.memory_space<vmem>>, %arg20: memref<5x32x1xf32, #tpu.memory_space<vmem>>, %arg21: memref<5x64x32xbf16, #tpu.memory_space<vmem>>, %arg22: memref<6x64x1xf32, #tpu.memory_space<vmem>>, %arg23: memref<64x320xbf16, #tpu.memory_space<vmem>>, %arg24: memref<8x32xbf16, #tpu.memory_space<vmem>>, %arg25: memref<8x64xbf16, #tpu.memory_space<vmem>>, %arg26: memref<8x1xf32, #tpu.memory_space<vmem>>, %arg27: memref<1x8x256xf32, #tpu.memory_space<vmem>>, %arg28: memref<320x1xf32, #tpu.memory_space<vmem>>) attributes {dimension_semantics = [#tpu.dimension_semantics<parallel>], iteration_bounds = array<i64: 2>, scalar_prefetch = 0 : i64, scratch_operands = 1 : i64, tpu.core_type = #tpu.core_type<tc>, window_params = [{transform_indices = @transform_0, window_bounds = array<i64: 1, 16, 3>}, {transform_indices = @transform_1, window_bounds = array<i64: 1, 32, 3>}, {transform_indices = @transform_2, window_bounds = array<i64: 1, 64, 3>}, {transform_indices = @transform_3, window_bounds = array<i64: 1, 128, 3>}, {transform_indices = @transform_4, window_bounds = array<i64: 1, 3, 32>}, {transform_indices = @transform_5, window_bounds = array<i64: 1, 3, 64>}, {transform_indices = @transform_6, window_bounds = array<i64: 1, 3, 128>}, {transform_indices = @transform_7, window_bounds = array<i64: 1, 3, 256>}, {transform_indices = @transform_8, window_bounds = array<i64: 1, 32, 16>}, {transform_indices = @transform_9, window_bounds = array<i64: 1, 32, 32>}, {transform_indices = @transform_10, window_bounds = array<i64: 1, 32, 64>}, {transform_indices = @transform_11, window_bounds = array<i64: 1, 32, 128>}, {pipeline_mode = #tpu.pipeline_mode<synchronous>, transform_indices = @transform_12, window_bounds = array<i64: 6, 32, 32>}, {pipeline_mode = #tpu.pipeline_mode<synchronous>, transform_indices = @transform_13, window_bounds = array<i64: 5, 32, 1>}, {pipeline_mode = #tpu.pipeline_mode<synchronous>, transform_indices = @transform_14, window_bounds = array<i64: 6, 32, 32>}, {pipeline_mode = #tpu.pipeline_mode<synchronous>, transform_indices = @transform_15, window_bounds = array<i64: 5, 32, 1>}, {pipeline_mode = #tpu.pipeline_mode<synchronous>, transform_indices = @transform_16, window_bounds = array<i64: 6, 32, 32>}, {pipeline_mode = #tpu.pipeline_mode<synchronous>, transform_indices = @transform_17, window_bounds = array<i64: 5, 32, 1>}, {pipeline_mode = #tpu.pipeline_mode<synchronous>, transform_indices = @transform_18, window_bounds = array<i64: 5, 32, 32>}, {pipeline_mode = #tpu.pipeline_mode<synchronous>, transform_indices = @transform_19, window_bounds = array<i64: 5, 32, 1>}, {pipeline_mode = #tpu.pipeline_mode<synchronous>, transform_indices = @transform_20, window_bounds = array<i64: 5, 64, 32>}, {pipeline_mode = #tpu.pipeline_mode<synchronous>, transform_indices = @transform_21, window_bounds = array<i64: 6, 64, 1>}, {pipeline_mode = #tpu.pipeline_mode<synchronous>, transform_indices = @transform_22, window_bounds = array<i64: 64, 320>}, {pipeline_mode = #tpu.pipeline_mode<synchronous>, transform_indices = @transform_23, window_bounds = array<i64: 8, 32>}, {pipeline_mode = #tpu.pipeline_mode<synchronous>, transform_indices = @transform_24, window_bounds = array<i64: 8, 64>}, {pipeline_mode = #tpu.pipeline_mode<synchronous>, transform_indices = @transform_25, window_bounds = array<i64: 8, 1>}, {transform_indices = @transform_26, window_bounds = array<i64: 1, 8, 256>}]} {
    %c0 = arith.constant 0 : index
    %c0_0 = arith.constant 0 : index
    %c0_1 = arith.constant 0 : index
    %0 = vector.load %arg9[%c0, %c0_0, %c0_1] : memref<1x32x16xf32, #tpu.memory_space<vmem>>, vector<1x32x16xf32>
    %1 = vector.shape_cast %0 : vector<1x32x16xf32> to vector<32x16xf32>
    %c0_2 = arith.constant 0 : index
    %c0_3 = arith.constant 0 : index
    %c0_4 = arith.constant 0 : index
    %2 = vector.load %arg10[%c0_2, %c0_3, %c0_4] : memref<1x32x32xf32, #tpu.memory_space<vmem>>, vector<1x32x32xf32>
    %3 = vector.shape_cast %2 : vector<1x32x32xf32> to vector<32x32xf32>
    %c0_5 = arith.constant 0 : index
    %c0_6 = arith.constant 0 : index
    %c0_7 = arith.constant 0 : index
    %4 = vector.load %arg11[%c0_5, %c0_6, %c0_7] : memref<1x32x64xf32, #tpu.memory_space<vmem>>, vector<1x32x64xf32>
    %5 = vector.shape_cast %4 : vector<1x32x64xf32> to vector<32x64xf32>
    %c0_8 = arith.constant 0 : index
    %c0_9 = arith.constant 0 : index
    %c0_10 = arith.constant 0 : index
    %6 = vector.load %arg12[%c0_8, %c0_9, %c0_10] : memref<1x32x128xf32, #tpu.memory_space<vmem>>, vector<1x32x128xf32>
    %7 = vector.shape_cast %6 : vector<1x32x128xf32> to vector<32x128xf32>
    %c0_11 = arith.constant 0 : index
    %c0_12 = arith.constant 0 : index
    %c0_13 = arith.constant 0 : index
    %8 = vector.load %arg1[%c0_11, %c0_12, %c0_13] : memref<1x16x3xf32, #tpu.memory_space<vmem>>, vector<1x16x3xf32>
    %9 = vector.shape_cast %8 : vector<1x16x3xf32> to vector<16x3xf32>
    %c0_14 = arith.constant 0 : index
    %c0_15 = arith.constant 0 : index
    %c0_16 = arith.constant 0 : index
    %10 = vector.load %arg5[%c0_14, %c0_15, %c0_16] : memref<1x3x32xf32, #tpu.memory_space<vmem>>, vector<1x3x32xf32>
    %11 = vector.shape_cast %10 : vector<1x3x32xf32> to vector<3x32xf32>
    %cst = arith.constant dense<0.000000e+00> : vector<16x32xf32>
    %12 = tpu.matmul %9, %11, %cst {dimension_numbers = #tpu.dot_dimension_numbers<[1], [0], [0], [1], [0, 0, 1, 1], [], []>} : vector<16x3xf32>, vector<3x32xf32>, vector<16x32xf32> -> vector<16x32xf32>
    %13 = arith.mulf %9, %9 : vector<16x3xf32>
    %cst_17 = arith.constant dense<0.000000e+00> : vector<16xf32>
    %14 = vector.multi_reduction <add>, %13, %cst_17 [1] : vector<16x3xf32> to vector<16xf32>
    %15 = vector.shape_cast %14 : vector<16xf32> to vector<16x1xf32>
    %16 = arith.mulf %11, %11 : vector<3x32xf32>
    %cst_18 = arith.constant dense<0.000000e+00> : vector<32xf32>
    %17 = vector.multi_reduction <add>, %16, %cst_18 [0] : vector<3x32xf32> to vector<32xf32>
    %18 = vector.shape_cast %17 : vector<32xf32> to vector<1x32xf32>
    %19 = vector.broadcast %15 : vector<16x1xf32> to vector<16x32xf32>
    %20 = vector.broadcast %18 : vector<1x32xf32> to vector<16x32xf32>
    %21 = arith.addf %19, %20 : vector<16x32xf32>
    %cst_19 = arith.constant 2.000000e+00 : f32
    %22 = vector.broadcast %cst_19 : f32 to vector<16x32xf32>
    %23 = arith.mulf %22, %12 : vector<16x32xf32>
    %24 = arith.subf %21, %23 : vector<16x32xf32>
    %cst_20 = arith.constant 0.000000e+00 : f32
    %25 = vector.broadcast %cst_20 : f32 to vector<16x32xf32>
    %26 = arith.maximumf %24, %25 : vector<16x32xf32>
    %27 = tpu.iota {dimensions = array<i32: 0>} : vector<16x32xi32>
    %cst_21 = arith.constant 0.000000e+00 : f32
    %28 = vector.broadcast %cst_21 : f32 to vector<1x32xf32>
    %cst_22 = arith.constant 0.000000e+00 : f32
    %29 = vector.broadcast %cst_22 : f32 to vector<16x32xf32>
    %cst_23 = arith.constant dense<0x7F800000> : vector<32xf32>
    %30 = vector.multi_reduction <minimumf>, %26, %cst_23 [0] : vector<16x32xf32> to vector<32xf32>
    %31 = vector.shape_cast %30 : vector<32xf32> to vector<1x32xf32>
    %32 = vector.broadcast %31 : vector<1x32xf32> to vector<16x32xf32>
    %33 = arith.cmpf oeq, %26, %32 : vector<16x32xf32>
    %c16_i32 = arith.constant 16 : i32
    %34 = vector.broadcast %c16_i32 : i32 to vector<16x32xi32>
    %35 = arith.select %33, %27, %34 : vector<16x32xi1>, vector<16x32xi32>
    %cst_24 = arith.constant dense<2147483647> : vector<32xi32>
    %36 = vector.multi_reduction <minsi>, %35, %cst_24 [0] : vector<16x32xi32> to vector<32xi32>
    %37 = vector.shape_cast %36 : vector<32xi32> to vector<1x32xi32>
    %38 = vector.broadcast %37 : vector<1x32xi32> to vector<16x32xi32>
    %39 = arith.cmpi eq, %27, %38 : vector<16x32xi32>
    %cst_25 = arith.constant 9.99999993E-9 : f32
    %40 = vector.broadcast %cst_25 : f32 to vector<1x32xf32>
    %41 = arith.addf %31, %40 : vector<1x32xf32>
    %42 = tpu.reciprocal %41 {approx = true} : vector<1x32xf32> -> vector<1x32xf32>
    %43 = arith.addf %28, %42 : vector<1x32xf32>
    %cst_26 = arith.constant 0.000000e+00 : f32
    %44 = vector.shape_cast %42 : vector<1x32xf32> to vector<1x32xf32>
    %45 = vector.broadcast %44 : vector<1x32xf32> to vector<16x32xf32>
    %46 = vector.broadcast %cst_26 : f32 to vector<16x32xf32>
    %47 = arith.select %39, %45, %46 : vector<16x32xi1>, vector<16x32xf32>
    %48 = arith.addf %29, %47 : vector<16x32xf32>
    %cst_27 = arith.constant 1.000000e+30 : f32
    %49 = vector.broadcast %cst_27 : f32 to vector<16x32xf32>
    %50 = arith.select %39, %49, %26 : vector<16x32xi1>, vector<16x32xf32>
    %cst_28 = arith.constant dense<0x7F800000> : vector<32xf32>
    %51 = vector.multi_reduction <minimumf>, %50, %cst_28 [0] : vector<16x32xf32> to vector<32xf32>
    %52 = vector.shape_cast %51 : vector<32xf32> to vector<1x32xf32>
    %53 = vector.broadcast %52 : vector<1x32xf32> to vector<16x32xf32>
    %54 = arith.cmpf oeq, %50, %53 : vector<16x32xf32>
    %c16_i32_29 = arith.constant 16 : i32
    %55 = vector.broadcast %c16_i32_29 : i32 to vector<16x32xi32>
    %56 = arith.select %54, %27, %55 : vector<16x32xi1>, vector<16x32xi32>
    %cst_30 = arith.constant dense<2147483647> : vector<32xi32>
    %57 = vector.multi_reduction <minsi>, %56, %cst_30 [0] : vector<16x32xi32> to vector<32xi32>
    %58 = vector.shape_cast %57 : vector<32xi32> to vector<1x32xi32>
    %59 = vector.broadcast %58 : vector<1x32xi32> to vector<16x32xi32>
    %60 = arith.cmpi eq, %27, %59 : vector<16x32xi32>
    %cst_31 = arith.constant 9.99999993E-9 : f32
    %61 = vector.broadcast %cst_31 : f32 to vector<1x32xf32>
    %62 = arith.addf %52, %61 : vector<1x32xf32>
    %63 = tpu.reciprocal %62 {approx = true} : vector<1x32xf32> -> vector<1x32xf32>
    %64 = arith.addf %43, %63 : vector<1x32xf32>
    %cst_32 = arith.constant 0.000000e+00 : f32
    %65 = vector.shape_cast %63 : vector<1x32xf32> to vector<1x32xf32>
    %66 = vector.broadcast %65 : vector<1x32xf32> to vector<16x32xf32>
    %67 = vector.broadcast %cst_32 : f32 to vector<16x32xf32>
    %68 = arith.select %60, %66, %67 : vector<16x32xi1>, vector<16x32xf32>
    %69 = arith.addf %48, %68 : vector<16x32xf32>
    %cst_33 = arith.constant 1.000000e+30 : f32
    %70 = vector.broadcast %cst_33 : f32 to vector<16x32xf32>
    %71 = arith.select %60, %70, %50 : vector<16x32xi1>, vector<16x32xf32>
    %cst_34 = arith.constant dense<0x7F800000> : vector<32xf32>
    %72 = vector.multi_reduction <minimumf>, %71, %cst_34 [0] : vector<16x32xf32> to vector<32xf32>
    %73 = vector.shape_cast %72 : vector<32xf32> to vector<1x32xf32>
    %74 = vector.broadcast %73 : vector<1x32xf32> to vector<16x32xf32>
    %75 = arith.cmpf oeq, %71, %74 : vector<16x32xf32>
    %c16_i32_35 = arith.constant 16 : i32
    %76 = vector.broadcast %c16_i32_35 : i32 to vector<16x32xi32>
    %77 = arith.select %75, %27, %76 : vector<16x32xi1>, vector<16x32xi32>
    %cst_36 = arith.constant dense<2147483647> : vector<32xi32>
    %78 = vector.multi_reduction <minsi>, %77, %cst_36 [0] : vector<16x32xi32> to vector<32xi32>
    %79 = vector.shape_cast %78 : vector<32xi32> to vector<1x32xi32>
    %80 = vector.broadcast %79 : vector<1x32xi32> to vector<16x32xi32>
    %81 = arith.cmpi eq, %27, %80 : vector<16x32xi32>
    %cst_37 = arith.constant 9.99999993E-9 : f32
    %82 = vector.broadcast %cst_37 : f32 to vector<1x32xf32>
    %83 = arith.addf %73, %82 : vector<1x32xf32>
    %84 = tpu.reciprocal %83 {approx = true} : vector<1x32xf32> -> vector<1x32xf32>
    %85 = arith.addf %64, %84 : vector<1x32xf32>
    %cst_38 = arith.constant 0.000000e+00 : f32
    %86 = vector.shape_cast %84 : vector<1x32xf32> to vector<1x32xf32>
    %87 = vector.broadcast %86 : vector<1x32xf32> to vector<16x32xf32>
    %88 = vector.broadcast %cst_38 : f32 to vector<16x32xf32>
    %89 = arith.select %81, %87, %88 : vector<16x32xi1>, vector<16x32xf32>
    %90 = arith.addf %69, %89 : vector<16x32xf32>
    %91 = arith.truncf %1 : vector<32x16xf32> to vector<32x16xbf16>
    %92 = arith.truncf %90 : vector<16x32xf32> to vector<16x32xbf16>
    %cst_39 = arith.constant dense<0.000000e+00> : vector<32x32xf32>
    %93 = tpu.matmul %91, %92, %cst_39 {dimension_numbers = #tpu.dot_dimension_numbers<[1], [0], [0], [1], [0, 0, 1, 1], [], []>} : vector<32x16xbf16>, vector<16x32xbf16>, vector<32x32xf32> -> vector<32x32xf32>
    %94 = tpu.reciprocal %85 {approx = true} : vector<1x32xf32> -> vector<1x32xf32>
    %95 = vector.broadcast %94 : vector<1x32xf32> to vector<32x32xf32>
    %96 = arith.mulf %93, %95 : vector<32x32xf32>
    %c0_40 = arith.constant 0 : index
    %c0_41 = arith.constant 0 : index
    %c0_42 = arith.constant 0 : index
    %97 = vector.load %arg13[%c0_40, %c0_41, %c0_42] : memref<6x32x32xbf16, #tpu.memory_space<vmem>>, vector<1x32x32xbf16>
    %98 = vector.shape_cast %97 : vector<1x32x32xbf16> to vector<32x32xbf16>
    %99 = arith.truncf %3 : vector<32x32xf32> to vector<32x32xbf16>
    %cst_43 = arith.constant dense<0.000000e+00> : vector<32x32xf32>
    %100 = tpu.matmul %98, %99, %cst_43 {dimension_numbers = #tpu.dot_dimension_numbers<[1], [0], [0], [1], [0, 0, 1, 1], [], []>} : vector<32x32xbf16>, vector<32x32xbf16>, vector<32x32xf32> -> vector<32x32xf32>
    %c1 = arith.constant 1 : index
    %c0_44 = arith.constant 0 : index
    %c0_45 = arith.constant 0 : index
    %101 = vector.load %arg13[%c1, %c0_44, %c0_45] : memref<6x32x32xbf16, #tpu.memory_space<vmem>>, vector<1x32x32xbf16>
    %102 = vector.shape_cast %101 : vector<1x32x32xbf16> to vector<32x32xbf16>
    %103 = arith.truncf %96 : vector<32x32xf32> to vector<32x32xbf16>
    %cst_46 = arith.constant dense<0.000000e+00> : vector<32x32xf32>
    %104 = tpu.matmul %102, %103, %cst_46 {dimension_numbers = #tpu.dot_dimension_numbers<[1], [0], [0], [1], [0, 0, 1, 1], [], []>} : vector<32x32xbf16>, vector<32x32xbf16>, vector<32x32xf32> -> vector<32x32xf32>
    %105 = arith.addf %100, %104 : vector<32x32xf32>
    %c0_47 = arith.constant 0 : index
    %c0_48 = arith.constant 0 : index
    %c0_49 = arith.constant 0 : index
    %106 = vector.load %arg14[%c0_47, %c0_48, %c0_49] : memref<5x32x1xf32, #tpu.memory_space<vmem>>, vector<1x32x1xf32>
    %107 = vector.shape_cast %106 : vector<1x32x1xf32> to vector<32x1xf32>
    %108 = vector.broadcast %107 : vector<32x1xf32> to vector<32x32xf32>
    %109 = arith.addf %105, %108 : vector<32x32xf32>
    %cst_50 = arith.constant 0.000000e+00 : f32
    %110 = vector.broadcast %cst_50 : f32 to vector<32x32xf32>
    %111 = arith.cmpf oge, %109, %110 : vector<32x32xf32>
    %cst_51 = arith.constant 0.00999999977 : f32
    %112 = vector.broadcast %cst_51 : f32 to vector<32x32xf32>
    %113 = arith.mulf %112, %109 : vector<32x32xf32>
    %114 = arith.select %111, %109, %113 : vector<32x32xi1>, vector<32x32xf32>
    %c2 = arith.constant 2 : index
    %c0_52 = arith.constant 0 : index
    %c0_53 = arith.constant 0 : index
    %115 = vector.load %arg13[%c2, %c0_52, %c0_53] : memref<6x32x32xbf16, #tpu.memory_space<vmem>>, vector<1x32x32xbf16>
    %116 = vector.shape_cast %115 : vector<1x32x32xbf16> to vector<32x32xbf16>
    %117 = arith.truncf %114 : vector<32x32xf32> to vector<32x32xbf16>
    %cst_54 = arith.constant dense<0.000000e+00> : vector<32x32xf32>
    %118 = tpu.matmul %116, %117, %cst_54 {dimension_numbers = #tpu.dot_dimension_numbers<[1], [0], [0], [1], [0, 0, 1, 1], [], []>} : vector<32x32xbf16>, vector<32x32xbf16>, vector<32x32xf32> -> vector<32x32xf32>
    %c1_55 = arith.constant 1 : index
    %c0_56 = arith.constant 0 : index
    %c0_57 = arith.constant 0 : index
    %119 = vector.load %arg14[%c1_55, %c0_56, %c0_57] : memref<5x32x1xf32, #tpu.memory_space<vmem>>, vector<1x32x1xf32>
    %120 = vector.shape_cast %119 : vector<1x32x1xf32> to vector<32x1xf32>
    %121 = vector.broadcast %120 : vector<32x1xf32> to vector<32x32xf32>
    %122 = arith.addf %118, %121 : vector<32x32xf32>
    %cst_58 = arith.constant 0.000000e+00 : f32
    %123 = vector.broadcast %cst_58 : f32 to vector<32x32xf32>
    %124 = arith.cmpf oge, %122, %123 : vector<32x32xf32>
    %cst_59 = arith.constant 0.00999999977 : f32
    %125 = vector.broadcast %cst_59 : f32 to vector<32x32xf32>
    %126 = arith.mulf %125, %122 : vector<32x32xf32>
    %127 = arith.select %124, %122, %126 : vector<32x32xi1>, vector<32x32xf32>
    %c3 = arith.constant 3 : index
    %c0_60 = arith.constant 0 : index
    %c0_61 = arith.constant 0 : index
    %128 = vector.load %arg13[%c3, %c0_60, %c0_61] : memref<6x32x32xbf16, #tpu.memory_space<vmem>>, vector<1x32x32xbf16>
    %129 = vector.shape_cast %128 : vector<1x32x32xbf16> to vector<32x32xbf16>
    %130 = arith.truncf %127 : vector<32x32xf32> to vector<32x32xbf16>
    %cst_62 = arith.constant dense<0.000000e+00> : vector<32x32xf32>
    %131 = tpu.matmul %129, %130, %cst_62 {dimension_numbers = #tpu.dot_dimension_numbers<[1], [0], [0], [1], [0, 0, 1, 1], [], []>} : vector<32x32xbf16>, vector<32x32xbf16>, vector<32x32xf32> -> vector<32x32xf32>
    %c2_63 = arith.constant 2 : index
    %c0_64 = arith.constant 0 : index
    %c0_65 = arith.constant 0 : index
    %132 = vector.load %arg14[%c2_63, %c0_64, %c0_65] : memref<5x32x1xf32, #tpu.memory_space<vmem>>, vector<1x32x1xf32>
    %133 = vector.shape_cast %132 : vector<1x32x1xf32> to vector<32x1xf32>
    %134 = vector.broadcast %133 : vector<32x1xf32> to vector<32x32xf32>
    %135 = arith.addf %131, %134 : vector<32x32xf32>
    %136 = arith.addf %135, %114 : vector<32x32xf32>
    %cst_66 = arith.constant 0.000000e+00 : f32
    %137 = vector.broadcast %cst_66 : f32 to vector<32x32xf32>
    %138 = arith.cmpf oge, %136, %137 : vector<32x32xf32>
    %cst_67 = arith.constant 0.00999999977 : f32
    %139 = vector.broadcast %cst_67 : f32 to vector<32x32xf32>
    %140 = arith.mulf %139, %136 : vector<32x32xf32>
    %141 = arith.select %138, %136, %140 : vector<32x32xi1>, vector<32x32xf32>
    %c4 = arith.constant 4 : index
    %c0_68 = arith.constant 0 : index
    %c0_69 = arith.constant 0 : index
    %142 = vector.load %arg13[%c4, %c0_68, %c0_69] : memref<6x32x32xbf16, #tpu.memory_space<vmem>>, vector<1x32x32xbf16>
    %143 = vector.shape_cast %142 : vector<1x32x32xbf16> to vector<32x32xbf16>
    %144 = arith.truncf %141 : vector<32x32xf32> to vector<32x32xbf16>
    %cst_70 = arith.constant dense<0.000000e+00> : vector<32x32xf32>
    %145 = tpu.matmul %143, %144, %cst_70 {dimension_numbers = #tpu.dot_dimension_numbers<[1], [0], [0], [1], [0, 0, 1, 1], [], []>} : vector<32x32xbf16>, vector<32x32xbf16>, vector<32x32xf32> -> vector<32x32xf32>
    %c3_71 = arith.constant 3 : index
    %c0_72 = arith.constant 0 : index
    %c0_73 = arith.constant 0 : index
    %146 = vector.load %arg14[%c3_71, %c0_72, %c0_73] : memref<5x32x1xf32, #tpu.memory_space<vmem>>, vector<1x32x1xf32>
    %147 = vector.shape_cast %146 : vector<1x32x1xf32> to vector<32x1xf32>
    %148 = vector.broadcast %147 : vector<32x1xf32> to vector<32x32xf32>
    %149 = arith.addf %145, %148 : vector<32x32xf32>
    %cst_74 = arith.constant 0.000000e+00 : f32
    %150 = vector.broadcast %cst_74 : f32 to vector<32x32xf32>
    %151 = arith.cmpf oge, %149, %150 : vector<32x32xf32>
    %cst_75 = arith.constant 0.00999999977 : f32
    %152 = vector.broadcast %cst_75 : f32 to vector<32x32xf32>
    %153 = arith.mulf %152, %149 : vector<32x32xf32>
    %154 = arith.select %151, %149, %153 : vector<32x32xi1>, vector<32x32xf32>
    %c5 = arith.constant 5 : index
    %c0_76 = arith.constant 0 : index
    %c0_77 = arith.constant 0 : index
    %155 = vector.load %arg13[%c5, %c0_76, %c0_77] : memref<6x32x32xbf16, #tpu.memory_space<vmem>>, vector<1x32x32xbf16>
    %156 = vector.shape_cast %155 : vector<1x32x32xbf16> to vector<32x32xbf16>
    %157 = arith.truncf %154 : vector<32x32xf32> to vector<32x32xbf16>
    %cst_78 = arith.constant dense<0.000000e+00> : vector<32x32xf32>
    %158 = tpu.matmul %156, %157, %cst_78 {dimension_numbers = #tpu.dot_dimension_numbers<[1], [0], [0], [1], [0, 0, 1, 1], [], []>} : vector<32x32xbf16>, vector<32x32xbf16>, vector<32x32xf32> -> vector<32x32xf32>
    %c4_79 = arith.constant 4 : index
    %c0_80 = arith.constant 0 : index
    %c0_81 = arith.constant 0 : index
    %159 = vector.load %arg14[%c4_79, %c0_80, %c0_81] : memref<5x32x1xf32, #tpu.memory_space<vmem>>, vector<1x32x1xf32>
    %160 = vector.shape_cast %159 : vector<1x32x1xf32> to vector<32x1xf32>
    %161 = vector.broadcast %160 : vector<32x1xf32> to vector<32x32xf32>
    %162 = arith.addf %158, %161 : vector<32x32xf32>
    %163 = arith.addf %162, %141 : vector<32x32xf32>
    %cst_82 = arith.constant 0.000000e+00 : f32
    %164 = vector.broadcast %cst_82 : f32 to vector<32x32xf32>
    %165 = arith.cmpf oge, %163, %164 : vector<32x32xf32>
    %cst_83 = arith.constant 0.00999999977 : f32
    %166 = vector.broadcast %cst_83 : f32 to vector<32x32xf32>
    %167 = arith.mulf %166, %163 : vector<32x32xf32>
    %168 = arith.select %165, %163, %167 : vector<32x32xi1>, vector<32x32xf32>
    %c0_84 = arith.constant 0 : index
    %c0_85 = arith.constant 0 : index
    %c0_86 = arith.constant 0 : index
    %169 = vector.load %arg2[%c0_84, %c0_85, %c0_86] : memref<1x32x3xf32, #tpu.memory_space<vmem>>, vector<1x32x3xf32>
    %170 = vector.shape_cast %169 : vector<1x32x3xf32> to vector<32x3xf32>
    %c0_87 = arith.constant 0 : index
    %c0_88 = arith.constant 0 : index
    %c0_89 = arith.constant 0 : index
    %171 = vector.load %arg6[%c0_87, %c0_88, %c0_89] : memref<1x3x64xf32, #tpu.memory_space<vmem>>, vector<1x3x64xf32>
    %172 = vector.shape_cast %171 : vector<1x3x64xf32> to vector<3x64xf32>
    %cst_90 = arith.constant dense<0.000000e+00> : vector<32x64xf32>
    %173 = tpu.matmul %170, %172, %cst_90 {dimension_numbers = #tpu.dot_dimension_numbers<[1], [0], [0], [1], [0, 0, 1, 1], [], []>} : vector<32x3xf32>, vector<3x64xf32>, vector<32x64xf32> -> vector<32x64xf32>
    %174 = arith.mulf %170, %170 : vector<32x3xf32>
    %cst_91 = arith.constant dense<0.000000e+00> : vector<32xf32>
    %175 = vector.multi_reduction <add>, %174, %cst_91 [1] : vector<32x3xf32> to vector<32xf32>
    %176 = vector.shape_cast %175 : vector<32xf32> to vector<32x1xf32>
    %177 = arith.mulf %172, %172 : vector<3x64xf32>
    %cst_92 = arith.constant dense<0.000000e+00> : vector<64xf32>
    %178 = vector.multi_reduction <add>, %177, %cst_92 [0] : vector<3x64xf32> to vector<64xf32>
    %179 = vector.shape_cast %178 : vector<64xf32> to vector<1x64xf32>
    %180 = vector.broadcast %176 : vector<32x1xf32> to vector<32x64xf32>
    %181 = vector.broadcast %179 : vector<1x64xf32> to vector<32x64xf32>
    %182 = arith.addf %180, %181 : vector<32x64xf32>
    %cst_93 = arith.constant 2.000000e+00 : f32
    %183 = vector.broadcast %cst_93 : f32 to vector<32x64xf32>
    %184 = arith.mulf %183, %173 : vector<32x64xf32>
    %185 = arith.subf %182, %184 : vector<32x64xf32>
    %cst_94 = arith.constant 0.000000e+00 : f32
    %186 = vector.broadcast %cst_94 : f32 to vector<32x64xf32>
    %187 = arith.maximumf %185, %186 : vector<32x64xf32>
    %188 = tpu.iota {dimensions = array<i32: 0>} : vector<32x64xi32>
    %cst_95 = arith.constant 0.000000e+00 : f32
    %189 = vector.broadcast %cst_95 : f32 to vector<1x64xf32>
    %cst_96 = arith.constant 0.000000e+00 : f32
    %190 = vector.broadcast %cst_96 : f32 to vector<32x64xf32>
    %cst_97 = arith.constant dense<0x7F800000> : vector<64xf32>
    %191 = vector.multi_reduction <minimumf>, %187, %cst_97 [0] : vector<32x64xf32> to vector<64xf32>
    %192 = vector.shape_cast %191 : vector<64xf32> to vector<1x64xf32>
    %193 = vector.broadcast %192 : vector<1x64xf32> to vector<32x64xf32>
    %194 = arith.cmpf oeq, %187, %193 : vector<32x64xf32>
    %c32_i32 = arith.constant 32 : i32
    %195 = vector.broadcast %c32_i32 : i32 to vector<32x64xi32>
    %196 = arith.select %194, %188, %195 : vector<32x64xi1>, vector<32x64xi32>
    %cst_98 = arith.constant dense<2147483647> : vector<64xi32>
    %197 = vector.multi_reduction <minsi>, %196, %cst_98 [0] : vector<32x64xi32> to vector<64xi32>
    %198 = vector.shape_cast %197 : vector<64xi32> to vector<1x64xi32>
    %199 = vector.broadcast %198 : vector<1x64xi32> to vector<32x64xi32>
    %200 = arith.cmpi eq, %188, %199 : vector<32x64xi32>
    %cst_99 = arith.constant 9.99999993E-9 : f32
    %201 = vector.broadcast %cst_99 : f32 to vector<1x64xf32>
    %202 = arith.addf %192, %201 : vector<1x64xf32>
    %203 = tpu.reciprocal %202 {approx = true} : vector<1x64xf32> -> vector<1x64xf32>
    %204 = arith.addf %189, %203 : vector<1x64xf32>
    %cst_100 = arith.constant 0.000000e+00 : f32
    %205 = vector.shape_cast %203 : vector<1x64xf32> to vector<1x64xf32>
    %206 = vector.broadcast %205 : vector<1x64xf32> to vector<32x64xf32>
    %207 = vector.broadcast %cst_100 : f32 to vector<32x64xf32>
    %208 = arith.select %200, %206, %207 : vector<32x64xi1>, vector<32x64xf32>
    %209 = arith.addf %190, %208 : vector<32x64xf32>
    %cst_101 = arith.constant 1.000000e+30 : f32
    %210 = vector.broadcast %cst_101 : f32 to vector<32x64xf32>
    %211 = arith.select %200, %210, %187 : vector<32x64xi1>, vector<32x64xf32>
    %cst_102 = arith.constant dense<0x7F800000> : vector<64xf32>
    %212 = vector.multi_reduction <minimumf>, %211, %cst_102 [0] : vector<32x64xf32> to vector<64xf32>
    %213 = vector.shape_cast %212 : vector<64xf32> to vector<1x64xf32>
    %214 = vector.broadcast %213 : vector<1x64xf32> to vector<32x64xf32>
    %215 = arith.cmpf oeq, %211, %214 : vector<32x64xf32>
    %c32_i32_103 = arith.constant 32 : i32
    %216 = vector.broadcast %c32_i32_103 : i32 to vector<32x64xi32>
    %217 = arith.select %215, %188, %216 : vector<32x64xi1>, vector<32x64xi32>
    %cst_104 = arith.constant dense<2147483647> : vector<64xi32>
    %218 = vector.multi_reduction <minsi>, %217, %cst_104 [0] : vector<32x64xi32> to vector<64xi32>
    %219 = vector.shape_cast %218 : vector<64xi32> to vector<1x64xi32>
    %220 = vector.broadcast %219 : vector<1x64xi32> to vector<32x64xi32>
    %221 = arith.cmpi eq, %188, %220 : vector<32x64xi32>
    %cst_105 = arith.constant 9.99999993E-9 : f32
    %222 = vector.broadcast %cst_105 : f32 to vector<1x64xf32>
    %223 = arith.addf %213, %222 : vector<1x64xf32>
    %224 = tpu.reciprocal %223 {approx = true} : vector<1x64xf32> -> vector<1x64xf32>
    %225 = arith.addf %204, %224 : vector<1x64xf32>
    %cst_106 = arith.constant 0.000000e+00 : f32
    %226 = vector.shape_cast %224 : vector<1x64xf32> to vector<1x64xf32>
    %227 = vector.broadcast %226 : vector<1x64xf32> to vector<32x64xf32>
    %228 = vector.broadcast %cst_106 : f32 to vector<32x64xf32>
    %229 = arith.select %221, %227, %228 : vector<32x64xi1>, vector<32x64xf32>
    %230 = arith.addf %209, %229 : vector<32x64xf32>
    %cst_107 = arith.constant 1.000000e+30 : f32
    %231 = vector.broadcast %cst_107 : f32 to vector<32x64xf32>
    %232 = arith.select %221, %231, %211 : vector<32x64xi1>, vector<32x64xf32>
    %cst_108 = arith.constant dense<0x7F800000> : vector<64xf32>
    %233 = vector.multi_reduction <minimumf>, %232, %cst_108 [0] : vector<32x64xf32> to vector<64xf32>
    %234 = vector.shape_cast %233 : vector<64xf32> to vector<1x64xf32>
    %235 = vector.broadcast %234 : vector<1x64xf32> to vector<32x64xf32>
    %236 = arith.cmpf oeq, %232, %235 : vector<32x64xf32>
    %c32_i32_109 = arith.constant 32 : i32
    %237 = vector.broadcast %c32_i32_109 : i32 to vector<32x64xi32>
    %238 = arith.select %236, %188, %237 : vector<32x64xi1>, vector<32x64xi32>
    %cst_110 = arith.constant dense<2147483647> : vector<64xi32>
    %239 = vector.multi_reduction <minsi>, %238, %cst_110 [0] : vector<32x64xi32> to vector<64xi32>
    %240 = vector.shape_cast %239 : vector<64xi32> to vector<1x64xi32>
    %241 = vector.broadcast %240 : vector<1x64xi32> to vector<32x64xi32>
    %242 = arith.cmpi eq, %188, %241 : vector<32x64xi32>
    %cst_111 = arith.constant 9.99999993E-9 : f32
    %243 = vector.broadcast %cst_111 : f32 to vector<1x64xf32>
    %244 = arith.addf %234, %243 : vector<1x64xf32>
    %245 = tpu.reciprocal %244 {approx = true} : vector<1x64xf32> -> vector<1x64xf32>
    %246 = arith.addf %225, %245 : vector<1x64xf32>
    %cst_112 = arith.constant 0.000000e+00 : f32
    %247 = vector.shape_cast %245 : vector<1x64xf32> to vector<1x64xf32>
    %248 = vector.broadcast %247 : vector<1x64xf32> to vector<32x64xf32>
    %249 = vector.broadcast %cst_112 : f32 to vector<32x64xf32>
    %250 = arith.select %242, %248, %249 : vector<32x64xi1>, vector<32x64xf32>
    %251 = arith.addf %230, %250 : vector<32x64xf32>
    %252 = arith.truncf %168 : vector<32x32xf32> to vector<32x32xbf16>
    %253 = arith.truncf %251 : vector<32x64xf32> to vector<32x64xbf16>
    %cst_113 = arith.constant dense<0.000000e+00> : vector<32x64xf32>
    %254 = tpu.matmul %252, %253, %cst_113 {dimension_numbers = #tpu.dot_dimension_numbers<[1], [0], [0], [1], [0, 0, 1, 1], [], []>} : vector<32x32xbf16>, vector<32x64xbf16>, vector<32x64xf32> -> vector<32x64xf32>
    %255 = tpu.reciprocal %246 {approx = true} : vector<1x64xf32> -> vector<1x64xf32>
    %256 = vector.broadcast %255 : vector<1x64xf32> to vector<32x64xf32>
    %257 = arith.mulf %254, %256 : vector<32x64xf32>
    %c0_114 = arith.constant 0 : index
    %c0_115 = arith.constant 0 : index
    %c0_116 = arith.constant 0 : index
    %258 = vector.load %arg15[%c0_114, %c0_115, %c0_116] : memref<6x32x32xbf16, #tpu.memory_space<vmem>>, vector<1x32x32xbf16>
    %259 = vector.shape_cast %258 : vector<1x32x32xbf16> to vector<32x32xbf16>
    %260 = arith.truncf %5 : vector<32x64xf32> to vector<32x64xbf16>
    %cst_117 = arith.constant dense<0.000000e+00> : vector<32x64xf32>
    %261 = tpu.matmul %259, %260, %cst_117 {dimension_numbers = #tpu.dot_dimension_numbers<[1], [0], [0], [1], [0, 0, 1, 1], [], []>} : vector<32x32xbf16>, vector<32x64xbf16>, vector<32x64xf32> -> vector<32x64xf32>
    %c1_118 = arith.constant 1 : index
    %c0_119 = arith.constant 0 : index
    %c0_120 = arith.constant 0 : index
    %262 = vector.load %arg15[%c1_118, %c0_119, %c0_120] : memref<6x32x32xbf16, #tpu.memory_space<vmem>>, vector<1x32x32xbf16>
    %263 = vector.shape_cast %262 : vector<1x32x32xbf16> to vector<32x32xbf16>
    %264 = arith.truncf %257 : vector<32x64xf32> to vector<32x64xbf16>
    %cst_121 = arith.constant dense<0.000000e+00> : vector<32x64xf32>
    %265 = tpu.matmul %263, %264, %cst_121 {dimension_numbers = #tpu.dot_dimension_numbers<[1], [0], [0], [1], [0, 0, 1, 1], [], []>} : vector<32x32xbf16>, vector<32x64xbf16>, vector<32x64xf32> -> vector<32x64xf32>
    %266 = arith.addf %261, %265 : vector<32x64xf32>
    %c0_122 = arith.constant 0 : index
    %c0_123 = arith.constant 0 : index
    %c0_124 = arith.constant 0 : index
    %267 = vector.load %arg16[%c0_122, %c0_123, %c0_124] : memref<5x32x1xf32, #tpu.memory_space<vmem>>, vector<1x32x1xf32>
    %268 = vector.shape_cast %267 : vector<1x32x1xf32> to vector<32x1xf32>
    %269 = vector.broadcast %268 : vector<32x1xf32> to vector<32x64xf32>
    %270 = arith.addf %266, %269 : vector<32x64xf32>
    %cst_125 = arith.constant 0.000000e+00 : f32
    %271 = vector.broadcast %cst_125 : f32 to vector<32x64xf32>
    %272 = arith.cmpf oge, %270, %271 : vector<32x64xf32>
    %cst_126 = arith.constant 0.00999999977 : f32
    %273 = vector.broadcast %cst_126 : f32 to vector<32x64xf32>
    %274 = arith.mulf %273, %270 : vector<32x64xf32>
    %275 = arith.select %272, %270, %274 : vector<32x64xi1>, vector<32x64xf32>
    %c2_127 = arith.constant 2 : index
    %c0_128 = arith.constant 0 : index
    %c0_129 = arith.constant 0 : index
    %276 = vector.load %arg15[%c2_127, %c0_128, %c0_129] : memref<6x32x32xbf16, #tpu.memory_space<vmem>>, vector<1x32x32xbf16>
    %277 = vector.shape_cast %276 : vector<1x32x32xbf16> to vector<32x32xbf16>
    %278 = arith.truncf %275 : vector<32x64xf32> to vector<32x64xbf16>
    %cst_130 = arith.constant dense<0.000000e+00> : vector<32x64xf32>
    %279 = tpu.matmul %277, %278, %cst_130 {dimension_numbers = #tpu.dot_dimension_numbers<[1], [0], [0], [1], [0, 0, 1, 1], [], []>} : vector<32x32xbf16>, vector<32x64xbf16>, vector<32x64xf32> -> vector<32x64xf32>
    %c1_131 = arith.constant 1 : index
    %c0_132 = arith.constant 0 : index
    %c0_133 = arith.constant 0 : index
    %280 = vector.load %arg16[%c1_131, %c0_132, %c0_133] : memref<5x32x1xf32, #tpu.memory_space<vmem>>, vector<1x32x1xf32>
    %281 = vector.shape_cast %280 : vector<1x32x1xf32> to vector<32x1xf32>
    %282 = vector.broadcast %281 : vector<32x1xf32> to vector<32x64xf32>
    %283 = arith.addf %279, %282 : vector<32x64xf32>
    %cst_134 = arith.constant 0.000000e+00 : f32
    %284 = vector.broadcast %cst_134 : f32 to vector<32x64xf32>
    %285 = arith.cmpf oge, %283, %284 : vector<32x64xf32>
    %cst_135 = arith.constant 0.00999999977 : f32
    %286 = vector.broadcast %cst_135 : f32 to vector<32x64xf32>
    %287 = arith.mulf %286, %283 : vector<32x64xf32>
    %288 = arith.select %285, %283, %287 : vector<32x64xi1>, vector<32x64xf32>
    %c3_136 = arith.constant 3 : index
    %c0_137 = arith.constant 0 : index
    %c0_138 = arith.constant 0 : index
    %289 = vector.load %arg15[%c3_136, %c0_137, %c0_138] : memref<6x32x32xbf16, #tpu.memory_space<vmem>>, vector<1x32x32xbf16>
    %290 = vector.shape_cast %289 : vector<1x32x32xbf16> to vector<32x32xbf16>
    %291 = arith.truncf %288 : vector<32x64xf32> to vector<32x64xbf16>
    %cst_139 = arith.constant dense<0.000000e+00> : vector<32x64xf32>
    %292 = tpu.matmul %290, %291, %cst_139 {dimension_numbers = #tpu.dot_dimension_numbers<[1], [0], [0], [1], [0, 0, 1, 1], [], []>} : vector<32x32xbf16>, vector<32x64xbf16>, vector<32x64xf32> -> vector<32x64xf32>
    %c2_140 = arith.constant 2 : index
    %c0_141 = arith.constant 0 : index
    %c0_142 = arith.constant 0 : index
    %293 = vector.load %arg16[%c2_140, %c0_141, %c0_142] : memref<5x32x1xf32, #tpu.memory_space<vmem>>, vector<1x32x1xf32>
    %294 = vector.shape_cast %293 : vector<1x32x1xf32> to vector<32x1xf32>
    %295 = vector.broadcast %294 : vector<32x1xf32> to vector<32x64xf32>
    %296 = arith.addf %292, %295 : vector<32x64xf32>
    %297 = arith.addf %296, %275 : vector<32x64xf32>
    %cst_143 = arith.constant 0.000000e+00 : f32
    %298 = vector.broadcast %cst_143 : f32 to vector<32x64xf32>
    %299 = arith.cmpf oge, %297, %298 : vector<32x64xf32>
    %cst_144 = arith.constant 0.00999999977 : f32
    %300 = vector.broadcast %cst_144 : f32 to vector<32x64xf32>
    %301 = arith.mulf %300, %297 : vector<32x64xf32>
    %302 = arith.select %299, %297, %301 : vector<32x64xi1>, vector<32x64xf32>
    %c4_145 = arith.constant 4 : index
    %c0_146 = arith.constant 0 : index
    %c0_147 = arith.constant 0 : index
    %303 = vector.load %arg15[%c4_145, %c0_146, %c0_147] : memref<6x32x32xbf16, #tpu.memory_space<vmem>>, vector<1x32x32xbf16>
    %304 = vector.shape_cast %303 : vector<1x32x32xbf16> to vector<32x32xbf16>
    %305 = arith.truncf %302 : vector<32x64xf32> to vector<32x64xbf16>
    %cst_148 = arith.constant dense<0.000000e+00> : vector<32x64xf32>
    %306 = tpu.matmul %304, %305, %cst_148 {dimension_numbers = #tpu.dot_dimension_numbers<[1], [0], [0], [1], [0, 0, 1, 1], [], []>} : vector<32x32xbf16>, vector<32x64xbf16>, vector<32x64xf32> -> vector<32x64xf32>
    %c3_149 = arith.constant 3 : index
    %c0_150 = arith.constant 0 : index
    %c0_151 = arith.constant 0 : index
    %307 = vector.load %arg16[%c3_149, %c0_150, %c0_151] : memref<5x32x1xf32, #tpu.memory_space<vmem>>, vector<1x32x1xf32>
    %308 = vector.shape_cast %307 : vector<1x32x1xf32> to vector<32x1xf32>
    %309 = vector.broadcast %308 : vector<32x1xf32> to vector<32x64xf32>
    %310 = arith.addf %306, %309 : vector<32x64xf32>
    %cst_152 = arith.constant 0.000000e+00 : f32
    %311 = vector.broadcast %cst_152 : f32 to vector<32x64xf32>
    %312 = arith.cmpf oge, %310, %311 : vector<32x64xf32>
    %cst_153 = arith.constant 0.00999999977 : f32
    %313 = vector.broadcast %cst_153 : f32 to vector<32x64xf32>
    %314 = arith.mulf %313, %310 : vector<32x64xf32>
    %315 = arith.select %312, %310, %314 : vector<32x64xi1>, vector<32x64xf32>
    %c5_154 = arith.constant 5 : index
    %c0_155 = arith.constant 0 : index
    %c0_156 = arith.constant 0 : index
    %316 = vector.load %arg15[%c5_154, %c0_155, %c0_156] : memref<6x32x32xbf16, #tpu.memory_space<vmem>>, vector<1x32x32xbf16>
    %317 = vector.shape_cast %316 : vector<1x32x32xbf16> to vector<32x32xbf16>
    %318 = arith.truncf %315 : vector<32x64xf32> to vector<32x64xbf16>
    %cst_157 = arith.constant dense<0.000000e+00> : vector<32x64xf32>
    %319 = tpu.matmul %317, %318, %cst_157 {dimension_numbers = #tpu.dot_dimension_numbers<[1], [0], [0], [1], [0, 0, 1, 1], [], []>} : vector<32x32xbf16>, vector<32x64xbf16>, vector<32x64xf32> -> vector<32x64xf32>
    %c4_158 = arith.constant 4 : index
    %c0_159 = arith.constant 0 : index
    %c0_160 = arith.constant 0 : index
    %320 = vector.load %arg16[%c4_158, %c0_159, %c0_160] : memref<5x32x1xf32, #tpu.memory_space<vmem>>, vector<1x32x1xf32>
    %321 = vector.shape_cast %320 : vector<1x32x1xf32> to vector<32x1xf32>
    %322 = vector.broadcast %321 : vector<32x1xf32> to vector<32x64xf32>
    %323 = arith.addf %319, %322 : vector<32x64xf32>
    %324 = arith.addf %323, %302 : vector<32x64xf32>
    %cst_161 = arith.constant 0.000000e+00 : f32
    %325 = vector.broadcast %cst_161 : f32 to vector<32x64xf32>
    %326 = arith.cmpf oge, %324, %325 : vector<32x64xf32>
    %cst_162 = arith.constant 0.00999999977 : f32
    %327 = vector.broadcast %cst_162 : f32 to vector<32x64xf32>
    %328 = arith.mulf %327, %324 : vector<32x64xf32>
    %329 = arith.select %326, %324, %328 : vector<32x64xi1>, vector<32x64xf32>
    %c0_163 = arith.constant 0 : index
    %c0_164 = arith.constant 0 : index
    %c0_165 = arith.constant 0 : index
    %330 = vector.load %arg3[%c0_163, %c0_164, %c0_165] : memref<1x64x3xf32, #tpu.memory_space<vmem>>, vector<1x64x3xf32>
    %331 = vector.shape_cast %330 : vector<1x64x3xf32> to vector<64x3xf32>
    %c0_166 = arith.constant 0 : index
    %c0_167 = arith.constant 0 : index
    %c0_168 = arith.constant 0 : index
    %332 = vector.load %arg7[%c0_166, %c0_167, %c0_168] : memref<1x3x128xf32, #tpu.memory_space<vmem>>, vector<1x3x128xf32>
    %333 = vector.shape_cast %332 : vector<1x3x128xf32> to vector<3x128xf32>
    %cst_169 = arith.constant dense<0.000000e+00> : vector<64x128xf32>
    %334 = tpu.matmul %331, %333, %cst_169 {dimension_numbers = #tpu.dot_dimension_numbers<[1], [0], [0], [1], [0, 0, 1, 1], [], []>} : vector<64x3xf32>, vector<3x128xf32>, vector<64x128xf32> -> vector<64x128xf32>
    %335 = arith.mulf %331, %331 : vector<64x3xf32>
    %cst_170 = arith.constant dense<0.000000e+00> : vector<64xf32>
    %336 = vector.multi_reduction <add>, %335, %cst_170 [1] : vector<64x3xf32> to vector<64xf32>
    %337 = vector.shape_cast %336 : vector<64xf32> to vector<64x1xf32>
    %338 = arith.mulf %333, %333 : vector<3x128xf32>
    %cst_171 = arith.constant dense<0.000000e+00> : vector<128xf32>
    %339 = vector.multi_reduction <add>, %338, %cst_171 [0] : vector<3x128xf32> to vector<128xf32>
    %340 = vector.shape_cast %339 : vector<128xf32> to vector<1x128xf32>
    %341 = vector.broadcast %337 : vector<64x1xf32> to vector<64x128xf32>
    %342 = vector.broadcast %340 : vector<1x128xf32> to vector<64x128xf32>
    %343 = arith.addf %341, %342 : vector<64x128xf32>
    %cst_172 = arith.constant 2.000000e+00 : f32
    %344 = vector.broadcast %cst_172 : f32 to vector<64x128xf32>
    %345 = arith.mulf %344, %334 : vector<64x128xf32>
    %346 = arith.subf %343, %345 : vector<64x128xf32>
    %cst_173 = arith.constant 0.000000e+00 : f32
    %347 = vector.broadcast %cst_173 : f32 to vector<64x128xf32>
    %348 = arith.maximumf %346, %347 : vector<64x128xf32>
    %349 = tpu.iota {dimensions = array<i32: 0>} : vector<64x128xi32>
    %cst_174 = arith.constant 0.000000e+00 : f32
    %350 = vector.broadcast %cst_174 : f32 to vector<1x128xf32>
    %cst_175 = arith.constant 0.000000e+00 : f32
    %351 = vector.broadcast %cst_175 : f32 to vector<64x128xf32>
    %cst_176 = arith.constant dense<0x7F800000> : vector<128xf32>
    %352 = vector.multi_reduction <minimumf>, %348, %cst_176 [0] : vector<64x128xf32> to vector<128xf32>
    %353 = vector.shape_cast %352 : vector<128xf32> to vector<1x128xf32>
    %354 = vector.broadcast %353 : vector<1x128xf32> to vector<64x128xf32>
    %355 = arith.cmpf oeq, %348, %354 : vector<64x128xf32>
    %c64_i32 = arith.constant 64 : i32
    %356 = vector.broadcast %c64_i32 : i32 to vector<64x128xi32>
    %357 = arith.select %355, %349, %356 : vector<64x128xi1>, vector<64x128xi32>
    %cst_177 = arith.constant dense<2147483647> : vector<128xi32>
    %358 = vector.multi_reduction <minsi>, %357, %cst_177 [0] : vector<64x128xi32> to vector<128xi32>
    %359 = vector.shape_cast %358 : vector<128xi32> to vector<1x128xi32>
    %360 = vector.broadcast %359 : vector<1x128xi32> to vector<64x128xi32>
    %361 = arith.cmpi eq, %349, %360 : vector<64x128xi32>
    %cst_178 = arith.constant 9.99999993E-9 : f32
    %362 = vector.broadcast %cst_178 : f32 to vector<1x128xf32>
    %363 = arith.addf %353, %362 : vector<1x128xf32>
    %364 = tpu.reciprocal %363 {approx = true} : vector<1x128xf32> -> vector<1x128xf32>
    %365 = arith.addf %350, %364 : vector<1x128xf32>
    %cst_179 = arith.constant 0.000000e+00 : f32
    %366 = vector.shape_cast %364 : vector<1x128xf32> to vector<1x128xf32>
    %367 = vector.broadcast %366 : vector<1x128xf32> to vector<64x128xf32>
    %368 = vector.broadcast %cst_179 : f32 to vector<64x128xf32>
    %369 = arith.select %361, %367, %368 : vector<64x128xi1>, vector<64x128xf32>
    %370 = arith.addf %351, %369 : vector<64x128xf32>
    %cst_180 = arith.constant 1.000000e+30 : f32
    %371 = vector.broadcast %cst_180 : f32 to vector<64x128xf32>
    %372 = arith.select %361, %371, %348 : vector<64x128xi1>, vector<64x128xf32>
    %cst_181 = arith.constant dense<0x7F800000> : vector<128xf32>
    %373 = vector.multi_reduction <minimumf>, %372, %cst_181 [0] : vector<64x128xf32> to vector<128xf32>
    %374 = vector.shape_cast %373 : vector<128xf32> to vector<1x128xf32>
    %375 = vector.broadcast %374 : vector<1x128xf32> to vector<64x128xf32>
    %376 = arith.cmpf oeq, %372, %375 : vector<64x128xf32>
    %c64_i32_182 = arith.constant 64 : i32
    %377 = vector.broadcast %c64_i32_182 : i32 to vector<64x128xi32>
    %378 = arith.select %376, %349, %377 : vector<64x128xi1>, vector<64x128xi32>
    %cst_183 = arith.constant dense<2147483647> : vector<128xi32>
    %379 = vector.multi_reduction <minsi>, %378, %cst_183 [0] : vector<64x128xi32> to vector<128xi32>
    %380 = vector.shape_cast %379 : vector<128xi32> to vector<1x128xi32>
    %381 = vector.broadcast %380 : vector<1x128xi32> to vector<64x128xi32>
    %382 = arith.cmpi eq, %349, %381 : vector<64x128xi32>
    %cst_184 = arith.constant 9.99999993E-9 : f32
    %383 = vector.broadcast %cst_184 : f32 to vector<1x128xf32>
    %384 = arith.addf %374, %383 : vector<1x128xf32>
    %385 = tpu.reciprocal %384 {approx = true} : vector<1x128xf32> -> vector<1x128xf32>
    %386 = arith.addf %365, %385 : vector<1x128xf32>
    %cst_185 = arith.constant 0.000000e+00 : f32
    %387 = vector.shape_cast %385 : vector<1x128xf32> to vector<1x128xf32>
    %388 = vector.broadcast %387 : vector<1x128xf32> to vector<64x128xf32>
    %389 = vector.broadcast %cst_185 : f32 to vector<64x128xf32>
    %390 = arith.select %382, %388, %389 : vector<64x128xi1>, vector<64x128xf32>
    %391 = arith.addf %370, %390 : vector<64x128xf32>
    %cst_186 = arith.constant 1.000000e+30 : f32
    %392 = vector.broadcast %cst_186 : f32 to vector<64x128xf32>
    %393 = arith.select %382, %392, %372 : vector<64x128xi1>, vector<64x128xf32>
    %cst_187 = arith.constant dense<0x7F800000> : vector<128xf32>
    %394 = vector.multi_reduction <minimumf>, %393, %cst_187 [0] : vector<64x128xf32> to vector<128xf32>
    %395 = vector.shape_cast %394 : vector<128xf32> to vector<1x128xf32>
    %396 = vector.broadcast %395 : vector<1x128xf32> to vector<64x128xf32>
    %397 = arith.cmpf oeq, %393, %396 : vector<64x128xf32>
    %c64_i32_188 = arith.constant 64 : i32
    %398 = vector.broadcast %c64_i32_188 : i32 to vector<64x128xi32>
    %399 = arith.select %397, %349, %398 : vector<64x128xi1>, vector<64x128xi32>
    %cst_189 = arith.constant dense<2147483647> : vector<128xi32>
    %400 = vector.multi_reduction <minsi>, %399, %cst_189 [0] : vector<64x128xi32> to vector<128xi32>
    %401 = vector.shape_cast %400 : vector<128xi32> to vector<1x128xi32>
    %402 = vector.broadcast %401 : vector<1x128xi32> to vector<64x128xi32>
    %403 = arith.cmpi eq, %349, %402 : vector<64x128xi32>
    %cst_190 = arith.constant 9.99999993E-9 : f32
    %404 = vector.broadcast %cst_190 : f32 to vector<1x128xf32>
    %405 = arith.addf %395, %404 : vector<1x128xf32>
    %406 = tpu.reciprocal %405 {approx = true} : vector<1x128xf32> -> vector<1x128xf32>
    %407 = arith.addf %386, %406 : vector<1x128xf32>
    %cst_191 = arith.constant 0.000000e+00 : f32
    %408 = vector.shape_cast %406 : vector<1x128xf32> to vector<1x128xf32>
    %409 = vector.broadcast %408 : vector<1x128xf32> to vector<64x128xf32>
    %410 = vector.broadcast %cst_191 : f32 to vector<64x128xf32>
    %411 = arith.select %403, %409, %410 : vector<64x128xi1>, vector<64x128xf32>
    %412 = arith.addf %391, %411 : vector<64x128xf32>
    %413 = arith.truncf %329 : vector<32x64xf32> to vector<32x64xbf16>
    %414 = arith.truncf %412 : vector<64x128xf32> to vector<64x128xbf16>
    %cst_192 = arith.constant dense<0.000000e+00> : vector<32x128xf32>
    %415 = tpu.matmul %413, %414, %cst_192 {dimension_numbers = #tpu.dot_dimension_numbers<[1], [0], [0], [1], [0, 0, 1, 1], [], []>} : vector<32x64xbf16>, vector<64x128xbf16>, vector<32x128xf32> -> vector<32x128xf32>
    %416 = tpu.reciprocal %407 {approx = true} : vector<1x128xf32> -> vector<1x128xf32>
    %417 = vector.broadcast %416 : vector<1x128xf32> to vector<32x128xf32>
    %418 = arith.mulf %415, %417 : vector<32x128xf32>
    %c0_193 = arith.constant 0 : index
    %c0_194 = arith.constant 0 : index
    %c0_195 = arith.constant 0 : index
    %419 = vector.load %arg17[%c0_193, %c0_194, %c0_195] : memref<6x32x32xbf16, #tpu.memory_space<vmem>>, vector<1x32x32xbf16>
    %420 = vector.shape_cast %419 : vector<1x32x32xbf16> to vector<32x32xbf16>
    %421 = arith.truncf %7 : vector<32x128xf32> to vector<32x128xbf16>
    %cst_196 = arith.constant dense<0.000000e+00> : vector<32x128xf32>
    %422 = tpu.matmul %420, %421, %cst_196 {dimension_numbers = #tpu.dot_dimension_numbers<[1], [0], [0], [1], [0, 0, 1, 1], [], []>} : vector<32x32xbf16>, vector<32x128xbf16>, vector<32x128xf32> -> vector<32x128xf32>
    %c1_197 = arith.constant 1 : index
    %c0_198 = arith.constant 0 : index
    %c0_199 = arith.constant 0 : index
    %423 = vector.load %arg17[%c1_197, %c0_198, %c0_199] : memref<6x32x32xbf16, #tpu.memory_space<vmem>>, vector<1x32x32xbf16>
    %424 = vector.shape_cast %423 : vector<1x32x32xbf16> to vector<32x32xbf16>
    %425 = arith.truncf %418 : vector<32x128xf32> to vector<32x128xbf16>
    %cst_200 = arith.constant dense<0.000000e+00> : vector<32x128xf32>
    %426 = tpu.matmul %424, %425, %cst_200 {dimension_numbers = #tpu.dot_dimension_numbers<[1], [0], [0], [1], [0, 0, 1, 1], [], []>} : vector<32x32xbf16>, vector<32x128xbf16>, vector<32x128xf32> -> vector<32x128xf32>
    %427 = arith.addf %422, %426 : vector<32x128xf32>
    %c0_201 = arith.constant 0 : index
    %c0_202 = arith.constant 0 : index
    %c0_203 = arith.constant 0 : index
    %428 = vector.load %arg18[%c0_201, %c0_202, %c0_203] : memref<5x32x1xf32, #tpu.memory_space<vmem>>, vector<1x32x1xf32>
    %429 = vector.shape_cast %428 : vector<1x32x1xf32> to vector<32x1xf32>
    %430 = vector.broadcast %429 : vector<32x1xf32> to vector<32x128xf32>
    %431 = arith.addf %427, %430 : vector<32x128xf32>
    %cst_204 = arith.constant 0.000000e+00 : f32
    %432 = vector.broadcast %cst_204 : f32 to vector<32x128xf32>
    %433 = arith.cmpf oge, %431, %432 : vector<32x128xf32>
    %cst_205 = arith.constant 0.00999999977 : f32
    %434 = vector.broadcast %cst_205 : f32 to vector<32x128xf32>
    %435 = arith.mulf %434, %431 : vector<32x128xf32>
    %436 = arith.select %433, %431, %435 : vector<32x128xi1>, vector<32x128xf32>
    %c2_206 = arith.constant 2 : index
    %c0_207 = arith.constant 0 : index
    %c0_208 = arith.constant 0 : index
    %437 = vector.load %arg17[%c2_206, %c0_207, %c0_208] : memref<6x32x32xbf16, #tpu.memory_space<vmem>>, vector<1x32x32xbf16>
    %438 = vector.shape_cast %437 : vector<1x32x32xbf16> to vector<32x32xbf16>
    %439 = arith.truncf %436 : vector<32x128xf32> to vector<32x128xbf16>
    %cst_209 = arith.constant dense<0.000000e+00> : vector<32x128xf32>
    %440 = tpu.matmul %438, %439, %cst_209 {dimension_numbers = #tpu.dot_dimension_numbers<[1], [0], [0], [1], [0, 0, 1, 1], [], []>} : vector<32x32xbf16>, vector<32x128xbf16>, vector<32x128xf32> -> vector<32x128xf32>
    %c1_210 = arith.constant 1 : index
    %c0_211 = arith.constant 0 : index
    %c0_212 = arith.constant 0 : index
    %441 = vector.load %arg18[%c1_210, %c0_211, %c0_212] : memref<5x32x1xf32, #tpu.memory_space<vmem>>, vector<1x32x1xf32>
    %442 = vector.shape_cast %441 : vector<1x32x1xf32> to vector<32x1xf32>
    %443 = vector.broadcast %442 : vector<32x1xf32> to vector<32x128xf32>
    %444 = arith.addf %440, %443 : vector<32x128xf32>
    %cst_213 = arith.constant 0.000000e+00 : f32
    %445 = vector.broadcast %cst_213 : f32 to vector<32x128xf32>
    %446 = arith.cmpf oge, %444, %445 : vector<32x128xf32>
    %cst_214 = arith.constant 0.00999999977 : f32
    %447 = vector.broadcast %cst_214 : f32 to vector<32x128xf32>
    %448 = arith.mulf %447, %444 : vector<32x128xf32>
    %449 = arith.select %446, %444, %448 : vector<32x128xi1>, vector<32x128xf32>
    %c3_215 = arith.constant 3 : index
    %c0_216 = arith.constant 0 : index
    %c0_217 = arith.constant 0 : index
    %450 = vector.load %arg17[%c3_215, %c0_216, %c0_217] : memref<6x32x32xbf16, #tpu.memory_space<vmem>>, vector<1x32x32xbf16>
    %451 = vector.shape_cast %450 : vector<1x32x32xbf16> to vector<32x32xbf16>
    %452 = arith.truncf %449 : vector<32x128xf32> to vector<32x128xbf16>
    %cst_218 = arith.constant dense<0.000000e+00> : vector<32x128xf32>
    %453 = tpu.matmul %451, %452, %cst_218 {dimension_numbers = #tpu.dot_dimension_numbers<[1], [0], [0], [1], [0, 0, 1, 1], [], []>} : vector<32x32xbf16>, vector<32x128xbf16>, vector<32x128xf32> -> vector<32x128xf32>
    %c2_219 = arith.constant 2 : index
    %c0_220 = arith.constant 0 : index
    %c0_221 = arith.constant 0 : index
    %454 = vector.load %arg18[%c2_219, %c0_220, %c0_221] : memref<5x32x1xf32, #tpu.memory_space<vmem>>, vector<1x32x1xf32>
    %455 = vector.shape_cast %454 : vector<1x32x1xf32> to vector<32x1xf32>
    %456 = vector.broadcast %455 : vector<32x1xf32> to vector<32x128xf32>
    %457 = arith.addf %453, %456 : vector<32x128xf32>
    %458 = arith.addf %457, %436 : vector<32x128xf32>
    %cst_222 = arith.constant 0.000000e+00 : f32
    %459 = vector.broadcast %cst_222 : f32 to vector<32x128xf32>
    %460 = arith.cmpf oge, %458, %459 : vector<32x128xf32>
    %cst_223 = arith.constant 0.00999999977 : f32
    %461 = vector.broadcast %cst_223 : f32 to vector<32x128xf32>
    %462 = arith.mulf %461, %458 : vector<32x128xf32>
    %463 = arith.select %460, %458, %462 : vector<32x128xi1>, vector<32x128xf32>
    %c4_224 = arith.constant 4 : index
    %c0_225 = arith.constant 0 : index
    %c0_226 = arith.constant 0 : index
    %464 = vector.load %arg17[%c4_224, %c0_225, %c0_226] : memref<6x32x32xbf16, #tpu.memory_space<vmem>>, vector<1x32x32xbf16>
    %465 = vector.shape_cast %464 : vector<1x32x32xbf16> to vector<32x32xbf16>
    %466 = arith.truncf %463 : vector<32x128xf32> to vector<32x128xbf16>
    %cst_227 = arith.constant dense<0.000000e+00> : vector<32x128xf32>
    %467 = tpu.matmul %465, %466, %cst_227 {dimension_numbers = #tpu.dot_dimension_numbers<[1], [0], [0], [1], [0, 0, 1, 1], [], []>} : vector<32x32xbf16>, vector<32x128xbf16>, vector<32x128xf32> -> vector<32x128xf32>
    %c3_228 = arith.constant 3 : index
    %c0_229 = arith.constant 0 : index
    %c0_230 = arith.constant 0 : index
    %468 = vector.load %arg18[%c3_228, %c0_229, %c0_230] : memref<5x32x1xf32, #tpu.memory_space<vmem>>, vector<1x32x1xf32>
    %469 = vector.shape_cast %468 : vector<1x32x1xf32> to vector<32x1xf32>
    %470 = vector.broadcast %469 : vector<32x1xf32> to vector<32x128xf32>
    %471 = arith.addf %467, %470 : vector<32x128xf32>
    %cst_231 = arith.constant 0.000000e+00 : f32
    %472 = vector.broadcast %cst_231 : f32 to vector<32x128xf32>
    %473 = arith.cmpf oge, %471, %472 : vector<32x128xf32>
    %cst_232 = arith.constant 0.00999999977 : f32
    %474 = vector.broadcast %cst_232 : f32 to vector<32x128xf32>
    %475 = arith.mulf %474, %471 : vector<32x128xf32>
    %476 = arith.select %473, %471, %475 : vector<32x128xi1>, vector<32x128xf32>
    %c5_233 = arith.constant 5 : index
    %c0_234 = arith.constant 0 : index
    %c0_235 = arith.constant 0 : index
    %477 = vector.load %arg17[%c5_233, %c0_234, %c0_235] : memref<6x32x32xbf16, #tpu.memory_space<vmem>>, vector<1x32x32xbf16>
    %478 = vector.shape_cast %477 : vector<1x32x32xbf16> to vector<32x32xbf16>
    %479 = arith.truncf %476 : vector<32x128xf32> to vector<32x128xbf16>
    %cst_236 = arith.constant dense<0.000000e+00> : vector<32x128xf32>
    %480 = tpu.matmul %478, %479, %cst_236 {dimension_numbers = #tpu.dot_dimension_numbers<[1], [0], [0], [1], [0, 0, 1, 1], [], []>} : vector<32x32xbf16>, vector<32x128xbf16>, vector<32x128xf32> -> vector<32x128xf32>
    %c4_237 = arith.constant 4 : index
    %c0_238 = arith.constant 0 : index
    %c0_239 = arith.constant 0 : index
    %481 = vector.load %arg18[%c4_237, %c0_238, %c0_239] : memref<5x32x1xf32, #tpu.memory_space<vmem>>, vector<1x32x1xf32>
    %482 = vector.shape_cast %481 : vector<1x32x1xf32> to vector<32x1xf32>
    %483 = vector.broadcast %482 : vector<32x1xf32> to vector<32x128xf32>
    %484 = arith.addf %480, %483 : vector<32x128xf32>
    %485 = arith.addf %484, %463 : vector<32x128xf32>
    %cst_240 = arith.constant 0.000000e+00 : f32
    %486 = vector.broadcast %cst_240 : f32 to vector<32x128xf32>
    %487 = arith.cmpf oge, %485, %486 : vector<32x128xf32>
    %cst_241 = arith.constant 0.00999999977 : f32
    %488 = vector.broadcast %cst_241 : f32 to vector<32x128xf32>
    %489 = arith.mulf %488, %485 : vector<32x128xf32>
    %490 = arith.select %487, %485, %489 : vector<32x128xi1>, vector<32x128xf32>
    %c0_242 = arith.constant 0 : index
    %c0_243 = arith.constant 0 : index
    %c0_244 = arith.constant 0 : index
    %491 = vector.load %arg4[%c0_242, %c0_243, %c0_244] : memref<1x128x3xf32, #tpu.memory_space<vmem>>, vector<1x128x3xf32>
    %492 = vector.shape_cast %491 : vector<1x128x3xf32> to vector<128x3xf32>
    %c0_245 = arith.constant 0 : index
    %c0_246 = arith.constant 0 : index
    %c0_247 = arith.constant 0 : index
    %493 = vector.load %arg8[%c0_245, %c0_246, %c0_247] : memref<1x3x256xf32, #tpu.memory_space<vmem>>, vector<1x3x256xf32>
    %494 = vector.shape_cast %493 : vector<1x3x256xf32> to vector<3x256xf32>
    %cst_248 = arith.constant dense<0.000000e+00> : vector<128x256xf32>
    %495 = tpu.matmul %492, %494, %cst_248 {dimension_numbers = #tpu.dot_dimension_numbers<[1], [0], [0], [1], [0, 0, 1, 1], [], []>} : vector<128x3xf32>, vector<3x256xf32>, vector<128x256xf32> -> vector<128x256xf32>
    %496 = arith.mulf %492, %492 : vector<128x3xf32>
    %cst_249 = arith.constant dense<0.000000e+00> : vector<128xf32>
    %497 = vector.multi_reduction <add>, %496, %cst_249 [1] : vector<128x3xf32> to vector<128xf32>
    %498 = vector.shape_cast %497 : vector<128xf32> to vector<128x1xf32>
    %499 = arith.mulf %494, %494 : vector<3x256xf32>
    %cst_250 = arith.constant dense<0.000000e+00> : vector<256xf32>
    %500 = vector.multi_reduction <add>, %499, %cst_250 [0] : vector<3x256xf32> to vector<256xf32>
    %501 = vector.shape_cast %500 : vector<256xf32> to vector<1x256xf32>
    %502 = vector.broadcast %498 : vector<128x1xf32> to vector<128x256xf32>
    %503 = vector.broadcast %501 : vector<1x256xf32> to vector<128x256xf32>
    %504 = arith.addf %502, %503 : vector<128x256xf32>
    %cst_251 = arith.constant 2.000000e+00 : f32
    %505 = vector.broadcast %cst_251 : f32 to vector<128x256xf32>
    %506 = arith.mulf %505, %495 : vector<128x256xf32>
    %507 = arith.subf %504, %506 : vector<128x256xf32>
    %cst_252 = arith.constant 0.000000e+00 : f32
    %508 = vector.broadcast %cst_252 : f32 to vector<128x256xf32>
    %509 = arith.maximumf %507, %508 : vector<128x256xf32>
    %510 = tpu.iota {dimensions = array<i32: 0>} : vector<128x256xi32>
    %cst_253 = arith.constant 0.000000e+00 : f32
    %511 = vector.broadcast %cst_253 : f32 to vector<1x256xf32>
    %cst_254 = arith.constant 0.000000e+00 : f32
    %512 = vector.broadcast %cst_254 : f32 to vector<128x256xf32>
    %cst_255 = arith.constant dense<0x7F800000> : vector<256xf32>
    %513 = vector.multi_reduction <minimumf>, %509, %cst_255 [0] : vector<128x256xf32> to vector<256xf32>
    %514 = vector.shape_cast %513 : vector<256xf32> to vector<1x256xf32>
    %515 = vector.broadcast %514 : vector<1x256xf32> to vector<128x256xf32>
    %516 = arith.cmpf oeq, %509, %515 : vector<128x256xf32>
    %c128_i32 = arith.constant 128 : i32
    %517 = vector.broadcast %c128_i32 : i32 to vector<128x256xi32>
    %518 = arith.select %516, %510, %517 : vector<128x256xi1>, vector<128x256xi32>
    %cst_256 = arith.constant dense<2147483647> : vector<256xi32>
    %519 = vector.multi_reduction <minsi>, %518, %cst_256 [0] : vector<128x256xi32> to vector<256xi32>
    %520 = vector.shape_cast %519 : vector<256xi32> to vector<1x256xi32>
    %521 = vector.broadcast %520 : vector<1x256xi32> to vector<128x256xi32>
    %522 = arith.cmpi eq, %510, %521 : vector<128x256xi32>
    %cst_257 = arith.constant 9.99999993E-9 : f32
    %523 = vector.broadcast %cst_257 : f32 to vector<1x256xf32>
    %524 = arith.addf %514, %523 : vector<1x256xf32>
    %525 = tpu.reciprocal %524 {approx = true} : vector<1x256xf32> -> vector<1x256xf32>
    %526 = arith.addf %511, %525 : vector<1x256xf32>
    %cst_258 = arith.constant 0.000000e+00 : f32
    %527 = vector.shape_cast %525 : vector<1x256xf32> to vector<1x256xf32>
    %528 = vector.broadcast %527 : vector<1x256xf32> to vector<128x256xf32>
    %529 = vector.broadcast %cst_258 : f32 to vector<128x256xf32>
    %530 = arith.select %522, %528, %529 : vector<128x256xi1>, vector<128x256xf32>
    %531 = arith.addf %512, %530 : vector<128x256xf32>
    %cst_259 = arith.constant 1.000000e+30 : f32
    %532 = vector.broadcast %cst_259 : f32 to vector<128x256xf32>
    %533 = arith.select %522, %532, %509 : vector<128x256xi1>, vector<128x256xf32>
    %cst_260 = arith.constant dense<0x7F800000> : vector<256xf32>
    %534 = vector.multi_reduction <minimumf>, %533, %cst_260 [0] : vector<128x256xf32> to vector<256xf32>
    %535 = vector.shape_cast %534 : vector<256xf32> to vector<1x256xf32>
    %536 = vector.broadcast %535 : vector<1x256xf32> to vector<128x256xf32>
    %537 = arith.cmpf oeq, %533, %536 : vector<128x256xf32>
    %c128_i32_261 = arith.constant 128 : i32
    %538 = vector.broadcast %c128_i32_261 : i32 to vector<128x256xi32>
    %539 = arith.select %537, %510, %538 : vector<128x256xi1>, vector<128x256xi32>
    %cst_262 = arith.constant dense<2147483647> : vector<256xi32>
    %540 = vector.multi_reduction <minsi>, %539, %cst_262 [0] : vector<128x256xi32> to vector<256xi32>
    %541 = vector.shape_cast %540 : vector<256xi32> to vector<1x256xi32>
    %542 = vector.broadcast %541 : vector<1x256xi32> to vector<128x256xi32>
    %543 = arith.cmpi eq, %510, %542 : vector<128x256xi32>
    %cst_263 = arith.constant 9.99999993E-9 : f32
    %544 = vector.broadcast %cst_263 : f32 to vector<1x256xf32>
    %545 = arith.addf %535, %544 : vector<1x256xf32>
    %546 = tpu.reciprocal %545 {approx = true} : vector<1x256xf32> -> vector<1x256xf32>
    %547 = arith.addf %526, %546 : vector<1x256xf32>
    %cst_264 = arith.constant 0.000000e+00 : f32
    %548 = vector.shape_cast %546 : vector<1x256xf32> to vector<1x256xf32>
    %549 = vector.broadcast %548 : vector<1x256xf32> to vector<128x256xf32>
    %550 = vector.broadcast %cst_264 : f32 to vector<128x256xf32>
    %551 = arith.select %543, %549, %550 : vector<128x256xi1>, vector<128x256xf32>
    %552 = arith.addf %531, %551 : vector<128x256xf32>
    %cst_265 = arith.constant 1.000000e+30 : f32
    %553 = vector.broadcast %cst_265 : f32 to vector<128x256xf32>
    %554 = arith.select %543, %553, %533 : vector<128x256xi1>, vector<128x256xf32>
    %cst_266 = arith.constant dense<0x7F800000> : vector<256xf32>
    %555 = vector.multi_reduction <minimumf>, %554, %cst_266 [0] : vector<128x256xf32> to vector<256xf32>
    %556 = vector.shape_cast %555 : vector<256xf32> to vector<1x256xf32>
    %557 = vector.broadcast %556 : vector<1x256xf32> to vector<128x256xf32>
    %558 = arith.cmpf oeq, %554, %557 : vector<128x256xf32>
    %c128_i32_267 = arith.constant 128 : i32
    %559 = vector.broadcast %c128_i32_267 : i32 to vector<128x256xi32>
    %560 = arith.select %558, %510, %559 : vector<128x256xi1>, vector<128x256xi32>
    %cst_268 = arith.constant dense<2147483647> : vector<256xi32>
    %561 = vector.multi_reduction <minsi>, %560, %cst_268 [0] : vector<128x256xi32> to vector<256xi32>
    %562 = vector.shape_cast %561 : vector<256xi32> to vector<1x256xi32>
    %563 = vector.broadcast %562 : vector<1x256xi32> to vector<128x256xi32>
    %564 = arith.cmpi eq, %510, %563 : vector<128x256xi32>
    %cst_269 = arith.constant 9.99999993E-9 : f32
    %565 = vector.broadcast %cst_269 : f32 to vector<1x256xf32>
    %566 = arith.addf %556, %565 : vector<1x256xf32>
    %567 = tpu.reciprocal %566 {approx = true} : vector<1x256xf32> -> vector<1x256xf32>
    %568 = arith.addf %547, %567 : vector<1x256xf32>
    %cst_270 = arith.constant 0.000000e+00 : f32
    %569 = vector.shape_cast %567 : vector<1x256xf32> to vector<1x256xf32>
    %570 = vector.broadcast %569 : vector<1x256xf32> to vector<128x256xf32>
    %571 = vector.broadcast %cst_270 : f32 to vector<128x256xf32>
    %572 = arith.select %564, %570, %571 : vector<128x256xi1>, vector<128x256xf32>
    %573 = arith.addf %552, %572 : vector<128x256xf32>
    %574 = arith.truncf %490 : vector<32x128xf32> to vector<32x128xbf16>
    %575 = arith.truncf %573 : vector<128x256xf32> to vector<128x256xbf16>
    %cst_271 = arith.constant dense<0.000000e+00> : vector<32x256xf32>
    %576 = tpu.matmul %574, %575, %cst_271 {dimension_numbers = #tpu.dot_dimension_numbers<[1], [0], [0], [1], [0, 0, 1, 1], [], []>} : vector<32x128xbf16>, vector<128x256xbf16>, vector<32x256xf32> -> vector<32x256xf32>
    %577 = tpu.reciprocal %568 {approx = true} : vector<1x256xf32> -> vector<1x256xf32>
    %578 = vector.broadcast %577 : vector<1x256xf32> to vector<32x256xf32>
    %579 = arith.mulf %576, %578 : vector<32x256xf32>
    %c0_272 = arith.constant 0 : index
    %c0_273 = arith.constant 0 : index
    %c0_274 = arith.constant 0 : index
    %580 = vector.load %arg19[%c0_272, %c0_273, %c0_274] : memref<5x32x32xbf16, #tpu.memory_space<vmem>>, vector<1x32x32xbf16>
    %581 = vector.shape_cast %580 : vector<1x32x32xbf16> to vector<32x32xbf16>
    %582 = arith.truncf %579 : vector<32x256xf32> to vector<32x256xbf16>
    %cst_275 = arith.constant dense<0.000000e+00> : vector<32x256xf32>
    %583 = tpu.matmul %581, %582, %cst_275 {dimension_numbers = #tpu.dot_dimension_numbers<[1], [0], [0], [1], [0, 0, 1, 1], [], []>} : vector<32x32xbf16>, vector<32x256xbf16>, vector<32x256xf32> -> vector<32x256xf32>
    %c0_276 = arith.constant 0 : index
    %c0_277 = arith.constant 0 : index
    %c0_278 = arith.constant 0 : index
    %584 = vector.load %arg20[%c0_276, %c0_277, %c0_278] : memref<5x32x1xf32, #tpu.memory_space<vmem>>, vector<1x32x1xf32>
    %585 = vector.shape_cast %584 : vector<1x32x1xf32> to vector<32x1xf32>
    %586 = vector.broadcast %585 : vector<32x1xf32> to vector<32x256xf32>
    %587 = arith.addf %583, %586 : vector<32x256xf32>
    %cst_279 = arith.constant 0.000000e+00 : f32
    %588 = vector.broadcast %cst_279 : f32 to vector<32x256xf32>
    %589 = arith.cmpf oge, %587, %588 : vector<32x256xf32>
    %cst_280 = arith.constant 0.00999999977 : f32
    %590 = vector.broadcast %cst_280 : f32 to vector<32x256xf32>
    %591 = arith.mulf %590, %587 : vector<32x256xf32>
    %592 = arith.select %589, %587, %591 : vector<32x256xi1>, vector<32x256xf32>
    %c1_281 = arith.constant 1 : index
    %c0_282 = arith.constant 0 : index
    %c0_283 = arith.constant 0 : index
    %593 = vector.load %arg19[%c1_281, %c0_282, %c0_283] : memref<5x32x32xbf16, #tpu.memory_space<vmem>>, vector<1x32x32xbf16>
    %594 = vector.shape_cast %593 : vector<1x32x32xbf16> to vector<32x32xbf16>
    %595 = arith.truncf %592 : vector<32x256xf32> to vector<32x256xbf16>
    %cst_284 = arith.constant dense<0.000000e+00> : vector<32x256xf32>
    %596 = tpu.matmul %594, %595, %cst_284 {dimension_numbers = #tpu.dot_dimension_numbers<[1], [0], [0], [1], [0, 0, 1, 1], [], []>} : vector<32x32xbf16>, vector<32x256xbf16>, vector<32x256xf32> -> vector<32x256xf32>
    %c1_285 = arith.constant 1 : index
    %c0_286 = arith.constant 0 : index
    %c0_287 = arith.constant 0 : index
    %597 = vector.load %arg20[%c1_285, %c0_286, %c0_287] : memref<5x32x1xf32, #tpu.memory_space<vmem>>, vector<1x32x1xf32>
    %598 = vector.shape_cast %597 : vector<1x32x1xf32> to vector<32x1xf32>
    %599 = vector.broadcast %598 : vector<32x1xf32> to vector<32x256xf32>
    %600 = arith.addf %596, %599 : vector<32x256xf32>
    %cst_288 = arith.constant 0.000000e+00 : f32
    %601 = vector.broadcast %cst_288 : f32 to vector<32x256xf32>
    %602 = arith.cmpf oge, %600, %601 : vector<32x256xf32>
    %cst_289 = arith.constant 0.00999999977 : f32
    %603 = vector.broadcast %cst_289 : f32 to vector<32x256xf32>
    %604 = arith.mulf %603, %600 : vector<32x256xf32>
    %605 = arith.select %602, %600, %604 : vector<32x256xi1>, vector<32x256xf32>
    %c2_290 = arith.constant 2 : index
    %c0_291 = arith.constant 0 : index
    %c0_292 = arith.constant 0 : index
    %606 = vector.load %arg19[%c2_290, %c0_291, %c0_292] : memref<5x32x32xbf16, #tpu.memory_space<vmem>>, vector<1x32x32xbf16>
    %607 = vector.shape_cast %606 : vector<1x32x32xbf16> to vector<32x32xbf16>
    %608 = arith.truncf %605 : vector<32x256xf32> to vector<32x256xbf16>
    %cst_293 = arith.constant dense<0.000000e+00> : vector<32x256xf32>
    %609 = tpu.matmul %607, %608, %cst_293 {dimension_numbers = #tpu.dot_dimension_numbers<[1], [0], [0], [1], [0, 0, 1, 1], [], []>} : vector<32x32xbf16>, vector<32x256xbf16>, vector<32x256xf32> -> vector<32x256xf32>
    %c2_294 = arith.constant 2 : index
    %c0_295 = arith.constant 0 : index
    %c0_296 = arith.constant 0 : index
    %610 = vector.load %arg20[%c2_294, %c0_295, %c0_296] : memref<5x32x1xf32, #tpu.memory_space<vmem>>, vector<1x32x1xf32>
    %611 = vector.shape_cast %610 : vector<1x32x1xf32> to vector<32x1xf32>
    %612 = vector.broadcast %611 : vector<32x1xf32> to vector<32x256xf32>
    %613 = arith.addf %609, %612 : vector<32x256xf32>
    %614 = arith.addf %613, %592 : vector<32x256xf32>
    %cst_297 = arith.constant 0.000000e+00 : f32
    %615 = vector.broadcast %cst_297 : f32 to vector<32x256xf32>
    %616 = arith.cmpf oge, %614, %615 : vector<32x256xf32>
    %cst_298 = arith.constant 0.00999999977 : f32
    %617 = vector.broadcast %cst_298 : f32 to vector<32x256xf32>
    %618 = arith.mulf %617, %614 : vector<32x256xf32>
    %619 = arith.select %616, %614, %618 : vector<32x256xi1>, vector<32x256xf32>
    %c3_299 = arith.constant 3 : index
    %c0_300 = arith.constant 0 : index
    %c0_301 = arith.constant 0 : index
    %620 = vector.load %arg19[%c3_299, %c0_300, %c0_301] : memref<5x32x32xbf16, #tpu.memory_space<vmem>>, vector<1x32x32xbf16>
    %621 = vector.shape_cast %620 : vector<1x32x32xbf16> to vector<32x32xbf16>
    %622 = arith.truncf %619 : vector<32x256xf32> to vector<32x256xbf16>
    %cst_302 = arith.constant dense<0.000000e+00> : vector<32x256xf32>
    %623 = tpu.matmul %621, %622, %cst_302 {dimension_numbers = #tpu.dot_dimension_numbers<[1], [0], [0], [1], [0, 0, 1, 1], [], []>} : vector<32x32xbf16>, vector<32x256xbf16>, vector<32x256xf32> -> vector<32x256xf32>
    %c3_303 = arith.constant 3 : index
    %c0_304 = arith.constant 0 : index
    %c0_305 = arith.constant 0 : index
    %624 = vector.load %arg20[%c3_303, %c0_304, %c0_305] : memref<5x32x1xf32, #tpu.memory_space<vmem>>, vector<1x32x1xf32>
    %625 = vector.shape_cast %624 : vector<1x32x1xf32> to vector<32x1xf32>
    %626 = vector.broadcast %625 : vector<32x1xf32> to vector<32x256xf32>
    %627 = arith.addf %623, %626 : vector<32x256xf32>
    %cst_306 = arith.constant 0.000000e+00 : f32
    %628 = vector.broadcast %cst_306 : f32 to vector<32x256xf32>
    %629 = arith.cmpf oge, %627, %628 : vector<32x256xf32>
    %cst_307 = arith.constant 0.00999999977 : f32
    %630 = vector.broadcast %cst_307 : f32 to vector<32x256xf32>
    %631 = arith.mulf %630, %627 : vector<32x256xf32>
    %632 = arith.select %629, %627, %631 : vector<32x256xi1>, vector<32x256xf32>
    %c4_308 = arith.constant 4 : index
    %c0_309 = arith.constant 0 : index
    %c0_310 = arith.constant 0 : index
    %633 = vector.load %arg19[%c4_308, %c0_309, %c0_310] : memref<5x32x32xbf16, #tpu.memory_space<vmem>>, vector<1x32x32xbf16>
    %634 = vector.shape_cast %633 : vector<1x32x32xbf16> to vector<32x32xbf16>
    %635 = arith.truncf %632 : vector<32x256xf32> to vector<32x256xbf16>
    %cst_311 = arith.constant dense<0.000000e+00> : vector<32x256xf32>
    %636 = tpu.matmul %634, %635, %cst_311 {dimension_numbers = #tpu.dot_dimension_numbers<[1], [0], [0], [1], [0, 0, 1, 1], [], []>} : vector<32x32xbf16>, vector<32x256xbf16>, vector<32x256xf32> -> vector<32x256xf32>
    %c4_312 = arith.constant 4 : index
    %c0_313 = arith.constant 0 : index
    %c0_314 = arith.constant 0 : index
    %637 = vector.load %arg20[%c4_312, %c0_313, %c0_314] : memref<5x32x1xf32, #tpu.memory_space<vmem>>, vector<1x32x1xf32>
    %638 = vector.shape_cast %637 : vector<1x32x1xf32> to vector<32x1xf32>
    %639 = vector.broadcast %638 : vector<32x1xf32> to vector<32x256xf32>
    %640 = arith.addf %636, %639 : vector<32x256xf32>
    %641 = arith.addf %640, %619 : vector<32x256xf32>
    %cst_315 = arith.constant 0.000000e+00 : f32
    %642 = vector.broadcast %cst_315 : f32 to vector<32x256xf32>
    %643 = arith.cmpf oge, %641, %642 : vector<32x256xf32>
    %cst_316 = arith.constant 0.00999999977 : f32
    %644 = vector.broadcast %cst_316 : f32 to vector<32x256xf32>
    %645 = arith.mulf %644, %641 : vector<32x256xf32>
    %646 = arith.select %643, %641, %645 : vector<32x256xi1>, vector<32x256xf32>
    %c0_317 = arith.constant 0 : index
    %c0_318 = arith.constant 0 : index
    %c0_319 = arith.constant 0 : index
    %647 = vector.load %arg21[%c0_317, %c0_318, %c0_319] : memref<5x64x32xbf16, #tpu.memory_space<vmem>>, vector<1x64x32xbf16>
    %648 = vector.shape_cast %647 : vector<1x64x32xbf16> to vector<64x32xbf16>
    %649 = arith.truncf %1 : vector<32x16xf32> to vector<32x16xbf16>
    %cst_320 = arith.constant dense<0.000000e+00> : vector<64x16xf32>
    %650 = tpu.matmul %648, %649, %cst_320 {dimension_numbers = #tpu.dot_dimension_numbers<[1], [0], [0], [1], [0, 0, 1, 1], [], []>} : vector<64x32xbf16>, vector<32x16xbf16>, vector<64x16xf32> -> vector<64x16xf32>
    %c0_321 = arith.constant 0 : index
    %c0_322 = arith.constant 0 : index
    %c0_323 = arith.constant 0 : index
    %651 = vector.load %arg22[%c0_321, %c0_322, %c0_323] : memref<6x64x1xf32, #tpu.memory_space<vmem>>, vector<1x64x1xf32>
    %652 = vector.shape_cast %651 : vector<1x64x1xf32> to vector<64x1xf32>
    %653 = vector.broadcast %652 : vector<64x1xf32> to vector<64x16xf32>
    %654 = arith.addf %650, %653 : vector<64x16xf32>
    %cst_324 = arith.constant 0.000000e+00 : f32
    %655 = vector.broadcast %cst_324 : f32 to vector<64x16xf32>
    %656 = arith.cmpf oge, %654, %655 : vector<64x16xf32>
    %cst_325 = arith.constant 0.00999999977 : f32
    %657 = vector.broadcast %cst_325 : f32 to vector<64x16xf32>
    %658 = arith.mulf %657, %654 : vector<64x16xf32>
    %659 = arith.select %656, %654, %658 : vector<64x16xi1>, vector<64x16xf32>
    %cst_326 = arith.constant dense<0xFF800000> : vector<64xf32>
    %660 = vector.multi_reduction <maximumf>, %659, %cst_326 [1] : vector<64x16xf32> to vector<64xf32>
    %661 = vector.shape_cast %660 : vector<64xf32> to vector<64x1xf32>
    %c0_327 = arith.constant 0 : index
    %c0_328 = arith.constant 0 : index
    %662 = vector.load %arg28[%c0_327, %c0_328] : memref<320x1xf32, #tpu.memory_space<vmem>>, vector<64x1xf32>
    tpu.vector_store %arg28[%c0_327, %c0_328], %661 {strides = array<i32>} : memref<320x1xf32, #tpu.memory_space<vmem>>, vector<64x1xf32>,
    %c1_329 = arith.constant 1 : index
    %c0_330 = arith.constant 0 : index
    %c0_331 = arith.constant 0 : index
    %663 = vector.load %arg21[%c1_329, %c0_330, %c0_331] : memref<5x64x32xbf16, #tpu.memory_space<vmem>>, vector<1x64x32xbf16>
    %664 = vector.shape_cast %663 : vector<1x64x32xbf16> to vector<64x32xbf16>
    %665 = arith.truncf %3 : vector<32x32xf32> to vector<32x32xbf16>
    %cst_332 = arith.constant dense<0.000000e+00> : vector<64x32xf32>
    %666 = tpu.matmul %664, %665, %cst_332 {dimension_numbers = #tpu.dot_dimension_numbers<[1], [0], [0], [1], [0, 0, 1, 1], [], []>} : vector<64x32xbf16>, vector<32x32xbf16>, vector<64x32xf32> -> vector<64x32xf32>
    %c1_333 = arith.constant 1 : index
    %c0_334 = arith.constant 0 : index
    %c0_335 = arith.constant 0 : index
    %667 = vector.load %arg22[%c1_333, %c0_334, %c0_335] : memref<6x64x1xf32, #tpu.memory_space<vmem>>, vector<1x64x1xf32>
    %668 = vector.shape_cast %667 : vector<1x64x1xf32> to vector<64x1xf32>
    %669 = vector.broadcast %668 : vector<64x1xf32> to vector<64x32xf32>
    %670 = arith.addf %666, %669 : vector<64x32xf32>
    %cst_336 = arith.constant 0.000000e+00 : f32
    %671 = vector.broadcast %cst_336 : f32 to vector<64x32xf32>
    %672 = arith.cmpf oge, %670, %671 : vector<64x32xf32>
    %cst_337 = arith.constant 0.00999999977 : f32
    %673 = vector.broadcast %cst_337 : f32 to vector<64x32xf32>
    %674 = arith.mulf %673, %670 : vector<64x32xf32>
    %675 = arith.select %672, %670, %674 : vector<64x32xi1>, vector<64x32xf32>
    %cst_338 = arith.constant dense<0xFF800000> : vector<64xf32>
    %676 = vector.multi_reduction <maximumf>, %675, %cst_338 [1] : vector<64x32xf32> to vector<64xf32>
    %677 = vector.shape_cast %676 : vector<64xf32> to vector<64x1xf32>
    %c64 = arith.constant 64 : index
    %c0_339 = arith.constant 0 : index
    %678 = vector.load %arg28[%c64, %c0_339] : memref<320x1xf32, #tpu.memory_space<vmem>>, vector<64x1xf32>
    tpu.vector_store %arg28[%c64, %c0_339], %677 {strides = array<i32>} : memref<320x1xf32, #tpu.memory_space<vmem>>, vector<64x1xf32>,
    %c2_340 = arith.constant 2 : index
    %c0_341 = arith.constant 0 : index
    %c0_342 = arith.constant 0 : index
    %679 = vector.load %arg21[%c2_340, %c0_341, %c0_342] : memref<5x64x32xbf16, #tpu.memory_space<vmem>>, vector<1x64x32xbf16>
    %680 = vector.shape_cast %679 : vector<1x64x32xbf16> to vector<64x32xbf16>
    %681 = arith.truncf %5 : vector<32x64xf32> to vector<32x64xbf16>
    %cst_343 = arith.constant dense<0.000000e+00> : vector<64x64xf32>
    %682 = tpu.matmul %680, %681, %cst_343 {dimension_numbers = #tpu.dot_dimension_numbers<[1], [0], [0], [1], [0, 0, 1, 1], [], []>} : vector<64x32xbf16>, vector<32x64xbf16>, vector<64x64xf32> -> vector<64x64xf32>
    %c2_344 = arith.constant 2 : index
    %c0_345 = arith.constant 0 : index
    %c0_346 = arith.constant 0 : index
    %683 = vector.load %arg22[%c2_344, %c0_345, %c0_346] : memref<6x64x1xf32, #tpu.memory_space<vmem>>, vector<1x64x1xf32>
    %684 = vector.shape_cast %683 : vector<1x64x1xf32> to vector<64x1xf32>
    %685 = vector.broadcast %684 : vector<64x1xf32> to vector<64x64xf32>
    %686 = arith.addf %682, %685 : vector<64x64xf32>
    %cst_347 = arith.constant 0.000000e+00 : f32
    %687 = vector.broadcast %cst_347 : f32 to vector<64x64xf32>
    %688 = arith.cmpf oge, %686, %687 : vector<64x64xf32>
    %cst_348 = arith.constant 0.00999999977 : f32
    %689 = vector.broadcast %cst_348 : f32 to vector<64x64xf32>
    %690 = arith.mulf %689, %686 : vector<64x64xf32>
    %691 = arith.select %688, %686, %690 : vector<64x64xi1>, vector<64x64xf32>
    %cst_349 = arith.constant dense<0xFF800000> : vector<64xf32>
    %692 = vector.multi_reduction <maximumf>, %691, %cst_349 [1] : vector<64x64xf32> to vector<64xf32>
    %693 = vector.shape_cast %692 : vector<64xf32> to vector<64x1xf32>
    %c128 = arith.constant 128 : index
    %c0_350 = arith.constant 0 : index
    %694 = vector.load %arg28[%c128, %c0_350] : memref<320x1xf32, #tpu.memory_space<vmem>>, vector<64x1xf32>
    tpu.vector_store %arg28[%c128, %c0_350], %693 {strides = array<i32>} : memref<320x1xf32, #tpu.memory_space<vmem>>, vector<64x1xf32>,
    %c3_351 = arith.constant 3 : index
    %c0_352 = arith.constant 0 : index
    %c0_353 = arith.constant 0 : index
    %695 = vector.load %arg21[%c3_351, %c0_352, %c0_353] : memref<5x64x32xbf16, #tpu.memory_space<vmem>>, vector<1x64x32xbf16>
    %696 = vector.shape_cast %695 : vector<1x64x32xbf16> to vector<64x32xbf16>
    %697 = arith.truncf %7 : vector<32x128xf32> to vector<32x128xbf16>
    %cst_354 = arith.constant dense<0.000000e+00> : vector<64x128xf32>
    %698 = tpu.matmul %696, %697, %cst_354 {dimension_numbers = #tpu.dot_dimension_numbers<[1], [0], [0], [1], [0, 0, 1, 1], [], []>} : vector<64x32xbf16>, vector<32x128xbf16>, vector<64x128xf32> -> vector<64x128xf32>
    %c3_355 = arith.constant 3 : index
    %c0_356 = arith.constant 0 : index
    %c0_357 = arith.constant 0 : index
    %699 = vector.load %arg22[%c3_355, %c0_356, %c0_357] : memref<6x64x1xf32, #tpu.memory_space<vmem>>, vector<1x64x1xf32>
    %700 = vector.shape_cast %699 : vector<1x64x1xf32> to vector<64x1xf32>
    %701 = vector.broadcast %700 : vector<64x1xf32> to vector<64x128xf32>
    %702 = arith.addf %698, %701 : vector<64x128xf32>
    %cst_358 = arith.constant 0.000000e+00 : f32
    %703 = vector.broadcast %cst_358 : f32 to vector<64x128xf32>
    %704 = arith.cmpf oge, %702, %703 : vector<64x128xf32>
    %cst_359 = arith.constant 0.00999999977 : f32
    %705 = vector.broadcast %cst_359 : f32 to vector<64x128xf32>
    %706 = arith.mulf %705, %702 : vector<64x128xf32>
    %707 = arith.select %704, %702, %706 : vector<64x128xi1>, vector<64x128xf32>
    %cst_360 = arith.constant dense<0xFF800000> : vector<64xf32>
    %708 = vector.multi_reduction <maximumf>, %707, %cst_360 [1] : vector<64x128xf32> to vector<64xf32>
    %709 = vector.shape_cast %708 : vector<64xf32> to vector<64x1xf32>
    %c192 = arith.constant 192 : index
    %c0_361 = arith.constant 0 : index
    %710 = vector.load %arg28[%c192, %c0_361] : memref<320x1xf32, #tpu.memory_space<vmem>>, vector<64x1xf32>
    tpu.vector_store %arg28[%c192, %c0_361], %709 {strides = array<i32>} : memref<320x1xf32, #tpu.memory_space<vmem>>, vector<64x1xf32>,
    %c4_362 = arith.constant 4 : index
    %c0_363 = arith.constant 0 : index
    %c0_364 = arith.constant 0 : index
    %711 = vector.load %arg21[%c4_362, %c0_363, %c0_364] : memref<5x64x32xbf16, #tpu.memory_space<vmem>>, vector<1x64x32xbf16>
    %712 = vector.shape_cast %711 : vector<1x64x32xbf16> to vector<64x32xbf16>
    %713 = arith.truncf %646 : vector<32x256xf32> to vector<32x256xbf16>
    %cst_365 = arith.constant dense<0.000000e+00> : vector<64x256xf32>
    %714 = tpu.matmul %712, %713, %cst_365 {dimension_numbers = #tpu.dot_dimension_numbers<[1], [0], [0], [1], [0, 0, 1, 1], [], []>} : vector<64x32xbf16>, vector<32x256xbf16>, vector<64x256xf32> -> vector<64x256xf32>
    %c4_366 = arith.constant 4 : index
    %c0_367 = arith.constant 0 : index
    %c0_368 = arith.constant 0 : index
    %715 = vector.load %arg22[%c4_366, %c0_367, %c0_368] : memref<6x64x1xf32, #tpu.memory_space<vmem>>, vector<1x64x1xf32>
    %716 = vector.shape_cast %715 : vector<1x64x1xf32> to vector<64x1xf32>
    %717 = vector.broadcast %716 : vector<64x1xf32> to vector<64x256xf32>
    %718 = arith.addf %714, %717 : vector<64x256xf32>
    %cst_369 = arith.constant 0.000000e+00 : f32
    %719 = vector.broadcast %cst_369 : f32 to vector<64x256xf32>
    %720 = arith.cmpf oge, %718, %719 : vector<64x256xf32>
    %cst_370 = arith.constant 0.00999999977 : f32
    %721 = vector.broadcast %cst_370 : f32 to vector<64x256xf32>
    %722 = arith.mulf %721, %718 : vector<64x256xf32>
    %723 = arith.select %720, %718, %722 : vector<64x256xi1>, vector<64x256xf32>
    %cst_371 = arith.constant dense<0xFF800000> : vector<64xf32>
    %724 = vector.multi_reduction <maximumf>, %723, %cst_371 [1] : vector<64x256xf32> to vector<64xf32>
    %725 = vector.shape_cast %724 : vector<64xf32> to vector<64x1xf32>
    %c256 = arith.constant 256 : index
    %c0_372 = arith.constant 0 : index
    %726 = vector.load %arg28[%c256, %c0_372] : memref<320x1xf32, #tpu.memory_space<vmem>>, vector<64x1xf32>
    tpu.vector_store %arg28[%c256, %c0_372], %725 {strides = array<i32>} : memref<320x1xf32, #tpu.memory_space<vmem>>, vector<64x1xf32>,
    %c0_373 = arith.constant 0 : index
    %c0_374 = arith.constant 0 : index
    %727 = vector.load %arg23[%c0_373, %c0_374] : memref<64x320xbf16, #tpu.memory_space<vmem>>, vector<64x320xbf16>
    %c0_375 = arith.constant 0 : index
    %c0_376 = arith.constant 0 : index
    %728 = vector.load %arg28[%c0_375, %c0_376] : memref<320x1xf32, #tpu.memory_space<vmem>>, vector<320x1xf32>
    %729 = arith.truncf %728 : vector<320x1xf32> to vector<320x1xbf16>
    %cst_377 = arith.constant dense<0.000000e+00> : vector<64x1xf32>
    %730 = tpu.matmul %727, %729, %cst_377 {dimension_numbers = #tpu.dot_dimension_numbers<[1], [0], [0], [1], [0, 0, 1, 1], [], []>} : vector<64x320xbf16>, vector<320x1xbf16>, vector<64x1xf32> -> vector<64x1xf32>
    %c5_378 = arith.constant 5 : index
    %c0_379 = arith.constant 0 : index
    %c0_380 = arith.constant 0 : index
    %731 = vector.load %arg22[%c5_378, %c0_379, %c0_380] : memref<6x64x1xf32, #tpu.memory_space<vmem>>, vector<1x64x1xf32>
    %732 = vector.shape_cast %731 : vector<1x64x1xf32> to vector<64x1xf32>
    %733 = arith.addf %730, %732 : vector<64x1xf32>
    %cst_381 = arith.constant 0.000000e+00 : f32
    %734 = vector.broadcast %cst_381 : f32 to vector<64x1xf32>
    %735 = arith.cmpf oge, %733, %734 : vector<64x1xf32>
    %cst_382 = arith.constant 0.00999999977 : f32
    %736 = vector.broadcast %cst_382 : f32 to vector<64x1xf32>
    %737 = arith.mulf %736, %733 : vector<64x1xf32>
    %738 = arith.select %735, %733, %737 : vector<64x1xi1>, vector<64x1xf32>
    %c0_383 = arith.constant 0 : index
    %c0_384 = arith.constant 0 : index
    %739 = vector.load %arg24[%c0_383, %c0_384] : memref<8x32xbf16, #tpu.memory_space<vmem>>, vector<8x32xbf16>
    %740 = arith.truncf %646 : vector<32x256xf32> to vector<32x256xbf16>
    %cst_385 = arith.constant dense<0.000000e+00> : vector<8x256xf32>
    %741 = tpu.matmul %739, %740, %cst_385 {dimension_numbers = #tpu.dot_dimension_numbers<[1], [0], [0], [1], [0, 0, 1, 1], [], []>} : vector<8x32xbf16>, vector<32x256xbf16>, vector<8x256xf32> -> vector<8x256xf32>
    %c0_386 = arith.constant 0 : index
    %c0_387 = arith.constant 0 : index
    %742 = vector.load %arg25[%c0_386, %c0_387] : memref<8x64xbf16, #tpu.memory_space<vmem>>, vector<8x64xbf16>
    %743 = arith.truncf %738 : vector<64x1xf32> to vector<64x1xbf16>
    %cst_388 = arith.constant dense<0.000000e+00> : vector<8x1xf32>
    %744 = tpu.matmul %742, %743, %cst_388 {dimension_numbers = #tpu.dot_dimension_numbers<[1], [0], [0], [1], [0, 0, 1, 1], [], []>} : vector<8x64xbf16>, vector<64x1xbf16>, vector<8x1xf32> -> vector<8x1xf32>
    %745 = vector.broadcast %744 : vector<8x1xf32> to vector<8x256xf32>
    %746 = arith.addf %741, %745 : vector<8x256xf32>
    %c0_389 = arith.constant 0 : index
    %c0_390 = arith.constant 0 : index
    %747 = vector.load %arg26[%c0_389, %c0_390] : memref<8x1xf32, #tpu.memory_space<vmem>>, vector<8x1xf32>
    %748 = vector.broadcast %747 : vector<8x1xf32> to vector<8x256xf32>
    %749 = arith.addf %746, %748 : vector<8x256xf32>
    %cst_391 = arith.constant dense<0xFF800000> : vector<256xf32>
    %750 = vector.multi_reduction <maximumf>, %749, %cst_391 [0] : vector<8x256xf32> to vector<256xf32>
    %751 = vector.shape_cast %750 : vector<256xf32> to vector<1x256xf32>
    %752 = vector.broadcast %751 : vector<1x256xf32> to vector<8x256xf32>
    %753 = arith.subf %749, %752 : vector<8x256xf32>
    %754 = math.exp %753 : vector<8x256xf32>
    %cst_392 = arith.constant dense<0.000000e+00> : vector<256xf32>
    %755 = vector.multi_reduction <add>, %754, %cst_392 [0] : vector<8x256xf32> to vector<256xf32>
    %756 = vector.shape_cast %755 : vector<256xf32> to vector<1x256xf32>
    %757 = math.log %756 : vector<1x256xf32>
    %758 = vector.broadcast %757 : vector<1x256xf32> to vector<8x256xf32>
    %759 = arith.subf %753, %758 : vector<8x256xf32>
    %c0_393 = arith.constant 0 : index
    %c0_394 = arith.constant 0 : index
    %c0_395 = arith.constant 0 : index
    %760 = vector.load %arg27[%c0_393, %c0_394, %c0_395] : memref<1x8x256xf32, #tpu.memory_space<vmem>>, vector<1x8x256xf32>
    %761 = vector.shape_cast %760 : vector<1x8x256xf32> to vector<8x256xf32>
    %762 = vector.shape_cast %759 : vector<8x256xf32> to vector<1x8x256xf32>
    tpu.vector_store %arg27[%c0_393, %c0_394, %c0_395], %762 {strides = array<i32>} : memref<1x8x256xf32, #tpu.memory_space<vmem>>, vector<1x8x256xf32>,
    return
  }
  func.func @transform_0(%arg0: i32) -> (i32, i32, i32) {
    %c0_i32 = arith.constant 0 : i32
    %c0_i32_0 = arith.constant 0 : i32
    %c0_i32_1 = arith.constant 0 : i32
    return %arg0, %c0_i32, %c0_i32_0 : i32, i32, i32
  }
  func.func @transform_1(%arg0: i32) -> (i32, i32, i32) {
    %c0_i32 = arith.constant 0 : i32
    %c0_i32_0 = arith.constant 0 : i32
    %c0_i32_1 = arith.constant 0 : i32
    return %arg0, %c0_i32, %c0_i32_0 : i32, i32, i32
  }
  func.func @transform_2(%arg0: i32) -> (i32, i32, i32) {
    %c0_i32 = arith.constant 0 : i32
    %c0_i32_0 = arith.constant 0 : i32
    %c0_i32_1 = arith.constant 0 : i32
    return %arg0, %c0_i32, %c0_i32_0 : i32, i32, i32
  }
  func.func @transform_3(%arg0: i32) -> (i32, i32, i32) {
    %c0_i32 = arith.constant 0 : i32
    %c0_i32_0 = arith.constant 0 : i32
    %c0_i32_1 = arith.constant 0 : i32
    return %arg0, %c0_i32, %c0_i32_0 : i32, i32, i32
  }
  func.func @transform_4(%arg0: i32) -> (i32, i32, i32) {
    %c0_i32 = arith.constant 0 : i32
    %c0_i32_0 = arith.constant 0 : i32
    %c0_i32_1 = arith.constant 0 : i32
    return %arg0, %c0_i32, %c0_i32_0 : i32, i32, i32
  }
  func.func @transform_5(%arg0: i32) -> (i32, i32, i32) {
    %c0_i32 = arith.constant 0 : i32
    %c0_i32_0 = arith.constant 0 : i32
    %c0_i32_1 = arith.constant 0 : i32
    return %arg0, %c0_i32, %c0_i32_0 : i32, i32, i32
  }
  func.func @transform_6(%arg0: i32) -> (i32, i32, i32) {
    %c0_i32 = arith.constant 0 : i32
    %c0_i32_0 = arith.constant 0 : i32
    %c0_i32_1 = arith.constant 0 : i32
    return %arg0, %c0_i32, %c0_i32_0 : i32, i32, i32
  }
  func.func @transform_7(%arg0: i32) -> (i32, i32, i32) {
    %c0_i32 = arith.constant 0 : i32
    %c0_i32_0 = arith.constant 0 : i32
    %c0_i32_1 = arith.constant 0 : i32
    return %arg0, %c0_i32, %c0_i32_0 : i32, i32, i32
  }
  func.func @transform_8(%arg0: i32) -> (i32, i32, i32) {
    %c0_i32 = arith.constant 0 : i32
    %c0_i32_0 = arith.constant 0 : i32
    %c0_i32_1 = arith.constant 0 : i32
    return %arg0, %c0_i32, %c0_i32_0 : i32, i32, i32
  }
  func.func @transform_9(%arg0: i32) -> (i32, i32, i32) {
    %c0_i32 = arith.constant 0 : i32
    %c0_i32_0 = arith.constant 0 : i32
    %c0_i32_1 = arith.constant 0 : i32
    return %arg0, %c0_i32, %c0_i32_0 : i32, i32, i32
  }
  func.func @transform_10(%arg0: i32) -> (i32, i32, i32) {
    %c0_i32 = arith.constant 0 : i32
    %c0_i32_0 = arith.constant 0 : i32
    %c0_i32_1 = arith.constant 0 : i32
    return %arg0, %c0_i32, %c0_i32_0 : i32, i32, i32
  }
  func.func @transform_11(%arg0: i32) -> (i32, i32, i32) {
    %c0_i32 = arith.constant 0 : i32
    %c0_i32_0 = arith.constant 0 : i32
    %c0_i32_1 = arith.constant 0 : i32
    return %arg0, %c0_i32, %c0_i32_0 : i32, i32, i32
  }
  func.func @transform_12(%arg0: i32) -> (i32, i32, i32) {
    %c0_i32 = arith.constant 0 : i32
    %c0_i32_0 = arith.constant 0 : i32
    %c0_i32_1 = arith.constant 0 : i32
    %c0_i32_2 = arith.constant 0 : i32
    return %c0_i32, %c0_i32_0, %c0_i32_1 : i32, i32, i32
  }
  func.func @transform_13(%arg0: i32) -> (i32, i32, i32) {
    %c0_i32 = arith.constant 0 : i32
    %c0_i32_0 = arith.constant 0 : i32
    %c0_i32_1 = arith.constant 0 : i32
    %c0_i32_2 = arith.constant 0 : i32
    return %c0_i32, %c0_i32_0, %c0_i32_1 : i32, i32, i32
  }
  func.func @transform_14(%arg0: i32) -> (i32, i32, i32) {
    %c0_i32 = arith.constant 0 : i32
    %c0_i32_0 = arith.constant 0 : i32
    %c0_i32_1 = arith.constant 0 : i32
    %c0_i32_2 = arith.constant 0 : i32
    return %c0_i32, %c0_i32_0, %c0_i32_1 : i32, i32, i32
  }
  func.func @transform_15(%arg0: i32) -> (i32, i32, i32) {
    %c0_i32 = arith.constant 0 : i32
    %c0_i32_0 = arith.constant 0 : i32
    %c0_i32_1 = arith.constant 0 : i32
    %c0_i32_2 = arith.constant 0 : i32
    return %c0_i32, %c0_i32_0, %c0_i32_1 : i32, i32, i32
  }
  func.func @transform_16(%arg0: i32) -> (i32, i32, i32) {
    %c0_i32 = arith.constant 0 : i32
    %c0_i32_0 = arith.constant 0 : i32
    %c0_i32_1 = arith.constant 0 : i32
    %c0_i32_2 = arith.constant 0 : i32
    return %c0_i32, %c0_i32_0, %c0_i32_1 : i32, i32, i32
  }
  func.func @transform_17(%arg0: i32) -> (i32, i32, i32) {
    %c0_i32 = arith.constant 0 : i32
    %c0_i32_0 = arith.constant 0 : i32
    %c0_i32_1 = arith.constant 0 : i32
    %c0_i32_2 = arith.constant 0 : i32
    return %c0_i32, %c0_i32_0, %c0_i32_1 : i32, i32, i32
  }
  func.func @transform_18(%arg0: i32) -> (i32, i32, i32) {
    %c0_i32 = arith.constant 0 : i32
    %c0_i32_0 = arith.constant 0 : i32
    %c0_i32_1 = arith.constant 0 : i32
    %c0_i32_2 = arith.constant 0 : i32
    return %c0_i32, %c0_i32_0, %c0_i32_1 : i32, i32, i32
  }
  func.func @transform_19(%arg0: i32) -> (i32, i32, i32) {
    %c0_i32 = arith.constant 0 : i32
    %c0_i32_0 = arith.constant 0 : i32
    %c0_i32_1 = arith.constant 0 : i32
    %c0_i32_2 = arith.constant 0 : i32
    return %c0_i32, %c0_i32_0, %c0_i32_1 : i32, i32, i32
  }
  func.func @transform_20(%arg0: i32) -> (i32, i32, i32) {
    %c0_i32 = arith.constant 0 : i32
    %c0_i32_0 = arith.constant 0 : i32
    %c0_i32_1 = arith.constant 0 : i32
    %c0_i32_2 = arith.constant 0 : i32
    return %c0_i32, %c0_i32_0, %c0_i32_1 : i32, i32, i32
  }
  func.func @transform_21(%arg0: i32) -> (i32, i32, i32) {
    %c0_i32 = arith.constant 0 : i32
    %c0_i32_0 = arith.constant 0 : i32
    %c0_i32_1 = arith.constant 0 : i32
    %c0_i32_2 = arith.constant 0 : i32
    return %c0_i32, %c0_i32_0, %c0_i32_1 : i32, i32, i32
  }
  func.func @transform_22(%arg0: i32) -> (i32, i32) {
    %c0_i32 = arith.constant 0 : i32
    %c0_i32_0 = arith.constant 0 : i32
    %c0_i32_1 = arith.constant 0 : i32
    return %c0_i32, %c0_i32_0 : i32, i32
  }
  func.func @transform_23(%arg0: i32) -> (i32, i32) {
    %c0_i32 = arith.constant 0 : i32
    %c0_i32_0 = arith.constant 0 : i32
    %c0_i32_1 = arith.constant 0 : i32
    return %c0_i32, %c0_i32_0 : i32, i32
  }
  func.func @transform_24(%arg0: i32) -> (i32, i32) {
    %c0_i32 = arith.constant 0 : i32
    %c0_i32_0 = arith.constant 0 : i32
    %c0_i32_1 = arith.constant 0 : i32
    return %c0_i32, %c0_i32_0 : i32, i32
  }
  func.func @transform_25(%arg0: i32) -> (i32, i32) {
    %c0_i32 = arith.constant 0 : i32
    %c0_i32_0 = arith.constant 0 : i32
    %c0_i32_1 = arith.constant 0 : i32
    return %c0_i32, %c0_i32_0 : i32, i32
  }
  func.func @transform_26(%arg0: i32) -> (i32, i32, i32) {
    %c0_i32 = arith.constant 0 : i32
    %c0_i32_0 = arith.constant 0 : i32
    %c0_i32_1 = arith.constant 0 : i32
    return %arg0, %c0_i32, %c0_i32_0 : i32, i32, i32
  }
}

</mosaic_0001>

<bundles_post_ra>
// kernel: semantic_forward.1
= control target key start
LH: loop header
LB: loop body
LE: loop exit
PB: predicated region body
PF: predicated region fallthrough
CT: control target
= control target key end

     0   :  { %s13226_s0 = inlined_call_operand.vmem [shape: f32[2,16,3], index: 0, kind: input, shape index: {}]   ;;  %s13227_s1 = inlined_call_operand.vmem [shape: f32[2,32,3], index: 1, kind: input, shape index: {}]   ;;  %s13228_s2 = inlined_call_operand.vmem [shape: f32[2,64,3], index: 2, kind: input, shape index: {}]   ;;  %s13229_s3 = inlined_call_operand.vmem [shape: f32[2,128,3], index: 3, kind: input, shape index: {}]   ;;  %s13230_s4 = inlined_call_operand.vmem [shape: f32[2,3,32], index: 4, kind: input, shape index: {}]   ;;  %s13231_s5 = inlined_call_operand.vmem [shape: f32[2,3,64], index: 5, kind: input, shape index: {}]   ;;  %s13232_s6 = inlined_call_operand.vmem [shape: f32[2,3,128], index: 6, kind: input, shape index: {}]   ;;  %s13233_s7 = inlined_call_operand.vmem [shape: f32[2,3,256], index: 7, kind: input, shape index: {}]   ;;  %s13234_s8 = inlined_call_operand.vmem [shape: f32[2,32,16], index: 8, kind: input, shape index: {}]   ;;  %s13235_s9 = inlined_call_operand.vmem [shape: f32[2,32,32], index: 9, kind: input, shape index: {}]   ;;  %s13236_s10 = inlined_call_operand.vmem [shape: f32[2,32,64], index: 10, kind: input, shape index: {}]   ;;  %s13237_s11 = inlined_call_operand.vmem [shape: f32[2,32,128], index: 11, kind: input, shape index: {}]   ;;  %s13238_s12 = inlined_call_operand.vmem [shape: bf16[6,32,32], index: 12, kind: input, shape index: {}]   ;;  %s13239_s13 = inlined_call_operand.vmem [shape: f32[5,32,1], index: 13, kind: input, shape index: {}]   ;;  %s13240_s14 = inlined_call_operand.vmem [shape: bf16[6,32,32], index: 14, kind: input, shape index: {}]   ;;  %s13241_s15 = inlined_call_operand.vmem [shape: f32[5,32,1], index: 15, kind: input, shape index: {}]   ;;  %s13242_s16 = inlined_call_operand.vmem [shape: bf16[6,32,32], index: 16, kind: input, shape index: {}]   ;;  %s13243_s17 = inlined_call_operand.vmem [shape: f32[5,32,1], index: 17, kind: input, shape index: {}]   ;;  %s13244_s18 = inlined_call_operand.vmem [shape: bf16[5,32,32], index: 18, kind: input, shape index: {}]   ;;  %s13245_s19 = inlined_call_operand.vmem [shape: f32[5,32,1], index: 19, kind: input, shape index: {}]   ;;  %s13246_s20 = inlined_call_operand.vmem [shape: bf16[5,64,32], index: 20, kind: input, shape index: {}]   ;;  %s13247_s21 = inlined_call_operand.vmem [shape: f32[6,64,1], index: 21, kind: input, shape index: {}]   ;;  %s13248_s22 = inlined_call_operand.vmem [shape: bf16[64,320], index: 22, kind: input, shape index: {}]   ;;  %s13249_s23 = inlined_call_operand.vmem [shape: bf16[8,32], index: 23, kind: input, shape index: {}]   ;;  %s13250_s24 = inlined_call_operand.vmem [shape: bf16[8,64], index: 24, kind: input, shape index: {}]   ;;  %s13251_s25 = inlined_call_operand.vmem [shape: f32[8,1], index: 25, kind: input, shape index: {}]   ;;  %s13252_s26 = inlined_call_operand.hbm [shape: f32[2,8,256], index: 26, kind: output, shape index: {}]  }
   0x1   :  { %13384 = sst [smem:[#allocation75_spill]] %s13226_s0 }
   0x2   :  { %13385 = sst [smem:[#allocation76_spill]] %s13227_s1 }
   0x3   :  { %13386 = sst [smem:[#allocation77_spill]] %s13228_s2 }
   0x4   :  { %13387 = sst [smem:[#allocation78_spill]] %s13229_s3 }
   0x5   :  { %13388 = sst [smem:[#allocation79_spill]] %s13230_s4 }
   0x6   :  { %13389 = sst [smem:[#allocation80_spill]] %s13231_s5 }
   0x7   :  { %13390 = sst [smem:[#allocation81_spill]] %s13232_s6 }
   0x8   :  { %13391 = sst [smem:[#allocation82_spill]] %s13233_s7 }
   0x9   :  { %13392 = sst [smem:[#allocation83_spill]] %s13234_s8 }
   0xa   :  { %13393 = sst [smem:[#allocation84_spill]] %s13235_s9 }
   0xb   :  { %13394 = sst [smem:[#allocation85_spill]] %s13236_s10 }
   0xc   :  { %13395 = sst [smem:[#allocation86_spill]] %s13239_s13 }
   0xd   :  { %13396 = sst [smem:[#allocation87_spill]] %s13241_s15 }
   0xe   :  { %13397 = sst [smem:[#allocation88_spill]] %s13252_s26 }
   0xf   :  { %31 = vsyncpa [#allocation4], 0 }
  0x10   :  { %33 = vsyncpa [#allocation4 + $0x1], 0  ;;  %s9271_s27 = smov 0   ;;  %s9273_s3 = smov 0  }
  0x11   :  { %s9275_s7 = smov 0   ;;  %s9277_s28 = smov 0  }
  0x12 LB: > { %13398 = sst [smem:[#allocation6_spill]] %s9118_s27  ;;  %s9292_s8 = sadd.s32 4294967295, %s9130_s28   ;;  %s9130_s28 = sphi %s9277_s28, %s13748_s28   ;;  %s9126_s7 = sphi %s9275_s7, %s13750_s7   ;;  %s9122_s3 = sphi %s9273_s3, %s13752_s3   ;;  %s9118_s27 = sphi %s9271_s27, %s13751_s27  }
  0x13   : > { %13399 = sst [smem:[#allocation7_spill]] %s9126_s7  ;;  %s7957_s4 = sadd.s32 4294967294, %s9130_s28  }
  0x14   : > { %13400 = sst [smem:[#allocation8_spill]] %s9130_s28  ;;  %s9296_s29 = sadd.s32 1, %s9130_s28  }
  0x15   : > { %13401 = sst [smem:[#allocation9_spill]] %s9296_s29  ;;  %s652_s0 = sadd.s32 1, %s9126_s7 }
  0x16   : > { %s649_s9 = ssub.s32 %s9130_s28, %s9296_s29  ;;  %p662_p0 = scmp.ne.s32.totalorder %s9126_s7, %s9122_s3 }
  0x17   : > { %p650_p1 = scmp.eq.s32.totalorder %s649_s9, 0  ;;  %p663_p2 = scmp.eq.s32.totalorder %s9292_s8, 1 }
  0x18   : > { %p668_p3 = scmp.ne.s32.totalorder %s9122_s3, %s9118_s27  ;;  %p669_p4 = scmp.eq.s32.totalorder %s7957_s4, 1 }
  0x19   : > { %s9307_s30 = scalar_select %p650_p1, %s9126_s7, %s652_s0  }
  0x1a   : > { %p9309_p5 = por %p663_p2, %p662_p0  ;;  %p9313_p6 = por %p669_p4, %p668_p3 }
  0x1b   : > { %13402 = sst [smem:[#allocation10_spill]] %s9307_s30  ;;  %p7960_p7 = scmp.ge.s32.totalorder %s9130_s28, 1 }
  0x1c   : > { %s13403_s2 = scalar_select %p9309_p5, 1, 0 }
  0x1d   : > { %s13405_s5 = scalar_select %p9313_p6, 1, 0 }
  0x1e   : > { %13404 = sst [smem:[#allocation11_spill]] %s13403_s2  ;;  %p822_p8 = scmp.lt.s32.totalorder %s9130_s28, 3 }
  0x1f   : > { %13406 = sst [smem:[#allocation12_spill]] %s13405_s5 }
  0x20   : > { %p823_p9 = pnand %p7960_p7, %p822_p8 }
  0x22   : > { %826 = sbr.rel (%p823_p9) target bundleno = 7124 (0x1bd4), region = 124 }
  0x29   : > { %p944_p10 = scmp.lt.s32.totalorder %s9292_s8, 1  ;;  %s13407_s13 = sld [smem:[#allocation86_spill]]  ;;  %vm1028_vm0 = vcmask 1042432   ;;  %v13262_v1 = vmov 0   ;;  %vm1021_vm1 = vcmask 23552   ;;  %vm1116_vm2 = vcmask 256000  }
  0x2a   : > { %8907 = vset.pattern.permute.xlu1 %v13262_v1  ;;  %8908 = vset.pattern.permute.xlu0 %v13262_v1  ;;  %s13408_s30 = sld [smem:[#allocation79_spill]]  ;;  %s13409_s28 = sld [smem:[#allocation75_spill]]  ;;  %vm13272_vm3 = vcmask 130048   ;;  %vm13286_vm4 = vcmask 261120  }
  0x2b   : > { %s9329_s0 = scalar_select %p944_p10, %s9292_s8, 1 }
  0x2c   : > { %s13410_s10 = sld [smem:[#allocation76_spill]]  ;;  %s13411_s15 = sld [smem:[#allocation87_spill]] }
  0x2d   : > { %s9332_s9 = sshll.u32 %s9329_s0, 2  ;;  %s8391_s1 = sshll.u32 %s9329_s0, 4 }
  0x2e   : > { %s9395_s29 = sshll.u32 %s9329_s0, 5  ;;  %s8393_s5 = sshll.u32 %s9329_s0, 6 }
  0x2f   : > { %v1452_v0 = vld [vmem:[%s13407_s13] sm:$0xff]  ;;  %v1453_v2 = vld [vmem:[%s13407_s13 + $0x8] sm:$0xff]  ;;  %v1455_v3 = vld [vmem:[%s13407_s13 + $0x18] sm:$0xff]  ;;  %s13414_s4 = sld [smem:[#allocation77_spill]] }
  0x30   : > { %1458 = vperm.xlu1 %8907, %v1452_v0   ;;  %s967_s7 = scalar_lea.vmem %s13408_s30, %s9332_s9  ;;  %s948_s26 = scalar_lea.vmem %s13409_s28, %s8391_s1  ;;  %v8004_v11 = vld [vmem:[%s13407_s13 + $0x20] sm:$0xff]  ;;  %v8005_v12 = vld [vmem:[%s13407_s13 + $0x28] sm:$0xff]  ;;  %v8006_v13 = vld [vmem:[%s13407_s13 + $0x30] sm:$0xff] }
  0x31   : > { %v9341_v4 = vld [vmem:[%s967_s7] sm:$0x7]  ;;  %v1019_v6 = vld [vmem:[%s948_s26 + $0x8] sm:$0xff]  ;;  %v8007_v14 = vld [vmem:[%s13407_s13 + $0x38] sm:$0xff]  ;;  %s13412_s1 = sld [smem:[#allocation83_spill]]  ;;  %s8394_s7 = sshll.u32 %s9329_s0, 7 }
  0x32   : > { %8580 = vmatprep.subr.msk.mxu1 %vm1028_vm0, %v9341_v4  ;;  %v1018_v5 = vld [vmem:[%s948_s26] sm:$0xff]  ;;  %v1108_v8 = vmul.f32 %v1019_v6, %v1019_v6  ;;  %v8017_v16 = vld [vmem:[%s13407_s13 + $0x48] sm:$0xff]  ;;  %v8018_v17 = vld [vmem:[%s13407_s13 + $0x50] sm:$0xff]  ;;  %s9401_s6 = scalar_lea.vmem %s13410_s10, %s9395_s29  ;;  %v1115_v38 = vmul.f32 %v9341_v4, %v9341_v4  ;;  %s13416_s30 = sld [smem:[#allocation78_spill]] }
  0x33   : > { %8581 = vmatpush3.msk.msra.mxu1 %vm1028_vm0, %v9341_v4  ;;  %8582 = vmatprep.mubr.msk.f32.mxu1 %vm1021_vm1, %v1018_v5  ;;  %v1107_v7 = vmul.f32 %v1018_v5, %v1018_v5  ;;  %v8016_v15 = vld [vmem:[%s13407_s13 + $0x40] sm:$0xff]  ;;  %v8019_v18 = vld [vmem:[%s13407_s13 + $0x58] sm:$0xff]  ;;  %v8029_v20 = vld [vmem:[%s13407_s13 + $0x68] sm:$0xff] }
  0x34   : > { %1463 = vperm.xlu1 %8907, %v1453_v2   ;;  %8583 = vmatmul.mubr.msk.f32.vlgmr.msra.gmra.mrb[0].mxu1 %vm1021_vm1, %v1019_v6  ;;  %v1112_v10 = vsel %vm1021_vm1, %v1108_v8, 0.0  ;;  %v8028_v19 = vld [vmem:[%s13407_s13 + $0x60] sm:$0xff]  ;;  %v8031_v21 = vld [vmem:[%s13407_s13 + $0x78] sm:$0xff]  ;;  %v1454_v22 = vld [vmem:[%s13407_s13 + $0x10] sm:$0xff]  ;;  %v1117_v40 = vsel %vm1116_vm2, %v1115_v38, 0.0 }
  0x35   : > { %v1109_v9 = vsel %vm1021_vm1, %v1107_v7, 0.0  ;;  %v8030_v23 = vld [vmem:[%s13407_s13 + $0x70] sm:$0xff]  ;;  %v1937_v24 = vld [vmem:[%s9401_s6 + $0x8] sm:$0xff]  ;;  %v1936_v27 = vld [vmem:[%s9401_s6] sm:$0xff]  ;;  %v1118_v42 = vrot.slane %v1117_v40, 4  ;;  %s9500_s27 = scalar_lea.vmem %s13414_s4, %s8393_s5  ;;  %s1000_s4 = scalar_lea.vmem %s13237_s11, %s9395_s29 }
  0x36   : > { %1110 = vadd.xlane.f32.xlu0 %v1109_v9  ;;  %v2042_v25 = vmul.f32 %v1937_v24, %v1937_v24  ;;  %v1938_v28 = vld [vmem:[%s9401_s6 + $0x10] sm:$0xff]  ;;  %v2041_v29 = vmul.f32 %v1936_v27, %v1936_v27  ;;  %v1939_v31 = vld [vmem:[%s9401_s6 + $0x18] sm:$0xff]  ;;  %v8040_v36 = vld [vmem:[%s13407_s13 + $0x80] sm:$0xff] }
  0x37   : > { %v2043_v30 = vmul.f32 %v1938_v28, %v1938_v28  ;;  %v2044_v34 = vmul.f32 %v1939_v31, %v1939_v31  ;;  %v8042_v37 = vld [vmem:[%s13407_s13 + $0x90] sm:$0xff]  ;;  %v8043_v39 = vld [vmem:[%s13407_s13 + $0x98] sm:$0xff]  ;;  %v2466_v41 = vld [vmem:[%s13411_s15 + $0x8] sm:$0xff]  ;;  %v1119_v45 = vadd.f32 %v1118_v42, %v1117_v40  ;;  %s9441_s2 = scalar_lea.vmem %s13412_s1, %s9395_s29 }
  0x38   : > { %1473 = vperm.xlu1 %8907, %v1455_v3   ;;  %v2048_v26 = vsel %vm1021_vm1, %v2042_v25, 0.0  ;;  %v2045_v32 = vsel %vm1021_vm1, %v2041_v29, 0.0  ;;  %v2468_v43 = vld [vmem:[%s13411_s15 + $0x18] sm:$0xff]  ;;  %v8041_v44 = vld [vmem:[%s13407_s13 + $0x88] sm:$0xff]  ;;  %v2465_v47 = vld [vmem:[%s13411_s15] sm:$0xff]  ;;  %s9633_s5 = scalar_lea.vmem %s13416_s30, %s8394_s7  ;;  %s13420_s13 = sld [smem:[#allocation84_spill]] }
  0x39   : > { %v2051_v33 = vsel %vm1021_vm1, %v2043_v30, 0.0  ;;  %v2054_v35 = vsel %vm1021_vm1, %v2044_v34, 0.0  ;;  %v8072_v46 = vld [vmem:[%s13411_s15 + $0x28] sm:$0xff]  ;;  %v1120_v48 = vrot.slane %v1119_v45, 2  ;;  %v1002_v49 = vld [vmem:[%s9441_s2] sm:$0xff]  ;;  %v8074_v51 = vld [vmem:[%s13411_s15 + $0x38] sm:$0xff] }
  0x3a   : > { %1113 = vadd.xlane.f32.xlu0 %v1112_v10  ;;  %v1003_v50 = vld [vmem:[%s9441_s2 + $0x8] sm:$0xff]  ;;  %v2467_v53 = vld [vmem:[%s13411_s15 + $0x10] sm:$0xff]  ;;  %v8071_v57 = vld [vmem:[%s13411_s15 + $0x20] sm:$0xff]  ;;  %s13427_s7 = sld [smem:[#allocation81_spill]] }
  0x3b   : > { %v9448_v52 = vpack.c.bf16 %v1003_v50, %v1002_v49  ;;  %v1121_v54 = vadd.f32 %v1120_v48, %v1119_v45  ;;  %v8084_v56 = vld [vmem:[%s13411_s15 + $0x48] sm:$0xff]  ;;  %v8086_v59 = vld [vmem:[%s13411_s15 + $0x58] sm:$0xff]  ;;  %v8073_v60 = vld [vmem:[%s13411_s15 + $0x30] sm:$0xff] }
  0x3c   : > { %1506 = vperm.xlu1 %8907, %v8004_v11   ;;  %v8096_v63 = vld [vmem:[%s13411_s15 + $0x68] sm:$0xff]  ;;  %v8083_v2 = vld [vmem:[%s13411_s15 + $0x40] sm:$0xff]  ;;  %v8098_v8 = vld [vmem:[%s13411_s15 + $0x78] sm:$0xff] }
  0x3d   : > { %13413 = vst [vmem:[#allocation13_spill] sm:$0xff] %v9448_v52  ;;  %8587 = vmatprep.mubr.msk.bf16.mxu1 %vm13272_vm3, %v9448_v52  ;;  %v1122_v58 = vrot.slane %v1121_v54, 1  ;;  %v8085_v10 = vld [vmem:[%s13411_s15 + $0x50] sm:$0xff]  ;;  %v2953_v40 = vld [vmem:[%s9500_s27 + $0x20] sm:$0xff] }
  0x3e   : > { %s990_s28 = scalar_lea.vmem %s13420_s13, %s9395_s29  ;;  %s13423_s13 = sld [smem:[#allocation80_spill]] }
  0x3f   : > { %v1123_v62 = vadd.f32 %v1122_v58, %v1121_v54 }
  0x40   : > { %1511 = vperm.xlu1 %8907, %v8005_v12  }
  0x44   : > { %1516 = vperm.xlu1 %8907, %v8006_v13  }
  0x48   : > { %1521 = vperm.xlu1 %8907, %v8007_v14  }
  0x4c   : > { %1615 = vperm.xlu1 %8907, %v8016_v15   ;;  %v8095_v15 = vld [vmem:[%s13411_s15 + $0x60] sm:$0xff] }
  0x50   : > { %1620 = vperm.xlu1 %8907, %v8017_v16   ;;  %1468 = vperm.xlu0 %8908, %v1454_v22  }
  0x54   : > { %1625 = vperm.xlu1 %8907, %v8018_v17   ;;  %1738 = vperm.xlu0 %8908, %v8030_v23  }
  0x58   : > { %1630 = vperm.xlu1 %8907, %v8019_v18  }
  0x5c   : > { %1728 = vperm.xlu1 %8907, %v8028_v19   ;;  %v8097_v19 = vld [vmem:[%s13411_s15 + $0x70] sm:$0xff] }
  0x60   : > { %1733 = vperm.xlu1 %8907, %v8029_v20   ;;  %v1132_v20 = vlaneseq }
  0x62   : > { %v9487_v23 = vshrl.u32 %v1132_v20, 7 }
  0x64   : > { %1743 = vperm.xlu1 %8907, %v8031_v21  }
  0x73   : > { %2046 = vadd.xlane.f32.xlu0 %v2045_v32 }
  0x77   : > { %2052 = vadd.xlane.f32.xlu0 %v2051_v33 }
  0x7b   : > { %2055 = vadd.xlane.f32.xlu0 %v2054_v35 }
  0x88   : > { %2049 = vadd.xlane.f32.xlu1 %v2048_v26  ;;  %v9490_v26 = vadd.s32 8, %v9487_v23 }
  0x91   : > { %1842 = vperm.xlu0 %8908, %v8041_v44   ;;  %v2951_v44 = vld [vmem:[%s9500_s27 + $0x10] sm:$0xff] }
  0x95   : > { %2471 = vperm.xlu0 %8908, %v2465_v47  }
  0x99   : > { %1837 = vperm.xlu1 %8907, %v8040_v36   ;;  %2481 = vperm.xlu0 %8908, %v2467_v53   ;;  %v2950_v36 = vld [vmem:[%s9500_s27 + $0x8] sm:$0xff] }
  0x9a   : > { %v3091_v38 = vmul.f32 %v2950_v36, %v2950_v36 }
  0x9c   : > { %v3101_v45 = vsel %vm1021_vm1, %v3091_v38, 0.0 }
  0x9d   : > { %1847 = vperm.xlu1 %8907, %v8042_v37   ;;  %2519 = vperm.xlu0 %8908, %v8071_v57  }
  0xa1   : > { %1852 = vperm.xlu1 %8907, %v8043_v39   ;;  %2529 = vperm.xlu0 %8908, %v8073_v60  }
  0xa5   : > { %2476 = vperm.xlu1 %8907, %v2466_v41   ;;  %2628 = vperm.xlu0 %8908, %v8083_v2   ;;  %v2949_v41 = vld [vmem:[%s9500_s27] sm:$0xff] }
  0xa6   : > { %v3090_v47 = vmul.f32 %v2949_v41, %v2949_v41 }
  0xa8   : > { %v3098_v60 = vsel %vm1021_vm1, %v3090_v47, 0.0  ;;  %v8108_v47 = vld [vmem:[%s13411_s15 + $0x88] sm:$0xff] }
  0xa9   : > { %2486 = vperm.xlu1 %8907, %v2468_v43   ;;  %2638 = vperm.xlu0 %8908, %v8085_v10   ;;  %v2955_v43 = vld [vmem:[%s9500_s27 + $0x30] sm:$0xff]  ;;  %v2956_v10 = vld [vmem:[%s9500_s27 + $0x38] sm:$0xff] }
  0xaa   : > { %v3096_v50 = vmul.f32 %v2955_v43, %v2955_v43 }
  0xad   : > { %2524 = vperm.xlu1 %8907, %v8072_v46   ;;  %2741 = vperm.xlu0 %8908, %v8095_v15   ;;  %v3094_v46 = vmul.f32 %v2953_v40, %v2953_v40 }
  0xb1   : > { %2534 = vperm.xlu1 %8907, %v8074_v51   ;;  %2751 = vperm.xlu0 %8908, %v8097_v19   ;;  %v3092_v51 = vmul.f32 %v2951_v44, %v2951_v44 }
  0xb3   : > { %v3104_v2 = vsel %vm1021_vm1, %v3092_v51, 0.0  ;;  %v3628_v51 = vld [vmem:[%s13243_s17] sm:$0xff] }
  0xb5   : > { %2633 = vperm.xlu1 %8907, %v8084_v56  }
  0xb9   : > { %2643 = vperm.xlu1 %8907, %v8086_v59   ;;  %v3110_v59 = vsel %vm1021_vm1, %v3094_v46, 0.0  ;;  %v3631_v46 = vld [vmem:[%s13243_s17 + $0x18] sm:$0xff] }
  0xbd   : > { %2746 = vperm.xlu1 %8907, %v8096_v63  }
  0xc1   : > { %2756 = vperm.xlu1 %8907, %v8098_v8  }
  0xc3   : > { %v1111_v55 = vpop.xlane.xlu0 %1110 }
  0xc4   : > { %v1124_v6 = vadd.f32 %v1123_v62, %v1111_v55 }
  0xc7   : > { %v1114_v61 = vpop.xlane.xlu0 %1113 }
  0xc8   : > { %v1125_v0 = vadd.f32 %v1123_v62, %v1114_v61  ;;  %v2952_v62 = vld [vmem:[%s9500_s27 + $0x18] sm:$0xff] }
  0xd0   : > { %3099 = vadd.xlane.f32.xlu0 %v3098_v60 }
  0xd4   : > { %3105 = vadd.xlane.f32.xlu0 %v3104_v2 }
  0xe5   : > { %3102 = vadd.xlane.f32.xlu1 %v3101_v45 }
  0xe9   : > { %3111 = vadd.xlane.f32.xlu1 %v3110_v59  ;;  %v8155_v59 = vld [vmem:[%s13243_s17 + $0x48] sm:$0xff] }
 0x107   : > { %v8584_v3 = vpop.f32.mrb[0].mxu1 }
 0x108   : > { %v1127_v4 = vmul.f32 2.0, %v8584_v3  ;;  %v1098_v5 = vpop.f32.mrb[1].mxu1  ;;  %v3093_v3 = vmul.f32 %v2952_v62, %v2952_v62  ;;  %v8142_v62 = vld [vmem:[%s13243_s17 + $0x20] sm:$0xff] }
 0x109   : > { %v1126_v7 = vmul.f32 2.0, %v1098_v5  ;;  %v2954_v5 = vld [vmem:[%s9500_s27 + $0x28] sm:$0xff] }
 0x10a   : > { %v1129_v9 = vsub.f32 %v1125_v0, %v1127_v4  ;;  %v3116_v0 = vsel %vm1021_vm1, %v3096_v50, 0.0  ;;  %v3095_v8 = vmul.f32 %v2954_v5, %v2954_v5  ;;  %v8143_v50 = vld [vmem:[%s13243_s17 + $0x28] sm:$0xff]  ;;  %v8144_v5 = vld [vmem:[%s13243_s17 + $0x30] sm:$0xff] }
 0x10b   : > { %v1128_v11 = vsub.f32 %v1124_v6, %v1126_v7  ;;  %3117 = vadd.xlane.f32.xlu1 %v3116_v0  ;;  %v3107_v7 = vsel %vm1021_vm1, %v3093_v3, 0.0  ;;  %v8157_v3 = vld [vmem:[%s13243_s17 + $0x58] sm:$0xff] }
 0x10c   : > { %v1131_v12 = vmax.f32 %v1129_v9, 0.0  ;;  %3108 = vadd.xlane.f32.xlu0 %v3107_v7  ;;  %v8167_v7 = vld [vmem:[%s13243_s17 + $0x68] sm:$0xff] }
 0x10d   : > { %v1130_v13 = vmax.f32 %v1128_v11, 0.0 }
 0x10e   : > { %v1137_v14 = vsel %vm13286_vm4, %v1131_v12, inf }
 0x10f   : > { %v1136_v16 = vsel %vm13286_vm4, %v1130_v13, inf }
 0x110   : > { %v1138_v17 = vmin.f32 %v1136_v16, %v1137_v14 }
 0x112   : > { %v1139_v18 = vrot.slane %v1138_v17, 4 }
 0x114   : > { %v1140_v21 = vmin.f32 %v1138_v17, %v1139_v18 }
 0x116   : > { %v1141_v22 = vrot.slane %v1140_v21, 2 }
 0x118   : > { %v1142_v24 = vmin.f32 %v1140_v21, %v1141_v22 }
 0x11a   : > { %v1143_v25 = vrot.slane %v1142_v24, 1 }
 0x11c   : > { %v1144_v27 = vmin.f32 %v1142_v24, %v1143_v25  ;;  %v8107_v24 = vld [vmem:[%s13411_s15 + $0x80] sm:$0xff] }
 0x11d   : > { %2850 = vperm.xlu1 %8907, %v8107_v24   ;;  %v1005_v24 = vld [vmem:[%s9441_s2 + $0x18] sm:$0xff] }
 0x11e   : > { %vm1145_vm5 = vcmp.eq.f32.partialorder %v1130_v13, %v1144_v27  ;;  %vm1146_vm6 = vcmp.eq.f32.partialorder %v1131_v12, %v1144_v27  ;;  %v1164_v32 = vadd.f32 1e-08, %v1144_v27 }
 0x11f   : > { %v1147_v28 = vsel %vm1145_vm5, %v9487_v23, 16  ;;  %v1148_v29 = vsel %vm1146_vm6, %v9490_v26, 16 }
 0x120   : > { %v1149_v30 = vsel %vm13286_vm4, %v1147_v28, 2147483647  ;;  %v1150_v31 = vsel %vm13286_vm4, %v1148_v29, 2147483647  ;;  %8992 = vrcp.f32 %v1164_v32  ;;  %v8109_v28 = vld [vmem:[%s13411_s15 + $0x90] sm:$0xff] }
 0x121   : > { %vm1151_vm7 = vcmp.lt.s32.totalorder %v1149_v30, %v1150_v31  ;;  %2860 = vperm.xlu1 %8907, %v8109_v28  }
 0x122   : > { %v1152_v33 = vsel %vm1151_vm7, %v1149_v30, %v1150_v31 }
 0x123   : > { %v1153_v34 = vrot.slane %v1152_v33, 4 }
 0x125   : > { %vm1154_vm8 = vcmp.lt.s32.totalorder %v1152_v33, %v1153_v34 }
 0x126   : > { %v1155_v35 = vsel %vm1154_vm8, %v1152_v33, %v1153_v34  ;;  %v8110_v33 = vld [vmem:[%s13411_s15 + $0x98] sm:$0xff] }
 0x127   : > { %v1156_v37 = vrot.slane %v1155_v35, 2  ;;  %2865 = vperm.xlu1 %8907, %v8110_v33   ;;  %v4112_v33 = vld [vmem:[%s9633_s5] sm:$0xff] }
 0x129   : > { %vm1157_vm9 = vcmp.lt.s32.totalorder %v1155_v35, %v1156_v37 }
 0x12a   : > { %v1158_v39 = vsel %vm1157_vm9, %v1155_v35, %v1156_v37  ;;  %v8993_v49 = vpop.eup %8992  ;;  %v3629_v35 = vld [vmem:[%s13243_s17 + $0x8] sm:$0xff] }
 0x12b   : > { %v1159_v42 = vrot.slane %v1158_v39, 1  ;;  %3639 = vperm.xlu1 %8907, %v3629_v35  }
 0x12d   : > { %vm1160_vm10 = vcmp.lt.s32.totalorder %v1158_v39, %v1159_v42 }
 0x12e   : > { %v1161_v48 = vsel %vm1160_vm10, %v1158_v39, %v1159_v42 }
 0x12f   : > { %vm1162_vm11 = vcmp.eq.s32.totalorder %v9487_v23, %v1161_v48  ;;  %vm1163_vm12 = vcmp.eq.s32.totalorder %v9490_v26, %v1161_v48  ;;  %3649 = vperm.xlu1 %8907, %v3631_v46   ;;  %v4115_v46 = vld [vmem:[%s9633_s5 + $0x18] sm:$0xff] }
 0x130   : > { %v9510_v53 = vsel %vm1162_vm11, 1e+30, %v1130_v13  ;;  %v9512_v54 = vsel %vm1163_vm12, 1e+30, %v1131_v12  ;;  %v9514_v55 = vsel %vm1162_vm11, %v8993_v49, 0.0  ;;  %v9516_v56 = vsel %vm1163_vm12, %v8993_v49, 0.0 }
 0x131   : > { %v1173_v57 = vsel %vm13286_vm4, %v9510_v53, inf  ;;  %v1174_v58 = vsel %vm13286_vm4, %v9512_v54, inf  ;;  %v3113_v12 = vsel %vm1021_vm1, %v3095_v8, 0.0  ;;  %v3097_v13 = vmul.f32 %v2956_v10, %v2956_v10 }
 0x132   : > { %v1175_v61 = vmin.f32 %v1173_v57, %v1174_v58  ;;  %3114 = vadd.xlane.f32.xlu0 %v3113_v12  ;;  %v8169_v12 = vld [vmem:[%s13243_s17 + $0x78] sm:$0xff] }
 0x133   : > { %v3119_v18 = vsel %vm1021_vm1, %v3097_v13, 0.0  ;;  %3687 = vperm.xlu1 %8907, %v8143_v50   ;;  %v4347_v50 = vmul.f32 %v4115_v46, %v4115_v46  ;;  %v8225_v46 = vld [vmem:[%s13245_s19 + $0x48] sm:$0xff] }
 0x134   : > { %v1176_v63 = vrot.slane %v1175_v61, 4 }
 0x136   : > { %v1177_v4 = vmin.f32 %v1175_v61, %v1176_v63  ;;  %3120 = vadd.xlane.f32.xlu0 %v3119_v18 }
 0x138   : > { %v1178_v6 = vrot.slane %v1177_v4, 2 }
 0x13a   : > { %v1179_v9 = vmin.f32 %v1177_v4, %v1178_v6 }
 0x13c   : > { %v1180_v11 = vrot.slane %v1179_v9, 1 }
 0x13e   : > { %v1181_v14 = vmin.f32 %v1179_v9, %v1180_v11  ;;  %v8154_v9 = vld [vmem:[%s13243_s17 + $0x40] sm:$0xff] }
 0x140   : > { %vm1182_vm13 = vcmp.eq.f32.partialorder %v9510_v53, %v1181_v14  ;;  %vm1183_vm14 = vcmp.eq.f32.partialorder %v9512_v54, %v1181_v14  ;;  %v1201_v15 = vadd.f32 1e-08, %v1181_v14  ;;  %v8156_v14 = vld [vmem:[%s13243_s17 + $0x50] sm:$0xff] }
 0x141   : > { %v1184_v16 = vsel %vm1182_vm13, %v9487_v23, 16  ;;  %v1185_v17 = vsel %vm1183_vm14, %v9490_v26, 16 }
 0x142   : > { %v1186_v19 = vsel %vm13286_vm4, %v1184_v16, 2147483647  ;;  %v1187_v20 = vsel %vm13286_vm4, %v1185_v17, 2147483647  ;;  %8994 = vrcp.f32 %v1201_v15  ;;  %v8166_v17 = vld [vmem:[%s13243_s17 + $0x60] sm:$0xff] }
 0x143   : > { %vm1188_vm15 = vcmp.lt.s32.totalorder %v1186_v19, %v1187_v20 }
 0x144   : > { %v1189_v21 = vsel %vm1188_vm15, %v1186_v19, %v1187_v20 }
 0x145   : > { %v1190_v22 = vrot.slane %v1189_v21, 4 }
 0x147   : > { %vm1191_vm2 = vcmp.lt.s32.totalorder %v1189_v21, %v1190_v22 }
 0x148   : > { %v1192_v25 = vsel %vm1191_vm2, %v1189_v21, %v1190_v22  ;;  %v1004_v22 = vld [vmem:[%s9441_s2 + $0x10] sm:$0xff]  ;;  %s8400_s2 = sshll.u32 %s9292_s8, 8  ;;  %s9135_s8 = smov [#allocation3]  }
 0x149   : > { %v1193_v27 = vrot.slane %v1192_v25, 2  ;;  %v9625_v28 = vpack.c.bf16 %v1005_v24, %v1004_v22 }
 0x14b   : > { %vm1194_vm5 = vcmp.lt.s32.totalorder %v1192_v25, %v1193_v27  ;;  %13415 = vst [vmem:[#allocation14_spill] sm:$0xff] %v9625_v28 }
 0x14c   : > { %v8995_v29 = vpop.eup %8994  ;;  %v1195_v30 = vsel %vm1194_vm5, %v1192_v25, %v1193_v27  ;;  %2855 = vperm.xlu0 %8908, %v8108_v47   ;;  %v8168_v27 = vld [vmem:[%s13243_s17 + $0x70] sm:$0xff] }
 0x14d   : > { %v1196_v31 = vrot.slane %v1195_v30, 1  ;;  %v9544_v32 = vadd.f32 %v8995_v29, %v8993_v49 }
 0x14f   : > { %vm1197_vm6 = vcmp.lt.s32.totalorder %v1195_v30, %v1196_v31 }
 0x150   : > { %v1198_v34 = vsel %vm1197_vm6, %v1195_v30, %v1196_v31  ;;  %3634 = vperm.xlu0 %8908, %v3628_v51   ;;  %v4113_v30 = vld [vmem:[%s9633_s5 + $0x8] sm:$0xff]  ;;  %v4122_v51 = vld [vmem:[%s9633_s5 + $0x50] sm:$0xff] }
 0x151   : > { %vm1199_vm7 = vcmp.eq.s32.totalorder %v9487_v23, %v1198_v34  ;;  %vm1200_vm8 = vcmp.eq.s32.totalorder %v9490_v26, %v1198_v34  ;;  %v4345_v31 = vmul.f32 %v4113_v30, %v4113_v30  ;;  %v8180_v30 = vld [vmem:[%s13243_s17 + $0x90] sm:$0xff] }
 0x152   : > { %v1208_v36 = vsel %vm1199_vm7, 1e+30, %v9510_v53  ;;  %v1204_v37 = vsel %vm1199_vm7, %v8995_v29, 0.0  ;;  %v1205_v38 = vsel %vm1200_vm8, %v8995_v29, 0.0  ;;  %v1209_v39 = vsel %vm1200_vm8, 1e+30, %v9512_v54  ;;  %v9635_v29 = vpop.permute.xlu1 %1458 }
 0x153   : > { %v1210_v40 = vsel %vm13286_vm4, %v1208_v36, inf  ;;  %v9558_v41 = vadd.f32 %v1204_v37, %v9514_v55  ;;  %v9561_v42 = vadd.f32 %v1205_v38, %v9516_v56  ;;  %v1211_v43 = vsel %vm13286_vm4, %v1209_v39, inf  ;;  %v8145_v55 = vld [vmem:[%s13243_s17 + $0x38] sm:$0xff]  ;;  %v3630_v56 = vld [vmem:[%s13243_s17 + $0x10] sm:$0xff] }
 0x154   : > { %v1212_v44 = vmin.f32 %v1210_v40, %v1211_v43  ;;  %3697 = vperm.xlu1 %8907, %v8145_v55   ;;  %3644 = vperm.xlu0 %8908, %v3630_v56   ;;  %v4363_v35 = vsel %vm1021_vm1, %v4345_v31, 0.0  ;;  %v4344_v37 = vmul.f32 %v4112_v33, %v4112_v33  ;;  %v4118_v38 = vld [vmem:[%s9633_s5 + $0x30] sm:$0xff]  ;;  %v4369_v56 = vsel %vm1021_vm1, %v4347_v50, 0.0  ;;  %v8227_v50 = vld [vmem:[%s13245_s19 + $0x58] sm:$0xff] }
 0x156   : > { %v1213_v45 = vrot.slane %v1212_v44, 4  ;;  %v9640_v34 = vpop.permute.xlu1 %1463 }
 0x158   : > { %v1214_v48 = vmin.f32 %v1212_v44, %v1213_v45  ;;  %3796 = vperm.xlu1 %8907, %v8155_v59   ;;  %3682 = vperm.xlu0 %8908, %v8142_v62   ;;  %v4120_v45 = vld [vmem:[%s9633_s5 + $0x40] sm:$0xff] }
 0x159   : > { %v4124_v59 = vld [vmem:[%s9633_s5 + $0x60] sm:$0xff] }
 0x15a   : > { %v1215_v49 = vrot.slane %v1214_v48, 2  ;;  %v9647_v44 = vpop.permute.xlu1 %1473 }
 0x15c   : > { %v1216_v53 = vmin.f32 %v1214_v48, %v1215_v49  ;;  %3806 = vperm.xlu1 %8907, %v8157_v3   ;;  %3692 = vperm.xlu0 %8908, %v8144_v5   ;;  %v4352_v49 = vmul.f32 %v4120_v45, %v4120_v45  ;;  %v4126_v3 = vld [vmem:[%s9633_s5 + $0x70] sm:$0xff] }
 0x15e   : > { %v1217_v54 = vrot.slane %v1216_v53, 1  ;;  %v4384_v55 = vsel %vm1021_vm1, %v4352_v49, 0.0  ;;  %v8909_v49 = vld [vmem:[%s13238_s12 + $0x10] sm:$0xff]  }
 0x15f   : > { %8595 = vmatprep.mubr.msk.bf16.mxu0 %vm13286_vm4, %v8909_v49 }
 0x160   : > { %v1218_v57 = vmin.f32 %v1216_v53, %v1217_v54  ;;  %3909 = vperm.xlu1 %8907, %v8167_v7   ;;  %3791 = vperm.xlu0 %8908, %v8154_v9   ;;  %v4117_v53 = vld [vmem:[%s9633_s5 + $0x28] sm:$0xff]  ;;  %v9655_v54 = vpop.permute.xlu1 %1506  ;;  %v4358_v7 = vmul.f32 %v4126_v3, %v4126_v3  ;;  %v4123_v9 = vld [vmem:[%s9633_s5 + $0x58] sm:$0xff] }
 0x161   : > { %v8251_v3 = vld [vmem:[%s13245_s19 + $0x98] sm:$0xff] }
 0x162   : > { %vm1219_vm9 = vcmp.eq.f32.partialorder %v1208_v36, %v1218_v57  ;;  %vm1220_vm10 = vcmp.eq.f32.partialorder %v1209_v39, %v1218_v57  ;;  %v1238_v58 = vadd.f32 1e-08, %v1218_v57  ;;  %v4114_v39 = vld [vmem:[%s9633_s5 + $0x10] sm:$0xff]  ;;  %v4354_v57 = vmul.f32 %v4122_v51, %v4122_v51 }
 0x163   : > { %v1221_v60 = vsel %vm1219_vm9, %v9487_v23, 16  ;;  %v1222_v61 = vsel %vm1220_vm10, %v9490_v26, 16  ;;  %v4346_v43 = vmul.f32 %v4114_v39, %v4114_v39  ;;  %v8213_v39 = vld [vmem:[%s13245_s19 + $0x28] sm:$0xff]  ;;  %v8214_v51 = vld [vmem:[%s13245_s19 + $0x30] sm:$0xff] }
 0x164   : > { %v1223_v63 = vsel %vm13286_vm4, %v1221_v60, 2147483647  ;;  %v1224_v0 = vsel %vm13286_vm4, %v1222_v61, 2147483647  ;;  %8996 = vrcp.f32 %v1238_v58  ;;  %3919 = vperm.xlu1 %8907, %v8169_v12   ;;  %3801 = vperm.xlu0 %8908, %v8156_v14   ;;  %v4349_v58 = vmul.f32 %v4117_v53, %v4117_v53  ;;  %v4119_v60 = vld [vmem:[%s9633_s5 + $0x38] sm:$0xff]  ;;  %v4125_v14 = vld [vmem:[%s9633_s5 + $0x68] sm:$0xff] }
 0x165   : > { %vm1225_vm11 = vcmp.lt.s32.totalorder %v1223_v63, %v1224_v0  ;;  %v4366_v48 = vsel %vm1021_vm1, %v4346_v43, 0.0  ;;  %v4390_v61 = vsel %vm1021_vm1, %v4354_v57, 0.0  ;;  %v5575_v43 = vld [vmem:[%s13245_s19 + $0x10] sm:$0xff] }
 0x166   : > { %v1226_v2 = vsel %vm1225_vm11, %v1223_v63, %v1224_v0  ;;  %v4375_v62 = vsel %vm1021_vm1, %v4349_v58, 0.0  ;;  %v4356_v63 = vmul.f32 %v4124_v59, %v4124_v59  ;;  %v4351_v0 = vmul.f32 %v4119_v60, %v4119_v60  ;;  %v8239_v58 = vld [vmem:[%s13245_s19 + $0x78] sm:$0xff]  ;;  %v8226_v60 = vld [vmem:[%s13245_s19 + $0x50] sm:$0xff] }
 0x167   : > { %v1227_v4 = vrot.slane %v1226_v2, 4 }
 0x168   : > { %3904 = vperm.xlu0 %8908, %v8166_v17   ;;  %v4396_v5 = vsel %vm1021_vm1, %v4356_v63, 0.0  ;;  %v4357_v17 = vmul.f32 %v4125_v14, %v4125_v14  ;;  %v8236_v63 = vld [vmem:[%s13245_s19 + $0x60] sm:$0xff]  ;;  %v8299_v14 = vld [vmem:[%s13247_s21 + $0x98] sm:$0xff] }
 0x169   : > { %vm1228_vm12 = vcmp.lt.s32.totalorder %v1226_v2, %v1227_v4 }
 0x16a   : > { %v1229_v6 = vsel %vm1228_vm12, %v1226_v2, %v1227_v4  ;;  %v9663_v2 = vpop.permute.xlu1 %1511  ;;  %v4121_v4 = vld [vmem:[%s9633_s5 + $0x48] sm:$0xff] }
 0x16b   : > { %v1230_v8 = vrot.slane %v1229_v6, 2 }
 0x16c   : > { %3914 = vperm.xlu0 %8908, %v8168_v27   ;;  %v8178_v27 = vld [vmem:[%s13243_s17 + $0x80] sm:$0xff] }
 0x16d   : > { %vm1231_vm13 = vcmp.lt.s32.totalorder %v1229_v6, %v1230_v8 }
 0x16e   : > { %v8997_v10 = vpop.eup %8996  ;;  %v1232_v11 = vsel %vm1231_vm13, %v1229_v6, %v1230_v8  ;;  %v4381_v6 = vsel %vm1021_vm1, %v4351_v0, 0.0  ;;  %v4353_v8 = vmul.f32 %v4121_v4, %v4121_v4  ;;  %v8238_v4 = vld [vmem:[%s13245_s19 + $0x70] sm:$0xff] }
 0x16f   : > { %v1233_v13 = vrot.slane %v1232_v11, 1  ;;  %v9611_v15 = vadd.f32 %v8997_v10, %v9544_v32  ;;  %v4116_v32 = vld [vmem:[%s9633_s5 + $0x20] sm:$0xff] }
 0x170   : > { %v4348_v36 = vmul.f32 %v4116_v32, %v4116_v32  ;;  %v4387_v12 = vsel %vm1021_vm1, %v4353_v8, 0.0  ;;  %v8181_v32 = vld [vmem:[%s13243_s17 + $0x98] sm:$0xff]  ;;  %v8248_v8 = vld [vmem:[%s13245_s19 + $0x80] sm:$0xff] }
 0x171   : > { %vm1234_vm14 = vcmp.lt.s32.totalorder %v1232_v11, %v1233_v13  ;;  %8998 = vrcp.f32 %v9611_v15  ;;  %v1007_v15 = vld [vmem:[%s990_s28 + $0x8] sm:$0xff] }
 0x172   : > { %v1235_v16 = vsel %vm1234_vm14, %v1232_v11, %v1233_v13  ;;  %v4372_v40 = vsel %vm1021_vm1, %v4348_v36, 0.0  ;;  %v4402_v11 = vsel %vm1021_vm1, %v4358_v7, 0.0  ;;  %v4355_v13 = vmul.f32 %v4123_v9, %v4123_v9  ;;  %v5576_v36 = vld [vmem:[%s13245_s19 + $0x18] sm:$0xff] }
 0x173   : > { %vm1236_vm15 = vcmp.eq.s32.totalorder %v9487_v23, %v1235_v16  ;;  %vm1237_vm2 = vcmp.eq.s32.totalorder %v9490_v26, %v1235_v16 }
 0x174   : > { %v1241_v18 = vsel %vm1236_vm15, %v8997_v10, 0.0  ;;  %v1242_v19 = vsel %vm1237_vm2, %v8997_v10, 0.0  ;;  %v9670_v10 = vpop.permute.xlu1 %1516  ;;  %v4393_v16 = vsel %vm1021_vm1, %v4355_v13, 0.0 }
 0x175   : > { %v1243_v20 = vadd.f32 %v1241_v18, %v9558_v41  ;;  %v1244_v21 = vadd.f32 %v1242_v19, %v9561_v42  ;;  %v4360_v41 = vsel %vm1021_vm1, %v4344_v37, 0.0  ;;  %v4350_v42 = vmul.f32 %v4118_v38, %v4118_v38  ;;  %v4127_v19 = vld [vmem:[%s9633_s5 + $0x78] sm:$0xff]  ;;  %v8179_v37 = vld [vmem:[%s13243_s17 + $0x88] sm:$0xff] }
 0x177   : > { %v1247_v25 = vpack.c.bf16 %v1244_v21, %v1243_v20  ;;  %v4378_v47 = vsel %vm1021_vm1, %v4350_v42, 0.0  ;;  %v4399_v20 = vsel %vm1021_vm1, %v4357_v17, 0.0  ;;  %v4359_v21 = vmul.f32 %v4127_v19, %v4127_v19  ;;  %v8215_v42 = vld [vmem:[%s13245_s19 + $0x38] sm:$0xff] }
 0x178   : > { %v9676_v18 = vpop.permute.xlu1 %1521  ;;  %v6225_v19 = vld [vmem:[%s13247_s21 + $0x18] sm:$0xff] }
 0x179   : > { %8585 = vmatprep.subr.bf16.mxu1 %v1247_v25  ;;  %v4405_v24 = vsel %vm1021_vm1, %v4359_v21, 0.0  ;;  %v6222_v21 = vld [vmem:[%s13247_s21] sm:$0xff] }
 0x17a   : > { %8586 = vmatpush3.bf16.msra.mxu1 %v1247_v25 }
 0x17c   : > { %v9680_v22 = vpop.permute.xlu1 %1615 }
 0x17d   : > { %8588 = vmatmul.mubr.msk.bf16.vlgmr.msra.gmra.mrb[4].mxu1 %vm13272_vm3, %v9625_v28 }
 0x180   : > { %v9683_v25 = vpop.permute.xlu1 %1620 }
 0x184   : > { %v9691_v31 = vpop.permute.xlu1 %1625 }
 0x188   : > { %4364 = vadd.xlane.f32.xlu1 %v4363_v35  ;;  %v9696_v33 = vpop.permute.xlu1 %1630  ;;  %v5574_v35 = vld [vmem:[%s13245_s19 + $0x8] sm:$0xff] }
 0x18b   : > { %4361 = vadd.xlane.f32.xlu0 %v4360_v41 }
 0x18c   : > { %4373 = vadd.xlane.f32.xlu1 %v4372_v40  ;;  %v9707_v38 = vpop.permute.xlu1 %1728  ;;  %v5573_v40 = vld [vmem:[%s13245_s19] sm:$0xff] }
 0x18f   : > { %4367 = vadd.xlane.f32.xlu0 %v4366_v48  ;;  %v9731_v48 = vpop.permute.xlu0 %1468 }
 0x190   : > { %4379 = vadd.xlane.f32.xlu1 %v4378_v47  ;;  %v9715_v41 = vpop.permute.xlu1 %1733  ;;  %v8212_v47 = vld [vmem:[%s13245_s19 + $0x20] sm:$0xff] }
 0x193   : > { %4370 = vadd.xlane.f32.xlu0 %v4369_v56  ;;  %v8224_v56 = vld [vmem:[%s13245_s19 + $0x40] sm:$0xff]  ;;  %v9751_v57 = vpop.permute.xlu0 %1738 }
 0x194   : > { %4385 = vadd.xlane.f32.xlu1 %v4384_v55  ;;  %v9723_v45 = vpop.permute.xlu1 %1743  ;;  %v8237_v55 = vld [vmem:[%s13245_s19 + $0x68] sm:$0xff] }
 0x197   : > { %4376 = vadd.xlane.f32.xlu0 %v4375_v62  ;;  %v8249_v62 = vld [vmem:[%s13245_s19 + $0x88] sm:$0xff] }
 0x198   : > { %4391 = vadd.xlane.f32.xlu1 %v4390_v61  ;;  %v9742_v53 = vpop.xlane.xlu1 %2049  ;;  %v9761_v61 = vpop.xlane.xlu0 %2046 }
 0x19b   : > { %4382 = vadd.xlane.f32.xlu0 %v4381_v6  ;;  %v8297_v6 = vld [vmem:[%s13247_s21 + $0x88] sm:$0xff] }
 0x19c   : > { %4397 = vadd.xlane.f32.xlu1 %v4396_v5  ;;  %v9756_v59 = vpop.permute.xlu1 %1837  ;;  %v9777_v5 = vpop.xlane.xlu0 %2052 }
 0x19f   : > { %4388 = vadd.xlane.f32.xlu0 %v4387_v12  ;;  %v8250_v12 = vld [vmem:[%s13245_s19 + $0x90] sm:$0xff] }
 0x1a0   : > { %4403 = vadd.xlane.f32.xlu1 %v4402_v11  ;;  %v9769_v0 = vpop.permute.xlu1 %1847  ;;  %v9787_v9 = vpop.xlane.xlu0 %2055  ;;  %v6223_v11 = vld [vmem:[%s13247_s21 + $0x8] sm:$0xff] }
 0x1a3   : > { %4394 = vadd.xlane.f32.xlu0 %v4393_v16  ;;  %v8296_v16 = vld [vmem:[%s13247_s21 + $0x80] sm:$0xff] }
 0x1a4   : > { %v9782_v7 = vpop.permute.xlu1 %1852  ;;  %v9803_v17 = vpop.permute.xlu0 %1842 }
 0x1a7   : > { %4400 = vadd.xlane.f32.xlu0 %v4399_v20 }
 0x1a8   : > { %v9795_v13 = vpop.permute.xlu1 %2476 }
 0x1ab   : > { %4406 = vadd.xlane.f32.xlu0 %v4405_v24  ;;  %v9813_v24 = vpop.permute.xlu0 %2471 }
 0x1ac   : > { %v9808_v20 = vpop.permute.xlu1 %2486 }
 0x1b1   : > { %4013 = vperm.xlu1 %8907, %v8178_v27   ;;  %v8301_v27 = vld [vmem:[%s13247_s21 + $0xa8] sm:$0xff] }
 0x1b5   : > { %4023 = vperm.xlu1 %8907, %v8180_v30   ;;  %v8298_v30 = vld [vmem:[%s13247_s21 + $0x90] sm:$0xff] }
 0x1b9   : > { %4028 = vperm.xlu1 %8907, %v8181_v32   ;;  %v9821_v32 = vpop.permute.xlu1 %2524 }
 0x1bd   : > { %5584 = vperm.xlu1 %8907, %v5574_v35   ;;  %v6227_v35 = vld [vmem:[%s13247_s21 + $0x28] sm:$0xff] }
 0x1c1   : > { %5594 = vperm.xlu1 %8907, %v5576_v36   ;;  %4018 = vperm.xlu0 %8908, %v8179_v37   ;;  %v6224_v36 = vld [vmem:[%s13247_s21 + $0x10] sm:$0xff]  ;;  %v9829_v37 = vpop.permute.xlu0 %2481 }
 0x1c5   : > { %5711 = vperm.xlu1 %8907, %v8213_v39   ;;  %5579 = vperm.xlu0 %8908, %v5573_v40   ;;  %v8303_v39 = vld [vmem:[%s13247_s21 + $0xb8] sm:$0xff]  ;;  %v9834_v40 = vpop.permute.xlu1 %2534 }
 0x1c9   : > { %5721 = vperm.xlu1 %8907, %v8215_v42   ;;  %5589 = vperm.xlu0 %8908, %v5575_v43   ;;  %v8300_v42 = vld [vmem:[%s13247_s21 + $0xa0] sm:$0xff]  ;;  %v9839_v43 = vpop.permute.xlu0 %2519  ;;  %v9847_v49 = vpop.permute.xlu1 %2633 }
 0x1cd   : > { %5838 = vperm.xlu1 %8907, %v8225_v46   ;;  %5706 = vperm.xlu0 %8908, %v8212_v47   ;;  %v6229_v46 = vld [vmem:[%s13247_s21 + $0x38] sm:$0xff]  ;;  %v6226_v47 = vld [vmem:[%s13247_s21 + $0x20] sm:$0xff] }
 0x1d1   : > { %5848 = vperm.xlu1 %8907, %v8227_v50   ;;  %5716 = vperm.xlu0 %8908, %v8214_v51   ;;  %v8273_v50 = vld [vmem:[%s13247_s21 + $0x48] sm:$0xff]  ;;  %v8302_v51 = vld [vmem:[%s13247_s21 + $0xb0] sm:$0xff] }
 0x1d5   : > { %5973 = vperm.xlu1 %8907, %v8237_v55   ;;  %5833 = vperm.xlu0 %8908, %v8224_v56   ;;  %v9855_v55 = vpop.permute.xlu0 %2529  ;;  %v8321_v56 = vld [vmem:[%s13247_s21 + $0xc8] sm:$0xff] }
 0x1d9   : > { %5983 = vperm.xlu1 %8907, %v8239_v58   ;;  %5843 = vperm.xlu0 %8908, %v8226_v60   ;;  %v9860_v58 = vpop.permute.xlu1 %2643  ;;  %v6228_v60 = vld [vmem:[%s13247_s21 + $0x30] sm:$0xff] }
 0x1dd   : > { %6100 = vperm.xlu1 %8907, %v8249_v62   ;;  %5968 = vperm.xlu0 %8908, %v8236_v63   ;;  %v9865_v62 = vpop.permute.xlu0 %2628  ;;  %v8275_v63 = vld [vmem:[%s13247_s21 + $0x58] sm:$0xff] }
 0x1e1   : > { %6110 = vperm.xlu1 %8907, %v8251_v3   ;;  %5978 = vperm.xlu0 %8908, %v8238_v4   ;;  %v8272_v3 = vld [vmem:[%s13247_s21 + $0x40] sm:$0xff]  ;;  %v9873_v4 = vpop.permute.xlu1 %2746 }
 0x1e5   : > { %6660 = vperm.xlu1 %8907, %v8297_v6   ;;  %6095 = vperm.xlu0 %8908, %v8248_v8   ;;  %v8323_v6 = vld [vmem:[%s13247_s21 + $0xd8] sm:$0xff]  ;;  %v8320_v8 = vld [vmem:[%s13247_s21 + $0xc0] sm:$0xff] }
 0x1e9   : > { %6237 = vperm.xlu1 %8907, %v6223_v11   ;;  %6105 = vperm.xlu0 %8908, %v8250_v12   ;;  %v9881_v11 = vpop.permute.xlu0 %2638  ;;  %v8277_v12 = vld [vmem:[%s13247_s21 + $0x68] sm:$0xff] }
 0x1ed   : > { %6670 = vperm.xlu1 %8907, %v8299_v14   ;;  %6655 = vperm.xlu0 %8908, %v8296_v16   ;;  %v9886_v14 = vpop.permute.xlu1 %2756  ;;  %v8274_v16 = vld [vmem:[%s13247_s21 + $0x50] sm:$0xff] }
 0x1f1   : > { %6247 = vperm.xlu1 %8907, %v6225_v19   ;;  %6232 = vperm.xlu0 %8908, %v6222_v21   ;;  %v9891_v19 = vpop.permute.xlu0 %2741  ;;  %v8325_v21 = vld [vmem:[%s13247_s21 + $0xe8] sm:$0xff] }
 0x1f5   : > { %6680 = vperm.xlu1 %8907, %v8301_v27   ;;  %6665 = vperm.xlu0 %8908, %v8298_v30   ;;  %v8322_v27 = vld [vmem:[%s13247_s21 + $0xd0] sm:$0xff]  ;;  %v9899_v30 = vpop.xlane.xlu1 %3102 }
 0x1f9   : > { %6257 = vperm.xlu1 %8907, %v6227_v35   ;;  %6242 = vperm.xlu0 %8908, %v6224_v36   ;;  %v8279_v35 = vld [vmem:[%s13247_s21 + $0x78] sm:$0xff]  ;;  %v8276_v36 = vld [vmem:[%s13247_s21 + $0x60] sm:$0xff] }
 0x1fd   : > { %6690 = vperm.xlu1 %8907, %v8303_v39   ;;  %6675 = vperm.xlu0 %8908, %v8300_v42   ;;  %v9907_v39 = vpop.permute.xlu0 %2751  ;;  %v8327_v42 = vld [vmem:[%s13247_s21 + $0xf8] sm:$0xff] }
 0x201   : > { %6267 = vperm.xlu1 %8907, %v6229_v46   ;;  %6252 = vperm.xlu0 %8908, %v6226_v47   ;;  %v9912_v46 = vpop.xlane.xlu1 %3111  ;;  %v8324_v47 = vld [vmem:[%s13247_s21 + $0xe0] sm:$0xff] }
 0x205   : > { %6449 = vperm.xlu1 %8907, %v8273_v50   ;;  %6685 = vperm.xlu0 %8908, %v8302_v51   ;;  %v9917_v50 = vpop.xlane.xlu0 %3099  ;;  %v8345_v51 = vld [vmem:[%s13247_s21 + $0x108] sm:$0xff] }
 0x209   : > { %6871 = vperm.xlu1 %8907, %v8321_v56   ;;  %6262 = vperm.xlu0 %8908, %v6228_v60   ;;  %v8278_v56 = vld [vmem:[%s13247_s21 + $0x70] sm:$0xff]  ;;  %v9925_v60 = vpop.xlane.xlu1 %3117 }
 0x20a   : > { %13417 = vst [vmem:[#allocation15_spill] sm:$0xff] %v9925_v60  ;;  %v1009_v60 = vld [vmem:[%s990_s28 + $0x18] sm:$0xff] }
 0x20d   : > { %6459 = vperm.xlu1 %8907, %v8275_v63   ;;  %6444 = vperm.xlu0 %8908, %v8272_v3   ;;  %v8347_v63 = vld [vmem:[%s13247_s21 + $0x118] sm:$0xff]  ;;  %v8326_v3 = vld [vmem:[%s13247_s21 + $0xf0] sm:$0xff] }
 0x211   : > { %6881 = vperm.xlu1 %8907, %v8323_v6   ;;  %6866 = vperm.xlu0 %8908, %v8320_v8   ;;  %v9933_v6 = vpop.xlane.xlu0 %3105  ;;  %v8349_v8 = vld [vmem:[%s13247_s21 + $0x128] sm:$0xff] }
 0x215   : > { %6469 = vperm.xlu1 %8907, %v8277_v12   ;;  %6454 = vperm.xlu0 %8908, %v8274_v16   ;;  %v9938_v12 = vpop.permute.xlu1 %2850  ;;  %v8344_v16 = vld [vmem:[%s13247_s21 + $0x100] sm:$0xff] }
 0x216   : > { %13418 = vst [vmem:[#allocation16_spill] sm:$0xff] %v9938_v12 }
 0x219   : > { %6891 = vperm.xlu1 %8907, %v8325_v21   ;;  %6876 = vperm.xlu0 %8908, %v8322_v27   ;;  %v9943_v21 = vpop.xlane.xlu0 %3108  ;;  %v8351_v27 = vld [vmem:[%s13247_s21 + $0x138] sm:$0xff] }
 0x21d   : > { %6479 = vperm.xlu1 %8907, %v8279_v35   ;;  %6464 = vperm.xlu0 %8908, %v8276_v36   ;;  %v8346_v35 = vld [vmem:[%s13247_s21 + $0x110] sm:$0xff]  ;;  %v9951_v36 = vpop.permute.xlu1 %2860 }
 0x21e   : > { %13419 = vst [vmem:[#allocation17_spill] sm:$0xff] %v9951_v36  ;;  %v1006_v36 = vld [vmem:[%s990_s28] sm:$0xff] }
 0x221   : > { %6901 = vperm.xlu1 %8907, %v8327_v42   ;;  %6886 = vperm.xlu0 %8908, %v8324_v47   ;;  %v8348_v42 = vld [vmem:[%s13247_s21 + $0x120] sm:$0xff]  ;;  %v9956_v47 = vpop.xlane.xlu0 %3114 }
 0x225   : > { %7078 = vperm.xlu1 %8907, %v8345_v51   ;;  %6474 = vperm.xlu0 %8908, %v8278_v56   ;;  %v8350_v51 = vld [vmem:[%s13247_s21 + $0x130] sm:$0xff]  ;;  %v9962_v56 = vpop.xlane.xlu0 %3120 }
 0x229   : > { %7088 = vperm.xlu1 %8907, %v8347_v63   ;;  %6896 = vperm.xlu0 %8908, %v8326_v3   ;;  %v8999_v63 = vpop.eup %8998 }
 0x22d   : > { %7098 = vperm.xlu1 %8907, %v8349_v8   ;;  %7073 = vperm.xlu0 %8908, %v8344_v16  }
 0x231   : > { %7108 = vperm.xlu1 %8907, %v8351_v27   ;;  %7083 = vperm.xlu0 %8908, %v8346_v35  }
 0x235   : > { %7093 = vperm.xlu0 %8908, %v8348_v42  }
 0x239   : > { %7103 = vperm.xlu0 %8908, %v8350_v51   ;;  %v9968_v51 = vpack.c.bf16 %v1007_v15, %v1006_v36 }
 0x23b   : > { %13421 = vst [vmem:[#allocation18_spill] sm:$0xff] %v9968_v51 }
 0x250   : > { %v8589_v3 = vpop.f32.mrb[4].mxu1 }
 0x251   : > { %v1307_v8 = vmul.f32 %v8999_v63, %v8589_v3  ;;  %v1289_v16 = vpop.f32.mrb[5].mxu1  ;;  %v1008_v3 = vld [vmem:[%s990_s28 + $0x10] sm:$0xff]  ;;  %s971_s28 = scalar_lea.vmem %s13423_s13, %s9332_s9  ;;  %s975_s13 = scalar_lea.vmem %s13427_s7, %s9332_s9 }
 0x252   : > { %v1305_v27 = vmul.f32 %v8999_v63, %v1289_v16  ;;  %v8590_v35 = vpop.f32.mrb[6].mxu1  ;;  %v8910_v16 = vld [vmem:[%s13238_s12 + $0x18] sm:$0xff]   ;;  %s13433_s9 = sld [smem:[#allocation82_spill]] }
 0x253   : > { %v1308_v1 = vmul.f32 %v8999_v63, %v8590_v35  ;;  %v1292_v28 = vpop.f32.mrb[7].mxu1 }
 0x254   : > { %v1306_v52 = vmul.f32 %v8999_v63, %v1292_v28  ;;  %v8911_v28 = vld [vmem:[%s13238_s12] sm:$0xff]  }
 0x255   : > { %v1321_v42 = vpack.c.bf16 %v1308_v1, %v1307_v8  ;;  %v9977_v1 = vpack.c.bf16 %v1009_v60, %v1008_v3  ;;  %v8913_v60 = vld [vmem:[%s13238_s12 + $0x20] sm:$0xff]  }
 0x256   : > { %v1320_v12 = vpack.c.bf16 %v1306_v52, %v1305_v27  ;;  %v8912_v52 = vld [vmem:[%s13238_s12 + $0x8] sm:$0xff]   ;;  %8611 = vmatprep.mubr.msk.bf16.mxu1 %vm13286_vm4, %v8913_v60 }
 0x257   : > { %13422 = vst [vmem:[#allocation19_spill] sm:$0xff] %v9977_v1 }
 0x258   : > { %8591 = vmatprep.subr.bf16.mxu0 %v1320_v12 }
 0x259   : > { %8592 = vmatpush3.bf16.msra.mxu0 %v1320_v12 }
 0x25a   : > { %8593 = vmatprep.subr.bf16.mxu0 %v1321_v42 }
 0x25d   : > { %8594 = vmatpush3.bf16.msra.mxu0 %v1321_v42 }
 0x25e   : > { %8599 = vmatprep.subr.bf16.mxu0 %v9968_v51 }
 0x260   : > { %8596 = vmatmul.mubr.msk.bf16.vlgmr.msra.gmra.mrb[0].mxu0 %vm13286_vm4, %v8910_v16 }
 0x261   : > { %8600 = vmatpush3.bf16.msra.mxu0 %v9968_v51  ;;  %8603 = vmatprep.mubr.msk.bf16.mxu0 %vm13286_vm4, %v8911_v28 }
 0x262   : > { %8601 = vmatprep.subr.bf16.mxu0 %v9977_v1 }
 0x265   : > { %8602 = vmatpush3.bf16.msra.mxu0 %v9977_v1 }
 0x26c   : > { %8604 = vmatmul.mubr.msk.bf16.vlgmr.msra.gmra.mrb[0].mxu0 %vm13286_vm4, %v8912_v52 }
 0x33f   : > { %v8605_v12 = vpop.f32.mrb[0].mxu0 }
 0x340   : > { %v1437_v36 = vpop.f32.mrb[1].mxu0  ;;  %v1478_v63 = vadd.f32 %v8605_v12, %v9731_v48 }
 0x341   : > { %v1476_v8 = vadd.f32 %v9635_v29, %v1437_v36  ;;  %v8606_v27 = vpop.f32.mrb[2].mxu0 }
 0x342   : > { %v1479_v35 = vadd.f32 %v8606_v27, %v9647_v44  ;;  %v1440_v42 = vpop.f32.mrb[3].mxu0  ;;  %v1486_v28 = vmul.f32 0.01, %v1478_v63  ;;  %vm1482_vm8 = vcmp.ge.f32.partialorder %v1478_v63, 0.0  ;;  %v8915_v44 = vld [vmem:[%s13238_s12 + $0x30] sm:$0xff]  }
 0x343   : > { %v1484_v15 = vmul.f32 0.01, %v1476_v8  ;;  %v1477_v3 = vadd.f32 %v9640_v34, %v1440_v42  ;;  %vm1480_vm5 = vcmp.ge.f32.partialorder %v1476_v8, 0.0  ;;  %v8914_v34 = vld [vmem:[%s13238_s12 + $0x28] sm:$0xff]  }
 0x344   : > { %vm1483_vm6 = vcmp.ge.f32.partialorder %v1479_v35, 0.0  ;;  %v1487_v16 = vmul.f32 0.01, %v1479_v35  ;;  %v1490_v12 = vsel %vm1482_vm8, %v1478_v63, %v1486_v28 }
 0x345   : > { %vm1481_vm7 = vcmp.ge.f32.partialorder %v1477_v3, 0.0  ;;  %v1485_v52 = vmul.f32 0.01, %v1477_v3  ;;  %v1488_v60 = vsel %vm1480_vm5, %v1476_v8, %v1484_v15  ;;  %vm2058_vm5 = vcmask 518144  }
 0x346   : > { %v1491_v51 = vsel %vm1483_vm6, %v1479_v35, %v1487_v16 }
 0x347   : > { %v1489_v1 = vsel %vm1481_vm7, %v1477_v3, %v1485_v52  ;;  %v1498_v29 = vpack.c.bf16 %v1491_v51, %v1490_v12 }
 0x348   : > { %v1497_v48 = vpack.c.bf16 %v1489_v1, %v1488_v60 }
 0x34a   : > { %8607 = vmatprep.subr.bf16.mxu1 %v1497_v48 }
 0x34b   : > { %8608 = vmatpush3.bf16.msra.mxu1 %v1497_v48 }
 0x34c   : > { %8609 = vmatprep.subr.bf16.mxu1 %v1498_v29 }
 0x34f   : > { %8610 = vmatpush3.bf16.msra.mxu1 %v1498_v29 }
 0x352   : > { %8612 = vmatmul.mubr.msk.bf16.vlgmr.msra.gmra.mrb[8].mxu1 %vm13286_vm4, %v8914_v34 }
 0x353   : > { %8619 = vmatprep.mubr.msk.bf16.mxu1 %vm13286_vm4, %v8915_v44 }
 0x425   : > { %v8613_v36 = vpop.f32.mrb[8].mxu1 }
 0x426   : > { %v1583_v63 = vadd.f32 %v8613_v36, %v9670_v10  ;;  %v1574_v8 = vpop.f32.mrb[9].mxu1 }
 0x427   : > { %v1575_v27 = vadd.f32 %v1574_v8, %v9655_v54  ;;  %v8614_v35 = vpop.f32.mrb[10].mxu1 }
 0x428   : > { %v1595_v42 = vmul.f32 0.01, %v1583_v63  ;;  %v1586_v15 = vadd.f32 %v8614_v35, %v9676_v18  ;;  %v1577_v3 = vpop.f32.mrb[11].mxu1  ;;  %vm1591_vm9 = vcmp.ge.f32.partialorder %v1583_v63, 0.0  ;;  %v8916_v18 = vld [vmem:[%s13238_s12 + $0x38] sm:$0xff]  }
 0x429   : > { %v1593_v16 = vmul.f32 0.01, %v1575_v27  ;;  %v1578_v28 = vadd.f32 %v1577_v3, %v9663_v2  ;;  %vm1589_vm10 = vcmp.ge.f32.partialorder %v1575_v27, 0.0  ;;  %v8917_v2 = vld [vmem:[%s13238_s12 + $0x40] sm:$0xff]  }
 0x42a   : > { %vm1592_vm11 = vcmp.ge.f32.partialorder %v1586_v15, 0.0  ;;  %v1596_v52 = vmul.f32 0.01, %v1586_v15  ;;  %v1599_v29 = vsel %vm1591_vm9, %v1583_v63, %v1595_v42  ;;  %8627 = vmatprep.mubr.msk.bf16.mxu0 %vm13286_vm4, %v8917_v2  ;;  %v9042_v2 = vld [vmem:[%s9401_s6 + $0x10] sm:$0xff] }
 0x42b   : > { %vm1590_vm12 = vcmp.ge.f32.partialorder %v1578_v28, 0.0  ;;  %v1594_v48 = vmul.f32 0.01, %v1578_v28  ;;  %v1597_v10 = vsel %vm1589_vm10, %v1575_v27, %v1593_v16  ;;  %vm13285_vm10 = vcmask 523264  }
 0x42c   : > { %v1600_v34 = vsel %vm1592_vm11, %v1586_v15, %v1596_v52 }
 0x42d   : > { %v1598_v44 = vsel %vm1590_vm12, %v1578_v28, %v1594_v48  ;;  %v1607_v36 = vpack.c.bf16 %v1600_v34, %v1599_v29 }
 0x42e   : > { %v1606_v54 = vpack.c.bf16 %v1598_v44, %v1597_v10 }
 0x430   : > { %8615 = vmatprep.subr.bf16.mxu1 %v1606_v54 }
 0x431   : > { %8616 = vmatpush3.bf16.msra.mxu1 %v1606_v54  ;;  %v9040_v54 = vld [vmem:[%s9401_s6] sm:$0xff] }
 0x432   : > { %8617 = vmatprep.subr.bf16.mxu1 %v1607_v36 }
 0x435   : > { %8618 = vmatpush3.bf16.msra.mxu1 %v1607_v36  ;;  %v8918_v36 = vld [vmem:[%s13238_s12 + $0x48] sm:$0xff]  }
 0x438   : > { %8620 = vmatmul.mubr.msk.bf16.vlgmr.msra.gmra.mrb[12].mxu1 %vm13286_vm4, %v8916_v18  ;;  %v9041_v18 = vld [vmem:[%s9401_s6 + $0x8] sm:$0xff] }
 0x50b   : > { %v8621_v63 = vpop.f32.mrb[12].mxu1 }
 0x50c   : > { %v1692_v8 = vadd.f32 %v8621_v63, %v9691_v31  ;;  %v1683_v27 = vpop.f32.mrb[13].mxu1  ;;  %v9043_v63 = vld [vmem:[%s9401_s6 + $0x18] sm:$0xff] }
 0x50d   : > { %v1684_v35 = vadd.f32 %v1683_v27, %v9680_v22  ;;  %v8622_v42 = vpop.f32.mrb[14].mxu1 }
 0x50e   : > { %v1695_v15 = vadd.f32 %v8622_v42, %v9696_v33  ;;  %v1686_v3 = vpop.f32.mrb[15].mxu1  ;;  %v1700_v16 = vadd.f32 %v1692_v8, %v1490_v12  ;;  %v8919_v8 = vld [vmem:[%s13238_s12 + $0x50] sm:$0xff]  }
 0x50f   : > { %v1698_v28 = vadd.f32 %v1684_v35, %v1488_v60  ;;  %v1687_v52 = vadd.f32 %v1686_v3, %v9683_v25  ;;  %v1940_v60 = vld [vmem:[%s971_s28] sm:$0x7]  ;;  %8635 = vmatprep.mubr.msk.bf16.mxu1 %vm13286_vm4, %v8919_v8  ;;  %s13424_s28 = sld [smem:[#allocation85_spill]] }
 0x510   : > { %v1701_v48 = vadd.f32 %v1695_v15, %v1491_v51  ;;  %v1708_v44 = vmul.f32 0.01, %v1700_v16  ;;  %vm1704_vm2 = vcmp.ge.f32.partialorder %v1700_v16, 0.0  ;;  %v2057_v27 = vmul.f32 %v1940_v60, %v1940_v60 }
 0x511   : > { %v1706_v29 = vmul.f32 0.01, %v1698_v28  ;;  %v1699_v34 = vadd.f32 %v1687_v52, %v1489_v1  ;;  %vm1702_vm13 = vcmp.ge.f32.partialorder %v1698_v28, 0.0 }
 0x512   : > { %vm1705_vm14 = vcmp.ge.f32.partialorder %v1701_v48, 0.0  ;;  %v1709_v10 = vmul.f32 0.01, %v1701_v48  ;;  %v10028_v51 = vsel %vm1704_vm2, %v1700_v16, %v1708_v44  ;;  %v2059_v35 = vsel %vm2058_vm5, %v2057_v27, 0.0 }
 0x513   : > { %vm1703_vm15 = vcmp.ge.f32.partialorder %v1699_v34, 0.0  ;;  %v1707_v31 = vmul.f32 0.01, %v1699_v34  ;;  %v10020_v22 = vsel %vm1702_vm13, %v1698_v28, %v1706_v29  ;;  %v2060_v42 = vrot.slane %v2059_v35, 4 }
 0x514   : > { %v10024_v12 = vsel %vm1705_vm14, %v1701_v48, %v1709_v10 }
 0x515   : > { %v10022_v33 = vsel %vm1703_vm15, %v1699_v34, %v1707_v31  ;;  %v1720_v1 = vpack.c.bf16 %v10024_v12, %v10028_v51  ;;  %v2061_v15 = vadd.f32 %v2060_v42, %v2059_v35  ;;  %s995_s15 = scalar_lea.vmem %s13424_s28, %s9395_s29  ;;  %s8395_s28 = sshll.u32 %s9329_s0, 3 }
 0x516   : > { %v1719_v25 = vpack.c.bf16 %v10022_v33, %v10020_v22  ;;  %s980_s26 = scalar_lea.vmem %s13433_s9, %s8395_s28  ;;  %s941_s0 = sand.u32 1, %s9122_s3  }
 0x517   : > { %v2062_v3 = vrot.slane %v2061_v15, 2 }
 0x518   : > { %8623 = vmatprep.subr.bf16.mxu0 %v1719_v25 }
 0x519   : > { %8624 = vmatpush3.bf16.msra.mxu0 %v1719_v25  ;;  %v2063_v16 = vadd.f32 %v2062_v3, %v2061_v15 }
 0x51a   : > { %8625 = vmatprep.subr.bf16.mxu0 %v1720_v1 }
 0x51b   : > { %v2064_v28 = vrot.slane %v2063_v16, 1 }
 0x51d   : > { %8626 = vmatpush3.bf16.msra.mxu0 %v1720_v1  ;;  %v2065_v44 = vadd.f32 %v2064_v28, %v2063_v16 }
 0x51e   : > { %8639 = vmatprep.subr.msk.mxu0 %vm1028_vm0, %v1940_v60 }
 0x520   : > { %8628 = vmatmul.mubr.msk.bf16.vlgmr.msra.gmra.mrb[4].mxu0 %vm13286_vm4, %v8918_v36 }
 0x521   : > { %8640 = vmatpush3.msk.msra.mxu0 %vm1028_vm0, %v1940_v60  ;;  %8641 = vmatprep.mubr.msk.f32.mxu0 %vm1021_vm1, %v9040_v54 }
 0x528   : > { %8642 = vmatmul.mubr.msk.f32.vlgmr.msra.gmra.mrb[8].mxu0 %vm1021_vm1, %v9041_v18 }
 0x529   : > { %8644 = vmatprep.mubr.msk.f32.mxu0 %vm1021_vm1, %v9042_v2 }
 0x52c   : > { %8645 = vmatmul.mubr.msk.f32.gmra.mrb[10].mxu0 %vm1021_vm1, %v9043_v63 }
 0x5f3   : > { %v8629_v52 = vpop.f32.mrb[4].mxu0 }
 0x5f4   : > { %v1805_v48 = vadd.f32 %v8629_v52, %v9751_v57  ;;  %v1796_v29 = vpop.f32.mrb[5].mxu0  ;;  %v2067_v57 = vadd.f32 %v2065_v44, %v9742_v53  ;;  %v2068_v52 = vadd.f32 %v2065_v44, %v9777_v5 }
 0x5f5   : > { %v1797_v34 = vadd.f32 %v1796_v29, %v9707_v38  ;;  %v8630_v10 = vpop.f32.mrb[6].mxu0  ;;  %v2066_v38 = vadd.f32 %v2065_v44, %v9761_v61 }
 0x5f6   : > { %v1817_v31 = vmul.f32 0.01, %v1805_v48  ;;  %v1808_v25 = vadd.f32 %v8630_v10, %v9723_v45  ;;  %v1799_v1 = vpop.f32.mrb[7].mxu0  ;;  %vm1813_vm6 = vcmp.ge.f32.partialorder %v1805_v48, 0.0 }
 0x5f7   : > { %v1815_v60 = vmul.f32 0.01, %v1797_v34  ;;  %v1800_v36 = vadd.f32 %v1799_v1, %v9715_v41  ;;  %vm1811_vm7 = vcmp.ge.f32.partialorder %v1797_v34, 0.0  ;;  %v2069_v41 = vadd.f32 %v2065_v44, %v9787_v9  ;;  %v8920_v9 = vld [vmem:[%s13238_s12 + $0x58] sm:$0xff]  }
 0x5f8   : > { %vm1814_vm8 = vcmp.ge.f32.partialorder %v1808_v25, 0.0  ;;  %v1818_v54 = vmul.f32 0.01, %v1808_v25  ;;  %v1821_v2 = vsel %vm1813_vm6, %v1805_v48, %v1817_v31 }
 0x5f9   : > { %vm1812_vm9 = vcmp.ge.f32.partialorder %v1800_v36, 0.0  ;;  %v1816_v18 = vmul.f32 0.01, %v1800_v36  ;;  %v1819_v27 = vsel %vm1811_vm7, %v1797_v34, %v1815_v60 }
 0x5fa   : > { %v1822_v63 = vsel %vm1814_vm8, %v1808_v25, %v1818_v54 }
 0x5fb   : > { %v8643_v8 = vpop.f32.mrb[8].mxu0  ;;  %v1820_v35 = vsel %vm1812_vm9, %v1800_v36, %v1816_v18  ;;  %v1829_v45 = vpack.c.bf16 %v1822_v63, %v1821_v2 }
 0x5fc   : > { %v2071_v42 = vmul.f32 2.0, %v8643_v8  ;;  %v1828_v15 = vpack.c.bf16 %v1820_v35, %v1819_v27  ;;  %v2022_v3 = vpop.f32.mrb[9].mxu0 }
 0x5fd   : > { %v2070_v16 = vmul.f32 2.0, %v2022_v3 }
 0x5fe   : > { %v2075_v28 = vsub.f32 %v2067_v57, %v2071_v42  ;;  %8631 = vmatprep.subr.bf16.mxu1 %v1828_v15 }
 0x5ff   : > { %v2074_v53 = vsub.f32 %v2066_v38, %v2070_v16  ;;  %8632 = vmatpush3.bf16.msra.mxu1 %v1828_v15  ;;  %v8646_v48 = vpop.f32.mrb[10].mxu0  ;;  %v10074_v15 = vadd.s32 16, %v9487_v23 }
 0x600   : > { %v10062_v29 = vmax.f32 %v2075_v28, 0.0  ;;  %v2073_v61 = vmul.f32 2.0, %v8646_v48  ;;  %8633 = vmatprep.subr.bf16.mxu1 %v1829_v45  ;;  %v2032_v34 = vpop.f32.mrb[11].mxu0 }
 0x601   : > { %v2078_v10 = vmax.f32 %v2074_v53, 0.0  ;;  %v2072_v31 = vmul.f32 2.0, %v2032_v34 }
 0x602   : > { %v2086_v25 = vsel %vm13285_vm10, %v10062_v29, inf  ;;  %v2077_v1 = vsub.f32 %v2069_v41, %v2073_v61 }
 0x603   : > { %v2085_v5 = vsel %vm13285_vm10, %v2078_v10, inf  ;;  %v2076_v44 = vsub.f32 %v2068_v52, %v2072_v31  ;;  %8634 = vmatpush3.bf16.msra.mxu1 %v1829_v45  ;;  %v10077_v45 = vadd.s32 24, %v9487_v23 }
 0x604   : > { %v2089_v60 = vmin.f32 %v2085_v5, %v2086_v25  ;;  %v2081_v36 = vmax.f32 %v2077_v1, 0.0 }
 0x605   : > { %v2080_v54 = vmax.f32 %v2076_v44, 0.0 }
 0x606   : > { %v2088_v18 = vsel %vm13285_vm10, %v2081_v36, inf  ;;  %8636 = vmatmul.mubr.msk.bf16.vlgmr.msra.gmra.mrb[16].mxu1 %vm13286_vm4, %v8920_v9 }
 0x607   : > { %v2087_v57 = vsel %vm13285_vm10, %v2080_v54, inf }
 0x608   : > { %v2090_v2 = vmin.f32 %v2087_v57, %v2088_v18 }
 0x60a   : > { %v2091_v63 = vmin.f32 %v2089_v60, %v2090_v2 }
 0x60c   : > { %v2092_v38 = vrot.slane %v2091_v63, 4 }
 0x60e   : > { %v2093_v8 = vmin.f32 %v2091_v63, %v2092_v38 }
 0x610   : > { %v2094_v27 = vrot.slane %v2093_v8, 2 }
 0x612   : > { %v2095_v35 = vmin.f32 %v2093_v8, %v2094_v27 }
 0x614   : > { %v2096_v42 = vrot.slane %v2095_v35, 1 }
 0x616   : > { %v2097_v3 = vmin.f32 %v2095_v35, %v2096_v42 }
 0x618   : > { %vm2098_vm11 = vcmp.eq.f32.partialorder %v2078_v10, %v2097_v3  ;;  %vm2099_vm12 = vcmp.eq.f32.partialorder %v10062_v29, %v2097_v3  ;;  %vm2100_vm13 = vcmp.eq.f32.partialorder %v2080_v54, %v2097_v3  ;;  %vm2101_vm14 = vcmp.eq.f32.partialorder %v2081_v36, %v2097_v3 }
 0x619   : > { %v2102_v16 = vsel %vm2098_vm11, %v9487_v23, 32  ;;  %v2103_v41 = vsel %vm2099_vm12, %v9490_v26, 32  ;;  %v2104_v28 = vsel %vm2100_vm13, %v10074_v15, 32  ;;  %v2105_v52 = vsel %vm2101_vm14, %v10077_v45, 32 }
 0x61a   : > { %v2106_v53 = vsel %vm13285_vm10, %v2102_v16, 2147483647  ;;  %v2107_v48 = vsel %vm13285_vm10, %v2103_v41, 2147483647  ;;  %v2108_v61 = vsel %vm13285_vm10, %v2104_v28, 2147483647 }
 0x61b   : > { %v2109_v34 = vsel %vm13285_vm10, %v2105_v52, 2147483647  ;;  %vm2110_vm15 = vcmp.lt.s32.totalorder %v2106_v53, %v2107_v48  ;;  %v2129_v1 = vadd.f32 1e-08, %v2097_v3 }
 0x61c   : > { %v2111_v31 = vsel %vm2110_vm15, %v2106_v53, %v2107_v48  ;;  %vm2112_vm2 = vcmp.lt.s32.totalorder %v2108_v61, %v2109_v34 }
 0x61d   : > { %v2113_v25 = vsel %vm2112_vm2, %v2108_v61, %v2109_v34  ;;  %9000 = vrcp.f32 %v2129_v1 }
 0x61e   : > { %vm2114_vm5 = vcmp.lt.s32.totalorder %v2111_v31, %v2113_v25 }
 0x61f   : > { %v2115_v9 = vsel %vm2114_vm5, %v2111_v31, %v2113_v25 }
 0x620   : > { %v2116_v5 = vrot.slane %v2115_v9, 4 }
 0x622   : > { %vm2117_vm6 = vcmp.lt.s32.totalorder %v2115_v9, %v2116_v5 }
 0x623   : > { %v2118_v44 = vsel %vm2117_vm6, %v2115_v9, %v2116_v5 }
 0x624   : > { %v2119_v60 = vrot.slane %v2118_v44, 2 }
 0x626   : > { %vm2120_vm7 = vcmp.lt.s32.totalorder %v2118_v44, %v2119_v60 }
 0x627   : > { %v2121_v18 = vsel %vm2120_vm7, %v2118_v44, %v2119_v60  ;;  %v9001_v63 = vpop.eup %9000 }
 0x628   : > { %v2122_v57 = vrot.slane %v2121_v18, 1 }
 0x62a   : > { %vm2123_vm8 = vcmp.lt.s32.totalorder %v2121_v18, %v2122_v57 }
 0x62b   : > { %v2124_v2 = vsel %vm2123_vm8, %v2121_v18, %v2122_v57 }
 0x62c   : > { %vm2125_vm9 = vcmp.eq.s32.totalorder %v9487_v23, %v2124_v2  ;;  %vm2126_vm11 = vcmp.eq.s32.totalorder %v9490_v26, %v2124_v2  ;;  %vm2127_vm12 = vcmp.eq.s32.totalorder %v10074_v15, %v2124_v2  ;;  %vm2128_vm13 = vcmp.eq.s32.totalorder %v10077_v45, %v2124_v2 }
 0x62d   : > { %v10092_v38 = vsel %vm2125_vm9, 1e+30, %v2078_v10  ;;  %v10095_v8 = vsel %vm2126_vm11, 1e+30, %v10062_v29  ;;  %v2142_v27 = vsel %vm2127_vm12, 1e+30, %v2080_v54 }
 0x62e   : > { %v2143_v35 = vsel %vm2128_vm13, 1e+30, %v2081_v36  ;;  %v2144_v42 = vsel %vm13285_vm10, %v10092_v38, inf  ;;  %v2145_v3 = vsel %vm13285_vm10, %v10095_v8, inf  ;;  %v2146_v16 = vsel %vm13285_vm10, %v2142_v27, inf }
 0x62f   : > { %v2147_v41 = vsel %vm13285_vm10, %v2143_v35, inf  ;;  %v2148_v28 = vmin.f32 %v2144_v42, %v2145_v3  ;;  %v2132_v52 = vsel %vm2125_vm9, %v9001_v63, 0.0  ;;  %v2133_v53 = vsel %vm2126_vm11, %v9001_v63, 0.0 }
 0x630   : > { %v2149_v10 = vmin.f32 %v2146_v16, %v2147_v41  ;;  %v2134_v48 = vsel %vm2127_vm12, %v9001_v63, 0.0  ;;  %v2135_v61 = vsel %vm2128_vm13, %v9001_v63, 0.0 }
 0x632   : > { %v2150_v29 = vmin.f32 %v2148_v28, %v2149_v10 }
 0x634   : > { %v2151_v34 = vrot.slane %v2150_v29, 4 }
 0x636   : > { %v2152_v54 = vmin.f32 %v2150_v29, %v2151_v34 }
 0x638   : > { %v2153_v36 = vrot.slane %v2152_v54, 2 }
 0x63a   : > { %v2154_v31 = vmin.f32 %v2152_v54, %v2153_v36 }
 0x63c   : > { %v2155_v25 = vrot.slane %v2154_v31, 1 }
 0x63e   : > { %v2156_v1 = vmin.f32 %v2154_v31, %v2155_v25 }
 0x640   : > { %vm2157_vm14 = vcmp.eq.f32.partialorder %v10092_v38, %v2156_v1  ;;  %vm2158_vm15 = vcmp.eq.f32.partialorder %v10095_v8, %v2156_v1  ;;  %vm2159_vm2 = vcmp.eq.f32.partialorder %v2142_v27, %v2156_v1  ;;  %vm2160_vm5 = vcmp.eq.f32.partialorder %v2143_v35, %v2156_v1 }
 0x641   : > { %v2161_v9 = vsel %vm2157_vm14, %v9487_v23, 32  ;;  %v2162_v5 = vsel %vm2158_vm15, %v9490_v26, 32  ;;  %v2163_v44 = vsel %vm2159_vm2, %v10074_v15, 32  ;;  %v2164_v60 = vsel %vm2160_vm5, %v10077_v45, 32 }
 0x642   : > { %v2165_v18 = vsel %vm13285_vm10, %v2161_v9, 2147483647  ;;  %v2166_v57 = vsel %vm13285_vm10, %v2162_v5, 2147483647  ;;  %v2167_v2 = vsel %vm13285_vm10, %v2163_v44, 2147483647 }
 0x643   : > { %v2168_v42 = vsel %vm13285_vm10, %v2164_v60, 2147483647  ;;  %vm2169_vm6 = vcmp.lt.s32.totalorder %v2165_v18, %v2166_v57  ;;  %v2188_v3 = vadd.f32 1e-08, %v2156_v1 }
 0x644   : > { %v2170_v16 = vsel %vm2169_vm6, %v2165_v18, %v2166_v57  ;;  %vm2171_vm7 = vcmp.lt.s32.totalorder %v2167_v2, %v2168_v42 }
 0x645   : > { %v2172_v41 = vsel %vm2171_vm7, %v2167_v2, %v2168_v42  ;;  %9002 = vrcp.f32 %v2188_v3 }
 0x646   : > { %vm2173_vm8 = vcmp.lt.s32.totalorder %v2170_v16, %v2172_v41 }
 0x647   : > { %v2174_v28 = vsel %vm2173_vm8, %v2170_v16, %v2172_v41 }
 0x648   : > { %v2175_v10 = vrot.slane %v2174_v28, 4 }
 0x64a   : > { %vm2176_vm9 = vcmp.lt.s32.totalorder %v2174_v28, %v2175_v10 }
 0x64b   : > { %v2177_v29 = vsel %vm2176_vm9, %v2174_v28, %v2175_v10 }
 0x64c   : > { %v2178_v34 = vrot.slane %v2177_v29, 2 }
 0x64e   : > { %vm2179_vm11 = vcmp.lt.s32.totalorder %v2177_v29, %v2178_v34 }
 0x64f   : > { %v9003_v54 = vpop.eup %9002  ;;  %v2180_v36 = vsel %vm2179_vm11, %v2177_v29, %v2178_v34 }
 0x650   : > { %v2181_v31 = vrot.slane %v2180_v36, 1  ;;  %v2190_v25 = vadd.f32 %v9003_v54, %v9001_v63 }
 0x652   : > { %vm2182_vm12 = vcmp.lt.s32.totalorder %v2180_v36, %v2181_v31 }
 0x653   : > { %v2183_v9 = vsel %vm2182_vm12, %v2180_v36, %v2181_v31 }
 0x654   : > { %vm2186_vm13 = vcmp.eq.s32.totalorder %v10074_v15, %v2183_v9  ;;  %vm2187_vm14 = vcmp.eq.s32.totalorder %v10077_v45, %v2183_v9  ;;  %vm2184_vm15 = vcmp.eq.s32.totalorder %v9487_v23, %v2183_v9  ;;  %vm2185_vm2 = vcmp.eq.s32.totalorder %v9490_v26, %v2183_v9 }
 0x655   : > { %v2201_v1 = vsel %vm2186_vm13, 1e+30, %v2142_v27  ;;  %v2202_v5 = vsel %vm2187_vm14, 1e+30, %v2143_v35  ;;  %v2191_v44 = vsel %vm2184_vm15, %v9003_v54, 0.0  ;;  %v2192_v60 = vsel %vm2185_vm2, %v9003_v54, 0.0 }
 0x656   : > { %v2205_v18 = vsel %vm13285_vm10, %v2201_v1, inf  ;;  %v2206_v63 = vsel %vm13285_vm10, %v2202_v5, inf  ;;  %v2195_v57 = vadd.f32 %v2191_v44, %v2132_v52  ;;  %v2196_v2 = vadd.f32 %v2192_v60, %v2133_v53 }
 0x657   : > { %v2208_v42 = vmin.f32 %v2205_v18, %v2206_v63  ;;  %v2199_v3 = vsel %vm2184_vm15, 1e+30, %v10092_v38  ;;  %v2200_v16 = vsel %vm2185_vm2, 1e+30, %v10095_v8  ;;  %v2193_v41 = vsel %vm2186_vm13, %v9003_v54, 0.0 }
 0x658   : > { %v2203_v28 = vsel %vm13285_vm10, %v2199_v3, inf  ;;  %v2204_v27 = vsel %vm13285_vm10, %v2200_v16, inf  ;;  %v2194_v35 = vsel %vm2187_vm14, %v9003_v54, 0.0  ;;  %v2197_v10 = vadd.f32 %v2193_v41, %v2134_v48 }
 0x659   : > { %v2207_v29 = vmin.f32 %v2203_v28, %v2204_v27  ;;  %v2198_v34 = vadd.f32 %v2194_v35, %v2135_v61 }
 0x65b   : > { %v2209_v36 = vmin.f32 %v2207_v29, %v2208_v42 }
 0x65d   : > { %v2210_v31 = vrot.slane %v2209_v36, 4 }
 0x65f   : > { %v2211_v52 = vmin.f32 %v2209_v36, %v2210_v31 }
 0x661   : > { %v2212_v53 = vrot.slane %v2211_v52, 2 }
 0x663   : > { %v2213_v44 = vmin.f32 %v2211_v52, %v2212_v53 }
 0x665   : > { %v2214_v60 = vrot.slane %v2213_v44, 1 }
 0x667   : > { %v2215_v38 = vmin.f32 %v2213_v44, %v2214_v60 }
 0x669   : > { %vm2216_vm5 = vcmp.eq.f32.partialorder %v2199_v3, %v2215_v38  ;;  %vm2217_vm6 = vcmp.eq.f32.partialorder %v2200_v16, %v2215_v38  ;;  %vm2218_vm7 = vcmp.eq.f32.partialorder %v2201_v1, %v2215_v38  ;;  %vm2219_vm8 = vcmp.eq.f32.partialorder %v2202_v5, %v2215_v38 }
 0x66a   : > { %v2220_v8 = vsel %vm2216_vm5, %v9487_v23, 32  ;;  %v2221_v18 = vsel %vm2217_vm6, %v9490_v26, 32  ;;  %v2222_v54 = vsel %vm2218_vm7, %v10074_v15, 32  ;;  %v2223_v48 = vsel %vm2219_vm8, %v10077_v45, 32 }
 0x66b   : > { %v2224_v61 = vsel %vm13285_vm10, %v2220_v8, 2147483647  ;;  %v2225_v9 = vsel %vm13285_vm10, %v2221_v18, 2147483647  ;;  %v2226_v63 = vsel %vm13285_vm10, %v2222_v54, 2147483647 }
 0x66c   : > { %v2227_v42 = vsel %vm13285_vm10, %v2223_v48, 2147483647  ;;  %vm2228_vm9 = vcmp.lt.s32.totalorder %v2224_v61, %v2225_v9  ;;  %v2247_v3 = vadd.f32 1e-08, %v2215_v38 }
 0x66d   : > { %v2229_v1 = vsel %vm2228_vm9, %v2224_v61, %v2225_v9  ;;  %vm2230_vm11 = vcmp.lt.s32.totalorder %v2226_v63, %v2227_v42 }
 0x66e   : > { %v2231_v5 = vsel %vm2230_vm11, %v2226_v63, %v2227_v42  ;;  %9004 = vrcp.f32 %v2247_v3 }
 0x66f   : > { %vm2232_vm12 = vcmp.lt.s32.totalorder %v2229_v1, %v2231_v5 }
 0x670   : > { %v2233_v16 = vsel %vm2232_vm12, %v2229_v1, %v2231_v5 }
 0x671   : > { %v2234_v41 = vrot.slane %v2233_v16, 4 }
 0x673   : > { %vm2235_vm13 = vcmp.lt.s32.totalorder %v2233_v16, %v2234_v41 }
 0x674   : > { %v2236_v28 = vsel %vm2235_vm13, %v2233_v16, %v2234_v41 }
 0x675   : > { %v2237_v27 = vrot.slane %v2236_v28, 2 }
 0x677   : > { %vm2238_vm14 = vcmp.lt.s32.totalorder %v2236_v28, %v2237_v27 }
 0x678   : > { %v9005_v35 = vpop.eup %9004  ;;  %v2239_v29 = vsel %vm2238_vm14, %v2236_v28, %v2237_v27 }
 0x679   : > { %v2240_v36 = vrot.slane %v2239_v29, 1  ;;  %v2249_v31 = vadd.f32 %v9005_v35, %v2190_v25 }
 0x67b   : > { %vm2241_vm15 = vcmp.lt.s32.totalorder %v2239_v29, %v2240_v36  ;;  %9006 = vrcp.f32 %v2249_v31 }
 0x67c   : > { %v2242_v52 = vsel %vm2241_vm15, %v2239_v29, %v2240_v36 }
 0x67d   : > { %vm2243_vm2 = vcmp.eq.s32.totalorder %v9487_v23, %v2242_v52  ;;  %vm2244_vm5 = vcmp.eq.s32.totalorder %v9490_v26, %v2242_v52  ;;  %vm2245_vm6 = vcmp.eq.s32.totalorder %v10074_v15, %v2242_v52  ;;  %vm2246_vm7 = vcmp.eq.s32.totalorder %v10077_v45, %v2242_v52 }
 0x67e   : > { %v2250_v53 = vsel %vm2243_vm2, %v9005_v35, 0.0  ;;  %v2251_v44 = vsel %vm2244_vm5, %v9005_v35, 0.0  ;;  %v2252_v60 = vsel %vm2245_vm6, %v9005_v35, 0.0  ;;  %v2253_v38 = vsel %vm2246_vm7, %v9005_v35, 0.0 }
 0x67f   : > { %v2254_v8 = vadd.f32 %v2250_v53, %v2195_v57  ;;  %v2255_v18 = vadd.f32 %v2251_v44, %v2196_v2  ;;  %v2256_v54 = vadd.f32 %v2252_v60, %v2197_v10  ;;  %v2257_v48 = vadd.f32 %v2253_v38, %v2198_v34 }
 0x681   : > { %v2260_v61 = vpack.c.bf16 %v2255_v18, %v2254_v8  ;;  %v2261_v25 = vpack.c.bf16 %v2257_v48, %v2256_v54 }
 0x683   : > { %8647 = vmatprep.subr.bf16.mxu1 %v2260_v61 }
 0x684   : > { %8648 = vmatpush3.bf16.msra.mxu1 %v2260_v61  ;;  %v1010_v61 = vld [vmem:[%s995_s15] sm:$0xff] }
 0x685   : > { %8649 = vmatprep.subr.bf16.mxu1 %v2261_v25 }
 0x688   : > { %8650 = vmatpush3.bf16.msra.mxu1 %v2261_v25  ;;  %v1011_v25 = vld [vmem:[%s995_s15 + $0x8] sm:$0xff] }
 0x689   : > { %v10157_v31 = vpack.c.bf16 %v1011_v25, %v1010_v61 }
 0x68b   : > { %13425 = vst [vmem:[#allocation20_spill] sm:$0xff] %v10157_v31 }
 0x6d9   : > { %v8637_v9 = vpop.f32.mrb[16].mxu1 }
 0x6da   : > { %v1914_v63 = vadd.f32 %v8637_v9, %v9769_v0  ;;  %v1905_v42 = vpop.f32.mrb[17].mxu1  ;;  %v1012_v9 = vld [vmem:[%s995_s15 + $0x10] sm:$0xff] }
 0x6db   : > { %v1906_v3 = vadd.f32 %v1905_v42, %v9756_v59  ;;  %v8638_v1 = vpop.f32.mrb[18].mxu1  ;;  %v8922_v42 = vld [vmem:[%s13240_s14 + $0x18] sm:$0xff]  }
 0x6dc   : > { %v1922_v5 = vadd.f32 %v1914_v63, %v10028_v51  ;;  %v1917_v57 = vadd.f32 %v8638_v1, %v9782_v7  ;;  %v1908_v2 = vpop.f32.mrb[19].mxu1  ;;  %v1013_v63 = vld [vmem:[%s995_s15 + $0x18] sm:$0xff]  ;;  %s9072_s15 = sshll.u32 %s9135_s8, 4  ;;  %s9073_s15 = int_to_ptr.vmem [resolvable:$false] %s9072_s15 }
 0x6dd   : > { %v1920_v10 = vadd.f32 %v1906_v3, %v10020_v22  ;;  %v1909_v34 = vadd.f32 %v1908_v2, %v9803_v17  ;;  %v8921_v17 = vld [vmem:[%s13240_s14 + $0x10] sm:$0xff]   ;;  %v8923_v3 = vld [vmem:[%s13240_s14] sm:$0xff]   ;;  %v10166_v1 = vpack.c.bf16 %v1013_v63, %v1012_v9  ;;  %s9074_s29 = scalar_lea.vmem %s9073_s15, 512 }
 0x6de   : > { %v1930_v16 = vmul.f32 0.01, %v1922_v5  ;;  %v1923_v41 = vadd.f32 %v1917_v57, %v10024_v12  ;;  %vm1926_vm8 = vcmp.ge.f32.partialorder %v1922_v5, 0.0  ;;  %8659 = vmatprep.mubr.msk.bf16.mxu0 %vm13286_vm4, %v8921_v17  ;;  %v8925_v57 = vld [vmem:[%s13240_s14 + $0x20] sm:$0xff]  }
 0x6df   : > { %v1928_v28 = vmul.f32 0.01, %v1920_v10  ;;  %v1921_v0 = vadd.f32 %v1909_v34, %v10022_v33  ;;  %vm1924_vm9 = vcmp.ge.f32.partialorder %v1920_v10, 0.0  ;;  %v9007_v33 = vpop.eup %9006  ;;  %13426 = vst [vmem:[#allocation21_spill] sm:$0xff] %v10166_v1 }
 0x6e0   : > { %vm1927_vm11 = vcmp.ge.f32.partialorder %v1923_v41, 0.0  ;;  %v1931_v59 = vmul.f32 0.01, %v1923_v41  ;;  %v1934_v51 = vsel %vm1926_vm8, %v1922_v5, %v1930_v16  ;;  %v8924_v5 = vld [vmem:[%s13240_s14 + $0x8] sm:$0xff]  }
 0x6e1   : > { %vm1925_vm12 = vcmp.ge.f32.partialorder %v1921_v0, 0.0  ;;  %v1929_v27 = vmul.f32 0.01, %v1921_v0  ;;  %v1932_v7 = vsel %vm1924_vm9, %v1920_v10, %v1928_v28 }
 0x6e2   : > { %v1935_v35 = vsel %vm1927_vm11, %v1923_v41, %v1931_v59 }
 0x6e3   : > { %v2259_v29 = vpack.c.bf16 %v1935_v35, %v1934_v51  ;;  %v1933_v36 = vsel %vm1925_vm12, %v1921_v0, %v1929_v27 }
 0x6e4   : > { %v2258_v22 = vpack.c.bf16 %v1933_v36, %v1932_v7 }
 0x6e6   : > { %8651 = vmatprep.mubr.msk.bf16.mxu1 %vm13286_vm4, %v2258_v22 }
 0x6e7   : > { %8652 = vmatmul.mubr.msk.bf16.vlgmr.msra.gmra.mrb[20].mxu1 %vm13286_vm4, %v2259_v29 }
 0x6e8   : > { %8675 = vmatprep.mubr.msk.bf16.mxu1 %vm13286_vm4, %v8925_v57 }
 0x7ba   : > { %v8653_v12 = vpop.f32.mrb[20].mxu1 }
 0x7bb   : > { %v2320_v52 = vmul.f32 %v9007_v33, %v8653_v12  ;;  %v2302_v53 = vpop.f32.mrb[21].mxu1 }
 0x7bc   : > { %v2318_v44 = vmul.f32 %v9007_v33, %v2302_v53  ;;  %v8654_v60 = vpop.f32.mrb[22].mxu1 }
 0x7bd   : > { %v2321_v38 = vmul.f32 %v9007_v33, %v8654_v60  ;;  %v2305_v8 = vpop.f32.mrb[23].mxu1 }
 0x7be   : > { %v2319_v18 = vmul.f32 %v9007_v33, %v2305_v8 }
 0x7bf   : > { %v2334_v54 = vpack.c.bf16 %v2321_v38, %v2320_v52 }
 0x7c0   : > { %v2333_v48 = vpack.c.bf16 %v2319_v18, %v2318_v44 }
 0x7c2   : > { %8655 = vmatprep.subr.bf16.mxu0 %v2333_v48 }
 0x7c3   : > { %8656 = vmatpush3.bf16.msra.mxu0 %v2333_v48 }
 0x7c4   : > { %8657 = vmatprep.subr.bf16.mxu0 %v2334_v54 }
 0x7c7   : > { %8658 = vmatpush3.bf16.msra.mxu0 %v2334_v54 }
 0x7c8   : > { %8663 = vmatprep.subr.bf16.mxu0 %v10157_v31 }
 0x7ca   : > { %8660 = vmatmul.mubr.msk.bf16.vlgmr.msra.gmra.mrb[12].mxu0 %vm13286_vm4, %v8922_v42 }
 0x7cb   : > { %8664 = vmatpush3.bf16.msra.mxu0 %v10157_v31  ;;  %8667 = vmatprep.mubr.msk.bf16.mxu0 %vm13286_vm4, %v8923_v3 }
 0x7cc   : > { %8665 = vmatprep.subr.bf16.mxu0 %v10166_v1 }
 0x7cf   : > { %8666 = vmatpush3.bf16.msra.mxu0 %v10166_v1 }
 0x7d6   : > { %8668 = vmatmul.mubr.msk.bf16.vlgmr.msra.gmra.mrb[12].mxu0 %vm13286_vm4, %v8924_v5 }
 0x8a9   : > { %v8669_v2 = vpop.f32.mrb[12].mxu0 }
 0x8aa   : > { %v2450_v10 = vpop.f32.mrb[13].mxu0  ;;  %v2491_v34 = vadd.f32 %v8669_v2, %v9829_v37 }
 0x8ab   : > { %v2489_v16 = vadd.f32 %v9813_v24, %v2450_v10  ;;  %v8670_v41 = vpop.f32.mrb[14].mxu0 }
 0x8ac   : > { %v2492_v28 = vadd.f32 %v8670_v41, %v9808_v20  ;;  %v2453_v0 = vpop.f32.mrb[15].mxu0  ;;  %v2499_v35 = vmul.f32 0.01, %v2491_v34  ;;  %vm2495_vm2 = vcmp.ge.f32.partialorder %v2491_v34, 0.0  ;;  %v8927_v20 = vld [vmem:[%s13240_s14 + $0x30] sm:$0xff]  }
 0x8ad   : > { %v2497_v59 = vmul.f32 0.01, %v2489_v16  ;;  %v2490_v27 = vadd.f32 %v9795_v13, %v2453_v0  ;;  %vm2493_vm13 = vcmp.ge.f32.partialorder %v2489_v16, 0.0  ;;  %v8926_v13 = vld [vmem:[%s13240_s14 + $0x28] sm:$0xff]  }
 0x8ae   : > { %vm2496_vm14 = vcmp.ge.f32.partialorder %v2492_v28, 0.0  ;;  %v2500_v51 = vmul.f32 0.01, %v2492_v28  ;;  %v2503_v17 = vsel %vm2495_vm2, %v2491_v34, %v2499_v35 }
 0x8af   : > { %vm2494_vm15 = vcmp.ge.f32.partialorder %v2490_v27, 0.0  ;;  %v2498_v7 = vmul.f32 0.01, %v2490_v27  ;;  %v2501_v29 = vsel %vm2493_vm13, %v2489_v16, %v2497_v59 }
 0x8b0   : > { %v2504_v22 = vsel %vm2496_vm14, %v2492_v28, %v2500_v51 }
 0x8b1   : > { %v2502_v36 = vsel %vm2494_vm15, %v2490_v27, %v2498_v7  ;;  %v2511_v24 = vpack.c.bf16 %v2504_v22, %v2503_v17 }
 0x8b2   : > { %v2510_v37 = vpack.c.bf16 %v2502_v36, %v2501_v29 }
 0x8b4   : > { %8671 = vmatprep.subr.bf16.mxu1 %v2510_v37 }
 0x8b5   : > { %8672 = vmatpush3.bf16.msra.mxu1 %v2510_v37 }
 0x8b6   : > { %8673 = vmatprep.subr.bf16.mxu1 %v2511_v24 }
 0x8b9   : > { %8674 = vmatpush3.bf16.msra.mxu1 %v2511_v24  ;;  %v9044_v24 = vld [vmem:[%s9500_s27] sm:$0xff] }
 0x8bc   : > { %8676 = vmatmul.mubr.msk.bf16.vlgmr.msra.gmra.mrb[24].mxu1 %vm13286_vm4, %v8926_v13  ;;  %v9045_v13 = vld [vmem:[%s9500_s27 + $0x8] sm:$0xff] }
 0x8bd   : > { %8683 = vmatprep.mubr.msk.bf16.mxu1 %vm13286_vm4, %v8927_v20  ;;  %v9046_v20 = vld [vmem:[%s9500_s27 + $0x10] sm:$0xff] }
 0x98f   : > { %v8677_v33 = vpop.f32.mrb[24].mxu1 }
 0x990   : > { %v2596_v12 = vadd.f32 %v8677_v33, %v9855_v55  ;;  %v2587_v52 = vpop.f32.mrb[25].mxu1  ;;  %v9047_v33 = vld [vmem:[%s9500_s27 + $0x18] sm:$0xff] }
 0x991   : > { %v2588_v53 = vadd.f32 %v2587_v52, %v9839_v43  ;;  %v8678_v44 = vpop.f32.mrb[26].mxu1  ;;  %v9049_v52 = vld [vmem:[%s9500_s27 + $0x28] sm:$0xff] }
 0x992   : > { %v2608_v60 = vmul.f32 0.01, %v2596_v12  ;;  %v2599_v38 = vadd.f32 %v8678_v44, %v9834_v40  ;;  %v2590_v8 = vpop.f32.mrb[27].mxu1  ;;  %vm2604_vm5 = vcmp.ge.f32.partialorder %v2596_v12, 0.0  ;;  %v8928_v40 = vld [vmem:[%s13240_s14 + $0x38] sm:$0xff]  }
 0x993   : > { %v2606_v18 = vmul.f32 0.01, %v2588_v53  ;;  %v2591_v54 = vadd.f32 %v2590_v8, %v9821_v32  ;;  %vm2602_vm6 = vcmp.ge.f32.partialorder %v2588_v53, 0.0  ;;  %v8929_v32 = vld [vmem:[%s13240_s14 + $0x40] sm:$0xff]   ;;  %v9051_v44 = vld [vmem:[%s9500_s27 + $0x38] sm:$0xff] }
 0x994   : > { %vm2605_vm7 = vcmp.ge.f32.partialorder %v2599_v38, 0.0  ;;  %v2609_v48 = vmul.f32 0.01, %v2599_v38  ;;  %v2612_v25 = vsel %vm2604_vm5, %v2596_v12, %v2608_v60  ;;  %8691 = vmatprep.mubr.msk.bf16.mxu0 %vm13286_vm4, %v8929_v32  ;;  %v9048_v12 = vld [vmem:[%s9500_s27 + $0x20] sm:$0xff]  ;;  %v8931_v60 = vld [vmem:[%s13240_s14 + $0x50] sm:$0xff]  }
 0x995   : > { %vm2603_vm8 = vcmp.ge.f32.partialorder %v2591_v54, 0.0  ;;  %v2607_v61 = vmul.f32 0.01, %v2591_v54  ;;  %v2610_v55 = vsel %vm2602_vm6, %v2588_v53, %v2606_v18  ;;  %v9050_v53 = vld [vmem:[%s9500_s27 + $0x30] sm:$0xff]  ;;  %s7961_s27 = sshll.u32 %s941_s0, 4 }
 0x996   : > { %v2613_v9 = vsel %vm2605_vm7, %v2599_v38, %v2609_v48 }
 0x997   : > { %v2611_v63 = vsel %vm2603_vm8, %v2591_v54, %v2607_v61  ;;  %v2620_v42 = vpack.c.bf16 %v2613_v9, %v2612_v25 }
 0x998   : > { %v2619_v43 = vpack.c.bf16 %v2611_v63, %v2610_v55 }
 0x99a   : > { %8679 = vmatprep.subr.bf16.mxu1 %v2619_v43 }
 0x99b   : > { %8680 = vmatpush3.bf16.msra.mxu1 %v2619_v43 }
 0x99c   : > { %8681 = vmatprep.subr.bf16.mxu1 %v2620_v42 }
 0x99f   : > { %8682 = vmatpush3.bf16.msra.mxu1 %v2620_v42 }
 0x9a2   : > { %8684 = vmatmul.mubr.msk.bf16.vlgmr.msra.gmra.mrb[28].mxu1 %vm13286_vm4, %v8928_v40 }
 0x9a3   : > { %8699 = vmatprep.mubr.msk.bf16.mxu1 %vm13286_vm4, %v8931_v60 }
 0xa75   : > { %v8685_v3 = vpop.f32.mrb[28].mxu1 }
 0xa76   : > { %v2705_v5 = vadd.f32 %v8685_v3, %v9881_v11  ;;  %v2696_v57 = vpop.f32.mrb[29].mxu1 }
 0xa77   : > { %v2697_v2 = vadd.f32 %v2696_v57, %v9865_v62  ;;  %v8686_v10 = vpop.f32.mrb[30].mxu1 }
 0xa78   : > { %v2708_v34 = vadd.f32 %v8686_v10, %v9860_v58  ;;  %v2699_v16 = vpop.f32.mrb[31].mxu1  ;;  %v2713_v41 = vadd.f32 %v2705_v5, %v2503_v17  ;;  %v8930_v17 = vld [vmem:[%s13240_s14 + $0x48] sm:$0xff]  }
 0xa79   : > { %v2711_v28 = vadd.f32 %v2697_v2, %v2501_v29  ;;  %v2700_v0 = vadd.f32 %v2699_v16, %v9847_v49 }
 0xa7a   : > { %v2714_v59 = vadd.f32 %v2708_v34, %v2504_v22  ;;  %v2721_v7 = vmul.f32 0.01, %v2713_v41  ;;  %vm2717_vm13 = vcmp.ge.f32.partialorder %v2713_v41, 0.0  ;;  %v2957_v22 = vld [vmem:[%s975_s13] sm:$0x7]  ;;  %s7752_s13 = scalar_lea.sflag [#allocation4], %s941_s0 }
 0xa7b   : > { %v2719_v27 = vmul.f32 0.01, %v2711_v28  ;;  %v2712_v51 = vadd.f32 %v2700_v0, %v2502_v36  ;;  %vm2715_vm9 = vcmp.ge.f32.partialorder %v2711_v28, 0.0  ;;  %v3122_v38 = vmul.f32 %v2957_v22, %v2957_v22 }
 0xa7c   : > { %vm2718_vm11 = vcmp.ge.f32.partialorder %v2714_v59, 0.0  ;;  %v2722_v35 = vmul.f32 0.01, %v2714_v59  ;;  %v10217_v29 = vsel %vm2717_vm13, %v2713_v41, %v2721_v7 }
 0xa7d   : > { %vm2716_vm12 = vcmp.ge.f32.partialorder %v2712_v51, 0.0  ;;  %v2720_v11 = vmul.f32 0.01, %v2712_v51  ;;  %v10209_v62 = vsel %vm2715_vm9, %v2711_v28, %v2719_v27  ;;  %v3123_v8 = vsel %vm1028_vm0, %v3122_v38, 0.0  ;;  %v13428_v38 = vld [vmem:[#allocation15_spill] sm:$0xff] }
 0xa7e   : > { %v10213_v37 = vsel %vm2718_vm11, %v2714_v59, %v2722_v35  ;;  %v3124_v18 = vrot.slane %v3123_v8, 4 }
 0xa7f   : > { %v10211_v58 = vsel %vm2716_vm12, %v2712_v51, %v2720_v11  ;;  %v2733_v36 = vpack.c.bf16 %v10213_v37, %v10217_v29 }
 0xa80   : > { %v2732_v49 = vpack.c.bf16 %v10211_v58, %v10209_v62  ;;  %v3125_v54 = vadd.f32 %v3124_v18, %v3123_v8 }
 0xa82   : > { %8687 = vmatprep.subr.bf16.mxu0 %v2732_v49  ;;  %v3126_v48 = vrot.slane %v3125_v54, 2 }
 0xa83   : > { %8688 = vmatpush3.bf16.msra.mxu0 %v2732_v49 }
 0xa84   : > { %8689 = vmatprep.subr.bf16.mxu0 %v2733_v36  ;;  %v3127_v61 = vadd.f32 %v3126_v48, %v3125_v54 }
 0xa86   : > { %v3128_v43 = vrot.slane %v3127_v61, 1 }
 0xa87   : > { %8690 = vmatpush3.bf16.msra.mxu0 %v2733_v36 }
 0xa88   : > { %8703 = vmatprep.subr.msk.mxu0 %vm1028_vm0, %v2957_v22  ;;  %v3129_v34 = vadd.f32 %v3128_v43, %v3127_v61 }
 0xa8a   : > { %8692 = vmatmul.mubr.msk.bf16.vlgmr.msra.gmra.mrb[16].mxu0 %vm13286_vm4, %v8930_v17  ;;  %v3133_v49 = vadd.f32 %v3129_v34, %v9943_v21  ;;  %v3135_v36 = vadd.f32 %v3129_v34, %v9956_v47  ;;  %v3137_v21 = vadd.f32 %v3129_v34, %v9962_v56  ;;  %v3136_v8 = vadd.f32 %v3129_v34, %v13428_v38 }
 0xa8b   : > { %8704 = vmatpush3.msk.msra.mxu0 %vm1028_vm0, %v2957_v22  ;;  %8705 = vmatprep.mubr.msk.f32.mxu0 %vm1021_vm1, %v9044_v24  ;;  %v8932_v24 = vld [vmem:[%s13240_s14 + $0x58] sm:$0xff]  }
 0xa92   : > { %8706 = vmatmul.mubr.msk.f32.vlgmr.msra.gmra.mrb[20].mxu0 %vm1021_vm1, %v9045_v13  ;;  %v3132_v13 = vadd.f32 %v3129_v34, %v9933_v6 }
 0xa93   : > { %8708 = vmatprep.mubr.msk.f32.mxu0 %vm1021_vm1, %v9046_v20 }
 0xa96   : > { %8709 = vmatmul.mubr.msk.f32.gmra.mrb[22].mxu0 %vm1021_vm1, %v9047_v33 }
 0xa97   : > { %8711 = vmatprep.mubr.msk.f32.mxu0 %vm1021_vm1, %v9048_v12 }
 0xa9a   : > { %8712 = vmatmul.mubr.msk.f32.gmra.mrb[24].mxu0 %vm1021_vm1, %v9049_v52 }
 0xa9b   : > { %8714 = vmatprep.mubr.msk.f32.mxu0 %vm1021_vm1, %v9050_v53 }
 0xa9e   : > { %8715 = vmatmul.mubr.msk.f32.gmra.mrb[26].mxu0 %vm1021_vm1, %v9051_v44 }
 0xb5d   : > { %v8693_v25 = vpop.f32.mrb[16].mxu0 }
 0xb5e   : > { %v2818_v9 = vadd.f32 %v8693_v25, %v9907_v39  ;;  %v2809_v55 = vpop.f32.mrb[17].mxu0 }
 0xb5f   : > { %v2810_v63 = vadd.f32 %v2809_v55, %v9891_v19  ;;  %v8694_v42 = vpop.f32.mrb[18].mxu0 }
 0xb60   : > { %v2830_v40 = vmul.f32 0.01, %v2818_v9  ;;  %v2821_v32 = vadd.f32 %v8694_v42, %v9886_v14  ;;  %v2812_v3 = vpop.f32.mrb[19].mxu0  ;;  %vm2826_vm14 = vcmp.ge.f32.partialorder %v2818_v9, 0.0  ;;  %v3131_v14 = vadd.f32 %v3129_v34, %v9899_v30 }
 0xb61   : > { %v2828_v5 = vmul.f32 0.01, %v2810_v63  ;;  %v2813_v57 = vadd.f32 %v2812_v3, %v9873_v4  ;;  %vm2824_vm15 = vcmp.ge.f32.partialorder %v2810_v63, 0.0  ;;  %v3130_v4 = vadd.f32 %v3129_v34, %v9917_v50 }
 0xb62   : > { %vm2827_vm2 = vcmp.ge.f32.partialorder %v2821_v32, 0.0  ;;  %v2831_v2 = vmul.f32 0.01, %v2821_v32  ;;  %v2834_v39 = vsel %vm2826_vm14, %v2818_v9, %v2830_v40  ;;  %v3134_v30 = vadd.f32 %v3129_v34, %v9912_v46 }
 0xb63   : > { %vm2825_vm5 = vcmp.ge.f32.partialorder %v2813_v57, 0.0  ;;  %v2829_v10 = vmul.f32 0.01, %v2813_v57  ;;  %v2832_v41 = vsel %vm2824_vm15, %v2810_v63, %v2828_v5 }
 0xb64   : > { %v2835_v16 = vsel %vm2827_vm2, %v2821_v32, %v2831_v2 }
 0xb65   : > { %v2833_v19 = vsel %vm2825_vm5, %v2813_v57, %v2829_v10  ;;  %v2842_v28 = vpack.c.bf16 %v2835_v16, %v2834_v39  ;;  %v8707_v0 = vpop.f32.mrb[20].mxu0 }
 0xb66   : > { %v2841_v59 = vpack.c.bf16 %v2833_v19, %v2832_v41  ;;  %v3051_v27 = vpop.f32.mrb[21].mxu0  ;;  %v3139_v51 = vmul.f32 2.0, %v8707_v0 }
 0xb67   : > { %v3138_v35 = vmul.f32 2.0, %v3051_v27  ;;  %v10293_v27 = vadd.s32 32, %v9487_v23 }
 0xb68   : > { %8695 = vmatprep.subr.bf16.mxu1 %v2841_v59  ;;  %v3147_v22 = vsub.f32 %v3131_v14, %v3139_v51  ;;  %v10296_v14 = vadd.s32 40, %v9487_v23  ;;  %v10299_v51 = vadd.s32 48, %v9487_v23 }
 0xb69   : > { %8696 = vmatpush3.bf16.msra.mxu1 %v2841_v59  ;;  %v8710_v7 = vpop.f32.mrb[22].mxu0  ;;  %v3146_v50 = vsub.f32 %v3130_v4, %v3138_v35  ;;  %v10302_v4 = vadd.s32 56, %v9487_v23 }
 0xb6a   : > { %8697 = vmatprep.subr.bf16.mxu1 %v2842_v28  ;;  %v3061_v11 = vpop.f32.mrb[23].mxu0  ;;  %v3141_v17 = vmul.f32 2.0, %v8710_v7  ;;  %v10266_v47 = vmax.f32 %v3147_v22, 0.0 }
 0xb6b   : > { %v3140_v20 = vmul.f32 2.0, %v3061_v11  ;;  %v10270_v46 = vmax.f32 %v3146_v50, 0.0 }
 0xb6c   : > { %v3149_v44 = vsub.f32 %v3133_v49, %v3141_v17 }
 0xb6d   : > { %8698 = vmatpush3.bf16.msra.mxu1 %v2842_v28  ;;  %v8713_v33 = vpop.f32.mrb[24].mxu0  ;;  %v3148_v6 = vsub.f32 %v3132_v13, %v3140_v20 }
 0xb6e   : > { %v3143_v12 = vmul.f32 2.0, %v8713_v33  ;;  %v3071_v52 = vpop.f32.mrb[25].mxu0  ;;  %v10276_v55 = vmax.f32 %v3149_v44, 0.0 }
 0xb6f   : > { %v3142_v53 = vmul.f32 2.0, %v3071_v52  ;;  %v10280_v43 = vmax.f32 %v3148_v6, 0.0 }
 0xb70   : > { %v3151_v60 = vsub.f32 %v3135_v36, %v3143_v12  ;;  %8700 = vmatmul.mubr.msk.bf16.vlgmr.msra.gmra.mrb[32].mxu1 %vm13286_vm4, %v8932_v24 }
 0xb71   : > { %v3150_v18 = vsub.f32 %v3134_v30, %v3142_v53  ;;  %v8716_v54 = vpop.f32.mrb[26].mxu0 }
 0xb72   : > { %v10272_v48 = vmax.f32 %v3151_v60, 0.0  ;;  %v3145_v61 = vmul.f32 2.0, %v8716_v54  ;;  %v3081_v25 = vpop.f32.mrb[27].mxu0 }
 0xb73   : > { %v10274_v9 = vmax.f32 %v3150_v18, 0.0  ;;  %v3144_v56 = vmul.f32 2.0, %v3081_v25 }
 0xb74   : > { %v3167_v63 = vmin.f32 %v10266_v47, %v10272_v48  ;;  %v3153_v42 = vsub.f32 %v3137_v21, %v3145_v61 }
 0xb75   : > { %v3166_v40 = vmin.f32 %v10270_v46, %v10274_v9  ;;  %v3152_v32 = vsub.f32 %v3136_v8, %v3144_v56 }
 0xb76   : > { %v10284_v3 = vmax.f32 %v3153_v42, 0.0 }
 0xb77   : > { %v3170_v5 = vmin.f32 %v3166_v40, %v3167_v63  ;;  %v10286_v57 = vmax.f32 %v3152_v32, 0.0 }
 0xb78   : > { %v3169_v2 = vmin.f32 %v10276_v55, %v10284_v3 }
 0xb79   : > { %v3168_v10 = vmin.f32 %v10280_v43, %v10286_v57 }
 0xb7b   : > { %v3171_v34 = vmin.f32 %v3168_v10, %v3169_v2 }
 0xb7d   : > { %v3172_v39 = vmin.f32 %v3170_v5, %v3171_v34 }
 0xb7f   : > { %v3173_v16 = vrot.slane %v3172_v39, 4 }
 0xb81   : > { %v3174_v41 = vmin.f32 %v3172_v39, %v3173_v16 }
 0xb83   : > { %v3175_v19 = vrot.slane %v3174_v41, 2 }
 0xb85   : > { %v3176_v28 = vmin.f32 %v3174_v41, %v3175_v19 }
 0xb87   : > { %v3177_v0 = vrot.slane %v3176_v28, 1 }
 0xb89   : > { %v3178_v59 = vmin.f32 %v3176_v28, %v3177_v0 }
 0xb8b   : > { %vm3179_vm6 = vcmp.eq.f32.partialorder %v10270_v46, %v3178_v59  ;;  %vm3180_vm7 = vcmp.eq.f32.partialorder %v10266_v47, %v3178_v59  ;;  %vm3181_vm8 = vcmp.eq.f32.partialorder %v10280_v43, %v3178_v59  ;;  %vm3182_vm9 = vcmp.eq.f32.partialorder %v10276_v55, %v3178_v59 }
 0xb8c   : > { %vm3183_vm11 = vcmp.eq.f32.partialorder %v10274_v9, %v3178_v59  ;;  %vm3184_vm12 = vcmp.eq.f32.partialorder %v10272_v48, %v3178_v59  ;;  %vm3185_vm13 = vcmp.eq.f32.partialorder %v10286_v57, %v3178_v59  ;;  %vm3186_vm14 = vcmp.eq.f32.partialorder %v10284_v3, %v3178_v59 }
 0xb8d   : > { %v3187_v35 = vsel %vm3179_vm6, %v9487_v23, 64  ;;  %v3188_v7 = vsel %vm3180_vm7, %v9490_v26, 64  ;;  %v3189_v11 = vsel %vm3181_vm8, %v10074_v15, 64  ;;  %v3190_v49 = vsel %vm3182_vm9, %v10077_v45, 64 }
 0xb8e   : > { %v3191_v36 = vsel %vm3183_vm11, %v10293_v27, 64  ;;  %v3192_v22 = vsel %vm3184_vm12, %v10296_v14, 64  ;;  %v3193_v17 = vsel %vm3185_vm13, %v10299_v51, 64  ;;  %v3194_v24 = vsel %vm3186_vm14, %v10302_v4, 64 }
 0xb8f   : > { %vm3195_vm15 = vcmp.lt.s32.totalorder %v3187_v35, %v3191_v36  ;;  %vm3197_vm2 = vcmp.lt.s32.totalorder %v3188_v7, %v3192_v22  ;;  %vm3199_vm5 = vcmp.lt.s32.totalorder %v3189_v11, %v3193_v17  ;;  %vm3201_vm3 = vcmp.lt.s32.totalorder %v3190_v49, %v3194_v24 }
 0xb90   : > { %v3196_v30 = vsel %vm3195_vm15, %v3187_v35, %v3191_v36  ;;  %v3198_v13 = vsel %vm3197_vm2, %v3188_v7, %v3192_v22  ;;  %v3200_v50 = vsel %vm3199_vm5, %v3189_v11, %v3193_v17  ;;  %v3202_v20 = vsel %vm3201_vm3, %v3190_v49, %v3194_v24 }
 0xb91   : > { %vm3203_vm6 = vcmp.lt.s32.totalorder %v3196_v30, %v3198_v13  ;;  %vm3205_vm7 = vcmp.lt.s32.totalorder %v3200_v50, %v3202_v20  ;;  %v3226_v21 = vadd.f32 1e-08, %v3178_v59 }
 0xb92   : > { %v3204_v33 = vsel %vm3203_vm6, %v3196_v30, %v3198_v13  ;;  %v3206_v12 = vsel %vm3205_vm7, %v3200_v50, %v3202_v20 }
 0xb93   : > { %vm3207_vm8 = vcmp.lt.s32.totalorder %v3204_v33, %v3206_v12  ;;  %9008 = vrcp.f32 %v3226_v21 }
 0xb94   : > { %v3208_v52 = vsel %vm3207_vm8, %v3204_v33, %v3206_v12 }
 0xb95   : > { %v3209_v53 = vrot.slane %v3208_v52, 4 }
 0xb97   : > { %vm3210_vm9 = vcmp.lt.s32.totalorder %v3208_v52, %v3209_v53 }
 0xb98   : > { %v3211_v44 = vsel %vm3210_vm9, %v3208_v52, %v3209_v53 }
 0xb99   : > { %v3212_v60 = vrot.slane %v3211_v44, 2 }
 0xb9b   : > { %vm3213_vm11 = vcmp.lt.s32.totalorder %v3211_v44, %v3212_v60 }
 0xb9c   : > { %v3214_v38 = vsel %vm3213_vm11, %v3211_v44, %v3212_v60 }
 0xb9d   : > { %v3215_v8 = vrot.slane %v3214_v38, 1  ;;  %v10328_v18 = vpop.eup %9008 }
 0xb9f   : > { %vm3216_vm12 = vcmp.lt.s32.totalorder %v3214_v38, %v3215_v8 }
 0xba0   : > { %v3217_v6 = vsel %vm3216_vm12, %v3214_v38, %v3215_v8 }
 0xba1   : > { %vm3218_vm13 = vcmp.eq.s32.totalorder %v9487_v23, %v3217_v6  ;;  %vm3219_vm3 = vcmp.eq.s32.totalorder %v9490_v26, %v3217_v6  ;;  %vm3220_vm14 = vcmp.eq.s32.totalorder %v10074_v15, %v3217_v6  ;;  %vm3221_vm15 = vcmp.eq.s32.totalorder %v10077_v45, %v3217_v6 }
 0xba2   : > { %vm3222_vm2 = vcmp.eq.s32.totalorder %v10293_v27, %v3217_v6  ;;  %vm3223_vm5 = vcmp.eq.s32.totalorder %v10296_v14, %v3217_v6  ;;  %vm3224_vm6 = vcmp.eq.s32.totalorder %v10299_v51, %v3217_v6  ;;  %vm3225_vm7 = vcmp.eq.s32.totalorder %v10302_v4, %v3217_v6 }
 0xba3   : > { %v10333_v54 = vsel %vm3218_vm13, 1e+30, %v10270_v46  ;;  %v10338_v61 = vsel %vm3219_vm3, 1e+30, %v10266_v47  ;;  %v10343_v25 = vsel %vm3220_vm14, 1e+30, %v10280_v43 }
 0xba4   : > { %v10348_v56 = vsel %vm3221_vm15, 1e+30, %v10276_v55  ;;  %v10353_v46 = vsel %vm3222_vm2, 1e+30, %v10274_v9  ;;  %v10358_v47 = vsel %vm3223_vm5, 1e+30, %v10272_v48 }
 0xba5   : > { %v10363_v63 = vsel %vm3224_vm6, 1e+30, %v10286_v57  ;;  %v10368_v55 = vsel %vm3225_vm7, 1e+30, %v10284_v3  ;;  %v3253_v42 = vmin.f32 %v10333_v54, %v10353_v46  ;;  %v3254_v9 = vmin.f32 %v10338_v61, %v10358_v47 }
 0xba6   : > { %v3255_v48 = vmin.f32 %v10343_v25, %v10363_v63  ;;  %v3256_v43 = vmin.f32 %v10348_v56, %v10368_v55  ;;  %v10381_v40 = vsel %vm3218_vm13, %v10328_v18, 0.0  ;;  %v10386_v32 = vsel %vm3219_vm3, %v10328_v18, 0.0 }
 0xba7   : > { %v3257_v3 = vmin.f32 %v3253_v42, %v3254_v9  ;;  %v10391_v5 = vsel %vm3220_vm14, %v10328_v18, 0.0  ;;  %v10396_v57 = vsel %vm3221_vm15, %v10328_v18, 0.0  ;;  %v10401_v2 = vsel %vm3222_vm2, %v10328_v18, 0.0 }
 0xba8   : > { %v3258_v10 = vmin.f32 %v3255_v48, %v3256_v43  ;;  %v10406_v34 = vsel %vm3223_vm5, %v10328_v18, 0.0  ;;  %v10411_v39 = vsel %vm3224_vm6, %v10328_v18, 0.0  ;;  %v10416_v16 = vsel %vm3225_vm7, %v10328_v18, 0.0 }
 0xbaa   : > { %v3259_v41 = vmin.f32 %v3257_v3, %v3258_v10 }
 0xbac   : > { %v3260_v19 = vrot.slane %v3259_v41, 4 }
 0xbae   : > { %v3261_v28 = vmin.f32 %v3259_v41, %v3260_v19 }
 0xbb0   : > { %v3262_v0 = vrot.slane %v3261_v28, 2 }
 0xbb2   : > { %v3263_v59 = vmin.f32 %v3261_v28, %v3262_v0 }
 0xbb4   : > { %v3264_v35 = vrot.slane %v3263_v59, 1 }
 0xbb6   : > { %v3265_v7 = vmin.f32 %v3263_v59, %v3264_v35 }
 0xbb8   : > { %vm3266_vm8 = vcmp.eq.f32.partialorder %v10333_v54, %v3265_v7  ;;  %vm3267_vm9 = vcmp.eq.f32.partialorder %v10338_v61, %v3265_v7  ;;  %vm3268_vm11 = vcmp.eq.f32.partialorder %v10343_v25, %v3265_v7  ;;  %vm3269_vm12 = vcmp.eq.f32.partialorder %v10348_v56, %v3265_v7 }
 0xbb9   : > { %vm3270_vm13 = vcmp.eq.f32.partialorder %v10353_v46, %v3265_v7  ;;  %vm3271_vm3 = vcmp.eq.f32.partialorder %v10358_v47, %v3265_v7  ;;  %vm3272_vm14 = vcmp.eq.f32.partialorder %v10363_v63, %v3265_v7  ;;  %vm3273_vm15 = vcmp.eq.f32.partialorder %v10368_v55, %v3265_v7 }
 0xbba   : > { %v3274_v11 = vsel %vm3266_vm8, %v9487_v23, 64  ;;  %v3275_v49 = vsel %vm3267_vm9, %v9490_v26, 64  ;;  %v3276_v36 = vsel %vm3268_vm11, %v10074_v15, 64  ;;  %v3277_v22 = vsel %vm3269_vm12, %v10077_v45, 64 }
 0xbbb   : > { %v3278_v17 = vsel %vm3270_vm13, %v10293_v27, 64  ;;  %v3279_v24 = vsel %vm3271_vm3, %v10296_v14, 64  ;;  %v3280_v30 = vsel %vm3272_vm14, %v10299_v51, 64  ;;  %v3281_v13 = vsel %vm3273_vm15, %v10302_v4, 64 }
 0xbbc   : > { %vm3282_vm2 = vcmp.lt.s32.totalorder %v3274_v11, %v3278_v17  ;;  %vm3284_vm5 = vcmp.lt.s32.totalorder %v3275_v49, %v3279_v24  ;;  %vm3286_vm6 = vcmp.lt.s32.totalorder %v3276_v36, %v3280_v30  ;;  %vm3288_vm7 = vcmp.lt.s32.totalorder %v3277_v22, %v3281_v13 }
 0xbbd   : > { %v3283_v50 = vsel %vm3282_vm2, %v3274_v11, %v3278_v17  ;;  %v3285_v20 = vsel %vm3284_vm5, %v3275_v49, %v3279_v24  ;;  %v3287_v33 = vsel %vm3286_vm6, %v3276_v36, %v3280_v30  ;;  %v3289_v12 = vsel %vm3288_vm7, %v3277_v22, %v3281_v13 }
 0xbbe   : > { %vm3290_vm8 = vcmp.lt.s32.totalorder %v3283_v50, %v3285_v20  ;;  %vm3292_vm9 = vcmp.lt.s32.totalorder %v3287_v33, %v3289_v12  ;;  %v3313_v52 = vadd.f32 1e-08, %v3265_v7 }
 0xbbf   : > { %v3291_v53 = vsel %vm3290_vm8, %v3283_v50, %v3285_v20  ;;  %v3293_v21 = vsel %vm3292_vm9, %v3287_v33, %v3289_v12 }
 0xbc0   : > { %vm3294_vm11 = vcmp.lt.s32.totalorder %v3291_v53, %v3293_v21  ;;  %9010 = vrcp.f32 %v3313_v52 }
 0xbc1   : > { %v3295_v44 = vsel %vm3294_vm11, %v3291_v53, %v3293_v21 }
 0xbc2   : > { %v3296_v60 = vrot.slane %v3295_v44, 4 }
 0xbc4   : > { %vm3297_vm12 = vcmp.lt.s32.totalorder %v3295_v44, %v3296_v60 }
 0xbc5   : > { %v3298_v38 = vsel %vm3297_vm12, %v3295_v44, %v3296_v60 }
 0xbc6   : > { %v3299_v8 = vrot.slane %v3298_v38, 2 }
 0xbc8   : > { %vm3300_vm13 = vcmp.lt.s32.totalorder %v3298_v38, %v3299_v8 }
 0xbc9   : > { %v3301_v6 = vsel %vm3300_vm13, %v3298_v38, %v3299_v8 }
 0xbca   : > { %v9011_v42 = vpop.eup %9010  ;;  %v3302_v9 = vrot.slane %v3301_v6, 1 }
 0xbcb   : > { %v10435_v48 = vadd.f32 %v9011_v42, %v10328_v18 }
 0xbcc   : > { %vm3303_vm3 = vcmp.lt.s32.totalorder %v3301_v6, %v3302_v9 }
 0xbcd   : > { %v3304_v43 = vsel %vm3303_vm3, %v3301_v6, %v3302_v9 }
 0xbce   : > { %vm3307_vm14 = vcmp.eq.s32.totalorder %v10074_v15, %v3304_v43  ;;  %vm3308_vm15 = vcmp.eq.s32.totalorder %v10077_v45, %v3304_v43  ;;  %vm3311_vm2 = vcmp.eq.s32.totalorder %v10299_v51, %v3304_v43  ;;  %vm3312_vm5 = vcmp.eq.s32.totalorder %v10302_v4, %v3304_v43 }
 0xbcf   : > { %v3334_v3 = vsel %vm3307_vm14, 1e+30, %v10343_v25  ;;  %v3335_v10 = vsel %vm3308_vm15, 1e+30, %v10348_v56  ;;  %v3338_v18 = vsel %vm3311_vm2, 1e+30, %v10363_v63  ;;  %vm3305_vm6 = vcmp.eq.s32.totalorder %v9487_v23, %v3304_v43 }
 0xbd0   : > { %v3339_v41 = vsel %vm3312_vm5, 1e+30, %v10368_v55  ;;  %v3342_v19 = vmin.f32 %v3334_v3, %v3338_v18  ;;  %vm3306_vm7 = vcmp.eq.s32.totalorder %v9490_v26, %v3304_v43  ;;  %vm3309_vm8 = vcmp.eq.s32.totalorder %v10293_v27, %v3304_v43 }
 0xbd1   : > { %v3343_v25 = vmin.f32 %v3335_v10, %v3339_v41  ;;  %vm3310_vm9 = vcmp.eq.s32.totalorder %v10296_v14, %v3304_v43  ;;  %v3316_v28 = vsel %vm3305_vm6, %v9011_v42, 0.0  ;;  %v3317_v56 = vsel %vm3306_vm7, %v9011_v42, 0.0 }
 0xbd2   : > { %v10458_v0 = vadd.f32 %v3316_v28, %v10381_v40  ;;  %v10461_v63 = vadd.f32 %v3317_v56, %v10386_v32  ;;  %v3332_v59 = vsel %vm3305_vm6, 1e+30, %v10333_v54  ;;  %v3333_v55 = vsel %vm3306_vm7, 1e+30, %v10338_v61 }
 0xbd3   : > { %v3345_v35 = vmin.f32 %v3342_v19, %v3343_v25  ;;  %v3336_v7 = vsel %vm3309_vm8, 1e+30, %v10353_v46  ;;  %v3337_v11 = vsel %vm3310_vm9, 1e+30, %v10358_v47  ;;  %v3318_v40 = vsel %vm3307_vm14, %v9011_v42, 0.0 }
 0xbd4   : > { %v3340_v49 = vmin.f32 %v3332_v59, %v3336_v7  ;;  %v3341_v36 = vmin.f32 %v3333_v55, %v3337_v11  ;;  %v3319_v32 = vsel %vm3308_vm15, %v9011_v42, 0.0  ;;  %v10476_v54 = vadd.f32 %v3318_v40, %v10391_v5 }
 0xbd5   : > { %v10479_v61 = vadd.f32 %v3319_v32, %v10396_v57  ;;  %v3320_v46 = vsel %vm3309_vm8, %v9011_v42, 0.0  ;;  %v3321_v47 = vsel %vm3310_vm9, %v9011_v42, 0.0  ;;  %v3322_v22 = vsel %vm3311_vm2, %v9011_v42, 0.0 }
 0xbd6   : > { %v3344_v17 = vmin.f32 %v3340_v49, %v3341_v36  ;;  %v10488_v24 = vadd.f32 %v3320_v46, %v10401_v2  ;;  %v10491_v30 = vadd.f32 %v3321_v47, %v10406_v34  ;;  %v3323_v5 = vsel %vm3312_vm5, %v9011_v42, 0.0 }
 0xbd7   : > { %v10496_v57 = vadd.f32 %v3322_v22, %v10411_v39  ;;  %v10499_v13 = vadd.f32 %v3323_v5, %v10416_v16 }
 0xbd8   : > { %v3346_v50 = vmin.f32 %v3344_v17, %v3345_v35 }
 0xbda   : > { %v3347_v20 = vrot.slane %v3346_v50, 4 }
 0xbdc   : > { %v3348_v33 = vmin.f32 %v3346_v50, %v3347_v20 }
 0xbde   : > { %v3349_v12 = vrot.slane %v3348_v33, 2 }
 0xbe0   : > { %v3350_v52 = vmin.f32 %v3348_v33, %v3349_v12 }
 0xbe2   : > { %v3351_v53 = vrot.slane %v3350_v52, 1 }
 0xbe4   : > { %v3352_v2 = vmin.f32 %v3350_v52, %v3351_v53 }
 0xbe6   : > { %vm3353_vm11 = vcmp.eq.f32.partialorder %v3332_v59, %v3352_v2  ;;  %vm3354_vm12 = vcmp.eq.f32.partialorder %v3333_v55, %v3352_v2  ;;  %vm3355_vm13 = vcmp.eq.f32.partialorder %v3334_v3, %v3352_v2  ;;  %vm3356_vm3 = vcmp.eq.f32.partialorder %v3335_v10, %v3352_v2 }
 0xbe7   : > { %vm3357_vm14 = vcmp.eq.f32.partialorder %v3336_v7, %v3352_v2  ;;  %vm3358_vm15 = vcmp.eq.f32.partialorder %v3337_v11, %v3352_v2  ;;  %vm3359_vm2 = vcmp.eq.f32.partialorder %v3338_v18, %v3352_v2  ;;  %vm3360_vm5 = vcmp.eq.f32.partialorder %v3339_v41, %v3352_v2 }
 0xbe8   : > { %v3361_v34 = vsel %vm3353_vm11, %v9487_v23, 64  ;;  %v3362_v39 = vsel %vm3354_vm12, %v9490_v26, 64  ;;  %v3363_v16 = vsel %vm3355_vm13, %v10074_v15, 64  ;;  %v3364_v21 = vsel %vm3356_vm3, %v10077_v45, 64 }
 0xbe9   : > { %v3365_v44 = vsel %vm3357_vm14, %v10293_v27, 64  ;;  %v3366_v60 = vsel %vm3358_vm15, %v10296_v14, 64  ;;  %v3367_v38 = vsel %vm3359_vm2, %v10299_v51, 64  ;;  %v3368_v8 = vsel %vm3360_vm5, %v10302_v4, 64 }
 0xbea   : > { %vm3369_vm6 = vcmp.lt.s32.totalorder %v3361_v34, %v3365_v44  ;;  %vm3371_vm7 = vcmp.lt.s32.totalorder %v3362_v39, %v3366_v60  ;;  %vm3373_vm8 = vcmp.lt.s32.totalorder %v3363_v16, %v3367_v38  ;;  %vm3375_vm9 = vcmp.lt.s32.totalorder %v3364_v21, %v3368_v8 }
 0xbeb   : > { %v3370_v6 = vsel %vm3369_vm6, %v3361_v34, %v3365_v44  ;;  %v3372_v42 = vsel %vm3371_vm7, %v3362_v39, %v3366_v60  ;;  %v3374_v9 = vsel %vm3373_vm8, %v3363_v16, %v3367_v38  ;;  %v3376_v43 = vsel %vm3375_vm9, %v3364_v21, %v3368_v8  ;;  %v2866_v34 = vpop.permute.xlu1 %2865  ;;  %v13430_v39 = vld [vmem:[#allocation16_spill] sm:$0xff] }
 0xbec   : > { %vm3377_vm11 = vcmp.lt.s32.totalorder %v3370_v6, %v3372_v42  ;;  %vm3379_vm12 = vcmp.lt.s32.totalorder %v3374_v9, %v3376_v43  ;;  %v3400_v3 = vadd.f32 1e-08, %v3352_v2 }
 0xbed   : > { %v3378_v10 = vsel %vm3377_vm11, %v3370_v6, %v3372_v42  ;;  %v3380_v18 = vsel %vm3379_vm12, %v3374_v9, %v3376_v43 }
 0xbee   : > { %vm3381_vm13 = vcmp.lt.s32.totalorder %v3378_v10, %v3380_v18  ;;  %9012 = vrcp.f32 %v3400_v3 }
 0xbef   : > { %v3382_v41 = vsel %vm3381_vm13, %v3378_v10, %v3380_v18 }
 0xbf0   : > { %v3383_v19 = vrot.slane %v3382_v41, 4 }
 0xbf2   : > { %vm3384_vm3 = vcmp.lt.s32.totalorder %v3382_v41, %v3383_v19 }
 0xbf3   : > { %v3385_v25 = vsel %vm3384_vm3, %v3382_v41, %v3383_v19 }
 0xbf4   : > { %v3386_v28 = vrot.slane %v3385_v25, 2 }
 0xbf6   : > { %vm3387_vm14 = vcmp.lt.s32.totalorder %v3385_v25, %v3386_v28 }
 0xbf7   : > { %v3388_v56 = vsel %vm3387_vm14, %v3385_v25, %v3386_v28 }
 0xbf8   : > { %v9013_v59 = vpop.eup %9012  ;;  %v3389_v55 = vrot.slane %v3388_v56, 1 }
 0xbf9   : > { %v10510_v35 = vadd.f32 %v9013_v59, %v10435_v48 }
 0xbfa   : > { %vm3390_vm15 = vcmp.lt.s32.totalorder %v3388_v56, %v3389_v55 }
 0xbfb   : > { %v3391_v7 = vsel %vm3390_vm15, %v3388_v56, %v3389_v55  ;;  %9014 = vrcp.f32 %v10510_v35 }
 0xbfc   : > { %vm3392_vm2 = vcmp.eq.s32.totalorder %v9487_v23, %v3391_v7  ;;  %vm3393_vm5 = vcmp.eq.s32.totalorder %v9490_v26, %v3391_v7  ;;  %vm3394_vm6 = vcmp.eq.s32.totalorder %v10074_v15, %v3391_v7  ;;  %vm3395_vm7 = vcmp.eq.s32.totalorder %v10077_v45, %v3391_v7 }
 0xbfd   : > { %v3403_v11 = vsel %vm3392_vm2, %v9013_v59, 0.0  ;;  %v3404_v40 = vsel %vm3393_vm5, %v9013_v59, 0.0  ;;  %v3405_v49 = vsel %vm3394_vm6, %v9013_v59, 0.0  ;;  %v3406_v36 = vsel %vm3395_vm7, %v9013_v59, 0.0 }
 0xbfe   : > { %v3411_v32 = vadd.f32 %v3403_v11, %v10458_v0  ;;  %v3412_v46 = vadd.f32 %v3404_v40, %v10461_v63  ;;  %v3413_v48 = vadd.f32 %v3405_v49, %v10476_v54  ;;  %v3414_v47 = vadd.f32 %v3406_v36, %v10479_v61 }
 0xbff   : > { %vm3396_vm8 = vcmp.eq.s32.totalorder %v10293_v27, %v3391_v7  ;;  %vm3397_vm9 = vcmp.eq.s32.totalorder %v10296_v14, %v3391_v7  ;;  %vm3398_vm11 = vcmp.eq.s32.totalorder %v10299_v51, %v3391_v7  ;;  %vm3399_vm12 = vcmp.eq.s32.totalorder %v10302_v4, %v3391_v7 }
 0xc00   : > { %v3421_v22 = vpack.c.bf16 %v3412_v46, %v3411_v32  ;;  %v3422_v17 = vpack.c.bf16 %v3414_v47, %v3413_v48  ;;  %v3407_v5 = vsel %vm3396_vm8, %v9013_v59, 0.0  ;;  %v3408_v50 = vsel %vm3397_vm9, %v9013_v59, 0.0  ;;  %v1014_v46 = vld [vmem:[%s1000_s4] sm:$0xff]  ;;  %v1015_v48 = vld [vmem:[%s1000_s4 + $0x8] sm:$0xff]  ;;  %v1016_v47 = vld [vmem:[%s1000_s4 + $0x10] sm:$0xff] }
 0xc01   : > { %v3415_v0 = vadd.f32 %v3407_v5, %v10488_v24  ;;  %v3416_v63 = vadd.f32 %v3408_v50, %v10491_v30  ;;  %v3409_v20 = vsel %vm3398_vm11, %v9013_v59, 0.0  ;;  %v3410_v54 = vsel %vm3399_vm12, %v9013_v59, 0.0  ;;  %v13429_v24 = vld [vmem:[#allocation17_spill] sm:$0xff] }
 0xc02   : > { %8717 = vmatprep.subr.bf16.mxu1 %v3421_v22  ;;  %v3417_v61 = vadd.f32 %v3409_v20, %v10496_v57  ;;  %v3418_v33 = vadd.f32 %v3410_v54, %v10499_v13  ;;  %v2856_v57 = vpop.permute.xlu0 %2855  ;;  %v10545_v35 = vpack.c.bf16 %v1015_v48, %v1014_v46  ;;  %v8935_v5 = vld [vmem:[%s13242_s16] sm:$0xff]   ;;  %v3640_v54 = vpop.permute.xlu1 %3639 }
 0xc03   : > { %8718 = vmatpush3.bf16.msra.mxu1 %v3421_v22  ;;  %v3423_v12 = vpack.c.bf16 %v3416_v63, %v3415_v0  ;;  %v1017_v22 = vld [vmem:[%s1000_s4 + $0x18] sm:$0xff]  ;;  %v8936_v0 = vld [vmem:[%s13242_s16 + $0x8] sm:$0xff]   ;;  %v8937_v63 = vld [vmem:[%s13242_s16 + $0x20] sm:$0xff]   ;;  %s13744_s4 = sld [smem:[#allocation88_spill]] }
 0xc04   : > { %8719 = vmatprep.subr.bf16.mxu1 %v3422_v17  ;;  %v3424_v52 = vpack.c.bf16 %v3418_v33, %v3417_v61  ;;  %13431 = vst [vmem:[#allocation15_spill] sm:$0xff] %v10545_v35  ;;  %v10554_v50 = vpack.c.bf16 %v1017_v22, %v1016_v47  ;;  %v8940_v47 = vld [vmem:[%s13242_s16 + $0x38] sm:$0xff]   ;;  %v8941_v22 = vld [vmem:[%s13242_s16 + $0x40] sm:$0xff]  }
 0xc06   : > { %13432 = vst [vmem:[#allocation17_spill] sm:$0xff] %v10554_v50  ;;  %v3635_v20 = vpop.permute.xlu0 %3634 }
 0xc07   : > { %8720 = vmatpush3.bf16.msra.mxu1 %v3422_v17  ;;  %v8934_v17 = vld [vmem:[%s13242_s16 + $0x18] sm:$0xff]  }
 0xc08   : > { %8721 = vmatprep.subr.bf16.mxu1 %v3423_v12 }
 0xc09   : > { %s13184_s7 = scalar_lea.hbm %s13744_s4, %s8400_s2 }
 0xc0a   : > { %v3645_v33 = vpop.permute.xlu0 %3644 }
 0xc0b   : > { %8722 = vmatpush3.bf16.msra.mxu1 %v3423_v12 }
 0xc0c   : > { %8723 = vmatprep.subr.bf16.mxu1 %v3424_v52 }
 0xc0f   : > { %8724 = vmatpush3.bf16.msra.mxu1 %v3424_v52  ;;  %v3650_v52 = vpop.permute.xlu1 %3649 }
 0xc43   : > { %v8701_v53 = vpop.f32.mrb[32].mxu1 }
 0xc44   : > { %v2927_v2 = vadd.f32 %v8701_v53, %v13429_v24  ;;  %v2918_v30 = vpop.f32.mrb[33].mxu1 }
 0xc45   : > { %v2919_v16 = vadd.f32 %v2918_v30, %v13430_v39  ;;  %v8702_v21 = vpop.f32.mrb[34].mxu1 }
 0xc46   : > { %v2935_v13 = vadd.f32 %v2927_v2, %v10217_v29  ;;  %v2930_v44 = vadd.f32 %v8702_v21, %v2866_v34  ;;  %v2921_v60 = vpop.f32.mrb[35].mxu1 }
 0xc47   : > { %v2933_v38 = vadd.f32 %v2919_v16, %v10209_v62  ;;  %v2922_v8 = vadd.f32 %v2921_v60, %v2856_v57 }
 0xc48   : > { %v2943_v6 = vmul.f32 0.01, %v2935_v13  ;;  %v2936_v42 = vadd.f32 %v2930_v44, %v10213_v37  ;;  %vm2939_vm13 = vcmp.ge.f32.partialorder %v2935_v13, 0.0  ;;  %v9015_v37 = vpop.eup %9014 }
 0xc49   : > { %v2941_v9 = vmul.f32 0.01, %v2933_v38  ;;  %v2934_v43 = vadd.f32 %v2922_v8, %v10211_v58  ;;  %vm2937_vm3 = vcmp.ge.f32.partialorder %v2933_v38, 0.0  ;;  %v8933_v58 = vld [vmem:[%s13242_s16 + $0x10] sm:$0xff]  }
 0xc4a   : > { %vm2940_vm14 = vcmp.ge.f32.partialorder %v2936_v42, 0.0  ;;  %v2944_v3 = vmul.f32 0.01, %v2936_v42  ;;  %v2947_v18 = vsel %vm2939_vm13, %v2935_v13, %v2943_v6  ;;  %8733 = vmatprep.mubr.msk.bf16.mxu0 %vm13286_vm4, %v8933_v58 }
 0xc4b   : > { %vm2938_vm15 = vcmp.ge.f32.partialorder %v2934_v43, 0.0  ;;  %v2942_v10 = vmul.f32 0.01, %v2934_v43  ;;  %v2945_v29 = vsel %vm2937_vm3, %v2933_v38, %v2941_v9  ;;  %v8938_v9 = vld [vmem:[%s13242_s16 + $0x28] sm:$0xff]  }
 0xc4c   : > { %v2948_v41 = vsel %vm2940_vm14, %v2936_v42, %v2944_v3  ;;  %v3683_v3 = vpop.permute.xlu0 %3682 }
 0xc4d   : > { %v3420_v19 = vpack.c.bf16 %v2948_v41, %v2947_v18  ;;  %v2946_v25 = vsel %vm2938_vm15, %v2934_v43, %v2942_v10  ;;  %v8939_v43 = vld [vmem:[%s13242_s16 + $0x30] sm:$0xff]   ;;  %v3688_v10 = vpop.permute.xlu1 %3687 }
 0xc4e   : > { %v3419_v62 = vpack.c.bf16 %v2946_v25, %v2945_v29 }
 0xc50   : > { %8725 = vmatprep.mubr.msk.bf16.mxu1 %vm13285_vm10, %v3419_v62  ;;  %v3693_v18 = vpop.permute.xlu0 %3692 }
 0xc51   : > { %8726 = vmatmul.mubr.msk.bf16.vlgmr.msra.gmra.mrb[36].mxu1 %vm13285_vm10, %v3420_v19  ;;  %v3698_v25 = vpop.permute.xlu1 %3697 }
 0xc52   : > { %8749 = vmatprep.mubr.msk.bf16.mxu1 %vm13286_vm4, %v8937_v63 }
 0xd24   : > { %v8727_v28 = vpop.f32.mrb[36].mxu1 }
 0xd25   : > { %v3483_v56 = vmul.f32 %v9015_v37, %v8727_v28  ;;  %v3465_v59 = vpop.f32.mrb[37].mxu1 }
 0xd26   : > { %v3481_v55 = vmul.f32 %v9015_v37, %v3465_v59  ;;  %v8728_v7 = vpop.f32.mrb[38].mxu1 }
 0xd27   : > { %v3484_v11 = vmul.f32 %v9015_v37, %v8728_v7  ;;  %v3468_v40 = vpop.f32.mrb[39].mxu1 }
 0xd28   : > { %v3482_v49 = vmul.f32 %v9015_v37, %v3468_v40 }
 0xd29   : > { %v3497_v36 = vpack.c.bf16 %v3484_v11, %v3483_v56 }
 0xd2a   : > { %v3496_v32 = vpack.c.bf16 %v3482_v49, %v3481_v55 }
 0xd2c   : > { %8729 = vmatprep.subr.bf16.mxu0 %v3496_v32 }
 0xd2d   : > { %8730 = vmatpush3.bf16.msra.mxu0 %v3496_v32 }
 0xd2e   : > { %8731 = vmatprep.subr.bf16.mxu0 %v3497_v36 }
 0xd31   : > { %8732 = vmatpush3.bf16.msra.mxu0 %v3497_v36 }
 0xd32   : > { %8737 = vmatprep.subr.bf16.mxu0 %v10545_v35 }
 0xd34   : > { %8734 = vmatmul.mubr.msk.bf16.vlgmr.msra.gmra.mrb[28].mxu0 %vm13286_vm4, %v8934_v17  ;;  %v3792_v17 = vpop.permute.xlu0 %3791 }
 0xd35   : > { %8738 = vmatpush3.bf16.msra.mxu0 %v10545_v35  ;;  %8741 = vmatprep.mubr.msk.bf16.mxu0 %vm13286_vm4, %v8935_v5  ;;  %v3797_v5 = vpop.permute.xlu1 %3796 }
 0xd36   : > { %8739 = vmatprep.subr.bf16.mxu0 %v10554_v50 }
 0xd39   : > { %8740 = vmatpush3.bf16.msra.mxu0 %v10554_v50 }
 0xd40   : > { %8742 = vmatmul.mubr.msk.bf16.vlgmr.msra.gmra.mrb[28].mxu0 %vm13286_vm4, %v8936_v0  ;;  %v3802_v0 = vpop.permute.xlu0 %3801 }
 0xd41   : > { %8765 = vmatprep.mubr.msk.bf16.mxu0 %vm13286_vm4, %v8941_v22 }
 0xe13   : > { %v8743_v61 = vpop.f32.mrb[28].mxu0 }
 0xe14   : > { %v3613_v12 = vpop.f32.mrb[29].mxu0  ;;  %v3654_v53 = vadd.f32 %v8743_v61, %v3645_v33  ;;  %v3807_v61 = vpop.permute.xlu1 %3806 }
 0xe15   : > { %v3652_v24 = vadd.f32 %v3635_v20, %v3613_v12  ;;  %v8744_v2 = vpop.f32.mrb[30].mxu0 }
 0xe16   : > { %v3655_v30 = vadd.f32 %v8744_v2, %v3650_v52  ;;  %v3616_v34 = vpop.f32.mrb[31].mxu0  ;;  %v3662_v57 = vmul.f32 0.01, %v3654_v53  ;;  %vm3658_vm7 = vcmp.ge.f32.partialorder %v3654_v53, 0.0 }
 0xe17   : > { %v3660_v39 = vmul.f32 0.01, %v3652_v24  ;;  %v3653_v16 = vadd.f32 %v3640_v54, %v3616_v34  ;;  %vm3656_vm2 = vcmp.ge.f32.partialorder %v3652_v24, 0.0 }
 0xe18   : > { %vm3659_vm5 = vcmp.ge.f32.partialorder %v3655_v30, 0.0  ;;  %v3663_v21 = vmul.f32 0.01, %v3655_v30  ;;  %v3666_v6 = vsel %vm3658_vm7, %v3654_v53, %v3662_v57 }
 0xe19   : > { %vm3657_vm6 = vcmp.ge.f32.partialorder %v3653_v16, 0.0  ;;  %v3661_v13 = vmul.f32 0.01, %v3653_v16  ;;  %v3664_v44 = vsel %vm3656_vm2, %v3652_v24, %v3660_v39 }
 0xe1a   : > { %v3667_v38 = vsel %vm3659_vm5, %v3655_v30, %v3663_v21 }
 0xe1b   : > { %v10569_v60 = vsel %vm3657_vm6, %v3653_v16, %v3661_v13  ;;  %v3674_v42 = vpack.c.bf16 %v3667_v38, %v3666_v6 }
 0xe1c   : > { %v3673_v8 = vpack.c.bf16 %v10569_v60, %v3664_v44 }
 0xe1e   : > { %8745 = vmatprep.subr.bf16.mxu1 %v3673_v8 }
 0xe1f   : > { %8746 = vmatpush3.bf16.msra.mxu1 %v3673_v8 }
 0xe20   : > { %8747 = vmatprep.subr.bf16.mxu1 %v3674_v42 }
 0xe23   : > { %8748 = vmatpush3.bf16.msra.mxu1 %v3674_v42 }
 0xe26   : > { %8750 = vmatmul.mubr.msk.bf16.vlgmr.msra.gmra.mrb[40].mxu1 %vm13286_vm4, %v8938_v9 }
 0xe27   : > { %8757 = vmatprep.mubr.msk.bf16.mxu1 %vm13286_vm4, %v8939_v43 }
 0xef9   : > { %v8751_v41 = vpop.f32.mrb[40].mxu1 }
 0xefa   : > { %v3759_v29 = vadd.f32 %v8751_v41, %v3693_v18  ;;  %v3750_v19 = vpop.f32.mrb[41].mxu1  ;;  %v9052_v18 = vld [vmem:[%s9633_s5] sm:$0xff]  ;;  %v9053_v41 = vld [vmem:[%s9633_s5 + $0x8] sm:$0xff] }
 0xefb   : > { %v3751_v62 = vadd.f32 %v3750_v19, %v3683_v3  ;;  %v8752_v58 = vpop.f32.mrb[42].mxu1  ;;  %v8942_v3 = vld [vmem:[%s13242_s16 + $0x48] sm:$0xff]   ;;  %v9055_v19 = vld [vmem:[%s9633_s5 + $0x18] sm:$0xff] }
 0xefc   : > { %v3771_v37 = vmul.f32 0.01, %v3759_v29  ;;  %v3762_v28 = vadd.f32 %v8752_v58, %v3698_v25  ;;  %v3753_v56 = vpop.f32.mrb[43].mxu1  ;;  %vm3767_vm8 = vcmp.ge.f32.partialorder %v3759_v29, 0.0  ;;  %v9056_v25 = vld [vmem:[%s9633_s5 + $0x20] sm:$0xff]  ;;  %v9058_v58 = vld [vmem:[%s9633_s5 + $0x30] sm:$0xff] }
 0xefd   : > { %v3769_v59 = vmul.f32 0.01, %v3751_v62  ;;  %v3754_v55 = vadd.f32 %v3753_v56, %v3688_v10  ;;  %vm3765_vm9 = vcmp.ge.f32.partialorder %v3751_v62, 0.0  ;;  %v13273_v10 = vmov 0.0   ;;  %v9061_v56 = vld [vmem:[%s9633_s5 + $0x48] sm:$0xff] }
 0xefe   : > { %vm3768_vm11 = vcmp.ge.f32.partialorder %v3762_v28, 0.0  ;;  %v3772_v7 = vmul.f32 0.01, %v3762_v28  ;;  %v3775_v40 = vsel %vm3767_vm8, %v3759_v29, %v3771_v37  ;;  %v9054_v29 = vld [vmem:[%s9633_s5 + $0x10] sm:$0xff]  ;;  %v9059_v37 = vld [vmem:[%s9633_s5 + $0x38] sm:$0xff] }
 0xeff   : > { %vm3766_vm12 = vcmp.ge.f32.partialorder %v3754_v55, 0.0  ;;  %v3770_v11 = vmul.f32 0.01, %v3754_v55  ;;  %v3773_v36 = vsel %vm3765_vm9, %v3751_v62, %v3769_v59  ;;  %v9057_v62 = vld [vmem:[%s9633_s5 + $0x28] sm:$0xff]  ;;  %v9062_v59 = vld [vmem:[%s9633_s5 + $0x50] sm:$0xff] }
 0xf00   : > { %v3776_v49 = vsel %vm3768_vm11, %v3762_v28, %v3772_v7  ;;  %v9060_v28 = vld [vmem:[%s9633_s5 + $0x40] sm:$0xff] }
 0xf01   : > { %v3774_v32 = vsel %vm3766_vm12, %v3754_v55, %v3770_v11  ;;  %v3783_v46 = vpack.c.bf16 %v3776_v49, %v3775_v40  ;;  %v9063_v55 = vld [vmem:[%s9633_s5 + $0x58] sm:$0xff]  ;;  %v9064_v7 = vld [vmem:[%s9633_s5 + $0x60] sm:$0xff]  ;;  %v9065_v11 = vld [vmem:[%s9633_s5 + $0x68] sm:$0xff] }
 0xf02   : > { %v3782_v48 = vpack.c.bf16 %v3774_v32, %v3773_v36  ;;  %v9066_v40 = vld [vmem:[%s9633_s5 + $0x70] sm:$0xff]  ;;  %v9067_v49 = vld [vmem:[%s9633_s5 + $0x78] sm:$0xff]  ;;  %v13438_v36 = vmov 0   ;;  %s943_s5 = scalar_lea.vmem [#allocation3], %s7961_s27 }
 0xf03   : > { %v8944_v32 = vld [vmem:[%s13242_s16 + $0x50] sm:$0xff]   ;;  %s7766_s6 = sshll.u32 %s943_s5, 4  ;;  %s13186_s6 = int_to_ptr.vmem [resolvable:$true] %s7766_s6 }
 0xf04   : > { %8753 = vmatprep.subr.bf16.mxu1 %v3782_v48  ;;  %s9068_s28 = scalar_lea.vmem %s13186_s6, 256  ;;  %p9075_p0 = scmp.lt.s32.totalorder %s13186_s6, %s9073_s15 }
 0xf05   : > { %8754 = vmatpush3.bf16.msra.mxu1 %v3782_v48  ;;  %p9069_p11 = scmp.ne.s32.totalorder %s13186_s6, %s9068_s28  ;;  %p9076_p1 = scmp.lt.s32.totalorder %s9074_s29, %s9068_s28 }
 0xf06   : > { %8755 = vmatprep.subr.bf16.mxu1 %v3783_v46 }
 0xf07   : > { %p9070_p12 = pnand %p9069_p11, %p9309_p5  ;;  %p9077_p2 = por %p9076_p1, %p9075_p0 }
 0xf09   : > { %8756 = vmatpush3.bf16.msra.mxu1 %v3783_v46  ;;  %p9071_p13 = pneg %p9070_p12 }
 0xf0b   : > { %p9078_p3 = pnand %p9077_p2, %p9071_p13 }
 0xf0c   : > { %8758 = vmatmul.mubr.msk.bf16.vlgmr.msra.gmra.mrb[44].mxu1 %vm13286_vm4, %v8940_v47 }
 0xf0d   : > { %8773 = vmatprep.mubr.msk.bf16.mxu1 %vm13286_vm4, %v8944_v32 }
 0xfdf   : > { %v8759_v63 = vpop.f32.mrb[44].mxu1 }
 0xfe0   : > { %v3868_v20 = vadd.f32 %v8759_v63, %v3802_v0  ;;  %v3859_v54 = vpop.f32.mrb[45].mxu1 }
 0xfe1   : > { %v3860_v33 = vadd.f32 %v3859_v54, %v3792_v17  ;;  %v8760_v12 = vpop.f32.mrb[46].mxu1  ;;  %v3910_v54 = vpop.permute.xlu1 %3909 }
 0xfe2   : > { %v3871_v52 = vadd.f32 %v8760_v12, %v3807_v61  ;;  %v3862_v53 = vpop.f32.mrb[47].mxu1  ;;  %v3876_v24 = vadd.f32 %v3868_v20, %v3666_v6  ;;  %v10601_v6 = vld [vmem:[%s980_s26] sm:$0x77]  ;;  %v3905_v20 = vpop.permute.xlu0 %3904 }
 0xfe3   : > { %v3874_v2 = vadd.f32 %v3860_v33, %v3664_v44  ;;  %v3863_v30 = vadd.f32 %v3862_v53, %v3797_v5  ;;  %v4130_v43 = vcombine.high %v10601_v6, %v10601_v6  ;;  %v4408_v46 = vmul.f32 %v10601_v6, %v10601_v6 }
 0xfe4   : > { %v3877_v34 = vadd.f32 %v3871_v52, %v3667_v38  ;;  %v3884_v57 = vmul.f32 0.01, %v3876_v24  ;;  %vm3880_vm15 = vcmp.ge.f32.partialorder %v3876_v24, 0.0 }
 0xfe5   : > { %v3882_v39 = vmul.f32 0.01, %v3874_v2  ;;  %v3875_v16 = vadd.f32 %v3863_v30, %v10569_v60  ;;  %vm3878_vm13 = vcmp.ge.f32.partialorder %v3874_v2, 0.0  ;;  %v4410_v48 = vcombine.high %v4408_v46, %v4408_v46  ;;  %v3920_v30 = vpop.permute.xlu1 %3919 }
 0xfe6   : > { %vm3881_vm3 = vcmp.ge.f32.partialorder %v3877_v34, 0.0  ;;  %v3885_v21 = vmul.f32 0.01, %v3877_v34  ;;  %v10603_v42 = vsel %vm3880_vm15, %v3876_v24, %v3884_v57  ;;  %v4412_v47 = vsel %vm1028_vm0, %v4408_v46, 0.0  ;;  %v3915_v12 = vpop.permute.xlu0 %3914 }
 0xfe7   : > { %vm3879_vm14 = vcmp.ge.f32.partialorder %v3875_v16, 0.0  ;;  %v3883_v13 = vmul.f32 0.01, %v3875_v16  ;;  %v10593_v8 = vsel %vm3878_vm13, %v3874_v2, %v3882_v39  ;;  %13437 = vst [vmem:[#allocation24_spill] sm:$0xff] %v10603_v42  ;;  %v4419_v22 = vsel %vm1028_vm0, %v4410_v48, 0.0 }
 0xfe8   : > { %13434 = vst [vmem:[#allocation16_spill] sm:$0xff] %v10593_v8  ;;  %v10597_v38 = vsel %vm3881_vm3, %v3877_v34, %v3885_v21  ;;  %v4413_v17 = vrot.slane %v4412_v47, 4  ;;  %v4420_v5 = vrot.slane %v4419_v22, 4 }
 0xfe9   : > { %v10595_v44 = vsel %vm3879_vm14, %v3875_v16, %v3883_v13  ;;  %13436 = vst [vmem:[#allocation23_spill] sm:$0xff] %v10597_v38  ;;  %v3896_v9 = vpack.c.bf16 %v10597_v38, %v10603_v42 }
 0xfea   : > { %13435 = vst [vmem:[#allocation22_spill] sm:$0xff] %v10595_v44  ;;  %v3895_v60 = vpack.c.bf16 %v10595_v44, %v10593_v8  ;;  %v4414_v0 = vadd.f32 %v4413_v17, %v4412_v47  ;;  %v4421_v63 = vadd.f32 %v4420_v5, %v4419_v22  ;;  %v8945_v22 = vld [vmem:[%s13242_s16 + $0x58] sm:$0xff]   ;;  %v4365_v17 = vpop.xlane.xlu1 %4364 }
 0xfec   : > { %8761 = vmatprep.subr.bf16.mxu0 %v3895_v60  ;;  %v4415_v61 = vrot.slane %v4414_v0, 2  ;;  %v4422_v33 = vrot.slane %v4421_v63, 2 }
 0xfed   : > { %8762 = vmatpush3.bf16.msra.mxu0 %v3895_v60 }
 0xfee   : > { %8763 = vmatprep.subr.bf16.mxu0 %v3896_v9  ;;  %v4416_v53 = vadd.f32 %v4415_v61, %v4414_v0  ;;  %v4423_v34 = vadd.f32 %v4422_v33, %v4421_v63 }
 0xff1   : > { %8764 = vmatpush3.bf16.msra.mxu0 %v3896_v9  ;;  %v4417_v9 = vrot.slane %v4416_v53, 1 }
 0xff2   : > { %8186 = vmatprep.subr.msk.mxu0 %vm1028_vm0, %v4130_v43 }
 0xff4   : > { %8766 = vmatmul.mubr.msk.bf16.vlgmr.msra.gmra.mrb[32].mxu0 %vm13286_vm4, %v8942_v3  ;;  %v4424_v3 = vrot.slane %v4423_v34, 1 }
 0xff5   : > { %8187 = vmatpush1.msk.msra.mxu0 %vm1028_vm0, %v10601_v6  ;;  %4247 = vmatprep.mubr.f32.mxu0 %v13273_v10 }
 0xffc   : > { %8188 = vmatmul.mubr.msk.f32.vlgmr.msra.gmra.mrb[36].mxu0 %vm1021_vm1, %v9052_v18  ;;  %v4362_v18 = vpop.xlane.xlu0 %4361 }
 0xffd   : > { %4253 = vmatprep.mubr.f32.mxu0 %v13273_v10 }
0x1000   : > { %8189 = vmatmul.mubr.msk.f32.gmra.mrb[38].mxu0 %vm1021_vm1, %v9053_v41 }
0x1001   : > { %4259 = vmatprep.mubr.f32.mxu0 %v13273_v10 }
0x1004   : > { %8190 = vmatmul.mubr.msk.f32.gmra.mrb[40].mxu0 %vm1021_vm1, %v9054_v29 }
0x1005   : > { %4265 = vmatprep.mubr.f32.mxu0 %v13273_v10 }
0x1008   : > { %8191 = vmatmul.mubr.msk.f32.gmra.mrb[42].mxu0 %vm1021_vm1, %v9055_v19 }
0x1009   : > { %4271 = vmatprep.mubr.f32.mxu0 %v13273_v10 }
0x100c   : > { %8192 = vmatmul.mubr.msk.f32.gmra.mrb[44].mxu0 %vm1021_vm1, %v9056_v25 }
0x100d   : > { %4277 = vmatprep.mubr.f32.mxu0 %v13273_v10 }
0x1010   : > { %8193 = vmatmul.mubr.msk.f32.gmra.mrb[46].mxu0 %vm1021_vm1, %v9057_v62 }
0x1011   : > { %4283 = vmatprep.mubr.f32.mxu0 %v13273_v10 }
0x1014   : > { %8194 = vmatmul.mubr.msk.f32.gmra.mrb[48].mxu0 %vm1021_vm1, %v9058_v58 }
0x1015   : > { %4289 = vmatprep.mubr.f32.mxu0 %v13273_v10 }
0x1018   : > { %8195 = vmatmul.mubr.msk.f32.gmra.mrb[50].mxu0 %vm1021_vm1, %v9059_v37 }
0x1019   : > { %4295 = vmatprep.mubr.f32.mxu0 %v13273_v10 }
0x101c   : > { %8196 = vmatmul.mubr.msk.f32.gmra.mrb[52].mxu0 %vm1021_vm1, %v9060_v28  ;;  %v10673_v28 = vadd.f32 %v4417_v9, %v4416_v53 }
0x101d   : > { %4301 = vmatprep.mubr.f32.mxu0 %v13273_v10 }
0x101e   : > { %v4428_v63 = vadd.f32 %v10673_v28, %v4365_v17 }
0x1020   : > { %8197 = vmatmul.mubr.msk.f32.gmra.mrb[54].mxu0 %vm1021_vm1, %v9061_v56 }
0x1021   : > { %4307 = vmatprep.mubr.f32.mxu0 %v13273_v10 }
0x1024   : > { %8198 = vmatmul.mubr.msk.f32.gmra.mrb[56].mxu0 %vm1021_vm1, %v9062_v59 }
0x1025   : > { %4313 = vmatprep.mubr.f32.mxu0 %v13273_v10 }
0x1028   : > { %8199 = vmatmul.mubr.msk.f32.gmra.mrb[58].mxu0 %vm1021_vm1, %v9063_v55  ;;  %v10675_v55 = vadd.f32 %v4424_v3, %v4423_v34 }
0x1029   : > { %4319 = vmatprep.mubr.f32.mxu0 %v13273_v10 }
0x102a   : > { %v4427_v46 = vadd.f32 %v10675_v55, %v4362_v18 }
0x102c   : > { %8200 = vmatmul.mubr.msk.f32.gmra.mrb[60].mxu0 %vm1021_vm1, %v9064_v7  ;;  %v4368_v7 = vpop.xlane.xlu0 %4367 }
0x102d   : > { %4325 = vmatprep.mubr.f32.mxu0 %v13273_v10  ;;  %v4430_v47 = vadd.f32 %v10673_v28, %v4368_v7  ;;  %v4431_v5 = vadd.f32 %v10675_v55, %v4368_v7 }
0x1030   : > { %8201 = vmatmul.mubr.msk.f32.gmra.mrb[62].mxu0 %vm1021_vm1, %v9065_v11 }
0x1031   : > { %4331 = vmatprep.mubr.f32.mxu0 %v13273_v10 }
0x1034   : > { %8202 = vmatmul.mubr.msk.f32.gmra.mrb[64].mxu0 %vm1021_vm1, %v9066_v40  ;;  %v4426_v40 = vadd.f32 %v10673_v28, %v4362_v18 }
0x1035   : > { %4337 = vmatprep.mubr.f32.mxu0 %v13273_v10 }
0x1038   : > { %8203 = vmatmul.mubr.msk.f32.gmra.mrb[66].mxu0 %vm1021_vm1, %v9067_v49 }
0x1039   : > { %5899 = vmatprep.mubr.bf16.mxu0 %v13438_v36 }
0x10c7   : > { %v8767_v52 = vpop.f32.mrb[32].mxu0 }
0x10c8   : > { %v3981_v24 = vadd.f32 %v8767_v52, %v3915_v12  ;;  %v3972_v2 = vpop.f32.mrb[33].mxu0  ;;  %v4429_v12 = vadd.f32 %v10675_v55, %v4365_v17  ;;  %v4371_v52 = vpop.xlane.xlu0 %4370 }
0x10c9   : > { %v3973_v39 = vadd.f32 %v3972_v2, %v3905_v20  ;;  %v8768_v16 = vpop.f32.mrb[34].mxu0 }
0x10ca   : > { %v3993_v21 = vmul.f32 0.01, %v3981_v24  ;;  %v3984_v57 = vadd.f32 %v8768_v16, %v3920_v30  ;;  %v3975_v13 = vpop.f32.mrb[35].mxu0  ;;  %vm3989_vm0 = vcmp.ge.f32.partialorder %v3981_v24, 0.0  ;;  %v4432_v30 = vadd.f32 %v10673_v28, %v4371_v52 }
0x10cb   : > { %v3991_v60 = vmul.f32 0.01, %v3973_v39  ;;  %v3976_v6 = vadd.f32 %v3975_v13, %v3910_v54  ;;  %vm3987_vm1 = vcmp.ge.f32.partialorder %v3973_v39, 0.0 }
0x10cc   : > { %vm3990_vm2 = vcmp.ge.f32.partialorder %v3984_v57, 0.0  ;;  %v3994_v43 = vmul.f32 0.01, %v3984_v57  ;;  %v3997_v29 = vsel %vm3989_vm0, %v3981_v24, %v3993_v21 }
0x10cd   : > { %vm3988_vm5 = vcmp.ge.f32.partialorder %v3976_v6, 0.0  ;;  %v3992_v41 = vmul.f32 0.01, %v3976_v6  ;;  %v3995_v62 = vsel %vm3987_vm1, %v3973_v39, %v3991_v60  ;;  %v4433_v39 = vadd.f32 %v10675_v55, %v4371_v52 }
0x10ce   : > { %v3998_v19 = vsel %vm3990_vm2, %v3984_v57, %v3994_v43  ;;  %v4374_v43 = vpop.xlane.xlu1 %4373 }
0x10cf   : > { %v4249_v25 = vpop.f32.mrb[36].mxu0  ;;  %v3996_v58 = vsel %vm3988_vm5, %v3976_v6, %v3992_v41  ;;  %v4005_v37 = vpack.c.bf16 %v3998_v19, %v3997_v29  ;;  %v4434_v19 = vadd.f32 %v10673_v28, %v4374_v43 }
0x10d0   : > { %v4251_v56 = vpop.f32.mrb[37].mxu0  ;;  %v4004_v59 = vpack.c.bf16 %v3996_v58, %v3995_v62  ;;  %v4458_v49 = vmul.f32 2.0, %v4249_v25  ;;  %v4435_v58 = vadd.f32 %v10675_v55, %v4374_v43 }
0x10d1   : > { %v4459_v48 = vmul.f32 2.0, %v4251_v56 }
0x10d2   : > { %8769 = vmatprep.subr.bf16.mxu1 %v4004_v59  ;;  %v4490_v20 = vsub.f32 %v4426_v40, %v4458_v49  ;;  %v4380_v52 = vpop.xlane.xlu1 %4379 }
0x10d3   : > { %8770 = vmatpush3.bf16.msra.mxu1 %v4004_v59  ;;  %v4255_v11 = vpop.f32.mrb[38].mxu0  ;;  %v4491_v53 = vsub.f32 %v4427_v46, %v4459_v48 }
0x10d4   : > { %8771 = vmatprep.subr.bf16.mxu1 %v4005_v37  ;;  %v4257_v32 = vpop.f32.mrb[39].mxu0  ;;  %v4460_v54 = vmul.f32 2.0, %v4255_v11  ;;  %v10690_v57 = vmax.f32 %v4490_v20, 0.0 }
0x10d5   : > { %v4461_v24 = vmul.f32 2.0, %v4257_v32  ;;  %v10694_v3 = vmax.f32 %v4491_v53, 0.0  ;;  %v4377_v32 = vpop.xlane.xlu0 %4376 }
0x10d6   : > { %v4492_v13 = vsub.f32 %v4428_v63, %v4460_v54 }
0x10d7   : > { %8772 = vmatpush3.bf16.msra.mxu1 %v4005_v37  ;;  %v4261_v0 = vpop.f32.mrb[40].mxu0  ;;  %v4493_v18 = vsub.f32 %v4429_v12, %v4461_v24 }
0x10d8   : > { %v4462_v61 = vmul.f32 2.0, %v4261_v0  ;;  %v4263_v33 = vpop.f32.mrb[41].mxu0  ;;  %v10704_v7 = vmax.f32 %v4492_v13, 0.0  ;;  %v4437_v0 = vadd.f32 %v10675_v55, %v4377_v32 }
0x10d9   : > { %v4463_v2 = vmul.f32 2.0, %v4263_v33  ;;  %v10708_v46 = vmax.f32 %v4493_v18, 0.0  ;;  %v4383_v18 = vpop.xlane.xlu0 %4382 }
0x10da   : > { %v4494_v34 = vsub.f32 %v4430_v47, %v4462_v61  ;;  %8774 = vmatmul.mubr.msk.bf16.vlgmr.msra.gmra.mrb[48].mxu1 %vm13286_vm4, %v8945_v22  ;;  %v4436_v22 = vadd.f32 %v10673_v28, %v4377_v32 }
0x10db   : > { %v4495_v16 = vsub.f32 %v4431_v5, %v4463_v2  ;;  %v4267_v21 = vpop.f32.mrb[42].mxu0  ;;  %5534 = vmatprep.mubr.bf16.mxu1 %v13438_v36  ;;  %v4438_v2 = vadd.f32 %v10673_v28, %v4380_v52 }
0x10dc   : > { %v10692_v60 = vmax.f32 %v4494_v34, 0.0  ;;  %v4464_v6 = vmul.f32 2.0, %v4267_v21  ;;  %v4269_v9 = vpop.f32.mrb[43].mxu0 }
0x10dd   : > { %v10696_v41 = vmax.f32 %v4495_v16, 0.0  ;;  %v4465_v29 = vmul.f32 2.0, %v4269_v9 }
0x10de   : > { %v4562_v25 = vmin.f32 %v10690_v57, %v10692_v60  ;;  %v4496_v62 = vsub.f32 %v4432_v30, %v4464_v6 }
0x10df   : > { %v4583_v37 = vmin.f32 %v10694_v3, %v10696_v41  ;;  %v4497_v56 = vsub.f32 %v4433_v39, %v4465_v29  ;;  %v4273_v59 = vpop.f32.mrb[44].mxu0  ;;  %v4439_v39 = vadd.f32 %v10675_v55, %v4380_v52 }
0x10e0   : > { %v10706_v11 = vmax.f32 %v4496_v62, 0.0  ;;  %v4466_v40 = vmul.f32 2.0, %v4273_v59  ;;  %v4275_v49 = vpop.f32.mrb[45].mxu0  ;;  %v4440_v62 = vadd.f32 %v10673_v28, %v4383_v18 }
0x10e1   : > { %v10710_v48 = vmax.f32 %v4497_v56, 0.0  ;;  %v4467_v47 = vmul.f32 2.0, %v4275_v49  ;;  %v4441_v56 = vadd.f32 %v10675_v55, %v4383_v18 }
0x10e2   : > { %v4563_v17 = vmin.f32 %v10704_v7, %v10706_v11  ;;  %v4498_v5 = vsub.f32 %v4434_v19, %v4466_v40 }
0x10e3   : > { %v4584_v63 = vmin.f32 %v10708_v46, %v10710_v48  ;;  %v4499_v20 = vsub.f32 %v4435_v58, %v4467_v47  ;;  %v4279_v54 = vpop.f32.mrb[46].mxu0 }
0x10e4   : > { %v10718_v61 = vmax.f32 %v4498_v5, 0.0  ;;  %v4468_v33 = vmul.f32 2.0, %v4279_v54  ;;  %v4281_v12 = vpop.f32.mrb[47].mxu0 }
0x10e5   : > { %v10720_v53 = vmax.f32 %v4499_v20, 0.0  ;;  %v4469_v24 = vmul.f32 2.0, %v4281_v12 }
0x10e6   : > { %v4564_v30 = vmin.f32 %v4562_v25, %v10718_v61  ;;  %v4500_v34 = vsub.f32 %v4436_v22, %v4468_v33  ;;  %v4386_v22 = vpop.xlane.xlu1 %4385 }
0x10e7   : > { %v4585_v16 = vmin.f32 %v4583_v37, %v10720_v53  ;;  %v4501_v21 = vsub.f32 %v4437_v0, %v4469_v24  ;;  %v4285_v13 = vpop.f32.mrb[48].mxu0  ;;  %v4442_v20 = vadd.f32 %v10673_v28, %v4386_v22  ;;  %v4443_v33 = vadd.f32 %v10675_v55, %v4386_v22 }
0x10e8   : > { %v10726_v6 = vmax.f32 %v4500_v34, 0.0  ;;  %v4470_v9 = vmul.f32 2.0, %v4285_v13  ;;  %v4287_v43 = vpop.f32.mrb[49].mxu0 }
0x10e9   : > { %v10728_v29 = vmax.f32 %v4501_v21, 0.0  ;;  %v4471_v19 = vmul.f32 2.0, %v4287_v43 }
0x10ea   : > { %v4565_v58 = vmin.f32 %v4563_v17, %v10726_v6  ;;  %v4502_v25 = vsub.f32 %v4438_v2, %v4470_v9 }
0x10eb   : > { %v4586_v59 = vmin.f32 %v4584_v63, %v10728_v29  ;;  %v4503_v37 = vsub.f32 %v4439_v39, %v4471_v19  ;;  %v4291_v40 = vpop.f32.mrb[50].mxu0  ;;  %v4389_v39 = vpop.xlane.xlu0 %4388 }
0x10ec   : > { %v10734_v49 = vmax.f32 %v4502_v25, 0.0  ;;  %v4472_v32 = vmul.f32 2.0, %v4291_v40  ;;  %v4293_v47 = vpop.f32.mrb[51].mxu0  ;;  %v4444_v9 = vadd.f32 %v10673_v28, %v4389_v39  ;;  %v4445_v18 = vadd.f32 %v10675_v55, %v4389_v39  ;;  %v4392_v40 = vpop.xlane.xlu1 %4391 }
0x10ed   : > { %v10736_v5 = vmax.f32 %v4503_v37, 0.0  ;;  %v4473_v0 = vmul.f32 2.0, %v4293_v47  ;;  %v4446_v22 = vadd.f32 %v10673_v28, %v4392_v40 }
0x10ee   : > { %v4566_v54 = vmin.f32 %v4564_v30, %v10734_v49  ;;  %v4504_v17 = vsub.f32 %v4440_v62, %v4472_v32 }
0x10ef   : > { %v4587_v12 = vmin.f32 %v4585_v16, %v10736_v5  ;;  %v4505_v63 = vsub.f32 %v4441_v56, %v4473_v0  ;;  %v4297_v52 = vpop.f32.mrb[52].mxu0 }
0x10f0   : > { %v10742_v24 = vmax.f32 %v4504_v17, 0.0  ;;  %v4474_v2 = vmul.f32 2.0, %v4297_v52  ;;  %v4299_v34 = vpop.f32.mrb[53].mxu0 }
0x10f1   : > { %v10744_v21 = vmax.f32 %v4505_v63, 0.0  ;;  %v4475_v13 = vmul.f32 2.0, %v4299_v34  ;;  %v4395_v34 = vpop.xlane.xlu0 %4394 }
0x10f2   : > { %v4567_v43 = vmin.f32 %v4565_v58, %v10742_v24  ;;  %v4506_v30 = vsub.f32 %v4442_v20, %v4474_v2  ;;  %v4447_v20 = vadd.f32 %v10675_v55, %v4392_v40 }
0x10f3   : > { %v4588_v19 = vmin.f32 %v4586_v59, %v10744_v21  ;;  %v4507_v16 = vsub.f32 %v4443_v33, %v4475_v13  ;;  %v4303_v62 = vpop.f32.mrb[54].mxu0 }
0x10f4   : > { %v10750_v25 = vmax.f32 %v4506_v30, 0.0  ;;  %v4476_v56 = vmul.f32 2.0, %v4303_v62  ;;  %v4305_v37 = vpop.f32.mrb[55].mxu0  ;;  %v4448_v30 = vadd.f32 %v10673_v28, %v4395_v34 }
0x10f5   : > { %v10752_v32 = vmax.f32 %v4507_v16, 0.0  ;;  %v4477_v47 = vmul.f32 2.0, %v4305_v37 }
0x10f6   : > { %v4568_v0 = vmin.f32 %v4566_v54, %v10750_v25  ;;  %v4508_v58 = vsub.f32 %v4444_v9, %v4476_v56  ;;  %v4449_v9 = vadd.f32 %v10675_v55, %v4395_v34 }
0x10f7   : > { %v4589_v17 = vmin.f32 %v4587_v12, %v10752_v32  ;;  %v4509_v59 = vsub.f32 %v4445_v18, %v4477_v47  ;;  %v4309_v33 = vpop.f32.mrb[56].mxu0  ;;  %v4398_v47 = vpop.xlane.xlu1 %4397 }
0x10f8   : > { %v10758_v63 = vmax.f32 %v4508_v58, 0.0  ;;  %v4478_v52 = vmul.f32 2.0, %v4309_v33  ;;  %v4311_v2 = vpop.f32.mrb[57].mxu0  ;;  %v4450_v33 = vadd.f32 %v10673_v28, %v4398_v47 }
0x10f9   : > { %v10760_v39 = vmax.f32 %v4509_v59, 0.0  ;;  %v4479_v13 = vmul.f32 2.0, %v4311_v2 }
0x10fa   : > { %13439 = vst [vmem:[#allocation25_spill] sm:$0xff] %v10758_v63  ;;  %v4569_v16 = vmin.f32 %v4567_v43, %v10758_v63  ;;  %v4510_v54 = vsub.f32 %v4446_v22, %v4478_v52  ;;  %v4451_v22 = vadd.f32 %v10675_v55, %v4398_v47 }
0x10fb   : > { %v4590_v62 = vmin.f32 %v4588_v19, %v10760_v39  ;;  %v4511_v12 = vsub.f32 %v4447_v20, %v4479_v13  ;;  %v4315_v18 = vpop.f32.mrb[58].mxu0 }
0x10fc   : > { %v10766_v56 = vmax.f32 %v4510_v54, 0.0  ;;  %v4480_v37 = vmul.f32 2.0, %v4315_v18  ;;  %v4317_v40 = vpop.f32.mrb[59].mxu0  ;;  %v4401_v18 = vpop.xlane.xlu0 %4400 }
0x10fd   : > { %v10768_v58 = vmax.f32 %v4511_v12, 0.0  ;;  %v4481_v59 = vmul.f32 2.0, %v4317_v40  ;;  %v4452_v40 = vadd.f32 %v10673_v28, %v4401_v18 }
0x10fe   : > { %13440 = vst [vmem:[#allocation26_spill] sm:$0xff] %v10766_v56  ;;  %v4570_v2 = vmin.f32 %v4568_v0, %v10766_v56  ;;  %v4512_v43 = vsub.f32 %v4448_v30, %v4480_v37  ;;  %v4453_v30 = vadd.f32 %v10675_v55, %v4401_v18 }
0x10ff   : > { %v4591_v52 = vmin.f32 %v4589_v17, %v10768_v58  ;;  %v4513_v19 = vsub.f32 %v4449_v9, %v4481_v59  ;;  %v4321_v20 = vpop.f32.mrb[60].mxu0 }
0x1100   : > { %v10774_v34 = vmax.f32 %v4512_v43, 0.0  ;;  %v4482_v13 = vmul.f32 2.0, %v4321_v20  ;;  %v4323_v54 = vpop.f32.mrb[61].mxu0  ;;  %v4404_v20 = vpop.xlane.xlu1 %4403 }
0x1101   : > { %v10776_v10 = vmax.f32 %v4513_v19, 0.0  ;;  %v4483_v12 = vmul.f32 2.0, %v4323_v54  ;;  %v4454_v54 = vadd.f32 %v10673_v28, %v4404_v20 }
0x1102   : > { %v4571_v50 = vmin.f32 %v4569_v16, %v10774_v34  ;;  %v4514_v0 = vsub.f32 %v4450_v33, %v4482_v13  ;;  %v4455_v33 = vadd.f32 %v10675_v55, %v4404_v20 }
0x1103   : > { %v4592_v37 = vmin.f32 %v4590_v62, %v10776_v10  ;;  %v4515_v17 = vsub.f32 %v4451_v22, %v4483_v12  ;;  %v4327_v9 = vpop.f32.mrb[62].mxu0 }
0x1104   : > { %v10782_v47 = vmax.f32 %v4514_v0, 0.0  ;;  %v4484_v59 = vmul.f32 2.0, %v4327_v9  ;;  %v4329_v43 = vpop.f32.mrb[63].mxu0  ;;  %v4407_v9 = vpop.xlane.xlu0 %4406 }
0x1105   : > { %v10784_v35 = vmax.f32 %v4515_v17, 0.0  ;;  %v4485_v19 = vmul.f32 2.0, %v4329_v43  ;;  %v4456_v43 = vadd.f32 %v10673_v28, %v4407_v9 }
0x1106   : > { %v4572_v1 = vmin.f32 %v4570_v2, %v10782_v47  ;;  %v4516_v16 = vsub.f32 %v4452_v40, %v4484_v59  ;;  %v4457_v40 = vadd.f32 %v10675_v55, %v4407_v9 }
0x1107   : > { %v4593_v13 = vmin.f32 %v4591_v52, %v10784_v35  ;;  %v4517_v62 = vsub.f32 %v4453_v30, %v4485_v19  ;;  %v4333_v22 = vpop.f32.mrb[64].mxu0 }
0x1108   : > { %v10790_v18 = vmax.f32 %v4516_v16, 0.0  ;;  %v4486_v12 = vmul.f32 2.0, %v4333_v22  ;;  %v4335_v0 = vpop.f32.mrb[65].mxu0 }
0x1109   : > { %v10792_v31 = vmax.f32 %v4517_v62, 0.0  ;;  %v4487_v17 = vmul.f32 2.0, %v4335_v0 }
0x110a   : > { %v4573_v36 = vmin.f32 %v4571_v50, %v10790_v18  ;;  %v4518_v2 = vsub.f32 %v4454_v54, %v4486_v12 }
0x110b   : > { %v4594_v59 = vmin.f32 %v4592_v37, %v10792_v31  ;;  %v4519_v52 = vsub.f32 %v4455_v33, %v4487_v17  ;;  %v4339_v30 = vpop.f32.mrb[66].mxu0 }
0x110c   : > { %v10798_v20 = vmax.f32 %v4518_v2, 0.0  ;;  %v4488_v19 = vmul.f32 2.0, %v4339_v30  ;;  %v4341_v16 = vpop.f32.mrb[67].mxu0 }
0x110d   : > { %v10800_v22 = vmax.f32 %v4519_v52, 0.0  ;;  %v4489_v62 = vmul.f32 2.0, %v4341_v16 }
0x110e   : > { %v4574_v0 = vmin.f32 %v4572_v1, %v10798_v20  ;;  %v4520_v38 = vsub.f32 %v4456_v43, %v4488_v19 }
0x110f   : > { %v4595_v28 = vmin.f32 %v4593_v13, %v10800_v22  ;;  %v4521_v50 = vsub.f32 %v4457_v40, %v4489_v62 }
0x1110   : > { %v10804_v54 = vmax.f32 %v4520_v38, 0.0  ;;  %v10813_v38 = vadd.s32 64, %v9487_v23 }
0x1111   : > { %v10806_v55 = vmax.f32 %v4521_v50, 0.0  ;;  %v10860_v50 = vadd.s32 104, %v9487_v23 }
0x1112   : > { %v4575_v37 = vmin.f32 %v4573_v36, %v10804_v54  ;;  %v10816_v36 = vadd.s32 72, %v9487_v23 }
0x1113   : > { %13441 = vst [vmem:[#allocation27_spill] sm:$0xff] %v10806_v55  ;;  %v4596_v33 = vmin.f32 %v4594_v59, %v10806_v55  ;;  %v10819_v59 = vadd.s32 80, %v9487_v23 }
0x1114   : > { %v4576_v12 = vmin.f32 %v4574_v0, %v4575_v37  ;;  %v10854_v0 = vadd.s32 88, %v9487_v23 }
0x1115   : > { %v4597_v9 = vmin.f32 %v4595_v28, %v4596_v33  ;;  %v10857_v28 = vadd.s32 96, %v9487_v23 }
0x1116   : > { %v4577_v17 = vrot.slane %v4576_v12, 4 }
0x1117   : > { %v4598_v2 = vrot.slane %v4597_v9, 4 }
0x1118   : > { %v4578_v52 = vmin.f32 %v4576_v12, %v4577_v17 }
0x1119   : > { %v4599_v30 = vmin.f32 %v4597_v9, %v4598_v2  ;;  %v10881_v2 = vadd.s32 112, %v9487_v23 }
0x111a   : > { %v4579_v16 = vrot.slane %v4578_v52, 2 }
0x111b   : > { %v4600_v1 = vrot.slane %v4599_v30, 2 }
0x111c   : > { %v4580_v43 = vmin.f32 %v4578_v52, %v4579_v16  ;;  %v10884_v52 = vadd.s32 120, %v9487_v23 }
0x111d   : > { %v4601_v19 = vmin.f32 %v4599_v30, %v4600_v1 }
0x111e   : > { %v4581_v13 = vrot.slane %v4580_v43, 1 }
0x111f   : > { %v4602_v62 = vrot.slane %v4601_v19, 1 }
0x1120   : > { %v10810_v40 = vmin.f32 %v4580_v43, %v4581_v13 }
0x1121   : > { %v10862_v37 = vmin.f32 %v4601_v19, %v4602_v62 }
0x1122   : > { %vm4604_vm6 = vcmp.eq.f32.partialorder %v10690_v57, %v10810_v40  ;;  %vm4606_vm7 = vcmp.eq.f32.partialorder %v10704_v7, %v10810_v40  ;;  %vm4608_vm8 = vcmp.eq.f32.partialorder %v10692_v60, %v10810_v40  ;;  %vm4610_vm9 = vcmp.eq.f32.partialorder %v10706_v11, %v10810_v40 }
0x1123   : > { %vm4612_vm11 = vcmp.eq.f32.partialorder %v10718_v61, %v10810_v40  ;;  %vm4614_vm12 = vcmp.eq.f32.partialorder %v10726_v6, %v10810_v40  ;;  %vm4616_vm13 = vcmp.eq.f32.partialorder %v10734_v49, %v10810_v40  ;;  %vm4618_vm3 = vcmp.eq.f32.partialorder %v10742_v24, %v10810_v40 }
0x1124   : > { %vm4620_vm14 = vcmp.eq.f32.partialorder %v10750_v25, %v10810_v40  ;;  %vm4622_vm15 = vcmp.eq.f32.partialorder %v10758_v63, %v10810_v40  ;;  %vm4624_vm0 = vcmp.eq.f32.partialorder %v10766_v56, %v10810_v40  ;;  %vm4626_vm1 = vcmp.eq.f32.partialorder %v10774_v34, %v10810_v40 }
0x1125   : > { %vm4628_vm2 = vcmp.eq.f32.partialorder %v10782_v47, %v10810_v40  ;;  %vm4630_vm5 = vcmp.eq.f32.partialorder %v10790_v18, %v10810_v40  ;;  %vm4632_vm10 = vcmp.eq.f32.partialorder %v10798_v20, %v10810_v40  ;;  %vm4634_vm4 = vcmp.eq.f32.partialorder %v10804_v54, %v10810_v40 }
0x1126   : > { %v4636_v33 = vsel %vm4604_vm6, %v9487_v23, 128  ;;  %v4638_v12 = vsel %vm4606_vm7, %v9490_v26, 128  ;;  %v4640_v9 = vsel %vm4608_vm8, %v10074_v15, 128  ;;  %v4642_v17 = vsel %vm4610_vm9, %v10077_v45, 128 }
0x1127   : > { %v4644_v30 = vsel %vm4612_vm11, %v10293_v27, 128  ;;  %v4646_v16 = vsel %vm4614_vm12, %v10296_v14, 128  ;;  %v4648_v1 = vsel %vm4616_vm13, %v10299_v51, 128  ;;  %v4650_v43 = vsel %vm4618_vm3, %v10302_v4, 128 }
0x1128   : > { %v4652_v19 = vsel %vm4620_vm14, %v10813_v38, 128  ;;  %v4654_v13 = vsel %vm4622_vm15, %v10816_v36, 128  ;;  %v4656_v62 = vsel %vm4624_vm0, %v10819_v59, 128  ;;  %vm4668_vm6 = vcmp.lt.s32.totalorder %v4636_v33, %v4640_v9 }
0x1129   : > { %vm4670_vm7 = vcmp.lt.s32.totalorder %v4638_v12, %v4642_v17  ;;  %vm4605_vm8 = vcmp.eq.f32.partialorder %v10694_v3, %v10862_v37  ;;  %v4669_v44 = vsel %vm4668_vm6, %v4636_v33, %v4640_v9  ;;  %vm4607_vm9 = vcmp.eq.f32.partialorder %v10708_v46, %v10862_v37 }
0x112a   : > { %v4671_v42 = vsel %vm4670_vm7, %v4638_v12, %v4642_v17  ;;  %v4658_v8 = vsel %vm4626_vm1, %v10854_v0, 128  ;;  %vm4672_vm12 = vcmp.lt.s32.totalorder %v4669_v44, %v4644_v30  ;;  %vm4625_vm15 = vcmp.eq.f32.partialorder %v10768_v58, %v10862_v37 }
0x112b   : > { %vm4674_vm13 = vcmp.lt.s32.totalorder %v4671_v42, %v4646_v16  ;;  %v4673_v56 = vsel %vm4672_vm12, %v4669_v44, %v4644_v30  ;;  %vm4627_vm11 = vcmp.eq.f32.partialorder %v10776_v10, %v10862_v37  ;;  %v4664_v30 = vsel %vm4632_vm10, %v10881_v2, 128 }
0x112c   : > { %v4675_v63 = vsel %vm4674_vm13, %v4671_v42, %v4646_v16  ;;  %vm4676_vm0 = vcmp.lt.s32.totalorder %v4673_v56, %v4648_v1  ;;  %vm4633_vm13 = vcmp.eq.f32.partialorder %v10800_v22, %v10862_v37  ;;  %v4666_v16 = vsel %vm4634_vm4, %v10884_v52, 128 }
0x112d   : > { %vm4678_vm6 = vcmp.lt.s32.totalorder %v4675_v63, %v4650_v43  ;;  %v4677_v33 = vsel %vm4676_vm0, %v4673_v56, %v4648_v1  ;;  %vm4629_vm0 = vcmp.eq.f32.partialorder %v10784_v35, %v10862_v37  ;;  %v4662_v56 = vsel %vm4630_vm5, %v10860_v50, 128 }
0x112e   : > { %v4679_v12 = vsel %vm4678_vm6, %v4675_v63, %v4650_v43  ;;  %vm4680_vm14 = vcmp.lt.s32.totalorder %v4677_v33, %v4652_v19  ;;  %vm4631_vm6 = vcmp.eq.f32.partialorder %v10792_v31, %v10862_v37  ;;  %v4660_v63 = vsel %vm4628_vm2, %v10857_v28, 128 }
0x112f   : > { %vm4682_vm3 = vcmp.lt.s32.totalorder %v4679_v12, %v4654_v13  ;;  %v4681_v44 = vsel %vm4680_vm14, %v4677_v33, %v4652_v19  ;;  %v4639_v19 = vsel %vm4607_vm9, %v9490_v26, 128  ;;  %vm13442_vm4 = vcmp.eq.f32.partialorder %v10696_v41, %v10862_v37 }
0x1130   : > { %v4683_v42 = vsel %vm4682_vm3, %v4679_v12, %v4654_v13  ;;  %vm4684_vm12 = vcmp.lt.s32.totalorder %v4681_v44, %v4656_v62  ;;  %v4641_v33 = vsel %vm13442_vm4, %v10074_v15, 128  ;;  %vm13443_vm10 = vcmp.eq.f32.partialorder %v10710_v48, %v10862_v37 }
0x1131   : > { %vm4686_vm1 = vcmp.lt.s32.totalorder %v4683_v42, %v4658_v8  ;;  %v4685_v9 = vsel %vm4684_vm12, %v4681_v44, %v4656_v62  ;;  %v4643_v12 = vsel %vm13443_vm10, %v10077_v45, 128  ;;  %vm13444_vm9 = vcmp.eq.f32.partialorder %v10720_v53, %v10862_v37 }
0x1132   : > { %v4687_v17 = vsel %vm4686_vm1, %v4683_v42, %v4658_v8  ;;  %vm4688_vm3 = vcmp.lt.s32.totalorder %v4685_v9, %v4660_v63  ;;  %v4637_v8 = vsel %vm4605_vm8, %v9487_v23, 128  ;;  %vm4709_vm1 = vcmp.lt.s32.totalorder %v4639_v19, %v4643_v12 }
0x1133   : > { %vm4690_vm14 = vcmp.lt.s32.totalorder %v4687_v17, %v4662_v56  ;;  %v4689_v1 = vsel %vm4688_vm3, %v4685_v9, %v4660_v63  ;;  %v4778_v63 = vadd.f32 1e-08, %v10810_v40  ;;  %vm4707_vm8 = vcmp.lt.s32.totalorder %v4637_v8, %v4641_v33 }
0x1134   : > { %v4691_v43 = vsel %vm4690_vm14, %v4687_v17, %v4662_v56  ;;  %vm4692_vm2 = vcmp.lt.s32.totalorder %v4689_v1, %v4664_v30  ;;  %v4645_v56 = vsel %vm13444_vm9, %v10293_v27, 128  ;;  %v4708_v17 = vsel %vm4707_vm8, %v4637_v8, %v4641_v33 }
0x1135   : > { %vm4694_vm7 = vcmp.lt.s32.totalorder %v4691_v43, %v4666_v16  ;;  %v4693_v13 = vsel %vm4692_vm2, %v4689_v1, %v4664_v30  ;;  %v4710_v30 = vsel %vm4709_vm1, %v4639_v19, %v4643_v12  ;;  %vm13446_vm3 = vcmp.eq.f32.partialorder %v10736_v5, %v10862_v37 }
0x1136   : > { %v4695_v62 = vsel %vm4694_vm7, %v4691_v43, %v4666_v16  ;;  %vm13445_vm7 = vcmp.eq.f32.partialorder %v10728_v29, %v10862_v37  ;;  %v4649_v40 = vsel %vm13446_vm3, %v10299_v51, 128  ;;  %vm4711_vm14 = vcmp.lt.s32.totalorder %v4708_v17, %v4645_v56 }
0x1137   : > { %vm4696_vm5 = vcmp.lt.s32.totalorder %v4693_v13, %v4695_v62  ;;  %v4647_v9 = vsel %vm13445_vm7, %v10296_v14, 128  ;;  %vm13447_vm4 = vcmp.eq.f32.partialorder %v10744_v21, %v10862_v37  ;;  %v4712_v43 = vsel %vm4711_vm14, %v4708_v17, %v4645_v56 }
0x1138   : > { %v4697_v44 = vsel %vm4696_vm5, %v4693_v13, %v4695_v62  ;;  %vm4713_vm2 = vcmp.lt.s32.totalorder %v4710_v30, %v4647_v9  ;;  %v4651_v1 = vsel %vm13447_vm4, %v10302_v4, 128  ;;  %9016 = vrcp.f32 %v4778_v63 }
0x1139   : > { %v4698_v42 = vrot.slane %v4697_v44, 4  ;;  %v4714_v13 = vsel %vm4713_vm2, %v4710_v30, %v4647_v9  ;;  %vm4715_vm10 = vcmp.lt.s32.totalorder %v4712_v43, %v4649_v40  ;;  %vm13448_vm8 = vcmp.eq.f32.partialorder %v10752_v32, %v10862_v37 }
0x113a   : > { %vm4717_vm5 = vcmp.lt.s32.totalorder %v4714_v13, %v4651_v1  ;;  %v4653_v8 = vsel %vm13448_vm8, %v10813_v38, 128  ;;  %vm13449_vm1 = vcmp.eq.f32.partialorder %v10760_v39, %v10862_v37  ;;  %v4716_v33 = vsel %vm4715_vm10, %v4712_v43, %v4649_v40 }
0x113b   : > { %vm4699_vm12 = vcmp.lt.s32.totalorder %v4697_v44, %v4698_v42  ;;  %v4655_v19 = vsel %vm13449_vm1, %v10816_v36, 128  ;;  %v4718_v12 = vsel %vm4717_vm5, %v4714_v13, %v4651_v1  ;;  %vm4719_vm7 = vcmp.lt.s32.totalorder %v4716_v33, %v4653_v8 }
0x113c   : > { %v4700_v16 = vsel %vm4699_vm12, %v4697_v44, %v4698_v42  ;;  %v4657_v44 = vsel %vm4625_vm15, %v10819_v59, 128  ;;  %vm4721_vm12 = vcmp.lt.s32.totalorder %v4718_v12, %v4655_v19  ;;  %v4659_v63 = vsel %vm4627_vm11, %v10854_v0, 128 }
0x113d   : > { %v4701_v62 = vrot.slane %v4700_v16, 2  ;;  %v4720_v56 = vsel %vm4719_vm7, %v4716_v33, %v4653_v8  ;;  %v4722_v9 = vsel %vm4721_vm12, %v4718_v12, %v4655_v19  ;;  %v4661_v30 = vsel %vm4629_vm0, %v10857_v28, 128 }
0x113e   : > { %vm4723_vm3 = vcmp.lt.s32.totalorder %v4720_v56, %v4657_v44  ;;  %vm4725_vm14 = vcmp.lt.s32.totalorder %v4722_v9, %v4659_v63  ;;  %v4663_v40 = vsel %vm4631_vm6, %v10860_v50, 128  ;;  %v4665_v43 = vsel %vm4633_vm13, %v10881_v2, 128 }
0x113f   : > { %vm4702_vm9 = vcmp.lt.s32.totalorder %v4700_v16, %v4701_v62  ;;  %v4726_v1 = vsel %vm4725_vm14, %v4722_v9, %v4659_v63  ;;  %vm13450_vm0 = vcmp.eq.f32.partialorder %v10806_v55, %v10862_v37 }
0x1140   : > { %v4703_v42 = vsel %vm4702_vm9, %v4700_v16, %v4701_v62  ;;  %v4724_v16 = vsel %vm4723_vm3, %v4720_v56, %v4657_v44  ;;  %vm4729_vm2 = vcmp.lt.s32.totalorder %v4726_v1, %v4663_v40  ;;  %v4667_v62 = vsel %vm13450_vm0, %v10884_v52, 128 }
0x1141   : > { %v4704_v17 = vrot.slane %v4703_v42, 1  ;;  %vm4727_vm11 = vcmp.lt.s32.totalorder %v4724_v16, %v4661_v30  ;;  %v4730_v19 = vsel %vm4729_vm2, %v4726_v1, %v4663_v40 }
0x1142   : > { %v4728_v8 = vsel %vm4727_vm11, %v4724_v16, %v4661_v30  ;;  %v11049_v33 = vpop.eup %9016  ;;  %v13456_v30 = vld [vmem:[#allocation26_spill] sm:$0xff] }
0x1143   : > { %vm4705_vm15 = vcmp.lt.s32.totalorder %v4703_v42, %v4704_v17  ;;  %13451 = vst [vmem:[#allocation28_spill] sm:$0xff] %v11049_v33  ;;  %vm4731_vm2 = vcmp.lt.s32.totalorder %v4728_v8, %v4665_v43 }
0x1144   : > { %v11027_v13 = vsel %vm4705_vm15, %v4703_v42, %v4704_v17  ;;  %v13455_v17 = vld [vmem:[#allocation25_spill] sm:$0xff] }
0x1145   : > { %vm4746_vm6 = vcmp.eq.s32.totalorder %v9487_v23, %v11027_v13  ;;  %vm4748_vm4 = vcmp.eq.s32.totalorder %v9490_v26, %v11027_v13  ;;  %vm4750_vm13 = vcmp.eq.s32.totalorder %v10074_v15, %v11027_v13  ;;  %vm4752_vm10 = vcmp.eq.s32.totalorder %v10077_v45, %v11027_v13 }
0x1146   : > { %vm4754_vm5 = vcmp.eq.s32.totalorder %v10293_v27, %v11027_v13  ;;  %vm4756_vm8 = vcmp.eq.s32.totalorder %v10296_v14, %v11027_v13  ;;  %vm4758_vm1 = vcmp.eq.s32.totalorder %v10299_v51, %v11027_v13  ;;  %vm4760_vm9 = vcmp.eq.s32.totalorder %v10302_v4, %v11027_v13 }
0x1147   : > { %vm4762_vm7 = vcmp.eq.s32.totalorder %v10813_v38, %v11027_v13  ;;  %vm4764_vm12 = vcmp.eq.s32.totalorder %v10816_v36, %v11027_v13  ;;  %vm4766_vm3 = vcmp.eq.s32.totalorder %v10819_v59, %v11027_v13  ;;  %vm4768_vm14 = vcmp.eq.s32.totalorder %v10854_v0, %v11027_v13 }
0x1148   : > { %vm13292_vm15 = vcmp.eq.s32.totalorder %v10857_v28, %v11027_v13  ;;  %vm4772_vm11 = vcmp.eq.s32.totalorder %v10860_v50, %v11027_v13  ;;  %vm4776_vm0 = vcmp.eq.s32.totalorder %v10884_v52, %v11027_v13  ;;  %v11077_v44 = vsel %vm4746_vm6, 1e+30, %v10690_v57 }
0x1149   : > { %v11071_v12 = vsel %vm4776_vm0, %v11049_v33, 0.0  ;;  %v11083_v42 = vsel %vm4748_vm4, 1e+30, %v10704_v7  ;;  %v11089_v63 = vsel %vm4750_vm13, 1e+30, %v10692_v60  ;;  %v4732_v7 = vsel %vm4731_vm2, %v4728_v8, %v4665_v43 }
0x114a   : > { %13452 = vst [vmem:[#allocation29_spill] sm:$0xff] %v11071_v12  ;;  %v11095_v56 = vsel %vm4752_vm10, 1e+30, %v10706_v11  ;;  %v11101_v57 = vsel %vm4754_vm5, 1e+30, %v10718_v61  ;;  %v4880_v61 = vmin.f32 %v11077_v44, %v11089_v63  ;;  %vm13458_vm2 = vcmp.eq.s32.totalorder %v10881_v2, %v11027_v13 }
0x114b   : > { %13453 = vst [vmem:[#allocation30_spill] sm:$0xff] %v11101_v57  ;;  %v11107_v9 = vsel %vm4756_vm8, 1e+30, %v10726_v6  ;;  %v11113_v60 = vsel %vm4758_vm1, 1e+30, %v10734_v49  ;;  %v4881_v40 = vmin.f32 %v11083_v42, %v11095_v56 }
0x114c   : > { %13454 = vst [vmem:[#allocation31_spill] sm:$0xff] %v11107_v9  ;;  %v11119_v11 = vsel %vm4760_vm9, 1e+30, %v10742_v24  ;;  %v11127_v6 = vsel %vm4762_vm7, 1e+30, %v10750_v25  ;;  %v4882_v43 = vmin.f32 %v4880_v61, %v11101_v57  ;;  %v11180_v61 = vsel %vm4746_vm6, %v11049_v33, 0.0 }
0x114d   : > { %v11133_v49 = vsel %vm4764_vm12, 1e+30, %v13455_v17  ;;  %v11139_v24 = vsel %vm4766_vm3, 1e+30, %v13456_v30  ;;  %v11147_v25 = vsel %vm4768_vm14, 1e+30, %v10774_v34  ;;  %v4883_v8 = vmin.f32 %v4881_v40, %v11107_v9 }
0x114e   : > { %v11153_v16 = vsel %vm13292_vm15, 1e+30, %v10782_v47  ;;  %v11159_v1 = vsel %vm4772_vm11, 1e+30, %v10790_v18  ;;  %v11166_v34 = vsel %vm13458_vm2, 1e+30, %v10798_v20  ;;  %vm4733_vm15 = vcmp.lt.s32.totalorder %v4730_v19, %v4667_v62 }
0x114f   : > { %13457 = vst [vmem:[#allocation25_spill] sm:$0xff] %v11159_v1  ;;  %13459 = vst [vmem:[#allocation26_spill] sm:$0xff] %v11166_v34  ;;  %v11172_v47 = vsel %vm4776_vm0, 1e+30, %v10804_v54  ;;  %v4884_v18 = vmin.f32 %v4882_v43, %v11113_v60  ;;  %v4734_v17 = vsel %vm4733_vm15, %v4730_v19, %v4667_v62  ;;  %v11186_v20 = vsel %vm4748_vm4, %v11049_v33, 0.0 }
0x1150   : > { %13460 = vst [vmem:[#allocation32_spill] sm:$0xff] %v11180_v61  ;;  %13461 = vst [vmem:[#allocation33_spill] sm:$0xff] %v11186_v20  ;;  %v4885_v54 = vmin.f32 %v4883_v8, %v11119_v11  ;;  %vm4735_vm0 = vcmp.lt.s32.totalorder %v4732_v7, %v4734_v17  ;;  %v11193_v62 = vsel %vm4750_vm13, %v11049_v33, 0.0  ;;  %v11199_v19 = vsel %vm4752_vm10, %v11049_v33, 0.0 }
0x1151   : > { %13462 = vst [vmem:[#allocation34_spill] sm:$0xff] %v11193_v62  ;;  %13463 = vst [vmem:[#allocation35_spill] sm:$0xff] %v11199_v19  ;;  %v4886_v30 = vmin.f32 %v4884_v18, %v11127_v6  ;;  %v4736_v40 = vsel %vm4735_vm0, %v4732_v7, %v4734_v17  ;;  %v11206_v43 = vsel %vm4754_vm5, %v11049_v33, 0.0  ;;  %v11212_v8 = vsel %vm4756_vm8, %v11049_v33, 0.0 }
0x1152   : > { %13464 = vst [vmem:[#allocation36_spill] sm:$0xff] %v11206_v43  ;;  %13465 = vst [vmem:[#allocation37_spill] sm:$0xff] %v11212_v8  ;;  %v4887_v62 = vmin.f32 %v4885_v54, %v11133_v49  ;;  %v4737_v20 = vrot.slane %v4736_v40, 4  ;;  %v11219_v7 = vsel %vm4758_vm1, %v11049_v33, 0.0  ;;  %v11225_v18 = vsel %vm4760_vm9, %v11049_v33, 0.0 }
0x1153   : > { %13466 = vst [vmem:[#allocation38_spill] sm:$0xff] %v11219_v7  ;;  %13467 = vst [vmem:[#allocation39_spill] sm:$0xff] %v11225_v18  ;;  %v4888_v17 = vmin.f32 %v4886_v30, %v11139_v24  ;;  %v11232_v54 = vsel %vm4762_vm7, %v11049_v33, 0.0  ;;  %v11238_v8 = vsel %vm4764_vm12, %v11049_v33, 0.0  ;;  %v11244_v7 = vsel %vm4766_vm3, %v11049_v33, 0.0 }
0x1154   : > { %13468 = vst [vmem:[#allocation40_spill] sm:$0xff] %v11232_v54  ;;  %13469 = vst [vmem:[#allocation41_spill] sm:$0xff] %v11238_v8  ;;  %v4889_v30 = vmin.f32 %v4887_v62, %v11147_v25  ;;  %vm4738_vm6 = vcmp.lt.s32.totalorder %v4736_v40, %v4737_v20  ;;  %v11251_v54 = vsel %vm4768_vm14, %v11049_v33, 0.0  ;;  %vm13472_vm4 = vcmp.eq.s32.totalorder %v10857_v28, %v11027_v13 }
0x1155   : > { %13470 = vst [vmem:[#allocation42_spill] sm:$0xff] %v11244_v7  ;;  %13471 = vst [vmem:[#allocation43_spill] sm:$0xff] %v11251_v54  ;;  %v11257_v8 = vsel %vm13472_vm4, %v11049_v33, 0.0  ;;  %v4890_v18 = vmin.f32 %v4888_v17, %v11153_v16  ;;  %v4739_v43 = vsel %vm4738_vm6, %v4736_v40, %v4737_v20  ;;  %v11264_v62 = vsel %vm4772_vm11, %v11049_v33, 0.0 }
0x1156   : > { %13473 = vst [vmem:[#allocation44_spill] sm:$0xff] %v11257_v8  ;;  %13474 = vst [vmem:[#allocation45_spill] sm:$0xff] %v11264_v62  ;;  %v4891_v7 = vmin.f32 %v4889_v30, %v11159_v1  ;;  %v4740_v19 = vrot.slane %v4739_v43, 2 }
0x1157   : > { %vm13475_vm13 = vmmov %vm13458_vm2  ;;  %v4892_v8 = vmin.f32 %v4890_v18, %v11166_v34 }
0x1158   : > { %v11270_v54 = vsel %vm13475_vm13, %v11049_v33, 0.0  ;;  %v4893_v17 = vmin.f32 %v4891_v7, %v11172_v47  ;;  %vm4741_vm10 = vcmp.lt.s32.totalorder %v4739_v43, %v4740_v19 }
0x1159   : > { %13476 = vst [vmem:[#allocation46_spill] sm:$0xff] %v11270_v54  ;;  %v4742_v20 = vsel %vm4741_vm10, %v4739_v43, %v4740_v19 }
0x115a   : > { %v4894_v40 = vmin.f32 %v4892_v8, %v4893_v17  ;;  %v4743_v61 = vrot.slane %v4742_v20, 1 }
0x115c   : > { %v4895_v12 = vrot.slane %v4894_v40, 4  ;;  %vm4744_vm5 = vcmp.lt.s32.totalorder %v4742_v20, %v4743_v61 }
0x115d   : > { %v11275_v62 = vsel %vm4744_vm5, %v4742_v20, %v4743_v61 }
0x115e   : > { %v4896_v55 = vmin.f32 %v4894_v40, %v4895_v12  ;;  %vm13308_vm8 = vcmp.eq.s32.totalorder %v9487_v23, %v11275_v62  ;;  %vm13307_vm1 = vcmp.eq.s32.totalorder %v9490_v26, %v11275_v62  ;;  %vm13306_vm9 = vcmp.eq.s32.totalorder %v10074_v15, %v11275_v62 }
0x115f   : > { %vm13305_vm7 = vcmp.eq.s32.totalorder %v10077_v45, %v11275_v62  ;;  %vm13304_vm12 = vcmp.eq.s32.totalorder %v10293_v27, %v11275_v62  ;;  %vm13303_vm3 = vcmp.eq.s32.totalorder %v10296_v14, %v11275_v62  ;;  %vm13302_vm14 = vcmp.eq.s32.totalorder %v10299_v51, %v11275_v62 }
0x1160   : > { %v4897_v13 = vrot.slane %v4896_v55, 2  ;;  %vm13301_vm15 = vcmp.eq.s32.totalorder %v10302_v4, %v11275_v62  ;;  %vm13300_vm11 = vcmp.eq.s32.totalorder %v10813_v38, %v11275_v62  ;;  %vm13299_vm2 = vcmp.eq.s32.totalorder %v10816_v36, %v11275_v62 }
0x1161   : > { %vm13297_vm0 = vcmp.eq.s32.totalorder %v10819_v59, %v11275_v62  ;;  %vm13295_vm6 = vcmp.eq.s32.totalorder %v10854_v0, %v11275_v62  ;;  %vm13294_vm4 = vcmp.eq.s32.totalorder %v10857_v28, %v11275_v62  ;;  %vm13296_vm13 = vcmp.eq.s32.totalorder %v10860_v50, %v11275_v62 }
0x1162   : > { %v4898_v12 = vmin.f32 %v4896_v55, %v4897_v13  ;;  %v11309_v61 = vsel %vm13308_vm8, 1e+30, %v10694_v3  ;;  %vm13298_vm10 = vcmp.eq.s32.totalorder %v10881_v2, %v11275_v62  ;;  %v11317_v55 = vsel %vm13307_vm1, 1e+30, %v10708_v46 }
0x1163   : > { %13477 = vst [vmem:[#allocation47_spill] sm:$0xff] %v11309_v61  ;;  %13478 = vst [vmem:[#allocation48_spill] sm:$0xff] %v11317_v55  ;;  %v11323_v19 = vsel %vm13306_vm9, 1e+30, %v10696_v41  ;;  %v11329_v3 = vsel %vm13305_vm7, 1e+30, %v10710_v48 }
0x1164   : > { %13479 = vst [vmem:[#allocation49_spill] sm:$0xff] %v11323_v19  ;;  %13480 = vst [vmem:[#allocation50_spill] sm:$0xff] %v11329_v3  ;;  %v4899_v43 = vrot.slane %v4898_v12, 1  ;;  %v11335_v8 = vsel %vm13304_vm12, 1e+30, %v10720_v53  ;;  %v4901_v41 = vmin.f32 %v11309_v61, %v11323_v19  ;;  %v4902_v7 = vmin.f32 %v11317_v55, %v11329_v3 }
0x1165   : > { %13481 = vst [vmem:[#allocation51_spill] sm:$0xff] %v11335_v8  ;;  %v11341_v46 = vsel %vm13303_vm3, 1e+30, %v10728_v29  ;;  %v11349_v48 = vsel %vm13302_vm14, 1e+30, %v10736_v5  ;;  %vm13322_vm14 = vcmp.eq.s32.totalorder %v10884_v52, %v11275_v62 }
0x1166   : > { %13482 = vst [vmem:[#allocation52_spill] sm:$0xff] %v11341_v46  ;;  %13483 = vst [vmem:[#allocation53_spill] sm:$0xff] %v11349_v48  ;;  %v11355_v53 = vsel %vm13301_vm15, 1e+30, %v10744_v21  ;;  %v11361_v29 = vsel %vm13300_vm11, 1e+30, %v10752_v32  ;;  %v11365_v18 = vmin.f32 %v4898_v12, %v4899_v43  ;;  %v4904_v33 = vmin.f32 %v4902_v7, %v11341_v46 }
0x1167   : > { %13484 = vst [vmem:[#allocation54_spill] sm:$0xff] %v11355_v53  ;;  %13485 = vst [vmem:[#allocation55_spill] sm:$0xff] %v11361_v29  ;;  %v11371_v5 = vsel %vm13299_vm2, 1e+30, %v10760_v39  ;;  %v11377_v21 = vsel %vm13297_vm0, 1e+30, %v10768_v58 }
0x1168   : > { %13486 = vst [vmem:[#allocation56_spill] sm:$0xff] %v11371_v5  ;;  %13487 = vst [vmem:[#allocation57_spill] sm:$0xff] %v11377_v21  ;;  %v11383_v32 = vsel %vm13295_vm6, 1e+30, %v10776_v10  ;;  %v11389_v30 = vsel %vm13294_vm4, 1e+30, %v10784_v35  ;;  %v4903_v10 = vmin.f32 %v4901_v41, %v11335_v8  ;;  %vm4922_vm5 = vcmp.eq.f32.partialorder %v11077_v44, %v11365_v18 }
0x1169   : > { %13488 = vst [vmem:[#allocation58_spill] sm:$0xff] %v11383_v32  ;;  %13489 = vst [vmem:[#allocation59_spill] sm:$0xff] %v11389_v30  ;;  %v11395_v39 = vsel %vm13296_vm13, 1e+30, %v10792_v31  ;;  %v11401_v58 = vsel %vm13298_vm10, 1e+30, %v10800_v22  ;;  %vm4924_vm4 = vcmp.eq.f32.partialorder %v11083_v42, %v11365_v18  ;;  %vm4926_vm6 = vcmp.eq.f32.partialorder %v11089_v63, %v11365_v18 }
0x116a   : > { %13490 = vst [vmem:[#allocation60_spill] sm:$0xff] %v11395_v39  ;;  %13491 = vst [vmem:[#allocation61_spill] sm:$0xff] %v11401_v58  ;;  %vm4928_vm13 = vcmp.eq.f32.partialorder %v11095_v56, %v11365_v18  ;;  %vm4930_vm0 = vcmp.eq.f32.partialorder %v11101_v57, %v11365_v18  ;;  %vm4932_vm10 = vcmp.eq.f32.partialorder %v11107_v9, %v11365_v18  ;;  %v4954_v31 = vsel %vm4922_vm5, %v9487_v23, 128  ;;  %v13492_v12 = vld [vmem:[#allocation27_spill] sm:$0xff] }
0x116b   : > { %vm4934_vm2 = vcmp.eq.f32.partialorder %v11113_v60, %v11365_v18  ;;  %vm4936_vm11 = vcmp.eq.f32.partialorder %v11119_v11, %v11365_v18  ;;  %vm4938_vm15 = vcmp.eq.f32.partialorder %v11127_v6, %v11365_v18  ;;  %vm4942_vm3 = vcmp.eq.f32.partialorder %v11139_v24, %v11365_v18 }
0x116c   : > { %vm4944_vm12 = vcmp.eq.f32.partialorder %v11147_v25, %v11365_v18  ;;  %vm4946_vm7 = vcmp.eq.f32.partialorder %v11153_v16, %v11365_v18  ;;  %vm4948_vm9 = vcmp.eq.f32.partialorder %v11159_v1, %v11365_v18  ;;  %vm4950_vm1 = vcmp.eq.f32.partialorder %v11166_v34, %v11365_v18 }
0x116d   : > { %vm4952_vm8 = vcmp.eq.f32.partialorder %v11172_v47, %v11365_v18  ;;  %v4956_v35 = vsel %vm4924_vm4, %v9490_v26, 128  ;;  %v4958_v22 = vsel %vm4926_vm6, %v10074_v15, 128  ;;  %v4960_v17 = vsel %vm4928_vm13, %v10077_v45, 128 }
0x116e   : > { %v4962_v20 = vsel %vm4930_vm0, %v10293_v27, 128  ;;  %v4779_v40 = vadd.f32 1e-08, %v10862_v37  ;;  %v4964_v13 = vsel %vm4932_vm10, %v10296_v14, 128  ;;  %vm4986_vm4 = vcmp.lt.s32.totalorder %v4954_v31, %v4958_v22 }
0x116f   : > { %vm4988_vm5 = vcmp.lt.s32.totalorder %v4956_v35, %v4960_v17  ;;  %v11467_v43 = vsel %vm13322_vm14, 1e+30, %v13492_v12  ;;  %v4987_v41 = vsel %vm4986_vm4, %v4954_v31, %v4958_v22  ;;  %v4905_v8 = vmin.f32 %v4903_v10, %v11349_v48 }
0x1170   : > { %13493 = vst [vmem:[#allocation27_spill] sm:$0xff] %v11467_v43  ;;  %v4989_v54 = vsel %vm4988_vm5, %v4956_v35, %v4960_v17  ;;  %v4966_v37 = vsel %vm4934_vm2, %v10299_v51, 128  ;;  %v4968_v9 = vsel %vm4936_vm11, %v10302_v4, 128  ;;  %vm4990_vm0 = vcmp.lt.s32.totalorder %v4987_v41, %v4962_v20 }
0x1171   : > { %vm4992_vm6 = vcmp.lt.s32.totalorder %v4989_v54, %v4964_v13  ;;  %v4991_v12 = vsel %vm4990_vm0, %v4987_v41, %v4962_v20  ;;  %v4906_v31 = vmin.f32 %v4904_v33, %v11355_v53  ;;  %v4907_v7 = vmin.f32 %v4905_v8, %v11361_v29 }
0x1172   : > { %v4993_v57 = vsel %vm4992_vm6, %v4989_v54, %v4964_v13  ;;  %v4970_v10 = vsel %vm4938_vm15, %v10813_v38, 128  ;;  %vm13494_vm2 = vcmp.eq.f32.partialorder %v11133_v49, %v11365_v18  ;;  %vm4994_vm13 = vcmp.lt.s32.totalorder %v4991_v12, %v4966_v37 }
0x1173   : > { %v4972_v35 = vsel %vm13494_vm2, %v10816_v36, 128  ;;  %vm4996_vm11 = vcmp.lt.s32.totalorder %v4993_v57, %v4968_v9  ;;  %v4995_v22 = vsel %vm4994_vm13, %v4991_v12, %v4966_v37  ;;  %v4908_v54 = vmin.f32 %v4906_v31, %v11371_v5 }
0x1174   : > { %v4997_v17 = vsel %vm4996_vm11, %v4993_v57, %v4968_v9  ;;  %v4909_v33 = vmin.f32 %v4907_v7, %v11377_v21  ;;  %v4974_v8 = vsel %vm4942_vm3, %v10819_v59, 128  ;;  %v4976_v20 = vsel %vm4944_vm12, %v10854_v0, 128 }
0x1175   : > { %vm4998_vm15 = vcmp.lt.s32.totalorder %v4995_v22, %v4970_v10  ;;  %vm5000_vm10 = vcmp.lt.s32.totalorder %v4997_v17, %v4972_v35  ;;  %v4910_v57 = vmin.f32 %v4908_v54, %v11383_v32  ;;  %v4978_v37 = vsel %vm4946_vm7, %v10857_v28, 128 }
0x1176   : > { %v4999_v13 = vsel %vm4998_vm15, %v4995_v22, %v4970_v10  ;;  %v5001_v41 = vsel %vm5000_vm10, %v4997_v17, %v4972_v35  ;;  %v4911_v9 = vmin.f32 %v4909_v33, %v11389_v30  ;;  %v4980_v12 = vsel %vm4948_vm9, %v10860_v50, 128 }
0x1177   : > { %vm5002_vm3 = vcmp.lt.s32.totalorder %v4999_v13, %v4974_v8  ;;  %vm5004_vm12 = vcmp.lt.s32.totalorder %v5001_v41, %v4976_v20  ;;  %v4912_v10 = vmin.f32 %v4910_v57, %v11395_v39  ;;  %v4982_v22 = vsel %vm4950_vm1, %v10881_v2, 128 }
0x1178   : > { %v5003_v31 = vsel %vm5002_vm3, %v4999_v13, %v4974_v8  ;;  %v5005_v7 = vsel %vm5004_vm12, %v5001_v41, %v4976_v20  ;;  %v4913_v35 = vmin.f32 %v4911_v9, %v11401_v58  ;;  %v4984_v17 = vsel %vm4952_vm8, %v10884_v52, 128 }
0x1179   : > { %vm5006_vm4 = vcmp.lt.s32.totalorder %v5003_v31, %v4978_v37  ;;  %vm5008_vm7 = vcmp.lt.s32.totalorder %v5005_v7, %v4980_v12  ;;  %v4914_v8 = vmin.f32 %v4912_v10, %v11467_v43  ;;  %9018 = vrcp.f32 %v4779_v40 }
0x117a   : > { %v5007_v54 = vsel %vm5006_vm4, %v5003_v31, %v4978_v37  ;;  %v5009_v33 = vsel %vm5008_vm7, %v5005_v7, %v4980_v12  ;;  %v5096_v58 = vadd.f32 1e-08, %v11365_v18  ;;  %vm13496_vm6 = vcmp.eq.s32.totalorder %v9487_v23, %v11275_v62 }
0x117b   : > { %vm5010_vm9 = vcmp.lt.s32.totalorder %v5007_v54, %v4982_v22  ;;  %vm5012_vm5 = vcmp.lt.s32.totalorder %v5009_v33, %v4984_v17  ;;  %v4915_v41 = vmin.f32 %v4913_v35, %v4914_v8  ;;  %vm13498_vm2 = vcmp.eq.s32.totalorder %v9490_v26, %v11275_v62 }
0x117c   : > { %v5011_v20 = vsel %vm5010_vm9, %v5007_v54, %v4982_v22  ;;  %v5013_v13 = vsel %vm5012_vm5, %v5009_v33, %v4984_v17  ;;  %9020 = vrcp.f32 %v5096_v58  ;;  %vm13500_vm13 = vcmp.eq.s32.totalorder %v10074_v15, %v11275_v62 }
0x117d   : > { %vm5014_vm0 = vcmp.lt.s32.totalorder %v5011_v20, %v5013_v13  ;;  %v4916_v9 = vrot.slane %v4915_v41, 4  ;;  %vm13502_vm11 = vcmp.eq.s32.totalorder %v10077_v45, %v11275_v62  ;;  %vm13504_vm15 = vcmp.eq.s32.totalorder %v10293_v27, %v11275_v62 }
0x117e   : > { %v5015_v57 = vsel %vm5014_vm0, %v5011_v20, %v5013_v13  ;;  %vm13506_vm10 = vcmp.eq.s32.totalorder %v10296_v14, %v11275_v62  ;;  %vm13508_vm12 = vcmp.eq.s32.totalorder %v10299_v51, %v11275_v62  ;;  %vm13510_vm4 = vcmp.eq.s32.totalorder %v10302_v4, %v11275_v62 }
0x117f   : > { %v5016_v34 = vrot.slane %v5015_v57, 4  ;;  %v4917_v1 = vmin.f32 %v4915_v41, %v4916_v9  ;;  %vm13512_vm7 = vcmp.eq.s32.totalorder %v10813_v38, %v11275_v62 }
0x1181   : > { %vm5017_vm1 = vcmp.lt.s32.totalorder %v5015_v57, %v5016_v34  ;;  %v4918_v30 = vrot.slane %v4917_v1, 2 }
0x1182   : > { %v5018_v39 = vsel %vm5017_vm1, %v5015_v57, %v5016_v34 }
0x1183   : > { %v5019_v37 = vrot.slane %v5018_v39, 2  ;;  %v4919_v12 = vmin.f32 %v4917_v1, %v4918_v30  ;;  %v11521_v31 = vpop.eup %9018 }
0x1184   : > { %13495 = vst [vmem:[#allocation62_spill] sm:$0xff] %v11521_v31  ;;  %v11527_v35 = vsel %vm13496_vm6, %v11521_v31, 0.0  ;;  %v11533_v34 = vsel %vm13498_vm2, %v11521_v31, 0.0  ;;  %v11539_v1 = vsel %vm13500_vm13, %v11521_v31, 0.0  ;;  %v11547_v30 = vsel %vm13502_vm11, %v11521_v31, 0.0 }
0x1185   : > { %vm5020_vm8 = vcmp.lt.s32.totalorder %v5018_v39, %v5019_v37  ;;  %v4920_v10 = vrot.slane %v4919_v12, 1  ;;  %13497 = vst [vmem:[#allocation63_spill] sm:$0xff] %v11527_v35  ;;  %13499 = vst [vmem:[#allocation64_spill] sm:$0xff] %v11533_v34  ;;  %v11559_v58 = vsel %vm13506_vm10, %v11521_v31, 0.0  ;;  %v11565_v22 = vsel %vm13508_vm12, %v11521_v31, 0.0 }
0x1186   : > { %v5021_v7 = vsel %vm5020_vm8, %v5018_v39, %v5019_v37  ;;  %13501 = vst [vmem:[#allocation65_spill] sm:$0xff] %v11539_v1  ;;  %13503 = vst [vmem:[#allocation66_spill] sm:$0xff] %v11547_v30  ;;  %v11553_v39 = vsel %vm13504_vm15, %v11521_v31, 0.0  ;;  %v11571_v17 = vsel %vm13510_vm4, %v11521_v31, 0.0  ;;  %v11577_v54 = vsel %vm13512_vm7, %v11521_v31, 0.0  ;;  %v11619_v13 = vpop.eup %9020  ;;  %v13519_v37 = vld [vmem:[#allocation29_spill] sm:$0xff] }
0x1187   : > { %v5022_v40 = vrot.slane %v5021_v7, 1  ;;  %v11541_v18 = vmin.f32 %v4919_v12, %v4920_v10  ;;  %13505 = vst [vmem:[#allocation67_spill] sm:$0xff] %v11553_v39  ;;  %13507 = vst [vmem:[#allocation68_spill] sm:$0xff] %v11559_v58  ;;  %vm13515_vm6 = vcmp.eq.s32.totalorder %v10816_v36, %v11275_v62  ;;  %vm13517_vm2 = vcmp.eq.s32.totalorder %v10819_v59, %v11275_v62 }
0x1188   : > { %13509 = vst [vmem:[#allocation69_spill] sm:$0xff] %v11565_v22  ;;  %13511 = vst [vmem:[#allocation70_spill] sm:$0xff] %v11571_v17  ;;  %v11595_v8 = vsel %vm13515_vm6, %v11521_v31, 0.0  ;;  %v11601_v20 = vsel %vm13517_vm2, %v11521_v31, 0.0  ;;  %v13527_v17 = vld [vmem:[#allocation61_spill] sm:$0xff] }
0x1189   : > { %vm5023_vm3 = vcmp.lt.s32.totalorder %v5021_v7, %v5022_v40  ;;  %13513 = vst [vmem:[#allocation71_spill] sm:$0xff] %v11577_v54  ;;  %vm4923_vm9 = vcmp.eq.f32.partialorder %v11309_v61, %v11541_v18  ;;  %13516 = vst [vmem:[#allocation73_spill] sm:$0xff] %v11595_v8  ;;  %vm4929_vm5 = vcmp.eq.f32.partialorder %v11329_v3, %v11541_v18  ;;  %v13523_v8 = vld [vmem:[#allocation51_spill] sm:$0xff] }
0x118a   : > { %v11579_v33 = vsel %vm5023_vm3, %v5021_v7, %v5022_v40  ;;  %13518 = vst [vmem:[#allocation74_spill] sm:$0xff] %v11601_v20  ;;  %v13522_v40 = vld [vmem:[#allocation31_spill] sm:$0xff] }
0x118b   : > { %13514 = vst [vmem:[#allocation72_spill] sm:$0xff] %v11579_v33  ;;  %vm13335_vm1 = vcmp.eq.s32.totalorder %v9487_v23, %v11579_v33  ;;  %vm13334_vm8 = vcmp.eq.s32.totalorder %v9490_v26, %v11579_v33  ;;  %vm13333_vm13 = vcmp.eq.s32.totalorder %v10074_v15, %v11579_v33  ;;  %vm13332_vm11 = vcmp.eq.s32.totalorder %v10077_v45, %v11579_v33 }
0x118c   : > { %vm13331_vm15 = vcmp.eq.s32.totalorder %v10293_v27, %v11579_v33  ;;  %vm13330_vm10 = vcmp.eq.s32.totalorder %v10296_v14, %v11579_v33  ;;  %vm13329_vm3 = vcmp.eq.s32.totalorder %v10299_v51, %v11579_v33  ;;  %vm13323_vm12 = vcmp.eq.s32.totalorder %v10302_v4, %v11579_v33 }
0x118d   : > { %vm13324_vm4 = vcmp.eq.s32.totalorder %v10813_v38, %v11579_v33  ;;  %vm13328_vm7 = vcmp.eq.s32.totalorder %v10816_v36, %v11579_v33  ;;  %vm13326_vm6 = vcmp.eq.s32.totalorder %v10819_v59, %v11579_v33  ;;  %vm13325_vm2 = vcmp.eq.s32.totalorder %v10854_v0, %v11579_v33 }
0x118e   : > { %vm13327_vm14 = vcmp.eq.s32.totalorder %v10857_v28, %v11579_v33  ;;  %vm5094_vm0 = vcmp.eq.s32.totalorder %v10884_v52, %v11579_v33  ;;  %v11637_v57 = vsel %vm13335_vm1, 1e+30, %v11077_v44  ;;  %v11643_v9 = vsel %vm13334_vm8, 1e+30, %v11083_v42  ;;  %v13521_v42 = vld [vmem:[#allocation30_spill] sm:$0xff] }
0x118f   : > { %v5132_v41 = vsel %vm5094_vm0, %v11619_v13, 0.0  ;;  %v11654_v7 = vsel %vm13333_vm13, 1e+30, %v11089_v63  ;;  %v11660_v44 = vsel %vm13332_vm11, 1e+30, %v11095_v56  ;;  %vm4951_vm8 = vcmp.eq.f32.partialorder %v13527_v17, %v11541_v18 }
0x1190   : > { %v11648_v12 = vadd.f32 %v5132_v41, %v13519_v37  ;;  %v11666_v10 = vsel %vm13331_vm15, 1e+30, %v13521_v42  ;;  %v11672_v41 = vsel %vm13330_vm10, 1e+30, %v13522_v40  ;;  %v11678_v63 = vsel %vm13329_vm3, 1e+30, %v11113_v60 }
0x1191   : > { %v11684_v56 = vsel %vm13323_vm12, 1e+30, %v11119_v11  ;;  %v5198_v37 = vmin.f32 %v11637_v57, %v11654_v7  ;;  %v11692_v42 = vsel %vm13324_vm4, 1e+30, %v11127_v6  ;;  %v11698_v60 = vsel %vm13328_vm7, 1e+30, %v11133_v49 }
0x1192   : > { %13520 = vst [vmem:[#allocation29_spill] sm:$0xff] %v11648_v12  ;;  %v11704_v11 = vsel %vm13326_vm6, 1e+30, %v11139_v24  ;;  %v5199_v40 = vmin.f32 %v11643_v9, %v11660_v44  ;;  %vm13336_vm12 = vcmp.eq.s32.totalorder %v10860_v50, %v11579_v33  ;;  %vm13353_vm4 = vcmp.eq.s32.totalorder %v10881_v2, %v11579_v33 }
0x1193   : > { %v11716_v6 = vsel %vm13325_vm2, 1e+30, %v11147_v25  ;;  %v5200_v49 = vmin.f32 %v5198_v37, %v11666_v10  ;;  %v11723_v24 = vsel %vm13327_vm14, 1e+30, %v11153_v16  ;;  %v11729_v12 = vsel %vm5094_vm0, 1e+30, %v11172_v47 }
0x1194   : > { %v5201_v20 = vmin.f32 %v5199_v40, %v11672_v41  ;;  %vm4931_vm2 = vcmp.eq.f32.partialorder %v13523_v8, %v11541_v18  ;;  %vm4933_vm6 = vcmp.eq.f32.partialorder %v11341_v46, %v11541_v18  ;;  %vm4935_vm14 = vcmp.eq.f32.partialorder %v11349_v48, %v11541_v18  ;;  %v13524_v37 = vld [vmem:[#allocation59_spill] sm:$0xff]  ;;  %v13525_v40 = vld [vmem:[#allocation60_spill] sm:$0xff] }
0x1195   : > { %v5202_v25 = vmin.f32 %v5200_v49, %v11678_v63  ;;  %vm4937_vm7 = vcmp.eq.f32.partialorder %v11355_v53, %v11541_v18  ;;  %vm4939_vm0 = vcmp.eq.f32.partialorder %v11361_v29, %v11541_v18  ;;  %vm4941_vm3 = vcmp.eq.f32.partialorder %v11371_v5, %v11541_v18 }
0x1196   : > { %v5203_v16 = vmin.f32 %v5201_v20, %v11684_v56  ;;  %vm4943_vm10 = vcmp.eq.f32.partialorder %v11377_v21, %v11541_v18  ;;  %vm4945_vm15 = vcmp.eq.f32.partialorder %v11383_v32, %v11541_v18  ;;  %vm4947_vm11 = vcmp.eq.f32.partialorder %v13524_v37, %v11541_v18  ;;  %v13526_v20 = vld [vmem:[#allocation25_spill] sm:$0xff] }
0x1197   : > { %v5204_v47 = vmin.f32 %v5202_v25, %v11692_v42  ;;  %vm4949_vm13 = vcmp.eq.f32.partialorder %v13525_v40, %v11541_v18  ;;  %v11759_v49 = vsel %vm13336_vm12, 1e+30, %v13526_v20  ;;  %v13528_v25 = vld [vmem:[#allocation26_spill] sm:$0xff]  ;;  %v4955_v20 = vsel %vm4923_vm9, %v9487_v23, 128  ;;  %v13535_v40 = vld [vmem:[#allocation33_spill] sm:$0xff] }
0x1198   : > { %v5205_v54 = vmin.f32 %v5203_v16, %v11698_v60  ;;  %v11770_v22 = vsel %vm13353_vm4, 1e+30, %v13528_v25  ;;  %vm13529_vm12 = vcmp.eq.f32.partialorder %v11317_v55, %v11541_v18  ;;  %vm13530_vm1 = vcmp.eq.f32.partialorder %v11323_v19, %v11541_v18 }
0x1199   : > { %v5206_v58 = vmin.f32 %v5204_v47, %v11704_v11  ;;  %v4957_v16 = vsel %vm13529_vm12, %v9490_v26, 128  ;;  %v4959_v25 = vsel %vm13530_vm1, %v10074_v15, 128  ;;  %v4961_v47 = vsel %vm4929_vm5, %v10077_v45, 128 }
0x119a   : > { %v5207_v39 = vmin.f32 %v5205_v54, %v11716_v6  ;;  %v4963_v30 = vsel %vm4931_vm2, %v10293_v27, 128  ;;  %v4965_v54 = vsel %vm4933_vm6, %v10296_v14, 128  ;;  %v4967_v19 = vsel %vm4935_vm14, %v10299_v51, 128 }
0x119b   : > { %v5208_v1 = vmin.f32 %v5206_v58, %v11723_v24  ;;  %v4969_v3 = vsel %vm4937_vm7, %v10302_v4, 128  ;;  %v4971_v58 = vsel %vm4939_vm0, %v10813_v38, 128  ;;  %v4973_v46 = vsel %vm4941_vm3, %v10816_v36, 128 }
0x119c   : > { %v5209_v8 = vmin.f32 %v5207_v39, %v11759_v49  ;;  %v4975_v48 = vsel %vm4943_vm10, %v10819_v59, 128  ;;  %v4977_v39 = vsel %vm4945_vm15, %v10854_v0, 128  ;;  %v4979_v29 = vsel %vm4947_vm11, %v10857_v28, 128 }
0x119d   : > { %v5210_v53 = vmin.f32 %v5208_v1, %v11770_v22  ;;  %v4981_v5 = vsel %vm4949_vm13, %v10860_v50, 128  ;;  %v4983_v1 = vsel %vm4951_vm8, %v10881_v2, 128  ;;  %vm5025_vm14 = vcmp.lt.s32.totalorder %v4955_v20, %v4959_v25 }
0x119e   : > { %v5211_v21 = vmin.f32 %v5209_v8, %v11729_v12  ;;  %vm5027_vm9 = vcmp.lt.s32.totalorder %v4957_v16, %v4961_v47  ;;  %v5026_v34 = vsel %vm5025_vm14, %v4955_v20, %v4959_v25  ;;  %vm13531_vm5 = vcmp.eq.s32.totalorder %v9487_v23, %v11579_v33  ;;  %v13534_v25 = vld [vmem:[#allocation32_spill] sm:$0xff] }
0x119f   : > { %v5028_v55 = vsel %vm5027_vm9, %v4957_v16, %v4961_v47  ;;  %v5102_v61 = vsel %vm13531_vm5, %v11619_v13, 0.0  ;;  %vm13532_vm1 = vcmp.eq.s32.totalorder %v9490_v26, %v11579_v33  ;;  %vm13533_vm13 = vcmp.eq.f32.partialorder %v11467_v43, %v11541_v18 }
0x11a0   : > { %v5104_v35 = vsel %vm13532_vm1, %v11619_v13, 0.0  ;;  %v5212_v8 = vmin.f32 %v5210_v53, %v5211_v21  ;;  %v4985_v17 = vsel %vm13533_vm13, %v10884_v52, 128  ;;  %vm5029_vm8 = vcmp.lt.s32.totalorder %v5026_v34, %v4963_v30 }
0x11a1   : > { %vm5031_vm11 = vcmp.lt.s32.totalorder %v5028_v55, %v4965_v54  ;;  %v5030_v20 = vsel %vm5029_vm8, %v5026_v34, %v4963_v30  ;;  %v11851_v47 = vadd.f32 %v5102_v61, %v13534_v25  ;;  %v11854_v37 = vadd.f32 %v5104_v35, %v13535_v40  ;;  %v13538_v61 = vld [vmem:[#allocation34_spill] sm:$0xff]  ;;  %v13539_v30 = vld [vmem:[#allocation35_spill] sm:$0xff] }
0x11a2   : > { %v5032_v16 = vsel %vm5031_vm11, %v5028_v55, %v4965_v54  ;;  %v5213_v32 = vrot.slane %v5212_v8, 4  ;;  %vm5033_vm15 = vcmp.lt.s32.totalorder %v5030_v20, %v4967_v19  ;;  %vm13536_vm3 = vcmp.eq.s32.totalorder %v10074_v15, %v11579_v33 }
0x11a3   : > { %vm5035_vm10 = vcmp.lt.s32.totalorder %v5032_v16, %v4969_v3  ;;  %v5106_v53 = vsel %vm13536_vm3, %v11619_v13, 0.0  ;;  %v5034_v21 = vsel %vm5033_vm15, %v5030_v20, %v4967_v19  ;;  %vm13537_vm12 = vcmp.eq.s32.totalorder %v10077_v45, %v11579_v33 }
0x11a4   : > { %v5036_v43 = vsel %vm5035_vm10, %v5032_v16, %v4969_v3  ;;  %v5108_v55 = vsel %vm13537_vm12, %v11619_v13, 0.0  ;;  %v11865_v34 = vadd.f32 %v5106_v53, %v13538_v61  ;;  %v5214_v35 = vmin.f32 %v5212_v8, %v5213_v32  ;;  %v13542_v32 = vld [vmem:[#allocation36_spill] sm:$0xff] }
0x11a5   : > { %vm5037_vm7 = vcmp.lt.s32.totalorder %v5034_v21, %v4971_v58  ;;  %vm5039_vm6 = vcmp.lt.s32.totalorder %v5036_v43, %v4973_v46  ;;  %v11868_v40 = vadd.f32 %v5108_v55, %v13539_v30  ;;  %vm13540_vm2 = vcmp.eq.s32.totalorder %v10293_v27, %v11579_v33 }
0x11a6   : > { %v5038_v54 = vsel %vm5037_vm7, %v5034_v21, %v4971_v58  ;;  %v5040_v25 = vsel %vm5039_vm6, %v5036_v43, %v4973_v46  ;;  %v5110_v19 = vsel %vm13540_vm2, %v11619_v13, 0.0  ;;  %vm13541_vm0 = vcmp.eq.s32.totalorder %v10296_v14, %v11579_v33  ;;  %v13543_v58 = vld [vmem:[#allocation37_spill] sm:$0xff] }
0x11a7   : > { %v5112_v3 = vsel %vm13541_vm0, %v11619_v13, 0.0  ;;  %v5215_v20 = vrot.slane %v5214_v35, 2  ;;  %vm5041_vm14 = vcmp.lt.s32.totalorder %v5038_v54, %v4975_v48  ;;  %vm5043_vm9 = vcmp.lt.s32.totalorder %v5040_v25, %v4977_v39 }
0x11a8   : > { %v11879_v8 = vadd.f32 %v5110_v19, %v13542_v32  ;;  %v5042_v16 = vsel %vm5041_vm14, %v5038_v54, %v4975_v48  ;;  %v5044_v53 = vsel %vm5043_vm9, %v5040_v25, %v4977_v39  ;;  %v11882_v46 = vadd.f32 %v5112_v3, %v13543_v58  ;;  %v13546_v48 = vld [vmem:[#allocation38_spill] sm:$0xff]  ;;  %v13547_v54 = vld [vmem:[#allocation39_spill] sm:$0xff]  ;;  %v4014_v3 = vpop.permute.xlu1 %4013 }
0x11a9   : > { %vm13544_vm5 = vcmp.eq.s32.totalorder %v10299_v51, %v11579_v33  ;;  %v5216_v21 = vmin.f32 %v5214_v35, %v5215_v20  ;;  %vm5045_vm1 = vcmp.lt.s32.totalorder %v5042_v16, %v4979_v29  ;;  %vm5047_vm13 = vcmp.lt.s32.totalorder %v5044_v53, %v4981_v5 }
0x11aa   : > { %v5114_v43 = vsel %vm13544_vm5, %v11619_v13, 0.0  ;;  %vm13545_vm8 = vcmp.eq.s32.totalorder %v10302_v4, %v11579_v33  ;;  %v5046_v61 = vsel %vm5045_vm1, %v5042_v16, %v4979_v29  ;;  %v5048_v30 = vsel %vm5047_vm13, %v5044_v53, %v4981_v5  ;;  %v13550_v5 = vld [vmem:[#allocation40_spill] sm:$0xff] }
0x11ab   : > { %v5116_v55 = vsel %vm13545_vm8, %v11619_v13, 0.0  ;;  %v11893_v39 = vadd.f32 %v5114_v43, %v13546_v48  ;;  %v5217_v19 = vrot.slane %v5216_v21, 1  ;;  %vm5049_vm11 = vcmp.lt.s32.totalorder %v5046_v61, %v4983_v1 }
0x11ac   : > { %v11896_v25 = vadd.f32 %v5116_v55, %v13547_v54  ;;  %vm5051_vm15 = vcmp.lt.s32.totalorder %v5048_v30, %v4985_v17  ;;  %vm13548_vm10 = vcmp.eq.s32.totalorder %v10813_v38, %v11579_v33  ;;  %v5050_v20 = vsel %vm5049_vm11, %v5046_v61, %v4983_v1  ;;  %v13551_v55 = vld [vmem:[#allocation41_spill] sm:$0xff] }
0x11ad   : > { %v5118_v35 = vsel %vm13548_vm10, %v11619_v13, 0.0  ;;  %v5052_v32 = vsel %vm5051_vm15, %v5048_v30, %v4985_v17  ;;  %v8775_v58 = vpop.f32.mrb[48].mxu1  ;;  %vm13549_vm3 = vcmp.eq.s32.totalorder %v10816_v36, %v11579_v33  ;;  %v11909_v53 = vmin.f32 %v5216_v21, %v5217_v19  ;;  %v4024_v19 = vpop.permute.xlu1 %4023 }
0x11ae   : > { %v5120_v29 = vsel %vm13549_vm3, %v11619_v13, 0.0  ;;  %v11907_v16 = vadd.f32 %v5118_v35, %v13550_v5  ;;  %vm5053_vm12 = vcmp.lt.s32.totalorder %v5050_v20, %v5052_v32  ;;  %v4081_v43 = vpop.f32.mrb[49].mxu1  ;;  %vm13552_vm7 = vcmp.eq.s32.totalorder %v10854_v0, %v11275_v62 }
0x11af   : > { %v11912_v48 = vadd.f32 %v5120_v29, %v13551_v55  ;;  %v11918_v17 = vsel %vm13552_vm7, %v11521_v31, 0.0  ;;  %v5054_v1 = vsel %vm5053_vm12, %v5050_v20, %v5052_v32  ;;  %v5097_v61 = vadd.f32 1e-08, %v11541_v18  ;;  %v11921_v30 = vpop.f32.mrb[50].mxu1 }
0x11b0   : > { %vm13553_vm6 = vcmp.eq.s32.totalorder %v10857_v28, %v11275_v62  ;;  %vm13554_vm2 = vcmp.eq.s32.totalorder %v10860_v50, %v11275_v62  ;;  %vm5240_vm0 = vcmp.eq.f32.partialorder %v11637_v57, %v11909_v53  ;;  %vm5242_vm14 = vcmp.eq.f32.partialorder %v11643_v9, %v11909_v53  ;;  %v11943_v18 = vpop.f32.mrb[51].mxu1 }
0x11b1   : > { %v11927_v21 = vsel %vm13553_vm6, %v11521_v31, 0.0  ;;  %v11933_v54 = vsel %vm13554_vm2, %v11521_v31, 0.0  ;;  %vm5244_vm9 = vcmp.eq.f32.partialorder %v11654_v7, %v11909_v53  ;;  %vm5246_vm5 = vcmp.eq.f32.partialorder %v11660_v44, %v11909_v53 }
0x11b2   : > { %vm5248_vm1 = vcmp.eq.f32.partialorder %v11666_v10, %v11909_v53  ;;  %vm5250_vm13 = vcmp.eq.f32.partialorder %v11672_v41, %v11909_v53  ;;  %vm5252_vm8 = vcmp.eq.f32.partialorder %v11678_v63, %v11909_v53  ;;  %vm5254_vm11 = vcmp.eq.f32.partialorder %v11684_v56, %v11909_v53 }
0x11b3   : > { %vm5256_vm15 = vcmp.eq.f32.partialorder %v11692_v42, %v11909_v53  ;;  %vm5258_vm10 = vcmp.eq.f32.partialorder %v11698_v60, %v11909_v53  ;;  %vm5262_vm12 = vcmp.eq.f32.partialorder %v11716_v6, %v11909_v53  ;;  %vm5266_vm6 = vcmp.eq.f32.partialorder %v11759_v49, %v11909_v53 }
0x11b4   : > { %vm5268_vm2 = vcmp.eq.f32.partialorder %v11770_v22, %v11909_v53  ;;  %vm5270_vm4 = vcmp.eq.f32.partialorder %v11729_v12, %v11909_v53  ;;  %9022 = vrcp.f32 %v5097_v61  ;;  %v4090_v35 = vadd.f32 %v8775_v58, %v4024_v19  ;;  %v13564_v22 = vld [vmem:[#allocation24_spill] sm:$0xff]  ;;  %v13566_v12 = vld [vmem:[#allocation42_spill] sm:$0xff] }
0x11b5   : > { %vm13555_vm3 = vcmp.eq.s32.totalorder %v10881_v2, %v11275_v62  ;;  %vm13557_vm7 = vcmp.eq.s32.totalorder %v10884_v52, %v11275_v62  ;;  %v5272_v29 = vsel %vm5240_vm0, %v9487_v23, 128  ;;  %v5274_v58 = vsel %vm5242_vm14, %v9490_v26, 128 }
0x11b6   : > { %v11973_v20 = vsel %vm13555_vm3, %v11521_v31, 0.0  ;;  %v11979_v32 = vsel %vm13557_vm7, %v11521_v31, 0.0  ;;  %v5276_v5 = vsel %vm5244_vm9, %v10074_v15, 128  ;;  %v5278_v62 = vsel %vm5246_vm5, %v10077_v45, 128 }
0x11b7   : > { %13556 = vst [vmem:[#allocation30_spill] sm:$0xff] %v11973_v20  ;;  %13558 = vst [vmem:[#allocation31_spill] sm:$0xff] %v11979_v32  ;;  %v5280_v57 = vsel %vm5248_vm1, %v10293_v27, 128  ;;  %v4082_v55 = vadd.f32 %v4081_v43, %v4014_v3  ;;  %vm13559_vm0 = vcmp.eq.s32.totalorder %v10819_v59, %v11579_v33  ;;  %vm13560_vm14 = vcmp.eq.s32.totalorder %v10854_v0, %v11579_v33 }
0x11b8   : > { %v5122_v9 = vsel %vm13559_vm0, %v11619_v13, 0.0  ;;  %v12009_v7 = vsel %vm13560_vm14, %v11619_v13, 0.0  ;;  %v5282_v44 = vsel %vm5250_vm13, %v10296_v14, 128  ;;  %v5284_v10 = vsel %vm5252_vm8, %v10299_v51, 128 }
0x11b9   : > { %v5286_v3 = vsel %vm5254_vm11, %v10302_v4, 128  ;;  %v5288_v43 = vsel %vm5256_vm15, %v10813_v38, 128  ;;  %v5290_v41 = vsel %vm5258_vm10, %v10816_v36, 128  ;;  %vm5304_vm9 = vcmp.lt.s32.totalorder %v5272_v29, %v5276_v5 }
0x11ba   : > { %vm5306_vm5 = vcmp.lt.s32.totalorder %v5274_v58, %v5278_v62  ;;  %v5055_v61 = vrot.slane %v5054_v1, 4  ;;  %vm13561_vm1 = vcmp.eq.f32.partialorder %v11704_v11, %v11909_v53  ;;  %v5294_v56 = vsel %vm5262_vm12, %v10854_v0, 128 }
0x11bb   : > { %v5292_v63 = vsel %vm13561_vm1, %v10819_v59, 128  ;;  %v5305_v42 = vsel %vm5304_vm9, %v5272_v29, %v5276_v5  ;;  %v5307_v19 = vsel %vm5306_vm5, %v5274_v58, %v5278_v62  ;;  %vm13562_vm13 = vcmp.eq.f32.partialorder %v11723_v24, %v11909_v53  ;;  %v13563_v62 = vld [vmem:[#allocation16_spill] sm:$0xff] }
0x11bc   : > { %v5296_v60 = vsel %vm13562_vm13, %v10857_v28, 128  ;;  %vm5308_vm8 = vcmp.lt.s32.totalorder %v5305_v42, %v5280_v57  ;;  %vm5310_vm11 = vcmp.lt.s32.totalorder %v5307_v19, %v5282_v44  ;;  %vm5056_vm15 = vcmp.lt.s32.totalorder %v5054_v1, %v5055_v61 }
0x11bd   : > { %v5298_v11 = vsel %vm5266_vm6, %v10860_v50, 128  ;;  %v5309_v31 = vsel %vm5308_vm8, %v5305_v42, %v5280_v57  ;;  %v5311_v32 = vsel %vm5310_vm11, %v5307_v19, %v5282_v44  ;;  %v5057_v20 = vsel %vm5056_vm15, %v5054_v1, %v5055_v61  ;;  %v4019_v19 = vpop.permute.xlu0 %4018 }
0x11be   : > { %vm5312_vm10 = vcmp.lt.s32.totalorder %v5309_v31, %v5284_v10  ;;  %vm5314_vm3 = vcmp.lt.s32.totalorder %v5311_v32, %v5286_v3  ;;  %v5414_v6 = vadd.f32 1e-08, %v11909_v53  ;;  %v5058_v29 = vrot.slane %v5057_v20, 2  ;;  %v12055_v49 = vpop.eup %9022 }
0x11bf   : > { %v5300_v24 = vsel %vm5268_vm2, %v10881_v2, 128  ;;  %v5313_v58 = vsel %vm5312_vm10, %v5309_v31, %v5284_v10  ;;  %v5315_v5 = vsel %vm5314_vm3, %v5311_v32, %v5286_v3  ;;  %v12053_v33 = vadd.f32 %v4082_v55, %v13563_v62  ;;  %v4029_v32 = vpop.permute.xlu1 %4028  ;;  %v13571_v62 = vld [vmem:[#allocation27_spill] sm:$0xff] }
0x11c0   : > { %v5302_v1 = vsel %vm5270_vm4, %v10884_v52, 128  ;;  %vm5316_vm12 = vcmp.lt.s32.totalorder %v5313_v58, %v5288_v43  ;;  %vm5318_vm7 = vcmp.lt.s32.totalorder %v5315_v5, %v5290_v41  ;;  %vm5059_vm6 = vcmp.lt.s32.totalorder %v5057_v20, %v5058_v29 }
0x11c1   : > { %v5317_v57 = vsel %vm5316_vm12, %v5313_v58, %v5288_v43  ;;  %v5319_v44 = vsel %vm5318_vm7, %v5315_v5, %v5290_v41  ;;  %v5060_v61 = vsel %vm5059_vm6, %v5057_v20, %v5058_v29  ;;  %v12062_v42 = vadd.f32 %v4090_v35, %v13564_v22  ;;  %v13569_v29 = vld [vmem:[#allocation60_spill] sm:$0xff]  ;;  %v13570_v58 = vld [vmem:[#allocation61_spill] sm:$0xff] }
0x11c2   : > { %vm5320_vm2 = vcmp.lt.s32.totalorder %v5317_v57, %v5292_v63  ;;  %vm5322_vm0 = vcmp.lt.s32.totalorder %v5319_v44, %v5294_v56  ;;  %9024 = vrcp.f32 %v5414_v6  ;;  %v5061_v31 = vrot.slane %v5060_v61, 1 }
0x11c3   : > { %13565 = vst [vmem:[#allocation25_spill] sm:$0xff] %v12062_v42  ;;  %v5321_v55 = vsel %vm5320_vm2, %v5317_v57, %v5292_v63  ;;  %v5323_v10 = vsel %vm5322_vm0, %v5319_v44, %v5294_v56  ;;  %v12065_v3 = vmul.f32 0.01, %v12053_v33  ;;  %v12068_v53 = vadd.f32 %v5122_v9, %v13566_v12  ;;  %v13572_v44 = vld [vmem:[#allocation22_spill] sm:$0xff]  ;;  %v13594_v42 = vld [vmem:[#allocation65_spill] sm:$0xff] }
0x11c4   : > { %vm5324_vm4 = vcmp.lt.s32.totalorder %v5321_v55, %v5296_v60  ;;  %vm5326_vm14 = vcmp.lt.s32.totalorder %v5323_v10, %v5298_v11  ;;  %vm5062_vm9 = vcmp.lt.s32.totalorder %v5060_v61, %v5061_v31  ;;  %v12071_v35 = vadd.f32 %v11921_v30, %v4029_v32  ;;  %v13567_v30 = vld [vmem:[#allocation58_spill] sm:$0xff] }
0x11c5   : > { %v5325_v20 = vsel %vm5324_vm4, %v5321_v55, %v5296_v60  ;;  %v5327_v43 = vsel %vm5326_vm14, %v5323_v10, %v5298_v11  ;;  %v12073_v41 = vsel %vm5062_vm9, %v5060_v61, %v5061_v31  ;;  %v4085_v63 = vadd.f32 %v11943_v18, %v4019_v19  ;;  %v13568_v60 = vld [vmem:[#allocation59_spill] sm:$0xff] }
0x11c6   : > { %vm5328_vm5 = vcmp.lt.s32.totalorder %v5325_v20, %v5300_v24  ;;  %vm5330_vm1 = vcmp.lt.s32.totalorder %v5327_v43, %v5302_v1  ;;  %vm5087_vm13 = vcmp.eq.s32.totalorder %v10854_v0, %v12073_v41  ;;  %vm5089_vm8 = vcmp.eq.s32.totalorder %v10857_v28, %v12073_v41 }
0x11c7   : > { %v5329_v9 = vsel %vm5328_vm5, %v5325_v20, %v5300_v24  ;;  %v5331_v56 = vsel %vm5330_vm1, %v5327_v43, %v5302_v1  ;;  %vm5091_vm11 = vcmp.eq.s32.totalorder %v10860_v50, %v12073_v41  ;;  %vm13358_vm15 = vcmp.eq.s32.totalorder %v10881_v2, %v12073_v41  ;;  %v13574_v20 = vld [vmem:[#allocation63_spill] sm:$0xff] }
0x11c8   : > { %vm5332_vm10 = vcmp.lt.s32.totalorder %v5329_v9, %v5331_v56  ;;  %vm13357_vm3 = vcmp.eq.s32.totalorder %v10884_v52, %v12073_v41  ;;  %v12090_v18 = vsel %vm5087_vm13, 1e+30, %v13567_v30  ;;  %v12096_v11 = vsel %vm5089_vm8, 1e+30, %v13568_v60  ;;  %v13580_v60 = vld [vmem:[#allocation64_spill] sm:$0xff] }
0x11c9   : > { %v5333_v6 = vsel %vm5332_vm10, %v5329_v9, %v5331_v56  ;;  %v12102_v24 = vsel %vm5091_vm11, 1e+30, %v13569_v29  ;;  %v12108_v5 = vsel %vm13358_vm15, 1e+30, %v13570_v58  ;;  %v12114_v1 = vsel %vm13357_vm3, 1e+30, %v13571_v62 }
0x11ca   : > { %v5334_v57 = vrot.slane %v5333_v6, 4  ;;  %v4097_v61 = vadd.f32 %v4085_v63, %v13572_v44  ;;  %vm5065_vm12 = vcmp.eq.s32.totalorder %v9487_v23, %v12073_v41  ;;  %vm5067_vm7 = vcmp.eq.s32.totalorder %v9490_v26, %v12073_v41  ;;  %v13576_v63 = vld [vmem:[#allocation47_spill] sm:$0xff]  ;;  %v13578_v56 = vld [vmem:[#allocation48_spill] sm:$0xff]  ;;  %v13582_v29 = vld [vmem:[#allocation49_spill] sm:$0xff] }
0x11cb   : > { %vm5069_vm6 = vcmp.eq.s32.totalorder %v10074_v15, %v12073_v41  ;;  %vm5071_vm2 = vcmp.eq.s32.totalorder %v10077_v45, %v12073_v41  ;;  %vm5073_vm0 = vcmp.eq.s32.totalorder %v10293_v27, %v12073_v41  ;;  %vm5075_vm4 = vcmp.eq.s32.totalorder %v10296_v14, %v12073_v41  ;;  %v13584_v62 = vld [vmem:[#allocation50_spill] sm:$0xff] }
0x11cc   : > { %v12129_v22 = vpop.eup %9024  ;;  %vm5335_vm14 = vcmp.lt.s32.totalorder %v5333_v6, %v5334_v57  ;;  %vm4101_vm9 = vcmp.ge.f32.partialorder %v4097_v61, 0.0  ;;  %v4105_v31 = vmul.f32 0.01, %v4097_v61  ;;  %vm5077_vm5 = vcmp.eq.s32.totalorder %v10299_v51, %v12073_v41 }
0x11cd   : > { %v5336_v32 = vsel %vm5335_vm14, %v5333_v6, %v5334_v57  ;;  %vm5079_vm1 = vcmp.eq.s32.totalorder %v10302_v4, %v12073_v41  ;;  %vm5081_vm10 = vcmp.eq.s32.totalorder %v10813_v38, %v12073_v41  ;;  %vm5083_vm3 = vcmp.eq.s32.totalorder %v10816_v36, %v12073_v41 }
0x11ce   : > { %v5337_v55 = vrot.slane %v5336_v32, 2  ;;  %v12139_v10 = vsel %vm4101_vm9, %v4097_v61, %v4105_v31  ;;  %vm5085_vm15 = vcmp.eq.s32.totalorder %v10819_v59, %v12073_v41  ;;  %v5103_v12 = vsel %vm5065_vm12, %v12055_v49, 0.0  ;;  %v13586_v61 = vld [vmem:[#allocation51_spill] sm:$0xff] }
0x11cf   : > { %13573 = vst [vmem:[#allocation26_spill] sm:$0xff] %v12139_v10  ;;  %v5105_v19 = vsel %vm5067_vm7, %v12055_v49, 0.0  ;;  %v12152_v43 = vadd.f32 %v5103_v12, %v13574_v20  ;;  %v12158_v9 = vsel %vm5065_vm12, 1e+30, %v13576_v63  ;;  %v12164_v30 = vsel %vm5067_vm7, 1e+30, %v13578_v56 }
0x11d0   : > { %13577 = vst [vmem:[#allocation33_spill] sm:$0xff] %v12158_v9  ;;  %13579 = vst [vmem:[#allocation34_spill] sm:$0xff] %v12164_v30  ;;  %vm5338_vm14 = vcmp.lt.s32.totalorder %v5336_v32, %v5337_v55  ;;  %v12167_v6 = vadd.f32 %v5105_v19, %v13580_v60  ;;  %v12173_v58 = vsel %vm5069_vm6, 1e+30, %v13582_v29  ;;  %v12179_v57 = vsel %vm5071_vm2, 1e+30, %v13584_v62 }
0x11d1   : > { %13575 = vst [vmem:[#allocation32_spill] sm:$0xff] %v12152_v43  ;;  %13583 = vst [vmem:[#allocation36_spill] sm:$0xff] %v12173_v58  ;;  %v5339_v44 = vsel %vm5338_vm14, %v5336_v32, %v5337_v55  ;;  %v12185_v31 = vsel %vm5073_vm0, 1e+30, %v13586_v61  ;;  %v13588_v12 = vld [vmem:[#allocation52_spill] sm:$0xff]  ;;  %v13589_v20 = vld [vmem:[#allocation53_spill] sm:$0xff]  ;;  %v5219_v62 = vmin.f32 %v12158_v9, %v12173_v58 }
0x11d2   : > { %13581 = vst [vmem:[#allocation35_spill] sm:$0xff] %v12167_v6  ;;  %13585 = vst [vmem:[#allocation37_spill] sm:$0xff] %v12179_v57  ;;  %v12191_v19 = vsel %vm5075_vm4, 1e+30, %v13588_v12  ;;  %v12197_v63 = vsel %vm5077_vm5, 1e+30, %v13589_v20  ;;  %v5220_v6 = vmin.f32 %v12164_v30, %v12179_v57 }
0x11d3   : > { %13587 = vst [vmem:[#allocation38_spill] sm:$0xff] %v12185_v31  ;;  %v5340_v56 = vrot.slane %v5339_v44, 1  ;;  %v13590_v32 = vld [vmem:[#allocation54_spill] sm:$0xff]  ;;  %v13591_v60 = vld [vmem:[#allocation55_spill] sm:$0xff]  ;;  %v13592_v61 = vld [vmem:[#allocation56_spill] sm:$0xff]  ;;  %v5221_v43 = vmin.f32 %v5219_v62, %v12185_v31  ;;  %v5111_v62 = vsel %vm5073_vm0, %v12055_v49, 0.0 }
0x11d4   : > { %v12203_v55 = vsel %vm5079_vm1, 1e+30, %v13590_v32  ;;  %v12209_v29 = vsel %vm5081_vm10, 1e+30, %v13591_v60  ;;  %v12217_v12 = vsel %vm5083_vm3, 1e+30, %v13592_v61  ;;  %v5222_v57 = vmin.f32 %v5220_v6, %v12191_v19 }
0x11d5   : > { %v13593_v20 = vld [vmem:[#allocation57_spill] sm:$0xff]  ;;  %v5107_v60 = vsel %vm5069_vm6, %v12055_v49, 0.0  ;;  %vm5341_vm12 = vcmp.lt.s32.totalorder %v5339_v44, %v5340_v56  ;;  %v5109_v61 = vsel %vm5071_vm2, %v12055_v49, 0.0  ;;  %v13596_v30 = vld [vmem:[#allocation66_spill] sm:$0xff]  ;;  %v5223_v31 = vmin.f32 %v5221_v43, %v12197_v63 }
0x11d6   : > { %v12223_v32 = vsel %vm5085_vm15, 1e+30, %v13593_v20  ;;  %v12237_v58 = vadd.f32 %v5107_v60, %v13594_v42  ;;  %v12239_v20 = vsel %vm5341_vm12, %v5339_v44, %v5340_v56  ;;  %v12243_v9 = vadd.f32 %v5109_v61, %v13596_v30 }
0x11d7   : > { %vm5382_vm7 = vcmp.eq.s32.totalorder %v9487_v23, %v12239_v20  ;;  %vm5384_vm6 = vcmp.eq.s32.totalorder %v9490_v26, %v12239_v20  ;;  %vm5386_vm2 = vcmp.eq.s32.totalorder %v10074_v15, %v12239_v20  ;;  %v5224_v42 = vmin.f32 %v5222_v57, %v12203_v55 }
0x11d8   : > { %13595 = vst [vmem:[#allocation39_spill] sm:$0xff] %v12237_v58  ;;  %13597 = vst [vmem:[#allocation40_spill] sm:$0xff] %v12243_v9  ;;  %v5420_v30 = vsel %vm5382_vm7, %v12129_v22, 0.0  ;;  %v5422_v6 = vsel %vm5384_vm6, %v12129_v22, 0.0  ;;  %vm5388_vm0 = vcmp.eq.s32.totalorder %v10077_v45, %v12239_v20  ;;  %v5225_v43 = vmin.f32 %v5223_v31, %v12209_v29 }
0x11d9   : > { %v12263_v44 = vadd.f32 %v5420_v30, %v11851_v47  ;;  %v12266_v56 = vadd.f32 %v5422_v6, %v11854_v37  ;;  %v5424_v60 = vsel %vm5386_vm2, %v12129_v22, 0.0  ;;  %v5226_v61 = vmin.f32 %v5224_v42, %v12217_v12  ;;  %v13600_v6 = vld [vmem:[#allocation67_spill] sm:$0xff]  ;;  %v13604_v37 = vld [vmem:[#allocation69_spill] sm:$0xff] }
0x11da   : > { %v5426_v57 = vsel %vm5388_vm0, %v12129_v22, 0.0  ;;  %v12272_v9 = vadd.f32 %v5424_v60, %v11865_v34  ;;  %v5113_v31 = vsel %vm5075_vm4, %v12055_v49, 0.0  ;;  %v5227_v47 = vmin.f32 %v5225_v43, %v12223_v32  ;;  %v13601_v34 = vld [vmem:[#allocation68_spill] sm:$0xff] }
0x11db   : > { %v12282_v30 = vadd.f32 %v5426_v57, %v11868_v40  ;;  %v12285_v42 = vadd.f32 %v5111_v62, %v13600_v6  ;;  %v5228_v58 = vmin.f32 %v5226_v61, %v12090_v18  ;;  %v12289_v60 = vadd.f32 %v5113_v31, %v13601_v34 }
0x11dc   : > { %13598 = vst [vmem:[#allocation41_spill] sm:$0xff] %v12272_v9  ;;  %vm5390_vm9 = vcmp.eq.s32.totalorder %v10293_v27, %v12239_v20  ;;  %vm5392_vm4 = vcmp.eq.s32.totalorder %v10296_v14, %v12239_v20  ;;  %v5229_v43 = vmin.f32 %v5227_v47, %v12096_v11  ;;  %v5115_v47 = vsel %vm5077_vm5, %v12055_v49, 0.0 }
0x11dd   : > { %13599 = vst [vmem:[#allocation16_spill] sm:$0xff] %v12282_v30  ;;  %v5428_v57 = vsel %vm5390_vm9, %v12129_v22, 0.0  ;;  %v5430_v62 = vsel %vm5392_vm4, %v12129_v22, 0.0  ;;  %v5230_v61 = vmin.f32 %v5228_v58, %v12102_v24  ;;  %v5117_v40 = vsel %vm5079_vm1, %v12055_v49, 0.0 }
0x11de   : > { %v12302_v31 = vadd.f32 %v5428_v57, %v11879_v8  ;;  %v12305_v6 = vadd.f32 %v5430_v62, %v11882_v46  ;;  %v5231_v34 = vmin.f32 %v5229_v43, %v12108_v5  ;;  %v12317_v58 = vadd.f32 %v5115_v47, %v13604_v37  ;;  %v13605_v57 = vld [vmem:[#allocation70_spill] sm:$0xff]  ;;  %v13608_v46 = vld [vmem:[#allocation71_spill] sm:$0xff] }
0x11df   : > { %vm5394_vm14 = vcmp.eq.s32.totalorder %v10299_v51, %v12239_v20  ;;  %v5232_v8 = vmin.f32 %v5230_v61, %v12114_v1  ;;  %v12325_v62 = vadd.f32 %v5117_v40, %v13605_v57  ;;  %vm5396_vm5 = vcmp.eq.s32.totalorder %v10302_v4, %v12239_v20 }
0x11e0   : > { %13602 = vst [vmem:[#allocation24_spill] sm:$0xff] %v12302_v31  ;;  %13603 = vst [vmem:[#allocation42_spill] sm:$0xff] %v12305_v6  ;;  %v5432_v43 = vsel %vm5394_vm14, %v12129_v22, 0.0  ;;  %v5434_v9 = vsel %vm5396_vm5, %v12129_v22, 0.0  ;;  %v5119_v37 = vsel %vm5081_vm10, %v12055_v49, 0.0  ;;  %v5121_v61 = vsel %vm5083_vm3, %v12055_v49, 0.0 }
0x11e1   : > { %vm4100_vm1 = vcmp.ge.f32.partialorder %v12053_v33, 0.0  ;;  %v5233_v40 = vmin.f32 %v5231_v34, %v5232_v8  ;;  %v12341_v47 = vadd.f32 %v5432_v43, %v11893_v39  ;;  %v12344_v57 = vadd.f32 %v5434_v9, %v11896_v25  ;;  %v13609_v6 = vld [vmem:[#allocation73_spill] sm:$0xff] }
0x11e2   : > { %v12347_v31 = vadd.f32 %v5119_v37, %v13608_v46  ;;  %v12350_v30 = vadd.f32 %v5121_v61, %v13609_v6  ;;  %vm5398_vm10 = vcmp.eq.s32.totalorder %v10813_v38, %v12239_v20  ;;  %vm5400_vm3 = vcmp.eq.s32.totalorder %v10816_v36, %v12239_v20  ;;  %v13613_v37 = vld [vmem:[#allocation74_spill] sm:$0xff] }
0x11e3   : > { %13606 = vst [vmem:[#allocation58_spill] sm:$0xff] %v12341_v47  ;;  %13607 = vst [vmem:[#allocation59_spill] sm:$0xff] %v12344_v57  ;;  %v5123_v39 = vsel %vm5085_vm15, %v12055_v49, 0.0  ;;  %v5234_v34 = vrot.slane %v5233_v40, 4  ;;  %v5436_v9 = vsel %vm5398_vm10, %v12129_v22, 0.0  ;;  %v5438_v6 = vsel %vm5400_vm3, %v12129_v22, 0.0 }
0x11e4   : > { %13610 = vst [vmem:[#allocation60_spill] sm:$0xff] %v12350_v30  ;;  %v12365_v8 = vadd.f32 %v5436_v9, %v11907_v16  ;;  %v12368_v46 = vadd.f32 %v5438_v6, %v11912_v48  ;;  %v5125_v43 = vsel %vm5087_vm13, %v12055_v49, 0.0  ;;  %v12375_v61 = vadd.f32 %v5123_v39, %v13613_v37  ;;  %v13614_v47 = vld [vmem:[#allocation43_spill] sm:$0xff]  ;;  %v13620_v16 = vld [vmem:[#allocation44_spill] sm:$0xff] }
0x11e5   : > { %v5235_v30 = vmin.f32 %v5233_v40, %v5234_v34  ;;  %v12378_v25 = vadd.f32 %v5125_v43, %v11918_v17  ;;  %v5156_v57 = vadd.f32 %v12009_v7, %v13614_v47  ;;  %vm5402_vm15 = vcmp.eq.s32.totalorder %v10819_v59, %v12239_v20  ;;  %v13617_v43 = vld [vmem:[#allocation72_spill] sm:$0xff] }
0x11e6   : > { %13611 = vst [vmem:[#allocation61_spill] sm:$0xff] %v12365_v8  ;;  %13612 = vst [vmem:[#allocation27_spill] sm:$0xff] %v12368_v46  ;;  %vm5404_vm12 = vcmp.eq.s32.totalorder %v10854_v0, %v12239_v20  ;;  %v5440_v48 = vsel %vm5402_vm15, %v12129_v22, 0.0  ;;  %v5127_v17 = vsel %vm5089_vm8, %v12055_v49, 0.0  ;;  %v5129_v47 = vsel %vm5091_vm11, %v12055_v49, 0.0  ;;  %v13630_v8 = vld [vmem:[#allocation31_spill] sm:$0xff] }
0x11e7   : > { %v5236_v40 = vrot.slane %v5235_v30, 2  ;;  %v5442_v39 = vsel %vm5404_vm12, %v12129_v22, 0.0  ;;  %v12395_v7 = vadd.f32 %v5440_v48, %v12068_v53  ;;  %v12404_v9 = vadd.f32 %v5127_v17, %v11927_v21  ;;  %v13629_v21 = vld [vmem:[#allocation23_spill] sm:$0xff] }
0x11e8   : > { %v12401_v34 = vadd.f32 %v5442_v39, %v5156_v57  ;;  %v12407_v6 = vadd.f32 %v5129_v47, %v11933_v54  ;;  %vm13618_vm13 = vcmp.eq.s32.totalorder %v10857_v28, %v13617_v43  ;;  %vm13619_vm8 = vcmp.eq.s32.totalorder %v10860_v50, %v13617_v43  ;;  %v13621_v54 = vld [vmem:[#allocation45_spill] sm:$0xff] }
0x11e9   : > { %13615 = vst [vmem:[#allocation22_spill] sm:$0xff] %v12395_v7  ;;  %v5126_v37 = vsel %vm13618_vm13, %v11619_v13, 0.0  ;;  %v5237_v53 = vmin.f32 %v5235_v30, %v5236_v40  ;;  %v5128_v48 = vsel %vm13619_vm8, %v11619_v13, 0.0  ;;  %vm5406_vm11 = vcmp.eq.s32.totalorder %v10857_v28, %v12239_v20 }
0x11ea   : > { %13616 = vst [vmem:[#allocation63_spill] sm:$0xff] %v12401_v34  ;;  %v5158_v57 = vadd.f32 %v5126_v37, %v13620_v16  ;;  %v5160_v17 = vadd.f32 %v5128_v48, %v13621_v54  ;;  %vm5408_vm7 = vcmp.eq.s32.totalorder %v10860_v50, %v12239_v20  ;;  %v5444_v30 = vsel %vm5406_vm11, %v12129_v22, 0.0 }
0x11eb   : > { %v5238_v40 = vrot.slane %v5237_v53, 1  ;;  %v5446_v39 = vsel %vm5408_vm7, %v12129_v22, 0.0  ;;  %vm13623_vm6 = vcmp.eq.s32.totalorder %v10881_v2, %v12073_v41  ;;  %v12437_v37 = vsel %vm4100_vm1, %v12053_v33, %v12065_v3  ;;  %v13640_v33 = vld [vmem:[#allocation46_spill] sm:$0xff] }
0x11ec   : > { %v12427_v47 = vadd.f32 %v5444_v30, %v5158_v57  ;;  %v5131_v16 = vsel %vm13623_vm6, %v12055_v49, 0.0  ;;  %13624 = vst [vmem:[#allocation48_spill] sm:$0xff] %v12437_v37  ;;  %v12439_v48 = vadd.f32 %v5446_v39, %v5160_v17  ;;  %vm13626_vm2 = vcmp.eq.s32.totalorder %v10884_v52, %v12073_v41  ;;  %v13627_v57 = vld [vmem:[#allocation30_spill] sm:$0xff]  ;;  %v13636_v17 = vld [vmem:[#allocation37_spill] sm:$0xff]  ;;  %v13639_v39 = vld [vmem:[#allocation28_spill] sm:$0xff] }
0x11ed   : > { %v5133_v54 = vsel %vm13626_vm2, %v12055_v49, 0.0  ;;  %v12446_v30 = vadd.f32 %v5131_v16, %v13627_v57  ;;  %v4099_v7 = vadd.f32 %v12071_v35, %v13629_v21  ;;  %v12450_v34 = vmin.f32 %v5237_v53, %v5238_v40  ;;  %v13633_v53 = vld [vmem:[#allocation33_spill] sm:$0xff]  ;;  %v13635_v21 = vld [vmem:[#allocation36_spill] sm:$0xff] }
0x11ee   : > { %13622 = vst [vmem:[#allocation47_spill] sm:$0xff] %v12427_v47  ;;  %13625 = vst [vmem:[#allocation64_spill] sm:$0xff] %v12439_v48  ;;  %v12453_v46 = vadd.f32 %v5133_v54, %v13630_v8  ;;  %vm5410_vm0 = vcmp.eq.s32.totalorder %v10881_v2, %v12239_v20  ;;  %vm13632_vm9 = vcmp.eq.s32.totalorder %v10881_v2, %v13617_v43  ;;  %v13634_v8 = vld [vmem:[#allocation34_spill] sm:$0xff]  ;;  %v13638_v40 = vld [vmem:[#allocation25_spill] sm:$0xff] }
0x11ef   : > { %13628 = vst [vmem:[#allocation49_spill] sm:$0xff] %v12446_v30  ;;  %v5130_v3 = vsel %vm13632_vm9, %v11619_v13, 0.0  ;;  %v5448_v41 = vsel %vm5410_vm0, %v12129_v22, 0.0  ;;  %vm5241_vm4 = vcmp.eq.f32.partialorder %v13633_v53, %v12450_v34  ;;  %vm5243_vm14 = vcmp.eq.f32.partialorder %v13634_v8, %v12450_v34  ;;  %v13637_v43 = vld [vmem:[#allocation38_spill] sm:$0xff] }
0x11f0   : > { %13631 = vst [vmem:[#allocation50_spill] sm:$0xff] %v12453_v46  ;;  %vm5245_vm5 = vcmp.eq.f32.partialorder %v13635_v21, %v12450_v34  ;;  %vm5247_vm1 = vcmp.eq.f32.partialorder %v13636_v17, %v12450_v34  ;;  %vm5249_vm10 = vcmp.eq.f32.partialorder %v13637_v43, %v12450_v34  ;;  %vm5251_vm3 = vcmp.eq.f32.partialorder %v12191_v19, %v12450_v34 }
0x11f1   : > { %vm5253_vm15 = vcmp.eq.f32.partialorder %v12197_v63, %v12450_v34  ;;  %vm5255_vm12 = vcmp.eq.f32.partialorder %v12203_v55, %v12450_v34  ;;  %vm5257_vm13 = vcmp.eq.f32.partialorder %v12209_v29, %v12450_v34  ;;  %vm5263_vm7 = vcmp.eq.f32.partialorder %v12090_v18, %v12450_v34  ;;  %v13641_v63 = vld [vmem:[#allocation29_spill] sm:$0xff] }
0x11f2   : > { %vm5265_vm6 = vcmp.eq.f32.partialorder %v12096_v11, %v12450_v34  ;;  %vm5267_vm2 = vcmp.eq.f32.partialorder %v12102_v24, %v12450_v34  ;;  %vm5269_vm0 = vcmp.eq.f32.partialorder %v12108_v5, %v12450_v34  ;;  %vm4102_vm8 = vcmp.ge.f32.partialorder %v13638_v40, 0.0 }
0x11f3   : > { %vm5412_vm11 = vcmp.eq.s32.totalorder %v10884_v52, %v12239_v20  ;;  %v5100_v16 = vadd.f32 %v11619_v13, %v13639_v39  ;;  %v5273_v54 = vsel %vm5241_vm4, %v9487_v23, 128  ;;  %v5275_v57 = vsel %vm5243_vm14, %v9490_v26, 128 }
0x11f4   : > { %v5277_v35 = vsel %vm5245_vm5, %v10074_v15, 128  ;;  %v5279_v13 = vsel %vm5247_vm1, %v10077_v45, 128  ;;  %v4106_v39 = vmul.f32 0.01, %v13638_v40  ;;  %vm4103_vm9 = vcmp.ge.f32.partialorder %v4099_v7, 0.0 }
0x11f5   : > { %v4107_v53 = vmul.f32 0.01, %v4099_v7  ;;  %v5162_v37 = vadd.f32 %v5130_v3, %v13640_v33  ;;  %v5281_v8 = vsel %vm5249_vm10, %v10293_v27, 128  ;;  %v5283_v21 = vsel %vm5251_vm3, %v10296_v14, 128 }
0x11f6   : > { %v5285_v17 = vsel %vm5253_vm15, %v10299_v51, 128  ;;  %v5287_v33 = vsel %vm5255_vm12, %v10302_v4, 128  ;;  %vm5343_vm4 = vcmp.lt.s32.totalorder %v5273_v54, %v5277_v35  ;;  %vm5345_vm14 = vcmp.lt.s32.totalorder %v5275_v57, %v5279_v13 }
0x11f7   : > { %v5415_v3 = vadd.f32 1e-08, %v12450_v34  ;;  %v5450_v19 = vsel %vm5412_vm11, %v12129_v22, 0.0  ;;  %v5344_v43 = vsel %vm5343_vm4, %v5273_v54, %v5277_v35  ;;  %v5346_v10 = vsel %vm5345_vm14, %v5275_v57, %v5279_v13 }
0x11f8   : > { %v12542_v47 = vadd.f32 %v5448_v41, %v5162_v37  ;;  %v12545_v48 = vadd.f32 %v5450_v19, %v13641_v63  ;;  %vm5347_vm5 = vcmp.lt.s32.totalorder %v5344_v43, %v5281_v8  ;;  %vm5349_vm1 = vcmp.lt.s32.totalorder %v5346_v10, %v5283_v21 }
0x11f9   : > { %9026 = vrcp.f32 %v5415_v3  ;;  %v12550_v55 = vsel %vm4102_vm8, %v13638_v40, %v4106_v39  ;;  %v5348_v46 = vsel %vm5347_vm5, %v5344_v43, %v5281_v8  ;;  %v5350_v30 = vsel %vm5349_vm1, %v5346_v10, %v5283_v21 }
0x11fa   : > { %v5500_v20 = vpack.c.bf16 %v12545_v48, %v12542_v47  ;;  %v12555_v35 = vsel %vm4103_vm9, %v4099_v7, %v4107_v53  ;;  %vm5351_vm10 = vcmp.lt.s32.totalorder %v5348_v46, %v5285_v17  ;;  %vm5353_vm3 = vcmp.lt.s32.totalorder %v5350_v30, %v5287_v33  ;;  %v13645_v53 = vld [vmem:[#allocation62_spill] sm:$0xff] }
0x11fb   : > { %v5485_v37 = vpack.c.bf16 %v12555_v35, %v12550_v55  ;;  %v12560_v41 = vadd.f32 %v12129_v22, %v5100_v16  ;;  %v5289_v40 = vsel %vm5257_vm13, %v10813_v38, 128  ;;  %vm13642_vm15 = vcmp.eq.f32.partialorder %v12217_v12, %v12450_v34 }
0x11fc   : > { %v5291_v10 = vsel %vm13642_vm15, %v10816_v36, 128  ;;  %v5352_v7 = vsel %vm5351_vm10, %v5348_v46, %v5285_v17  ;;  %v5354_v54 = vsel %vm5353_vm3, %v5350_v30, %v5287_v33  ;;  %vm13643_vm11 = vcmp.eq.f32.partialorder %v12223_v32, %v12450_v34 }
0x11fd   : > { %vm5355_vm12 = vcmp.lt.s32.totalorder %v5352_v7, %v5289_v40  ;;  %vm5357_vm8 = vcmp.lt.s32.totalorder %v5354_v54, %v5291_v10  ;;  %v5293_v22 = vsel %vm13643_vm11, %v10819_v59, 128  ;;  %v5295_v29 = vsel %vm5263_vm7, %v10854_v0, 128 }
0x11fe   : > { %v5356_v16 = vsel %vm5355_vm12, %v5352_v7, %v5289_v40  ;;  %v5358_v57 = vsel %vm5357_vm8, %v5354_v54, %v5291_v10  ;;  %v5297_v12 = vsel %vm5265_vm6, %v10857_v28, 128  ;;  %v5299_v32 = vsel %vm5267_vm2, %v10860_v50, 128  ;;  %v13646_v54 = vld [vmem:[#allocation32_spill] sm:$0xff] }
0x11ff   : > { %vm5359_vm13 = vcmp.lt.s32.totalorder %v5356_v16, %v5293_v22  ;;  %vm5361_vm9 = vcmp.lt.s32.totalorder %v5358_v57, %v5295_v29  ;;  %v5301_v18 = vsel %vm5269_vm0, %v10881_v2, 128  ;;  %vm13644_vm14 = vcmp.eq.f32.partialorder %v12114_v1, %v12450_v34 }
0x1200   : > { %v5360_v46 = vsel %vm5359_vm13, %v5356_v16, %v5293_v22  ;;  %v5362_v30 = vsel %vm5361_vm9, %v5358_v57, %v5295_v29  ;;  %v5303_v11 = vsel %vm13644_vm14, %v10884_v52, 128  ;;  %v5101_v24 = vadd.f32 %v12055_v49, %v13645_v53  ;;  %v13647_v29 = vld [vmem:[#allocation35_spill] sm:$0xff] }
0x1201   : > { %vm5363_vm7 = vcmp.lt.s32.totalorder %v5360_v46, %v5297_v12  ;;  %vm5365_vm4 = vcmp.lt.s32.totalorder %v5362_v30, %v5299_v32  ;;  %v13648_v57 = vld [vmem:[#allocation39_spill] sm:$0xff]  ;;  %9028 = vrcp.f32 %v12560_v41 }
0x1202   : > { %v5364_v13 = vsel %vm5363_vm7, %v5360_v46, %v5297_v12  ;;  %v5366_v39 = vsel %vm5365_vm4, %v5362_v30, %v5299_v32  ;;  %v13649_v12 = vld [vmem:[#allocation40_spill] sm:$0xff] }
0x1203   : > { %v12596_v8 = vpop.eup %9026  ;;  %vm5367_vm6 = vcmp.lt.s32.totalorder %v5364_v13, %v5301_v18  ;;  %vm5369_vm2 = vcmp.lt.s32.totalorder %v5366_v39, %v5303_v11 }
0x1204   : > { %v5368_v21 = vsel %vm5367_vm6, %v5364_v13, %v5301_v18  ;;  %v5370_v17 = vsel %vm5369_vm2, %v5366_v39, %v5303_v11  ;;  %v12599_v5 = vadd.f32 %v12596_v8, %v5101_v24 }
0x1205   : > { %vm5371_vm0 = vcmp.lt.s32.totalorder %v5368_v21, %v5370_v17 }
0x1206   : > { %v5372_v33 = vsel %vm5371_vm0, %v5368_v21, %v5370_v17  ;;  %v13653_v21 = vld [vmem:[#allocation41_spill] sm:$0xff]  ;;  %9030 = vrcp.f32 %v12599_v5 }
0x1207   : > { %v5373_v3 = vrot.slane %v5372_v33, 4 }
0x1209   : > { %vm5374_vm5 = vcmp.lt.s32.totalorder %v5372_v33, %v5373_v3 }
0x120a   : > { %v5375_v1 = vsel %vm5374_vm5, %v5372_v33, %v5373_v3  ;;  %v13655_v3 = vld [vmem:[#allocation49_spill] sm:$0xff] }
0x120b   : > { %v5376_v34 = vrot.slane %v5375_v1, 2 }
0x120d   : > { %vm5377_vm1 = vcmp.lt.s32.totalorder %v5375_v1, %v5376_v34 }
0x120e   : > { %v5378_v19 = vsel %vm5377_vm1, %v5375_v1, %v5376_v34  ;;  %v13656_v34 = vld [vmem:[#allocation50_spill] sm:$0xff] }
0x120f   : > { %v5379_v43 = vrot.slane %v5378_v19, 1 }
0x1211   : > { %vm5380_vm10 = vcmp.lt.s32.totalorder %v5378_v19, %v5379_v43 }
0x1212   : > { %v5381_v49 = vsel %vm5380_vm10, %v5378_v19, %v5379_v43 }
0x1213   : > { %vm5383_vm3 = vcmp.eq.s32.totalorder %v9487_v23, %v5381_v49  ;;  %vm5385_vm15 = vcmp.eq.s32.totalorder %v9490_v26, %v5381_v49  ;;  %vm5387_vm12 = vcmp.eq.s32.totalorder %v10074_v15, %v5381_v49  ;;  %vm5389_vm8 = vcmp.eq.s32.totalorder %v10077_v45, %v5381_v49 }
0x1214   : > { %v5421_v63 = vsel %vm5383_vm3, %v12596_v8, 0.0  ;;  %v5423_v40 = vsel %vm5385_vm15, %v12596_v8, 0.0  ;;  %v5425_v10 = vsel %vm5387_vm12, %v12596_v8, 0.0  ;;  %v5427_v7 = vsel %vm5389_vm8, %v12596_v8, 0.0 }
0x1215   : > { %v5453_v22 = vadd.f32 %v5421_v63, %v13646_v54  ;;  %v5455_v16 = vadd.f32 %v5423_v40, %v13647_v29  ;;  %v5457_v23 = vadd.f32 %v5425_v10, %v13648_v57  ;;  %v5459_v26 = vadd.f32 %v5427_v7, %v13649_v12  ;;  %v13657_v63 = vld [vmem:[#allocation42_spill] sm:$0xff]  ;;  %v13658_v40 = vld [vmem:[#allocation24_spill] sm:$0xff]  ;;  %v13664_v7 = vld [vmem:[#allocation61_spill] sm:$0xff] }
0x1216   : > { %vm5391_vm11 = vcmp.eq.s32.totalorder %v10293_v27, %v5381_v49  ;;  %vm5393_vm13 = vcmp.eq.s32.totalorder %v10296_v14, %v5381_v49  ;;  %vm5395_vm9 = vcmp.eq.s32.totalorder %v10299_v51, %v5381_v49  ;;  %vm5397_vm7 = vcmp.eq.s32.totalorder %v10302_v4, %v5381_v49  ;;  %v13670_v57 = vld [vmem:[#allocation47_spill] sm:$0xff]  ;;  %v13672_v12 = vld [vmem:[#allocation26_spill] sm:$0xff] }
0x1217   : > { %v5487_v15 = vpack.c.bf16 %v5455_v16, %v5453_v22  ;;  %v5489_v45 = vpack.c.bf16 %v5459_v26, %v5457_v23  ;;  %v5429_v32 = vsel %vm5391_vm11, %v12596_v8, 0.0  ;;  %v5431_v46 = vsel %vm5393_vm13, %v12596_v8, 0.0  ;;  %v13667_v22 = vld [vmem:[#allocation22_spill] sm:$0xff]  ;;  %v13669_v16 = vld [vmem:[#allocation64_spill] sm:$0xff] }
0x1218   : > { %v5461_v30 = vadd.f32 %v5429_v32, %v12285_v42  ;;  %v5463_v18 = vadd.f32 %v5431_v46, %v12289_v60  ;;  %v5433_v11 = vsel %vm5395_vm9, %v12596_v8, 0.0  ;;  %v5435_v27 = vsel %vm5397_vm7, %v12596_v8, 0.0  ;;  %v13673_v26 = vld [vmem:[#allocation48_spill] sm:$0xff]  ;;  %v9029_v32 = vpop.eup %9028 }
0x1219   : > { %5502 = vmatprep.subr.bf16.mxu1 %v5487_v15  ;;  %v5465_v14 = vadd.f32 %v5433_v11, %v12317_v58  ;;  %v5467_v51 = vadd.f32 %v5435_v27, %v12325_v62  ;;  %vm5399_vm4 = vcmp.eq.s32.totalorder %v10813_v38, %v5381_v49  ;;  %vm5401_vm14 = vcmp.eq.s32.totalorder %v10816_v36, %v5381_v49  ;;  %v13651_v62 = vld [vmem:[#allocation60_spill] sm:$0xff]  ;;  %v9031_v47 = vpop.eup %9030 }
0x121a   : > { %v13650_v4 = vpack.c.bf16 %v12266_v56, %v12263_v44  ;;  %v5491_v42 = vpack.c.bf16 %v5463_v18, %v5461_v30  ;;  %v5437_v60 = vsel %vm5399_vm4, %v12596_v8, 0.0  ;;  %v5439_v13 = vsel %vm5401_vm14, %v12596_v8, 0.0 }
0x121b   : > { %vm5403_vm6 = vcmp.eq.s32.totalorder %v10819_v59, %v5381_v49  ;;  %v5493_v39 = vpack.c.bf16 %v5467_v51, %v5465_v14  ;;  %v5469_v58 = vadd.f32 %v5437_v60, %v12347_v31  ;;  %v5471_v53 = vadd.f32 %v5439_v13, %v13651_v62  ;;  %v13652_v31 = vld [vmem:[#allocation16_spill] sm:$0xff]  ;;  %v8946_v62 = vld [vmem:[%s13244_s18] sm:$0xff]  }
0x121c   : > { %5503 = vmatpush1.bf16.msra.mxu1 %v13650_v4  ;;  %vm5405_vm2 = vcmp.eq.s32.totalorder %v10854_v0, %v5381_v49  ;;  %v5441_v38 = vsel %vm5403_vm6, %v12596_v8, 0.0  ;;  %vm5407_vm0 = vcmp.eq.s32.totalorder %v10857_v28, %v5381_v49  ;;  %vm5409_vm5 = vcmp.eq.s32.totalorder %v10860_v50, %v5381_v49 }
0x121d   : > { %5504 = vmatprep.subr.bf16.mxu1 %v5489_v45  ;;  %v5443_v36 = vsel %vm5405_vm2, %v12596_v8, 0.0  ;;  %v5495_v44 = vpack.c.bf16 %v5471_v53, %v5469_v58  ;;  %v5473_v56 = vadd.f32 %v5441_v38, %v12375_v61  ;;  %v5445_v24 = vsel %vm5407_vm0, %v12596_v8, 0.0  ;;  %v8947_v53 = vld [vmem:[%s13244_s18 + $0x8] sm:$0xff]   ;;  %v5580_v38 = vpop.permute.xlu0 %5579 }
0x121e   : > { %v5475_v59 = vadd.f32 %v5443_v36, %v12378_v25  ;;  %v13654_v17 = vpack.c.bf16 %v13652_v31, %v13653_v21  ;;  %v5447_v0 = vsel %vm5409_vm5, %v12596_v8, 0.0  ;;  %v5477_v33 = vadd.f32 %v5445_v24, %v12404_v9 }
0x121f   : > { %vm5411_vm1 = vcmp.eq.s32.totalorder %v10881_v2, %v5381_v49  ;;  %vm5413_vm10 = vcmp.eq.s32.totalorder %v10884_v52, %v5381_v49  ;;  %v5479_v50 = vadd.f32 %v5447_v0, %v12407_v6  ;;  %v13659_v9 = vpack.c.bf16 %v13657_v63, %v13658_v40  ;;  %v13660_v52 = vld [vmem:[#allocation59_spill] sm:$0xff]  ;;  %v13661_v49 = vld [vmem:[#allocation58_spill] sm:$0xff] }
0x1220   : > { %5505 = vmatpush1.bf16.msra.mxu1 %v13654_v17  ;;  %v5497_v28 = vpack.c.bf16 %v5475_v59, %v5473_v56  ;;  %v5449_v25 = vsel %vm5411_vm1, %v12596_v8, 0.0  ;;  %v5451_v61 = vsel %vm5413_vm10, %v12596_v8, 0.0  ;;  %v13662_v10 = vpack.c.bf16 %v13660_v52, %v13661_v49  ;;  %v13663_v6 = vld [vmem:[#allocation27_spill] sm:$0xff]  ;;  %v5585_v59 = vpop.permute.xlu1 %5584 }
0x1221   : > { %5506 = vmatprep.subr.bf16.mxu1 %v5491_v42  ;;  %v5481_v1 = vadd.f32 %v5449_v25, %v13655_v3  ;;  %v5483_v19 = vadd.f32 %v5451_v61, %v13656_v34  ;;  %v5499_v43 = vpack.c.bf16 %v5479_v50, %v5477_v33  ;;  %v13665_v54 = vpack.c.bf16 %v13663_v6, %v13664_v7  ;;  %v13666_v8 = vld [vmem:[#allocation63_spill] sm:$0xff]  ;;  %v5590_v3 = vpop.permute.xlu0 %5589 }
0x1222   : > { %v13668_v29 = vpack.c.bf16 %v13666_v8, %v13667_v22  ;;  %v13671_v23 = vpack.c.bf16 %v13669_v16, %v13670_v57  ;;  %v13674_v15 = vpack.c.bf16 %v13672_v12, %v13673_v26  ;;  %v13675_v45 = vmov 0  }
0x1223   : > { %v5501_v2 = vpack.c.bf16 %v5483_v19, %v5481_v1  ;;  %vm13676_vm3 = vcmask 261120  }
0x1224   : > { %5507 = vmatpush1.bf16.msra.mxu1 %v13659_v9  ;;  %vm13677_vm15 = vmmov %vm13676_vm3 }
0x1225   : > { %5508 = vmatprep.subr.bf16.mxu1 %v5493_v39  ;;  %vm13678_vm6 = vmmov %vm13676_vm3 }
0x1226   : > { %vm13679_vm2 = vmmov %vm13676_vm3 }
0x1228   : > { %5509 = vmatpush1.bf16.msra.mxu1 %v13662_v10 }
0x1229   : > { %5510 = vmatprep.subr.bf16.mxu1 %v5495_v44 }
0x122c   : > { %5511 = vmatpush1.bf16.msra.mxu1 %v13665_v54 }
0x122d   : > { %5512 = vmatprep.subr.bf16.mxu1 %v5497_v28 }
0x1230   : > { %5513 = vmatpush1.bf16.msra.mxu1 %v13668_v29 }
0x1231   : > { %5514 = vmatprep.subr.bf16.mxu1 %v5499_v43 }
0x1234   : > { %5515 = vmatpush1.bf16.msra.mxu1 %v13671_v23 }
0x1235   : > { %5516 = vmatprep.subr.bf16.mxu1 %v5501_v2  ;;  %v5595_v2 = vpop.permute.xlu1 %5594 }
0x1238   : > { %5517 = vmatpush1.bf16.msra.mxu1 %v5500_v20 }
0x123b   : > { %5535 = vmatmul.mubr.bf16.vlgmr.msra.gmra.mrb[52].mxu1 %v13674_v15 }
0x123c   : > { %5544 = vmatprep.mubr.bf16.mxu1 %v13675_v45 }
0x1243   : > { %5545 = vmatmul.mubr.bf16.gmra.mrb[56].mxu1 %v5485_v37 }
0x1244   : > { %5645 = vmatprep.mubr.bf16.mxu1 %v13675_v45 }
0x130e   : > { %v5536_v46 = vpop.f32.mrb[52].mxu1 }
0x130f   : > { %v5557_v48 = vmul.f32 %v9029_v32, %v5536_v46  ;;  %v5538_v20 = vpop.f32.mrb[53].mxu1  ;;  %v8948_v46 = vld [vmem:[%s13244_s18 + $0x10] sm:$0xff]  }
0x1310   : > { %v5558_v30 = vmul.f32 %v9031_v47, %v5538_v20  ;;  %v5540_v18 = vpop.f32.mrb[54].mxu1 }
0x1311   : > { %v5559_v11 = vmul.f32 %v9029_v32, %v5540_v18  ;;  %v5542_v27 = vpop.f32.mrb[55].mxu1 }
0x1312   : > { %v5560_v14 = vmul.f32 %v9031_v47, %v5542_v27 }
0x1313   : > { %v5569_v51 = vpack.c.bf16 %v5559_v11, %v5557_v48  ;;  %v5707_v48 = vpop.permute.xlu0 %5706  ;;  %v5712_v11 = vpop.permute.xlu1 %5711 }
0x1314   : > { %v5570_v4 = vpack.c.bf16 %v5560_v14, %v5558_v30 }
0x1316   : > { %v5546_v55 = vpop.f32.mrb[56].mxu1  ;;  %5613 = vmatprep.subr.bf16.mxu1 %v5570_v4 }
0x1317   : > { %v5561_v35 = vmul.f32 %v9029_v32, %v5546_v55  ;;  %v5548_v37 = vpop.f32.mrb[57].mxu1  ;;  %5614 = vmatpush1.bf16.msra.mxu1 %v5569_v51 }
0x1318   : > { %v5562_v41 = vmul.f32 %v9031_v47, %v5548_v37  ;;  %v5550_v42 = vpop.f32.mrb[58].mxu1 }
0x1319   : > { %v5563_v5 = vmul.f32 %v9029_v32, %v5550_v42  ;;  %v5552_v60 = vpop.f32.mrb[59].mxu1 }
0x131a   : > { %v5564_v13 = vmul.f32 %v9031_v47, %v5552_v60  ;;  %v8949_v47 = vld [vmem:[%s13244_s18 + $0x18] sm:$0xff]  }
0x131b   : > { %v5571_v39 = vpack.c.bf16 %v5563_v5, %v5561_v35 }
0x131c   : > { %v5572_v58 = vpack.c.bf16 %v5564_v13, %v5562_v41  ;;  %v5717_v13 = vpop.permute.xlu0 %5716 }
0x131e   : > { %5615 = vmatprep.subr.bf16.mxu1 %v5572_v58 }
0x131f   : > { %5616 = vmatpush1.bf16.msra.mxu1 %v5571_v39 }
0x1322   : > { %8206 = vmatmul.mubr.msk.bf16.vlgmr.msra.gmra.mrb[60].mxu1 %vm13676_vm3, %v8946_v62 }
0x1323   : > { %5655 = vmatprep.mubr.bf16.mxu1 %v13675_v45 }
0x132a   : > { %8207 = vmatmul.mubr.msk.bf16.gmra.mrb[64].mxu1 %vm13677_vm15, %v8947_v53 }
0x132b   : > { %5772 = vmatprep.mubr.bf16.mxu1 %v13675_v45 }
0x13f5   : > { %v5647_v36 = vpop.f32.mrb[60].mxu1 }
0x13f6   : > { %v5648_v44 = vadd.f32 %v5647_v36, %v5580_v38  ;;  %v5649_v56 = vpop.f32.mrb[61].mxu1 }
0x13f7   : > { %v5650_v24 = vadd.f32 %v5649_v56, %v5580_v38  ;;  %v5651_v31 = vpop.f32.mrb[62].mxu1  ;;  %v5722_v56 = vpop.permute.xlu1 %5721 }
0x13f8   : > { %v5652_v21 = vadd.f32 %v5651_v31, %v5585_v59  ;;  %v5653_v17 = vpop.f32.mrb[63].mxu1  ;;  %v5674_v28 = vmul.f32 0.01, %v5648_v44  ;;  %vm5666_vm11 = vcmp.ge.f32.partialorder %v5648_v44, 0.0 }
0x13f9   : > { %v5675_v0 = vmul.f32 0.01, %v5650_v24  ;;  %v5654_v33 = vadd.f32 %v5653_v17, %v5585_v59  ;;  %vm5667_vm12 = vcmp.ge.f32.partialorder %v5650_v24, 0.0 }
0x13fa   : > { %vm5668_vm8 = vcmp.ge.f32.partialorder %v5652_v21, 0.0  ;;  %v5676_v50 = vmul.f32 0.01, %v5652_v21  ;;  %v12699_v43 = vsel %vm5666_vm11, %v5648_v44, %v5674_v28  ;;  %vm13680_vm11 = vmmov %vm13679_vm2 }
0x13fb   : > { %vm5669_vm13 = vcmp.ge.f32.partialorder %v5654_v33, 0.0  ;;  %v5677_v25 = vmul.f32 0.01, %v5654_v33  ;;  %v12695_v34 = vsel %vm5667_vm12, %v5650_v24, %v5675_v0 }
0x13fc   : > { %v12693_v61 = vsel %vm5668_vm8, %v5652_v21, %v5676_v50 }
0x13fd   : > { %v5657_v1 = vpop.f32.mrb[64].mxu1  ;;  %v12697_v19 = vsel %vm5669_vm13, %v5654_v33, %v5677_v25  ;;  %v5695_v52 = vpack.c.bf16 %v12693_v61, %v12699_v43  ;;  %vm13681_vm13 = vmmov %vm13679_vm2 }
0x13fe   : > { %v5658_v63 = vadd.f32 %v5657_v1, %v5590_v3  ;;  %v5659_v40 = vpop.f32.mrb[65].mxu1  ;;  %v5696_v9 = vpack.c.bf16 %v12697_v19, %v12695_v34 }
0x13ff   : > { %v5660_v49 = vadd.f32 %v5659_v40, %v5590_v3  ;;  %v5661_v10 = vpop.f32.mrb[66].mxu1 }
0x1400   : > { %v5662_v6 = vadd.f32 %v5661_v10, %v5595_v2  ;;  %v5663_v7 = vpop.f32.mrb[67].mxu1  ;;  %5740 = vmatprep.subr.bf16.mxu1 %v5696_v9  ;;  %v5678_v22 = vmul.f32 0.01, %v5658_v63  ;;  %vm5670_vm4 = vcmp.ge.f32.partialorder %v5658_v63, 0.0 }
0x1401   : > { %v5679_v54 = vmul.f32 0.01, %v5660_v49  ;;  %v5664_v8 = vadd.f32 %v5663_v7, %v5595_v2  ;;  %5741 = vmatpush1.bf16.msra.mxu1 %v5695_v52  ;;  %vm5671_vm9 = vcmp.ge.f32.partialorder %v5660_v49, 0.0  ;;  %v8950_v2 = vld [vmem:[%s13244_s18 + $0x20] sm:$0xff]   ;;  %v8951_v52 = vld [vmem:[%s13244_s18 + $0x28] sm:$0xff]  }
0x1402   : > { %vm5672_vm7 = vcmp.ge.f32.partialorder %v5662_v6, 0.0  ;;  %v5680_v29 = vmul.f32 0.01, %v5662_v6  ;;  %v12711_v26 = vsel %vm5670_vm4, %v5658_v63, %v5678_v22 }
0x1403   : > { %vm5673_vm14 = vcmp.ge.f32.partialorder %v5664_v8, 0.0  ;;  %v5681_v16 = vmul.f32 0.01, %v5664_v8  ;;  %v12707_v23 = vsel %vm5671_vm9, %v5660_v49, %v5679_v54  ;;  %v5834_v49 = vpop.permute.xlu0 %5833  ;;  %v5839_v54 = vpop.permute.xlu1 %5838 }
0x1404   : > { %v12705_v57 = vsel %vm5672_vm7, %v5662_v6, %v5680_v29 }
0x1405   : > { %v12709_v12 = vsel %vm5673_vm14, %v5664_v8, %v5681_v16  ;;  %v5697_v32 = vpack.c.bf16 %v12705_v57, %v12711_v26 }
0x1406   : > { %v5698_v15 = vpack.c.bf16 %v12709_v12, %v12707_v23 }
0x1408   : > { %5742 = vmatprep.subr.bf16.mxu1 %v5698_v15 }
0x1409   : > { %5743 = vmatpush1.bf16.msra.mxu1 %v5697_v32 }
0x140c   : > { %8218 = vmatmul.mubr.msk.bf16.vlgmr.msra.gmra.mrb[68].mxu1 %vm13678_vm6, %v8948_v46 }
0x140d   : > { %5782 = vmatprep.mubr.bf16.mxu1 %v13675_v45 }
0x1414   : > { %8219 = vmatmul.mubr.msk.bf16.gmra.mrb[72].mxu1 %vm13679_vm2, %v8949_v47 }
0x1415   : > { %6034 = vmatprep.mubr.bf16.mxu1 %v13675_v45 }
0x14df   : > { %v5774_v20 = vpop.f32.mrb[68].mxu1 }
0x14e0   : > { %v5775_v30 = vadd.f32 %v5774_v20, %v5707_v48  ;;  %v5776_v18 = vpop.f32.mrb[69].mxu1 }
0x14e1   : > { %v5777_v27 = vadd.f32 %v5776_v18, %v5707_v48  ;;  %v5778_v14 = vpop.f32.mrb[70].mxu1 }
0x14e2   : > { %v5801_v51 = vmul.f32 0.01, %v5775_v30  ;;  %v5779_v4 = vadd.f32 %v5778_v14, %v5712_v11  ;;  %v5780_v55 = vpop.f32.mrb[71].mxu1  ;;  %vm5793_vm0 = vcmp.ge.f32.partialorder %v5775_v30, 0.0 }
0x14e3   : > { %v5802_v35 = vmul.f32 0.01, %v5777_v27  ;;  %v5781_v37 = vadd.f32 %v5780_v55, %v5712_v11  ;;  %vm5794_vm5 = vcmp.ge.f32.partialorder %v5777_v27, 0.0  ;;  %v5844_v11 = vpop.permute.xlu0 %5843 }
0x14e4   : > { %vm5795_vm1 = vcmp.ge.f32.partialorder %v5779_v4, 0.0  ;;  %v5803_v41 = vmul.f32 0.01, %v5779_v4  ;;  %v5809_v5 = vsel %vm5793_vm0, %v5775_v30, %v5801_v51 }
0x14e5   : > { %vm5796_vm10 = vcmp.ge.f32.partialorder %v5781_v37, 0.0  ;;  %v5804_v42 = vmul.f32 0.01, %v5781_v37  ;;  %v5810_v62 = vsel %vm5794_vm5, %v5777_v27, %v5802_v35 }
0x14e6   : > { %v5811_v60 = vsel %vm5795_vm1, %v5779_v4, %v5803_v41  ;;  %vm13683_vm1 = vmmov %vm13680_vm11 }
0x14e7   : > { %v5822_v39 = vpack.c.bf16 %v5811_v60, %v5809_v5  ;;  %v5784_v58 = vpop.f32.mrb[72].mxu1  ;;  %v5812_v53 = vsel %vm5796_vm10, %v5781_v37, %v5804_v42  ;;  %vm13686_vm10 = vmmov %vm13683_vm1 }
0x14e8   : > { %v5785_v38 = vadd.f32 %v5784_v58, %v5717_v13  ;;  %v5786_v36 = vpop.f32.mrb[73].mxu1  ;;  %v5823_v44 = vpack.c.bf16 %v5812_v53, %v5810_v62 }
0x14e9   : > { %v5787_v59 = vadd.f32 %v5786_v36, %v5717_v13  ;;  %v5788_v24 = vpop.f32.mrb[74].mxu1 }
0x14ea   : > { %v5805_v31 = vmul.f32 0.01, %v5785_v38  ;;  %v5789_v21 = vadd.f32 %v5788_v24, %v5722_v56  ;;  %v5790_v17 = vpop.f32.mrb[75].mxu1  ;;  %5867 = vmatprep.subr.bf16.mxu0 %v5823_v44  ;;  %vm5797_vm3 = vcmp.ge.f32.partialorder %v5785_v38, 0.0 }
0x14eb   : > { %v5806_v0 = vmul.f32 0.01, %v5787_v59  ;;  %v5791_v33 = vadd.f32 %v5790_v17, %v5722_v56  ;;  %5868 = vmatpush1.bf16.msra.mxu0 %v5822_v39  ;;  %vm5798_vm15 = vcmp.ge.f32.partialorder %v5787_v59, 0.0  ;;  %v13684_v17 = vld [vmem:[#allocation14_spill] sm:$0xff] }
0x14ec   : > { %vm5799_vm12 = vcmp.ge.f32.partialorder %v5789_v21, 0.0  ;;  %v5807_v28 = vmul.f32 0.01, %v5789_v21  ;;  %v5813_v25 = vsel %vm5797_vm3, %v5785_v38, %v5805_v31  ;;  %v8952_v31 = vld [vmem:[%s13244_s18 + $0x30] sm:$0xff]   ;;  %vm13687_vm3 = vmmov %vm13683_vm1 }
0x14ed   : > { %vm5800_vm8 = vcmp.ge.f32.partialorder %v5791_v33, 0.0  ;;  %v5808_v50 = vmul.f32 0.01, %v5791_v33  ;;  %v5814_v63 = vsel %vm5798_vm15, %v5787_v59, %v5806_v0  ;;  %v8953_v0 = vld [vmem:[%s13244_s18 + $0x38] sm:$0xff]   ;;  %vm13688_vm15 = vmmov %vm13683_vm1 }
0x14ee   : > { %v5815_v3 = vsel %vm5799_vm12, %v5789_v21, %v5807_v28  ;;  %v13682_v21 = vld [vmem:[#allocation13_spill] sm:$0xff]  ;;  %v13685_v28 = vld [vmem:[#allocation20_spill] sm:$0xff]  ;;  %vm13689_vm12 = vmmov %vm13683_vm1 }
0x14ef   : > { %v5824_v1 = vpack.c.bf16 %v5815_v3, %v5813_v25  ;;  %v5816_v40 = vsel %vm5800_vm8, %v5791_v33, %v5808_v50  ;;  %v8954_v33 = vld [vmem:[%s13246_s20] sm:$0xff]   ;;  %v8955_v50 = vld [vmem:[%s13246_s20 + $0x8] sm:$0xff]   ;;  %v8956_v25 = vld [vmem:[%s13246_s20 + $0x10] sm:$0xff]  }
0x14f0   : > { %v5825_v9 = vpack.c.bf16 %v5816_v40, %v5814_v63  ;;  %v13690_v3 = vld [vmem:[#allocation21_spill] sm:$0xff]  ;;  %vm13691_vm8 = vmmov %vm13683_vm1  ;;  %v8959_v40 = vld [vmem:[%s13246_s20 + $0x48] sm:$0xff]  }
0x14f1   : > { %v8958_v63 = vld [vmem:[%s13246_s20 + $0x40] sm:$0xff]  }
0x14f2   : > { %5869 = vmatprep.subr.bf16.mxu0 %v5825_v9  ;;  %v8960_v9 = vld [vmem:[%s13246_s20 + $0x50] sm:$0xff]  }
0x14f3   : > { %5870 = vmatpush1.bf16.msra.mxu0 %v5824_v1  ;;  %v8957_v1 = vld [vmem:[%s13246_s20 + $0x18] sm:$0xff]  }
0x14f6   : > { %8230 = vmatmul.mubr.msk.bf16.vlgmr.msra.gmra.mrb[68].mxu0 %vm13680_vm11, %v8950_v2  ;;  %vm13692_vm11 = vmmov %vm13683_vm1  ;;  %v8961_v2 = vld [vmem:[%s13246_s20 + $0x58] sm:$0xff]  }
0x14f7   : > { %5909 = vmatprep.mubr.bf16.mxu0 %v13675_v45 }
0x14fe   : > { %8231 = vmatmul.mubr.msk.bf16.gmra.mrb[72].mxu0 %vm13681_vm13, %v8951_v52  ;;  %vm13693_vm13 = vmmov %vm13683_vm1  ;;  %v5969_v52 = vpop.permute.xlu0 %5968 }
0x14ff   : > { %6161 = vmatprep.mubr.bf16.mxu0 %v13675_v45 }
0x15c9   : > { %v5901_v10 = vpop.f32.mrb[68].mxu0 }
0x15ca   : > { %v5902_v6 = vadd.f32 %v5901_v10, %v5834_v49  ;;  %v5903_v7 = vpop.f32.mrb[69].mxu0  ;;  %v5979_v10 = vpop.permute.xlu0 %5978 }
0x15cb   : > { %v5904_v8 = vadd.f32 %v5903_v7, %v5834_v49  ;;  %v5905_v22 = vpop.f32.mrb[70].mxu0 }
0x15cc   : > { %v5920_v29 = vadd.f32 %v5902_v6, %v12699_v43  ;;  %v5906_v16 = vadd.f32 %v5905_v22, %v5839_v54  ;;  %v5907_v15 = vpop.f32.mrb[71].mxu0 }
0x15cd   : > { %v5921_v32 = vadd.f32 %v5904_v8, %v12695_v34  ;;  %v5908_v46 = vadd.f32 %v5907_v15, %v5839_v54  ;;  %v5849_v34 = vpop.permute.xlu1 %5848 }
0x15ce   : > { %v5922_v47 = vadd.f32 %v5906_v16, %v12693_v61  ;;  %v5936_v30 = vmul.f32 0.01, %v5920_v29  ;;  %vm5928_vm4 = vcmp.ge.f32.partialorder %v5920_v29, 0.0  ;;  %v12819_v7 = vpop.permute.xlu0 %6095 }
0x15cf   : > { %v5937_v48 = vmul.f32 0.01, %v5921_v32  ;;  %v5923_v20 = vadd.f32 %v5908_v46, %v12697_v19  ;;  %vm5929_vm9 = vcmp.ge.f32.partialorder %v5921_v32, 0.0 }
0x15d0   : > { %vm5930_vm7 = vcmp.ge.f32.partialorder %v5922_v47, 0.0  ;;  %v5938_v18 = vmul.f32 0.01, %v5922_v47  ;;  %v12747_v19 = vsel %vm5928_vm4, %v5920_v29, %v5936_v30 }
0x15d1   : > { %vm5931_vm14 = vcmp.ge.f32.partialorder %v5923_v20, 0.0  ;;  %v5939_v27 = vmul.f32 0.01, %v5923_v20  ;;  %v5911_v14 = vpop.f32.mrb[72].mxu0  ;;  %v12743_v61 = vsel %vm5929_vm9, %v5921_v32, %v5937_v48  ;;  %vm13694_vm9 = vmmov %vm13683_vm1  ;;  %v5974_v49 = vpop.permute.xlu1 %5973 }
0x15d2   : > { %v12741_v43 = vsel %vm5930_vm7, %v5922_v47, %v5938_v18  ;;  %v5912_v51 = vadd.f32 %v5911_v14, %v5844_v11  ;;  %v5913_v4 = vpop.f32.mrb[73].mxu0  ;;  %vm13695_vm7 = vmmov %vm13683_vm1  ;;  %v12823_v8 = vpop.permute.xlu0 %6105 }
0x15d3   : > { %v5914_v55 = vadd.f32 %v5913_v4, %v5844_v11  ;;  %v5915_v35 = vpop.f32.mrb[74].mxu0  ;;  %v12745_v37 = vsel %vm5931_vm14, %v5923_v20, %v5939_v27  ;;  %v5957_v58 = vpack.c.bf16 %v12741_v43, %v12747_v19 }
0x15d4   : > { %v5924_v41 = vadd.f32 %v5912_v51, %v12711_v26  ;;  %v5916_v42 = vadd.f32 %v5915_v35, %v5849_v34  ;;  %v5917_v5 = vpop.f32.mrb[75].mxu0  ;;  %v5958_v60 = vpack.c.bf16 %v12745_v37, %v12743_v61 }
0x15d5   : > { %v5925_v13 = vadd.f32 %v5914_v55, %v12707_v23  ;;  %v5918_v39 = vadd.f32 %v5917_v5, %v5849_v34  ;;  %v5984_v6 = vpop.permute.xlu1 %5983 }
0x15d6   : > { %v5926_v62 = vadd.f32 %v5916_v42, %v12705_v57  ;;  %6002 = vmatprep.subr.bf16.mxu1 %v5958_v60  ;;  %v5940_v36 = vmul.f32 0.01, %v5924_v41  ;;  %vm5932_vm0 = vcmp.ge.f32.partialorder %v5924_v41, 0.0  ;;  %v12827_v29 = vpop.permute.xlu0 %6655 }
0x15d7   : > { %v5941_v53 = vmul.f32 0.01, %v5925_v13  ;;  %v5927_v38 = vadd.f32 %v5918_v39, %v12709_v12  ;;  %6003 = vmatpush1.bf16.msra.mxu1 %v5957_v58  ;;  %vm5933_vm6 = vcmp.ge.f32.partialorder %v5925_v13, 0.0 }
0x15d8   : > { %vm5934_vm2 = vcmp.ge.f32.partialorder %v5926_v62, 0.0  ;;  %v5942_v26 = vmul.f32 0.01, %v5926_v62  ;;  %v12763_v24 = vsel %vm5932_vm0, %v5924_v41, %v5940_v36 }
0x15d9   : > { %vm5935_vm5 = vcmp.ge.f32.partialorder %v5927_v38, 0.0  ;;  %v5943_v44 = vmul.f32 0.01, %v5927_v38  ;;  %v12759_v23 = vsel %vm5933_vm6, %v5925_v13, %v5941_v53  ;;  %v12821_v54 = vpop.permute.xlu1 %6100 }
0x15da   : > { %v12757_v56 = vsel %vm5934_vm2, %v5926_v62, %v5942_v26  ;;  %v6233_v15 = vpop.permute.xlu0 %6232 }
0x15db   : > { %v12761_v59 = vsel %vm5935_vm5, %v5927_v38, %v5943_v44  ;;  %v5959_v12 = vpack.c.bf16 %v12757_v56, %v12763_v24 }
0x15dc   : > { %v5960_v57 = vpack.c.bf16 %v12761_v59, %v12759_v23 }
0x15dd   : > { %v12825_v22 = vpop.permute.xlu1 %6110 }
0x15de   : > { %6004 = vmatprep.subr.bf16.mxu1 %v5960_v57  ;;  %v12833_v46 = vpop.permute.xlu0 %6665 }
0x15df   : > { %6005 = vmatpush1.bf16.msra.mxu1 %v5959_v12 }
0x15e0   : > { %8777 = vmatprep.subr.bf16.mxu1 %v13682_v21 }
0x15e1   : > { %v12829_v16 = vpop.permute.xlu1 %6660 }
0x15e2   : > { %8242 = vmatmul.mubr.msk.bf16.vlgmr.msra.gmra.mrb[76].mxu1 %vm13683_vm1, %v8952_v31  ;;  %v6243_v48 = vpop.permute.xlu0 %6242 }
0x15e3   : > { %6044 = vmatprep.mubr.bf16.mxu1 %v13675_v45  ;;  %8778 = vmatpush3.bf16.msra.mxu1 %v13682_v21 }
0x15e4   : > { %8779 = vmatprep.subr.bf16.mxu1 %v13684_v17 }
0x15e5   : > { %v12831_v32 = vpop.permute.xlu1 %6237 }
0x15e6   : > { %v12837_v42 = vpop.permute.xlu0 %6675 }
0x15e7   : > { %8780 = vmatpush3.bf16.msra.mxu1 %v13684_v17 }
0x15e8   : > { %8801 = vmatprep.subr.bf16.mxu1 %v13685_v28 }
0x15e9   : > { %v12835_v47 = vpop.permute.xlu1 %6670 }
0x15ea   : > { %8243 = vmatmul.mubr.msk.bf16.gmra.mrb[80].mxu1 %vm13686_vm10, %v8953_v0  ;;  %v6253_v0 = vpop.permute.xlu0 %6252 }
0x15eb   : > { %8781 = vmatprep.mubr.msk.bf16.mxu1 %vm13687_vm3, %v8954_v33 }
0x15ed   : > { %v6248_v11 = vpop.permute.xlu1 %6247 }
0x15f1   : > { %v12839_v39 = vpop.permute.xlu1 %6680 }
0x15f2   : > { %8782 = vmatmul.mubr.msk.bf16.vlgmr.msra.gmra.mrb[84].mxu1 %vm13688_vm15, %v8955_v50 }
0x15f3   : > { %8785 = vmatprep.mubr.msk.bf16.mxu1 %vm13689_vm12, %v8956_v25  ;;  %8802 = vmatpush3.bf16.msra.mxu1 %v13685_v28 }
0x15f4   : > { %8803 = vmatprep.subr.bf16.mxu1 %v13690_v3 }
0x15f5   : > { %v6258_v25 = vpop.permute.xlu1 %6257 }
0x15f7   : > { %8804 = vmatpush3.bf16.msra.mxu1 %v13690_v3 }
0x15fa   : > { %8786 = vmatmul.mubr.msk.bf16.gmra.mrb[88].mxu1 %vm13691_vm8, %v8957_v1  ;;  %vm13697_vm8 = vcmask 130048  }
0x15fb   : > { %8805 = vmatprep.mubr.msk.bf16.mxu1 %vm13692_vm11, %v8958_v63  ;;  %vm13698_vm11 = vmmov %vm13695_vm7 }
0x1602   : > { %8806 = vmatmul.mubr.msk.bf16.vlgmr.msra.gmra.mrb[92].mxu1 %vm13693_vm13, %v8959_v40  ;;  %vm13699_vm13 = vmmov %vm13697_vm8 }
0x1603   : > { %8809 = vmatprep.mubr.msk.bf16.mxu1 %vm13694_vm9, %v8960_v9 }
0x160a   : > { %8810 = vmatmul.mubr.msk.bf16.gmra.mrb[96].mxu1 %vm13695_vm7, %v8961_v2  ;;  %vm13701_vm7 = vmmov %vm13697_vm8 }
0x160b   : > { %7175 = vmatprep.mubr.bf16.mxu1 %v13675_v45 }
0x16b5   : > { %v6036_v20 = vpop.f32.mrb[76].mxu1 }
0x16b6   : > { %v6037_v30 = vadd.f32 %v6036_v20, %v5969_v52  ;;  %v6038_v18 = vpop.f32.mrb[77].mxu1 }
0x16b7   : > { %v6039_v27 = vadd.f32 %v6038_v18, %v5969_v52  ;;  %v6040_v14 = vpop.f32.mrb[78].mxu1 }
0x16b8   : > { %v6063_v51 = vmul.f32 0.01, %v6037_v30  ;;  %v6041_v4 = vadd.f32 %v6040_v14, %v5974_v49  ;;  %v6042_v34 = vpop.f32.mrb[79].mxu1  ;;  %vm6055_vm4 = vcmp.ge.f32.partialorder %v6037_v30, 0.0 }
0x16b9   : > { %v6064_v55 = vmul.f32 0.01, %v6039_v27  ;;  %v6043_v35 = vadd.f32 %v6042_v34, %v5974_v49  ;;  %vm6056_vm14 = vcmp.ge.f32.partialorder %v6039_v27, 0.0  ;;  %v12846_v34 = vpop.permute.xlu1 %6690 }
0x16ba   : > { %vm6057_vm6 = vcmp.ge.f32.partialorder %v6041_v4, 0.0  ;;  %v6065_v41 = vmul.f32 0.01, %v6041_v4  ;;  %v6071_v60 = vsel %vm6055_vm4, %v6037_v30, %v6063_v51  ;;  %v12841_v30 = vpop.permute.xlu0 %6685 }
0x16bb   : > { %vm6058_vm2 = vcmp.ge.f32.partialorder %v6043_v35, 0.0  ;;  %v6066_v5 = vmul.f32 0.01, %v6043_v35  ;;  %v6072_v53 = vsel %vm6056_vm14, %v6039_v27, %v6064_v55 }
0x16bc   : > { %v6073_v13 = vsel %vm6057_vm6, %v6041_v4, %v6065_v41  ;;  %v8962_v4 = vld [vmem:[%s13244_s18 + $0x40] sm:$0xff]  }
0x16bd   : > { %v6084_v58 = vpack.c.bf16 %v6073_v13, %v6071_v60  ;;  %v6046_v62 = vpop.f32.mrb[80].mxu1  ;;  %v6074_v38 = vsel %vm6058_vm2, %v6043_v35, %v6066_v5  ;;  %vm13702_vm2 = vmmov %vm13701_vm7 }
0x16be   : > { %v6047_v36 = vadd.f32 %v6046_v62, %v5979_v10  ;;  %v6048_v26 = vpop.f32.mrb[81].mxu1  ;;  %v6085_v44 = vpack.c.bf16 %v6074_v38, %v6072_v53  ;;  %v6263_v13 = vpop.permute.xlu0 %6262 }
0x16bf   : > { %v6049_v57 = vadd.f32 %v6048_v26, %v5979_v10  ;;  %v6050_v12 = vpop.f32.mrb[82].mxu1 }
0x16c0   : > { %v6067_v31 = vmul.f32 0.01, %v6047_v36  ;;  %v6051_v21 = vadd.f32 %v6050_v12, %v5984_v6  ;;  %v6052_v17 = vpop.f32.mrb[83].mxu1  ;;  %6129 = vmatprep.subr.bf16.mxu0 %v6085_v44  ;;  %vm6059_vm0 = vcmp.ge.f32.partialorder %v6047_v36, 0.0 }
0x16c1   : > { %v6068_v33 = vmul.f32 0.01, %v6049_v57  ;;  %v6053_v28 = vadd.f32 %v6052_v17, %v5984_v6  ;;  %6130 = vmatpush1.bf16.msra.mxu0 %v6084_v58  ;;  %vm6060_vm5 = vcmp.ge.f32.partialorder %v6049_v57, 0.0 }
0x16c2   : > { %vm6061_vm1 = vcmp.ge.f32.partialorder %v6051_v21, 0.0  ;;  %v6069_v50 = vmul.f32 0.01, %v6051_v21  ;;  %v6075_v1 = vsel %vm6059_vm0, %v6047_v36, %v6067_v31  ;;  %v6268_v36 = vpop.permute.xlu1 %6267  ;;  %vm13704_vm0 = vmmov %vm13698_vm11 }
0x16c3   : > { %vm6062_vm10 = vcmp.ge.f32.partialorder %v6053_v28, 0.0  ;;  %v6070_v3 = vmul.f32 0.01, %v6053_v28  ;;  %v6076_v2 = vsel %vm6060_vm5, %v6049_v57, %v6068_v33  ;;  %v13700_v57 = vld [vmem:[#allocation19_spill] sm:$0xff]  ;;  %v8963_v33 = vld [vmem:[%s13244_s18 + $0x48] sm:$0xff]   ;;  %vm13705_vm5 = vmmov %vm13702_vm2 }
0x16c4   : > { %v6077_v63 = vsel %vm6061_vm1, %v6051_v21, %v6069_v50  ;;  %vm13706_vm1 = vmmov %vm13704_vm0 }
0x16c5   : > { %v6086_v40 = vpack.c.bf16 %v6077_v63, %v6075_v1  ;;  %v8783_v9 = vpop.f32.mrb[84].mxu1  ;;  %v6078_v52 = vsel %vm6062_vm10, %v6053_v28, %v6070_v3 }
0x16c6   : > { %v6345_v49 = vadd.f32 %v8783_v9, %v6243_v48  ;;  %v6336_v10 = vpop.f32.mrb[85].mxu1  ;;  %v6087_v20 = vpack.c.bf16 %v6078_v52, %v6076_v2  ;;  %v13703_v9 = vld [vmem:[#allocation15_spill] sm:$0xff] }
0x16c7   : > { %v6337_v18 = vadd.f32 %v6336_v10, %v6233_v15  ;;  %v8784_v6 = vpop.f32.mrb[86].mxu1  ;;  %v13696_v15 = vld [vmem:[#allocation18_spill] sm:$0xff] }
0x16c8   : > { %v6377_v27 = vmul.f32 0.01, %v6345_v49  ;;  %v6348_v14 = vadd.f32 %v8784_v6, %v6248_v11  ;;  %6131 = vmatprep.subr.bf16.mxu0 %v6087_v20  ;;  %v6339_v51 = vpop.f32.mrb[87].mxu1  ;;  %vm6369_vm3 = vcmp.ge.f32.partialorder %v6345_v49, 0.0 }
0x16c9   : > { %v6375_v55 = vmul.f32 0.01, %v6337_v18  ;;  %v6340_v48 = vadd.f32 %v6339_v51, %v12831_v32  ;;  %6132 = vmatpush1.bf16.msra.mxu0 %v6086_v40  ;;  %vm6367_vm15 = vcmp.ge.f32.partialorder %v6337_v18, 0.0 }
0x16ca   : > { %v6378_v35 = vmul.f32 0.01, %v6348_v14  ;;  %v6385_v41 = vsel %vm6369_vm3, %v6345_v49, %v6377_v27  ;;  %vm6370_vm12 = vcmp.ge.f32.partialorder %v6348_v14, 0.0  ;;  %8789 = vmatprep.subr.bf16.mxu0 %v13696_v15  ;;  %vm13707_vm3 = vmmov %vm13702_vm2 }
0x16cb   : > { %v6397_v11 = vsel %vm13697_vm8, %v6385_v41, -inf  ;;  %v6383_v5 = vsel %vm6367_vm15, %v6337_v18, %v6375_v55  ;;  %v6376_v58 = vmul.f32 0.01, %v6340_v48  ;;  %vm6368_vm9 = vcmp.ge.f32.partialorder %v6340_v48, 0.0  ;;  %vm13708_vm15 = vmmov %vm13702_vm2 }
0x16cc   : > { %6398 = vmax.xlane.f32.xlu1 %v6397_v11  ;;  %8254 = vmatmul.mubr.msk.bf16.vlgmr.msra.gmra.mrb[76].mxu0 %vm13698_vm11, %v8962_v4  ;;  %v6391_v60 = vsel %vm13699_vm13, %v6383_v5, -inf  ;;  %v6386_v32 = vsel %vm6370_vm12, %v6348_v14, %v6378_v35  ;;  %vm13709_vm11 = vcmask 523264  }
0x16cd   : > { %v8787_v62 = vpop.f32.mrb[88].mxu1  ;;  %6392 = vmax.xlane.f32.xlu0 %v6391_v60  ;;  %6171 = vmatprep.mubr.bf16.mxu0 %v13675_v45  ;;  %v6400_v17 = vsel %vm13701_vm7, %v6386_v32, -inf  ;;  %v6384_v3 = vsel %vm6368_vm9, %v6340_v48, %v6376_v58  ;;  %v8965_v48 = vld [vmem:[%s13246_s20 + $0x28] sm:$0xff]   ;;  %vm13710_vm9 = vmmov %vm13704_vm0 }
0x16ce   : > { %v6361_v53 = vadd.f32 %v8787_v62, %v6263_v13  ;;  %v6352_v38 = vpop.f32.mrb[89].mxu1  ;;  %8790 = vmatpush3.bf16.msra.mxu0 %v13696_v15  ;;  %v8966_v15 = vld [vmem:[%s13246_s20 + $0x30] sm:$0xff]   ;;  %vm13711_vm7 = vmmov %vm13702_vm2 }
0x16cf   : > { %v6353_v26 = vadd.f32 %v6352_v38, %v6253_v0  ;;  %v8788_v44 = vpop.f32.mrb[90].mxu1  ;;  %8791 = vmatprep.subr.bf16.mxu0 %v13700_v57  ;;  %v8964_v0 = vld [vmem:[%s13246_s20 + $0x20] sm:$0xff]  }
0x16d0   : > { %v6381_v12 = vmul.f32 0.01, %v6361_v53  ;;  %v6364_v31 = vadd.f32 %v8788_v44, %v6268_v36  ;;  %v6355_v21 = vpop.f32.mrb[91].mxu1  ;;  %vm6373_vm4 = vcmp.ge.f32.partialorder %v6361_v53, 0.0  ;;  %v13714_v44 = vld [vmem:[#allocation17_spill] sm:$0xff] }
0x16d1   : > { %v6379_v28 = vmul.f32 0.01, %v6353_v26  ;;  %v6356_v50 = vadd.f32 %v6355_v21, %v6258_v25  ;;  %6401 = vmax.xlane.f32.xlu0 %v6400_v17  ;;  %vm6371_vm14 = vcmp.ge.f32.partialorder %v6353_v26, 0.0  ;;  %v6394_v25 = vsel %vm13705_vm5, %v6384_v3, -inf }
0x16d2   : > { %v6382_v1 = vmul.f32 0.01, %v6364_v31  ;;  %v6389_v63 = vsel %vm6373_vm4, %v6361_v53, %v6381_v12  ;;  %vm6374_vm6 = vcmp.ge.f32.partialorder %v6364_v31, 0.0  ;;  %8792 = vmatpush3.bf16.msra.mxu0 %v13700_v57  ;;  %vm13712_vm4 = vmmov %vm13704_vm0 }
0x16d3   : > { %v6409_v40 = vsel %vm13702_vm2, %v6389_v63, -inf  ;;  %8813 = vmatprep.subr.bf16.mxu0 %v13703_v9  ;;  %v6387_v2 = vsel %vm6371_vm14, %v6353_v26, %v6379_v28  ;;  %v6380_v52 = vmul.f32 0.01, %v6356_v50  ;;  %vm6372_vm10 = vcmp.ge.f32.partialorder %v6356_v50, 0.0  ;;  %vm13713_vm14 = vmmov %vm13709_vm11  ;;  %v8968_v28 = vld [vmem:[%s13246_s20 + $0x60] sm:$0xff]  }
0x16d4   : > { %6410 = vmax.xlane.f32.xlu1 %v6409_v40  ;;  %8255 = vmatmul.mubr.msk.bf16.gmra.mrb[80].mxu0 %vm13704_vm0, %v8963_v33  ;;  %v6390_v10 = vsel %vm6374_vm6, %v6364_v31, %v6382_v1  ;;  %v6403_v14 = vsel %vm13707_vm3, %v6387_v2, -inf  ;;  %vm13715_vm2 = vmmov %vm13709_vm11 }
0x16d5   : > { %v8807_v49 = vpop.f32.mrb[92].mxu1  ;;  %6395 = vmax.xlane.f32.xlu0 %v6394_v25  ;;  %8793 = vmatprep.mubr.msk.bf16.mxu0 %vm13706_vm1, %v8964_v0  ;;  %v6412_v55 = vsel %vm13708_vm15, %v6390_v10, -inf  ;;  %vm13717_vm3 = vmmov %vm13712_vm4  ;;  %v8969_v25 = vld [vmem:[%s13246_s20 + $0x68] sm:$0xff]   ;;  %v8971_v10 = vld [vmem:[%s13246_s20 + $0x78] sm:$0xff]  }
0x16d6   : > { %v6768_v20 = vadd.f32 %v8807_v49, %v12833_v46  ;;  %v6759_v18 = vpop.f32.mrb[93].mxu1  ;;  %vm13718_vm15 = vmmov %vm13715_vm2 }
0x16d7   : > { %v6760_v6 = vadd.f32 %v6759_v18, %v12827_v29  ;;  %v8808_v27 = vpop.f32.mrb[94].mxu1  ;;  %v6388_v29 = vsel %vm6372_vm10, %v6356_v50, %v6380_v52  ;;  %vm13716_vm10 = vmmov %vm13715_vm2  ;;  %v8970_v52 = vld [vmem:[%s13246_s20 + $0x70] sm:$0xff]   ;;  %v12921_v18 = vpop.permute.xlu0 %6444 }
0x16d8   : > { %v6800_v51 = vmul.f32 0.01, %v6768_v20  ;;  %v6762_v4 = vpop.f32.mrb[95].mxu1  ;;  %6404 = vmax.xlane.f32.xlu1 %v6403_v14  ;;  %vm6792_vm12 = vcmp.ge.f32.partialorder %v6768_v20, 0.0  ;;  %v6771_v46 = vadd.f32 %v8808_v27, %v12835_v47  ;;  %v6406_v13 = vsel %vm13711_vm7, %v6388_v29, -inf  ;;  %vm13723_vm7 = vmmov %vm13715_vm2 }
0x16d9   : > { %v6798_v35 = vmul.f32 0.01, %v6760_v6  ;;  %v6763_v41 = vadd.f32 %v6762_v4, %v12829_v16  ;;  %6413 = vmax.xlane.f32.xlu0 %v6412_v55  ;;  %vm6790_vm8 = vcmp.ge.f32.partialorder %v6760_v6, 0.0 }
0x16da   : > { %v6808_v11 = vsel %vm6792_vm12, %v6768_v20, %v6800_v51  ;;  %v6801_v47 = vmul.f32 0.01, %v6771_v46  ;;  %vm6793_vm6 = vcmp.ge.f32.partialorder %v6771_v46, 0.0  ;;  %vm13719_vm12 = vmmov %vm13717_vm3  ;;  %v12919_v20 = vpop.permute.xlu1 %6449 }
0x16db   : > { %v6799_v5 = vmul.f32 0.01, %v6763_v41  ;;  %v6820_v60 = vsel %vm13709_vm11, %v6808_v11, -inf  ;;  %vm6791_vm13 = vcmp.ge.f32.partialorder %v6763_v41, 0.0  ;;  %v6806_v62 = vsel %vm6790_vm8, %v6760_v6, %v6798_v35  ;;  %vm13720_vm11 = vmmov %vm13715_vm2  ;;  %v12925_v27 = vpop.permute.xlu0 %6866 }
0x16dc   : > { %6821 = vmax.xlane.f32.xlu1 %v6820_v60  ;;  %8794 = vmatmul.mubr.msk.bf16.vlgmr.msra.gmra.mrb[84].mxu0 %vm13710_vm9, %v8965_v48  ;;  %v6814_v21 = vsel %vm13715_vm2, %v6806_v62, -inf  ;;  %vm13722_vm9 = vmmov %vm13717_vm3 }
0x16dd   : > { %v8811_v58 = vpop.f32.mrb[96].mxu1  ;;  %6407 = vmax.xlane.f32.xlu0 %v6406_v13  ;;  %v6807_v16 = vsel %vm6791_vm13, %v6763_v41, %v6799_v5  ;;  %8797 = vmatprep.mubr.msk.bf16.mxu0 %vm13712_vm4, %v8966_v15  ;;  %vm13721_vm13 = vmmov %vm13715_vm2 }
0x16de   : > { %v6784_v32 = vadd.f32 %v8811_v58, %v12841_v30  ;;  %v6775_v53 = vpop.f32.mrb[97].mxu1  ;;  %v6817_v38 = vsel %vm13713_vm14, %v6807_v16, -inf  ;;  %8814 = vmatpush3.bf16.msra.mxu0 %v13703_v9  ;;  %v8967_v30 = vld [vmem:[%s13246_s20 + $0x38] sm:$0xff]   ;;  %vm13724_vm4 = vmmov %vm13717_vm3  ;;  %v12923_v6 = vpop.permute.xlu1 %6871 }
0x16df   : > { %v6776_v36 = vadd.f32 %v6775_v53, %v12837_v42  ;;  %v8812_v26 = vpop.f32.mrb[98].mxu1  ;;  %8815 = vmatprep.subr.bf16.mxu0 %v13714_v44  ;;  %v6809_v42 = vsel %vm6793_vm6, %v6771_v46, %v6801_v47  ;;  %vm13725_vm14 = vmmov %vm13717_vm3  ;;  %v12929_v51 = vpop.permute.xlu0 %6454  ;;  %vm6415_vm6 = vcmask 7168  }
0x16e0   : > { %v6804_v57 = vmul.f32 0.01, %v6784_v32  ;;  %v6787_v12 = vadd.f32 %v8812_v26, %v12846_v34  ;;  %v6778_v31 = vpop.f32.mrb[99].mxu1  ;;  %6818 = vmax.xlane.f32.xlu1 %v6817_v38  ;;  %vm6796_vm0 = vcmp.ge.f32.partialorder %v6784_v32, 0.0  ;;  %v6823_v0 = vsel %vm13718_vm15, %v6809_v42, -inf }
0x16e1   : > { %v6802_v17 = vmul.f32 0.01, %v6776_v36  ;;  %v6779_v33 = vadd.f32 %v6778_v31, %v12839_v39  ;;  %6815 = vmax.xlane.f32.xlu0 %v6814_v21  ;;  %vm6794_vm5 = vcmp.ge.f32.partialorder %v6776_v36, 0.0 }
0x16e2   : > { %v6805_v34 = vmul.f32 0.01, %v6787_v12  ;;  %v6812_v50 = vsel %vm6796_vm0, %v6784_v32, %v6804_v57  ;;  %vm6797_vm1 = vcmp.ge.f32.partialorder %v6787_v12, 0.0  ;;  %8816 = vmatpush3.bf16.msra.mxu0 %v13714_v44  ;;  %v12927_v14 = vpop.permute.xlu1 %6459 }
0x16e3   : > { %v6832_v3 = vsel %vm13716_vm10, %v6812_v50, -inf  ;;  %v6810_v39 = vsel %vm6794_vm5, %v6776_v36, %v6802_v17  ;;  %v6803_v1 = vmul.f32 0.01, %v6779_v33  ;;  %vm6795_vm8 = vcmp.ge.f32.partialorder %v6779_v33, 0.0  ;;  %v12933_v55 = vpop.permute.xlu0 %6876 }
0x16e4   : > { %6833 = vmax.xlane.f32.xlu1 %v6832_v3  ;;  %8798 = vmatmul.mubr.msk.bf16.gmra.mrb[88].mxu0 %vm13717_vm3, %v8967_v30  ;;  %v6813_v63 = vsel %vm6797_vm1, %v6787_v12, %v6805_v34  ;;  %v6826_v40 = vsel %vm13720_vm11, %v6810_v39, -inf }
0x16e5   : > { %6824 = vmax.xlane.f32.xlu0 %v6823_v0  ;;  %8817 = vmatprep.mubr.msk.bf16.mxu0 %vm13719_vm12, %v8968_v28  ;;  %v6835_v9 = vsel %vm13721_vm13, %v6813_v63, -inf  ;;  %v6811_v2 = vsel %vm6795_vm8, %v6779_v33, %v6803_v1 }
0x16e6   : > { %v6829_v49 = vsel %vm13723_vm7, %v6811_v2, -inf  ;;  %v12931_v4 = vpop.permute.xlu1 %6881 }
0x16e7   : > { %v12937_v35 = vpop.permute.xlu0 %6464 }
0x16e8   : > { %6827 = vmax.xlane.f32.xlu1 %v6826_v40 }
0x16e9   : > { %6836 = vmax.xlane.f32.xlu0 %v6835_v9 }
0x16ea   : > { %v12935_v48 = vpop.permute.xlu1 %6469 }
0x16eb   : > { %v12941_v41 = vpop.permute.xlu0 %6886 }
0x16ec   : > { %8818 = vmatmul.mubr.msk.bf16.vlgmr.msra.gmra.mrb[92].mxu0 %vm13722_vm9, %v8969_v25  ;;  %vm13726_vm9 = vmmov %vm13724_vm4 }
0x16ed   : > { %6830 = vmax.xlane.f32.xlu0 %v6829_v49  ;;  %8821 = vmatprep.mubr.msk.bf16.mxu0 %vm13724_vm4, %v8970_v52 }
0x16ee   : > { %v12939_v46 = vpop.permute.xlu1 %6891 }
0x16ef   : > { %v12945_v15 = vpop.permute.xlu0 %6474 }
0x16f2   : > { %v12943_v29 = vpop.permute.xlu1 %6479 }
0x16f3   : > { %v12949_v5 = vpop.permute.xlu0 %6896 }
0x16f4   : > { %8822 = vmatmul.mubr.msk.bf16.gmra.mrb[96].mxu0 %vm13725_vm14, %v8971_v10  ;;  %vm13727_vm14 = vmmov %vm13724_vm4 }
0x16f6   : > { %v12947_v11 = vpop.permute.xlu1 %6901 }
0x16f7   : > { %v12953_v13 = vpop.permute.xlu0 %7073 }
0x16fa   : > { %v12951_v60 = vpop.permute.xlu1 %7078 }
0x16fb   : > { %v12957_v58 = vpop.permute.xlu0 %7083 }
0x16fe   : > { %v12955_v47 = vpop.permute.xlu1 %7088 }
0x16ff   : > { %v12961_v62 = vpop.permute.xlu0 %7093 }
0x1702   : > { %v12959_v16 = vpop.permute.xlu1 %7098 }
0x1703   : > { %v12965_v53 = vpop.permute.xlu0 %7103 }
0x1706   : > { %v12963_v32 = vpop.permute.xlu1 %7108 }
0x1759   : > { %v6399_v38 = vpop.xlane.xlu1 %6398 }
0x175a   : > { %6418 = vst.msk [vmem:[#allocation2 + $0x10] sm:$0xff] %vm6415_vm6, %v6399_v38  ;;  %v6393_v36 = vpop.xlane.xlu0 %6392 }
0x175b   : > { %6416 = vst.msk [vmem:[#allocation2] sm:$0xff] %vm6415_vm6, %v6393_v36 }
0x175e   : > { %v6402_v26 = vpop.xlane.xlu0 %6401 }
0x175f   : > { %6419 = vst.msk [vmem:[#allocation2 + $0x18] sm:$0xff] %vm6415_vm6, %v6402_v26 }
0x1761   : > { %v6411_v44 = vpop.xlane.xlu1 %6410  ;;  %v7314_v10 = vld [vmem:[#allocation2 + $0x10] sm:$0xff] }
0x1762   : > { %6422 = vst.msk [vmem:[#allocation2 + $0x30] sm:$0xff] %vm6415_vm6, %v6411_v44  ;;  %v6396_v57 = vpop.xlane.xlu0 %6395  ;;  %v7312_v63 = vld [vmem:[#allocation2] sm:$0xff] }
0x1763   : > { %6417 = vst.msk [vmem:[#allocation2 + $0x8] sm:$0xff] %vm6415_vm6, %v6396_v57 }
0x1765   : > { %v6405_v12 = vpop.xlane.xlu1 %6404 }
0x1766   : > { %6420 = vst.msk [vmem:[#allocation2 + $0x20] sm:$0xff] %vm6415_vm6, %v6405_v12  ;;  %v6414_v31 = vpop.xlane.xlu0 %6413  ;;  %v7315_v9 = vld [vmem:[#allocation2 + $0x18] sm:$0xff] }
0x1767   : > { %6423 = vst.msk [vmem:[#allocation2 + $0x38] sm:$0xff] %vm6415_vm6, %v6414_v31  ;;  %v7353_v38 = vpack.c.bf16 %v7315_v9, %v7314_v10 }
0x1769   : > { %v6822_v21 = vpop.xlane.xlu1 %6821 }
0x176a   : > { %6840 = vst.msk [vmem:[#allocation2 + $0x90] sm:$0xff] %vm6415_vm6, %v6822_v21  ;;  %v6408_v30 = vpop.xlane.xlu0 %6407  ;;  %v7313_v3 = vld [vmem:[#allocation2 + $0x8] sm:$0xff] }
0x176b   : > { %6421 = vst.msk [vmem:[#allocation2 + $0x28] sm:$0xff] %vm6415_vm6, %v6408_v30  ;;  %v7352_v40 = vpack.c.bf16 %v7313_v3, %v7312_v63 }
0x176d   : > { %v6819_v17 = vpop.xlane.xlu1 %6818  ;;  %v7316_v31 = vld [vmem:[#allocation2 + $0x20] sm:$0xff] }
0x176e   : > { %6839 = vst.msk [vmem:[#allocation2 + $0x88] sm:$0xff] %vm6415_vm6, %v6819_v17  ;;  %v6816_v33 = vpop.xlane.xlu0 %6815 }
0x176f   : > { %6838 = vst.msk [vmem:[#allocation2 + $0x80] sm:$0xff] %vm6415_vm6, %v6816_v33  ;;  %v7319_v33 = vld [vmem:[#allocation2 + $0x38] sm:$0xff] }
0x1771   : > { %v6834_v42 = vpop.xlane.xlu1 %6833  ;;  %v7330_v2 = vld [vmem:[#allocation2 + $0x90] sm:$0xff] }
0x1772   : > { %6844 = vst.msk [vmem:[#allocation2 + $0xb0] sm:$0xff] %vm6415_vm6, %v6834_v42  ;;  %v6825_v28 = vpop.xlane.xlu0 %6824  ;;  %v7317_v36 = vld [vmem:[#allocation2 + $0x28] sm:$0xff]  ;;  %v7318_v42 = vld [vmem:[#allocation2 + $0x30] sm:$0xff] }
0x1773   : > { %6841 = vst.msk [vmem:[#allocation2 + $0x98] sm:$0xff] %vm6415_vm6, %v6825_v28  ;;  %v7354_v21 = vpack.c.bf16 %v7317_v36, %v7316_v31  ;;  %v7355_v28 = vpack.c.bf16 %v7319_v33, %v7318_v42 }
0x1775   : > { %v6828_v34 = vpop.xlane.xlu1 %6827  ;;  %v7329_v50 = vld [vmem:[#allocation2 + $0x88] sm:$0xff] }
0x1776   : > { %6842 = vst.msk [vmem:[#allocation2 + $0xa0] sm:$0xff] %vm6415_vm6, %v6828_v34  ;;  %v6837_v0 = vpop.xlane.xlu0 %6836  ;;  %v7328_v39 = vld [vmem:[#allocation2 + $0x80] sm:$0xff] }
0x1777   : > { %6845 = vst.msk [vmem:[#allocation2 + $0xb8] sm:$0xff] %vm6415_vm6, %v6837_v0  ;;  %v7360_v1 = vpack.c.bf16 %v7329_v50, %v7328_v39 }
0x1779   : > { %8527 = vmatprep.subr.bf16.mxu0 %v7360_v1  ;;  %v7334_v30 = vld [vmem:[#allocation2 + $0xb0] sm:$0xff] }
0x177a   : > { %v6831_v25 = vpop.xlane.xlu0 %6830  ;;  %8528 = vmatpush3.bf16.msra.mxu0 %v7352_v40  ;;  %v7331_v52 = vld [vmem:[#allocation2 + $0x98] sm:$0xff] }
0x177b   : > { %6843 = vst.msk [vmem:[#allocation2 + $0xa8] sm:$0xff] %vm6415_vm6, %v6831_v25  ;;  %v7361_v49 = vpack.c.bf16 %v7331_v52, %v7330_v2 }
0x177d   : > { %8529 = vmatprep.subr.bf16.mxu0 %v7361_v49  ;;  %v7332_v26 = vld [vmem:[#allocation2 + $0xa0] sm:$0xff] }
0x177e   : > { %8530 = vmatpush3.bf16.msra.mxu0 %v7353_v38  ;;  %v7335_v57 = vld [vmem:[#allocation2 + $0xb8] sm:$0xff] }
0x177f   : > { %v7363_v17 = vpack.c.bf16 %v7335_v57, %v7334_v30 }
0x1782   : > { %v7333_v44 = vld [vmem:[#allocation2 + $0xa8] sm:$0xff] }
0x1783   : > { %v7362_v12 = vpack.c.bf16 %v7333_v44, %v7332_v26 }
0x1785   : > { %8531 = vmatprep.subr.bf16.mxu0 %v7362_v12 }
0x1786   : > { %8532 = vmatpush3.bf16.msra.mxu0 %v7354_v21 }
0x1787   : > { %8533 = vmatprep.subr.bf16.mxu0 %v7363_v17 }
0x178a   : > { %8534 = vmatpush3.bf16.msra.mxu0 %v7355_v28 }
0x179f   : > { %v6163_v34 = vpop.f32.mrb[76].mxu0 }
0x17a0   : > { %v6164_v50 = vadd.f32 %v6163_v34, %v12819_v7  ;;  %v6165_v3 = vpop.f32.mrb[77].mxu0 }
0x17a1   : > { %v6166_v0 = vadd.f32 %v6165_v3, %v12819_v7  ;;  %v6167_v39 = vpop.f32.mrb[78].mxu0 }
0x17a2   : > { %v6182_v1 = vadd.f32 %v6164_v50, %v12747_v19  ;;  %v6168_v63 = vadd.f32 %v6167_v39, %v12821_v54  ;;  %v6169_v40 = vpop.f32.mrb[79].mxu0 }
0x17a3   : > { %v6183_v9 = vadd.f32 %v6166_v0, %v12743_v61  ;;  %v6170_v25 = vadd.f32 %v6169_v40, %v12821_v54 }
0x17a4   : > { %v6198_v2 = vmul.f32 0.01, %v6182_v1  ;;  %v6184_v52 = vadd.f32 %v6168_v63, %v12741_v43  ;;  %vm6190_vm2 = vcmp.ge.f32.partialorder %v6182_v1, 0.0 }
0x17a5   : > { %v6199_v49 = vmul.f32 0.01, %v6183_v9  ;;  %v6185_v10 = vadd.f32 %v6170_v25, %v12745_v37  ;;  %vm6191_vm0 = vcmp.ge.f32.partialorder %v6183_v9, 0.0 }
0x17a6   : > { %vm6192_vm5 = vcmp.ge.f32.partialorder %v6184_v52, 0.0  ;;  %v6200_v7 = vmul.f32 0.01, %v6184_v52  ;;  %v6206_v36 = vsel %vm6190_vm2, %v6182_v1, %v6198_v2  ;;  %vm13728_vm2 = vmmov %vm13724_vm4 }
0x17a7   : > { %vm6193_vm1 = vcmp.ge.f32.partialorder %v6185_v10, 0.0  ;;  %v6201_v38 = vmul.f32 0.01, %v6185_v10  ;;  %v6173_v19 = vpop.f32.mrb[80].mxu0  ;;  %v6207_v12 = vsel %vm6191_vm0, %v6183_v9, %v6199_v49  ;;  %vm13729_vm0 = vmmov %vm13728_vm2 }
0x17a8   : > { %v6208_v26 = vsel %vm6192_vm5, %v6184_v52, %v6200_v7  ;;  %v6174_v44 = vadd.f32 %v6173_v19, %v12823_v8  ;;  %v6175_v61 = vpop.f32.mrb[81].mxu0 }
0x17a9   : > { %v6176_v54 = vadd.f32 %v6175_v61, %v12823_v8  ;;  %v6177_v57 = vpop.f32.mrb[82].mxu0  ;;  %v6209_v43 = vsel %vm6193_vm1, %v6185_v10, %v6201_v38  ;;  %v12993_v31 = vpack.c.bf16 %v6208_v26, %v6206_v36  ;;  %v8972_v38 = vld [vmem:[%s13246_s20 + $0x80] sm:$0xff]  }
0x17aa   : > { %v6186_v37 = vadd.f32 %v6174_v44, %v12763_v24  ;;  %v6178_v21 = vadd.f32 %v6177_v57, %v12825_v22  ;;  %v6179_v30 = vpop.f32.mrb[83].mxu0  ;;  %v12997_v17 = vpack.c.bf16 %v6209_v43, %v6207_v12 }
0x17ab   : > { %v6187_v33 = vadd.f32 %v6176_v54, %v12759_v23  ;;  %v6180_v42 = vadd.f32 %v6179_v30, %v12825_v22 }
0x17ac   : > { %v6202_v28 = vmul.f32 0.01, %v6186_v37  ;;  %v6188_v34 = vadd.f32 %v6178_v21, %v12757_v56  ;;  %7143 = vmatprep.subr.bf16.mxu1 %v12997_v17  ;;  %vm6194_vm10 = vcmp.ge.f32.partialorder %v6186_v37, 0.0 }
0x17ad   : > { %v6203_v8 = vmul.f32 0.01, %v6187_v33  ;;  %v6189_v50 = vadd.f32 %v6180_v42, %v12761_v59  ;;  %7144 = vmatpush1.bf16.msra.mxu1 %v12993_v31  ;;  %vm6195_vm3 = vcmp.ge.f32.partialorder %v6187_v33, 0.0  ;;  %v8973_v42 = vld [vmem:[%s13246_s20 + $0x88] sm:$0xff]  }
0x17ae   : > { %vm6196_vm15 = vcmp.ge.f32.partialorder %v6188_v34, 0.0  ;;  %v6204_v24 = vmul.f32 0.01, %v6188_v34  ;;  %v6210_v23 = vsel %vm6194_vm10, %v6186_v37, %v6202_v28  ;;  %vm13730_vm10 = vmmov %vm13729_vm0 }
0x17af   : > { %vm6197_vm12 = vcmp.ge.f32.partialorder %v6189_v50, 0.0  ;;  %v6205_v3 = vmul.f32 0.01, %v6189_v50  ;;  %v8795_v0 = vpop.f32.mrb[84].mxu0  ;;  %v6211_v40 = vsel %vm6195_vm3, %v6187_v33, %v6203_v8  ;;  %vm13731_vm3 = vmmov %vm13729_vm0 }
0x17b0   : > { %v6212_v39 = vsel %vm6196_vm15, %v6188_v34, %v6204_v24  ;;  %v6557_v22 = vadd.f32 %v8795_v0, %v12929_v51  ;;  %v6548_v1 = vpop.f32.mrb[85].mxu0  ;;  %vm13732_vm15 = vmmov %vm13729_vm0 }
0x17b1   : > { %v6549_v56 = vadd.f32 %v6548_v1, %v12921_v18  ;;  %v8796_v63 = vpop.f32.mrb[86].mxu0  ;;  %v6213_v9 = vsel %vm6197_vm12, %v6189_v50, %v6205_v3  ;;  %v13007_v25 = vpack.c.bf16 %v6212_v39, %v6210_v23 }
0x17b2   : > { %v6589_v59 = vmul.f32 0.01, %v6557_v22  ;;  %v6560_v2 = vadd.f32 %v8796_v63, %v12927_v14  ;;  %v6551_v52 = vpop.f32.mrb[87].mxu0  ;;  %v13010_v49 = vpack.c.bf16 %v6213_v9, %v6211_v40  ;;  %vm6581_vm8 = vcmp.ge.f32.partialorder %v6557_v22, 0.0  ;;  %v8974_v9 = vld [vmem:[%s13246_s20 + $0x90] sm:$0xff]  }
0x17b3   : > { %v6587_v10 = vmul.f32 0.01, %v6549_v56  ;;  %v6552_v7 = vadd.f32 %v6551_v52, %v12919_v20  ;;  %vm6579_vm11 = vcmp.ge.f32.partialorder %v6549_v56, 0.0 }
0x17b4   : > { %v6590_v51 = vmul.f32 0.01, %v6560_v2  ;;  %7145 = vmatprep.subr.bf16.mxu1 %v13010_v49  ;;  %v6597_v18 = vsel %vm6581_vm8, %v6557_v22, %v6589_v59  ;;  %vm6582_vm13 = vcmp.ge.f32.partialorder %v6560_v2, 0.0 }
0x17b5   : > { %v6588_v19 = vmul.f32 0.01, %v6552_v7  ;;  %7146 = vmatpush1.bf16.msra.mxu1 %v13007_v25  ;;  %v6609_v14 = vsel %vm13726_vm9, %v6597_v18, -inf  ;;  %vm6580_vm7 = vcmp.ge.f32.partialorder %v6552_v7, 0.0  ;;  %v6595_v26 = vsel %vm6579_vm11, %v6549_v56, %v6587_v10  ;;  %vm13733_vm9 = vmmov %vm13729_vm0 }
0x17b6   : > { %6610 = vmax.xlane.f32.xlu1 %v6609_v14  ;;  %v6598_v36 = vsel %vm6582_vm13, %v6560_v2, %v6590_v51  ;;  %v6603_v43 = vsel %vm13728_vm2, %v6595_v26, -inf }
0x17b7   : > { %v8799_v20 = vpop.f32.mrb[88].mxu0  ;;  %v6612_v44 = vsel %vm13724_vm4, %v6598_v36, -inf  ;;  %v6596_v54 = vsel %vm6580_vm7, %v6552_v7, %v6588_v19 }
0x17b8   : > { %6613 = vmax.xlane.f32.xlu0 %v6612_v44  ;;  %v6564_v61 = vpop.f32.mrb[89].mxu0  ;;  %8356 = vmatmul.mubr.msk.bf16.vlgmr.msra.gmra.mrb[100].mxu1 %vm13727_vm14, %v8972_v38  ;;  %v6606_v33 = vsel %vm13729_vm0, %v6596_v54, -inf  ;;  %v6573_v10 = vadd.f32 %v8799_v20, %v12945_v15 }
0x17b9   : > { %v6565_v57 = vadd.f32 %v6564_v61, %v12937_v35  ;;  %v8800_v12 = vpop.f32.mrb[90].mxu0  ;;  %7185 = vmatprep.mubr.bf16.mxu1 %v13675_v45 }
0x17ba   : > { %v6567_v37 = vpop.f32.mrb[91].mxu0  ;;  %6604 = vmax.xlane.f32.xlu1 %v6603_v43  ;;  %v6593_v20 = vmul.f32 0.01, %v6573_v10  ;;  %vm6585_vm2 = vcmp.ge.f32.partialorder %v6573_v10, 0.0 }
0x17bb   : > { %v6591_v21 = vmul.f32 0.01, %v6565_v57  ;;  %v6568_v30 = vadd.f32 %v6567_v37, %v12935_v48  ;;  %vm6583_vm5 = vcmp.ge.f32.partialorder %v6565_v57, 0.0 }
0x17bc   : > { %6607 = vmax.xlane.f32.xlu0 %v6606_v33 }
0x17bd   : > { %v6592_v28 = vmul.f32 0.01, %v6568_v30  ;;  %v6599_v35 = vsel %vm6583_vm5, %v6565_v57, %v6591_v21  ;;  %vm6584_vm1 = vcmp.ge.f32.partialorder %v6568_v30, 0.0  ;;  %vm13734_vm5 = vmmov %vm13731_vm3  ;;  %v8978_v21 = vld [vmem:[%s13248_s22 + $0x4] ss:$12 sps:$4 sm:$0xff]  }
0x17be   : > { %v6615_v34 = vsel %vm13730_vm10, %v6599_v35, -inf  ;;  %vm13735_vm10 = vmmov %vm13731_vm3  ;;  %7485 = vmatprep.mubr.bf16.mxu0 %v8978_v21 }
0x17bf   : > { %v8819_v8 = vpop.f32.mrb[92].mxu0  ;;  %6616 = vmax.xlane.f32.xlu1 %v6615_v34  ;;  %v6600_v50 = vsel %vm6584_vm1, %v6568_v30, %v6592_v28 }
0x17c0   : > { %v6979_v24 = vadd.f32 %v8819_v8, %v12933_v55  ;;  %v6970_v3 = vpop.f32.mrb[93].mxu0  ;;  %8357 = vmatmul.mubr.msk.bf16.gmra.mrb[104].mxu1 %vm13731_vm3, %v8973_v42  ;;  %v6618_v48 = vsel %vm13732_vm15, %v6600_v50, -inf }
0x17c1   : > { %v6971_v0 = vadd.f32 %v6970_v3, %v12925_v27  ;;  %v8820_v23 = vpop.f32.mrb[94].mxu0  ;;  %6619 = vmax.xlane.f32.xlu0 %v6618_v48  ;;  %7195 = vmatprep.mubr.bf16.mxu1 %v13675_v45 }
0x17c2   : > { %v7011_v39 = vmul.f32 0.01, %v6979_v24  ;;  %v6982_v22 = vadd.f32 %v8820_v23, %v12931_v4  ;;  %v6973_v1 = vpop.f32.mrb[95].mxu0  ;;  %vm7003_vm12 = vcmp.ge.f32.partialorder %v6979_v24, 0.0 }
0x17c3   : > { %v6974_v56 = vadd.f32 %v6973_v1, %v12923_v6  ;;  %v7009_v63 = vmul.f32 0.01, %v6971_v0  ;;  %vm7001_vm11 = vcmp.ge.f32.partialorder %v6971_v0, 0.0 }
0x17c4   : > { %v7012_v55 = vmul.f32 0.01, %v6982_v22  ;;  %v7019_v40 = vsel %vm7003_vm12, %v6979_v24, %v7011_v39  ;;  %vm7004_vm8 = vcmp.ge.f32.partialorder %v6982_v22, 0.0 }
0x17c5   : > { %7029 = vmax.xlane.f32.xlu1 %v7019_v40  ;;  %v7010_v27 = vmul.f32 0.01, %v6974_v56  ;;  %vm7002_vm13 = vcmp.ge.f32.partialorder %v6974_v56, 0.0  ;;  %v7017_v6 = vsel %vm7001_vm11, %v6971_v0, %v7009_v63 }
0x17c6   : > { %v7020_v59 = vsel %vm7004_vm8, %v6982_v22, %v7012_v55 }
0x17c7   : > { %v8823_v2 = vpop.f32.mrb[96].mxu0  ;;  %7031 = vmax.xlane.f32.xlu0 %v7020_v59  ;;  %v7018_v14 = vsel %vm7002_vm13, %v6974_v56, %v7010_v27 }
0x17c8   : > { %v6995_v4 = vadd.f32 %v8823_v2, %v12949_v5  ;;  %v6986_v52 = vpop.f32.mrb[97].mxu0  ;;  %8358 = vmatmul.mubr.msk.bf16.gmra.mrb[108].mxu1 %vm13733_vm9, %v8974_v9  ;;  %v6576_v5 = vadd.f32 %v8800_v12, %v12943_v29  ;;  %v6601_v29 = vsel %vm6585_vm2, %v6573_v10, %v6593_v20  ;;  %v8976_v20 = vld [vmem:[%s13248_s22] ss:$12 sps:$4 sm:$0xff]  }
0x17c9   : > { %v6987_v7 = vadd.f32 %v6986_v52, %v12941_v41  ;;  %v8824_v51 = vpop.f32.mrb[98].mxu0  ;;  %7025 = vmax.xlane.f32.xlu1 %v7017_v6  ;;  %7205 = vmatprep.mubr.bf16.mxu1 %v13675_v45  ;;  %v8975_v41 = vld [vmem:[%s13246_s20 + $0x98] sm:$0xff]   ;;  %v6621_v43 = vsel %vm13735_vm10, %v6601_v29, -inf }
0x17ca   : > { %v7015_v18 = vmul.f32 0.01, %v6995_v4  ;;  %v6998_v38 = vadd.f32 %v8824_v51, %v12947_v11  ;;  %v6989_v19 = vpop.f32.mrb[99].mxu0  ;;  %vm7007_vm7 = vcmp.ge.f32.partialorder %v6995_v4, 0.0  ;;  %v6594_v54 = vmul.f32 0.01, %v6576_v5 }
0x17cb   : > { %v6990_v36 = vadd.f32 %v6989_v19, %v12939_v46  ;;  %7027 = vmax.xlane.f32.xlu0 %v7018_v14  ;;  %v7013_v26 = vmul.f32 0.01, %v6987_v7  ;;  %vm7005_vm14 = vcmp.ge.f32.partialorder %v6987_v7, 0.0  ;;  %vm6586_vm1 = vcmp.ge.f32.partialorder %v6576_v5, 0.0 }
0x17cc   : > { %v7016_v44 = vmul.f32 0.01, %v6998_v38  ;;  %v7023_v15 = vsel %vm7007_vm7, %v6995_v4, %v7015_v18  ;;  %vm7008_vm4 = vcmp.ge.f32.partialorder %v6998_v38, 0.0  ;;  %v6602_v12 = vsel %vm6586_vm1, %v6576_v5, %v6594_v54 }
0x17cd   : > { %7037 = vmax.xlane.f32.xlu1 %v7023_v15  ;;  %v7014_v11 = vmul.f32 0.01, %v6990_v36  ;;  %vm7006_vm0 = vcmp.ge.f32.partialorder %v6990_v36, 0.0  ;;  %v7021_v46 = vsel %vm7005_vm14, %v6987_v7, %v7013_v26  ;;  %v6624_v37 = vsel %vm13731_vm3, %v6602_v12, -inf }
0x17ce   : > { %v7024_v61 = vsel %vm7008_vm4, %v6998_v38, %v7016_v44 }
0x17cf   : > { %7039 = vmax.xlane.f32.xlu0 %v7024_v61  ;;  %v7022_v57 = vsel %vm7006_vm0, %v6990_v36, %v7014_v11 }
0x17d0   : > { %8359 = vmatmul.mubr.msk.bf16.gmra.mrb[112].mxu1 %vm13734_vm5, %v8975_v41 }
0x17d1   : > { %7033 = vmax.xlane.f32.xlu1 %v7021_v46 }
0x17d3   : > { %7035 = vmax.xlane.f32.xlu0 %v7022_v57 }
0x17d5   : > { %6622 = vmax.xlane.f32.xlu1 %v6621_v43 }
0x17d7   : > { %6625 = vmax.xlane.f32.xlu0 %v6624_v37 }
0x1843   : > { %v6611_v30 = vpop.xlane.xlu1 %6610 }
0x1844   : > { %6629 = vst.msk [vmem:[#allocation2 + $0x50] sm:$0xff] %vm6415_vm6, %v6611_v30 }
0x1845   : > { %v6614_v33 = vpop.xlane.xlu0 %6613 }
0x1846   : > { %6630 = vst.msk [vmem:[#allocation2 + $0x58] sm:$0xff] %vm6415_vm6, %v6614_v33 }
0x1847   : > { %v6605_v42 = vpop.xlane.xlu1 %6604 }
0x1848   : > { %6627 = vst.msk [vmem:[#allocation2 + $0x40] sm:$0xff] %vm6415_vm6, %v6605_v42 }
0x1849   : > { %v6608_v28 = vpop.xlane.xlu0 %6607 }
0x184a   : > { %6628 = vst.msk [vmem:[#allocation2 + $0x48] sm:$0xff] %vm6415_vm6, %v6608_v28 }
0x184b   : > { %v7322_v6 = vld [vmem:[#allocation2 + $0x50] sm:$0xff] }
0x184c   : > { %v6617_v35 = vpop.xlane.xlu1 %6616 }
0x184d   : > { %6631 = vst.msk [vmem:[#allocation2 + $0x60] sm:$0xff] %vm6415_vm6, %v6617_v35  ;;  %v7323_v4 = vld [vmem:[#allocation2 + $0x58] sm:$0xff] }
0x184e   : > { %v6620_v34 = vpop.xlane.xlu0 %6619  ;;  %v7357_v10 = vpack.c.bf16 %v7323_v4, %v7322_v6 }
0x184f   : > { %6632 = vst.msk [vmem:[#allocation2 + $0x68] sm:$0xff] %vm6415_vm6, %v6620_v34  ;;  %v7320_v40 = vld [vmem:[#allocation2 + $0x40] sm:$0xff] }
0x1851   : > { %v7321_v39 = vld [vmem:[#allocation2 + $0x48] sm:$0xff] }
0x1852   : > { %v7030_v8 = vpop.xlane.xlu1 %7029  ;;  %v7356_v27 = vpack.c.bf16 %v7321_v39, %v7320_v40 }
0x1853   : > { %7043 = vst.msk [vmem:[#allocation2 + $0xd0] sm:$0xff] %vm6415_vm6, %v7030_v8 }
0x1854   : > { %v7032_v50 = vpop.xlane.xlu0 %7031  ;;  %v7324_v14 = vld [vmem:[#allocation2 + $0x60] sm:$0xff] }
0x1855   : > { %7044 = vst.msk [vmem:[#allocation2 + $0xd8] sm:$0xff] %vm6415_vm6, %v7032_v50 }
0x1856   : > { %v7026_v24 = vpop.xlane.xlu1 %7025  ;;  %v7325_v7 = vld [vmem:[#allocation2 + $0x68] sm:$0xff] }
0x1857   : > { %7041 = vst.msk [vmem:[#allocation2 + $0xc0] sm:$0xff] %vm6415_vm6, %v7026_v24  ;;  %v7358_v5 = vpack.c.bf16 %v7325_v7, %v7324_v14 }
0x1858   : > { %v7028_v3 = vpop.xlane.xlu0 %7027 }
0x1859   : > { %7042 = vst.msk [vmem:[#allocation2 + $0xc8] sm:$0xff] %vm6415_vm6, %v7028_v3 }
0x185a   : > { %v7038_v48 = vpop.xlane.xlu1 %7037  ;;  %v7338_v59 = vld [vmem:[#allocation2 + $0xd0] sm:$0xff] }
0x185b   : > { %7047 = vst.msk [vmem:[#allocation2 + $0xf0] sm:$0xff] %vm6415_vm6, %v7038_v48 }
0x185c   : > { %v7040_v0 = vpop.xlane.xlu0 %7039  ;;  %v7339_v63 = vld [vmem:[#allocation2 + $0xd8] sm:$0xff] }
0x185d   : > { %7048 = vst.msk [vmem:[#allocation2 + $0xf8] sm:$0xff] %vm6415_vm6, %v7040_v0  ;;  %v7365_v2 = vpack.c.bf16 %v7339_v63, %v7338_v59 }
0x185e   : > { %v7034_v23 = vpop.xlane.xlu1 %7033  ;;  %v7336_v1 = vld [vmem:[#allocation2 + $0xc0] sm:$0xff] }
0x185f   : > { %7045 = vst.msk [vmem:[#allocation2 + $0xe0] sm:$0xff] %vm6415_vm6, %v7034_v23 }
0x1860   : > { %v7036_v22 = vpop.xlane.xlu0 %7035  ;;  %v7337_v56 = vld [vmem:[#allocation2 + $0xc8] sm:$0xff] }
0x1861   : > { %7046 = vst.msk [vmem:[#allocation2 + $0xe8] sm:$0xff] %vm6415_vm6, %v7036_v22  ;;  %v7364_v55 = vpack.c.bf16 %v7337_v56, %v7336_v1 }
0x1862   : > { %v6623_v9 = vpop.xlane.xlu1 %6622  ;;  %v7342_v36 = vld [vmem:[#allocation2 + $0xf0] sm:$0xff] }
0x1863   : > { %6633 = vst.msk [vmem:[#allocation2 + $0x70] sm:$0xff] %vm6415_vm6, %v6623_v9  ;;  %8535 = vmatprep.subr.bf16.mxu0 %v7364_v55 }
0x1864   : > { %v6626_v52 = vpop.xlane.xlu0 %6625  ;;  %8536 = vmatpush3.bf16.msra.mxu0 %v7356_v27  ;;  %v7343_v38 = vld [vmem:[#allocation2 + $0xf8] sm:$0xff] }
0x1865   : > { %6634 = vst.msk [vmem:[#allocation2 + $0x78] sm:$0xff] %vm6415_vm6, %v6626_v52  ;;  %8537 = vmatprep.subr.bf16.mxu0 %v7365_v2  ;;  %v7367_v26 = vpack.c.bf16 %v7343_v38, %v7342_v36 }
0x1866   : > { %v7340_v51 = vld [vmem:[#allocation2 + $0xe0] sm:$0xff] }
0x1868   : > { %8538 = vmatpush3.bf16.msra.mxu0 %v7357_v10  ;;  %v7341_v18 = vld [vmem:[#allocation2 + $0xe8] sm:$0xff] }
0x1869   : > { %v7366_v19 = vpack.c.bf16 %v7341_v18, %v7340_v51 }
0x186a   : > { %v7326_v44 = vld [vmem:[#allocation2 + $0x70] sm:$0xff] }
0x186b   : > { %8539 = vmatprep.subr.bf16.mxu0 %v7366_v19 }
0x186c   : > { %8540 = vmatpush3.bf16.msra.mxu0 %v7358_v5  ;;  %v7327_v15 = vld [vmem:[#allocation2 + $0x78] sm:$0xff] }
0x186d   : > { %8541 = vmatprep.subr.bf16.mxu0 %v7367_v26  ;;  %v7359_v41 = vpack.c.bf16 %v7327_v15, %v7326_v44 }
0x1870   : > { %8542 = vmatpush3.bf16.msra.mxu0 %v7359_v41 }
0x1871   : > { %7664 = vmatprep.subr.bf16.mxu0 %v12997_v17 }
0x1873   : > { %7486 = vmatmul.mubr.bf16.vlgmr.msra.gmra.mrb[100].mxu0 %v8976_v20 }
0x1874   : > { %7665 = vmatpush1.bf16.msra.mxu0 %v12993_v31 }
0x1875   : > { %7666 = vmatprep.subr.bf16.mxu0 %v13010_v49 }
0x1878   : > { %7667 = vmatpush1.bf16.msra.mxu0 %v13007_v25 }
0x188b   : > { %v7177_v11 = vpop.f32.mrb[100].mxu1 }
0x188c   : > { %v7178_v61 = vadd.f32 %v7177_v11, %v12953_v13  ;;  %v7179_v54 = vpop.f32.mrb[101].mxu1 }
0x188d   : > { %v7180_v46 = vadd.f32 %v7179_v54, %v12953_v13  ;;  %v7181_v29 = vpop.f32.mrb[102].mxu1 }
0x188e   : > { %vm7216_vm15 = vcmp.ge.f32.partialorder %v7178_v61, 0.0  ;;  %v7232_v57 = vmul.f32 0.01, %v7178_v61  ;;  %v7182_v12 = vadd.f32 %v7181_v29, %v12951_v60  ;;  %v7183_v43 = vpop.f32.mrb[103].mxu1 }
0x188f   : > { %vm7217_vm12 = vcmp.ge.f32.partialorder %v7180_v46, 0.0  ;;  %v7233_v17 = vmul.f32 0.01, %v7180_v46  ;;  %v7184_v31 = vadd.f32 %v7183_v43, %v12951_v60 }
0x1890   : > { %vm7218_vm8 = vcmp.ge.f32.partialorder %v7182_v12, 0.0  ;;  %v7234_v49 = vmul.f32 0.01, %v7182_v12  ;;  %v7248_v37 = vsel %vm7216_vm15, %v7178_v61, %v7232_v57 }
0x1891   : > { %vm7219_vm11 = vcmp.ge.f32.partialorder %v7184_v31, 0.0  ;;  %v7235_v25 = vmul.f32 0.01, %v7184_v31  ;;  %v7249_v21 = vsel %vm7217_vm12, %v7180_v46, %v7233_v17  ;;  %vm13736_vm12 = vcmask 523264  }
0x1892   : > { %v7264_v30 = vmax.f32 %v7248_v37, %v7249_v21  ;;  %v7250_v33 = vsel %vm7218_vm8, %v7182_v12, %v7234_v49  ;;  %v8979_v49 = vld [vmem:[%s13248_s22 + $0x1c] ss:$12 sps:$4 sm:$0xff]   ;;  %v7705_v37 = vld [vmem:[%s13251_s25] sm:$0xff] }
0x1893   : > { %v7187_v42 = vpop.f32.mrb[104].mxu1  ;;  %v7251_v13 = vsel %vm7219_vm11, %v7184_v31, %v7235_v25  ;;  %7493 = vmatprep.mubr.bf16.mxu0 %v8979_v49  ;;  %v8982_v25 = vld [vmem:[%s13248_s22 + $0x34] ss:$12 sps:$4 sm:$0xff]  }
0x1894   : > { %v7188_v28 = vadd.f32 %v7187_v42, %v12957_v58  ;;  %v7189_v35 = vpop.f32.mrb[105].mxu1  ;;  %7265 = vmax.xlane.f32.xlu1 %v7264_v30  ;;  %v7267_v34 = vmax.f32 %v7250_v33, %v7251_v13  ;;  %v8984_v21 = vld [vmem:[%s13248_s22 + $0x8] ss:$12 sps:$4 sm:$0xff]   ;;  %v8985_v30 = vld [vmem:[%s13248_s22 + $0x30] ss:$12 sps:$4 sm:$0xff]  }
0x1895   : > { %v7190_v8 = vadd.f32 %v7189_v35, %v12957_v58  ;;  %v7191_v50 = vpop.f32.mrb[106].mxu1  ;;  %8833 = vmatprep.mubr.msk.bf16.mxu1 %vm13736_vm12, %v8984_v21  ;;  %v8987_v33 = vld [vmem:[%s13248_s22 + $0x4c] ss:$12 sps:$4 sm:$0xff]   ;;  %v8990_v42 = vld [vmem:[%s13248_s22 + $0x48] ss:$12 sps:$4 sm:$0xff]  }
0x1896   : > { %vm7220_vm13 = vcmp.ge.f32.partialorder %v7188_v28, 0.0  ;;  %v7236_v60 = vmul.f32 0.01, %v7188_v28  ;;  %v7192_v24 = vadd.f32 %v7191_v50, %v12955_v47  ;;  %v7193_v3 = vpop.f32.mrb[107].mxu1  ;;  %7268 = vmax.xlane.f32.xlu0 %v7267_v34 }
0x1897   : > { %vm7221_vm9 = vcmp.ge.f32.partialorder %v7190_v8, 0.0  ;;  %v7237_v48 = vmul.f32 0.01, %v7190_v8  ;;  %v7194_v0 = vadd.f32 %v7193_v3, %v12955_v47 }
0x1898   : > { %vm7222_vm7 = vcmp.ge.f32.partialorder %v7192_v24, 0.0  ;;  %v7238_v23 = vmul.f32 0.01, %v7192_v24  ;;  %v7252_v39 = vsel %vm7220_vm13, %v7188_v28, %v7236_v60  ;;  %vm9134_vm13 = vmmov 0  }
0x1899   : > { %vm7223_vm4 = vcmp.ge.f32.partialorder %v7194_v0, 0.0  ;;  %v7239_v22 = vmul.f32 0.01, %v7194_v0  ;;  %v7253_v1 = vsel %vm7221_vm9, %v7190_v8, %v7237_v48  ;;  %vm13741_vm9 = vcmask 261120  }
0x189a   : > { %v7270_v56 = vmax.f32 %v7252_v39, %v7253_v1  ;;  %v7254_v63 = vsel %vm7222_vm7, %v7192_v24, %v7238_v23 }
0x189b   : > { %v7197_v58 = vpop.f32.mrb[108].mxu1  ;;  %v7255_v55 = vsel %vm7223_vm4, %v7194_v0, %v7239_v22 }
0x189c   : > { %v7198_v40 = vadd.f32 %v7197_v58, %v12961_v62  ;;  %v7199_v9 = vpop.f32.mrb[109].mxu1  ;;  %7271 = vmax.xlane.f32.xlu1 %v7270_v56  ;;  %v7273_v27 = vmax.f32 %v7254_v63, %v7255_v55 }
0x189d   : > { %v7200_v59 = vadd.f32 %v7199_v9, %v12961_v62  ;;  %v7201_v2 = vpop.f32.mrb[110].mxu1 }
0x189e   : > { %vm7224_vm14 = vcmp.ge.f32.partialorder %v7198_v40, 0.0  ;;  %v7240_v47 = vmul.f32 0.01, %v7198_v40  ;;  %v7202_v4 = vadd.f32 %v7201_v2, %v12959_v16  ;;  %v7203_v52 = vpop.f32.mrb[111].mxu1  ;;  %7274 = vmax.xlane.f32.xlu0 %v7273_v27  ;;  %v8989_v27 = vld [vmem:[%s13248_s22 + $0x38] ss:$12 sps:$4 sm:$0xff]  }
0x189f   : > { %vm7225_vm2 = vcmp.ge.f32.partialorder %v7200_v59, 0.0  ;;  %v7241_v6 = vmul.f32 0.01, %v7200_v59  ;;  %v7204_v10 = vadd.f32 %v7203_v52, %v12959_v16 }
0x18a0   : > { %vm7226_vm0 = vcmp.ge.f32.partialorder %v7202_v4, 0.0  ;;  %v7242_v7 = vmul.f32 0.01, %v7202_v4  ;;  %v7256_v51 = vsel %vm7224_vm14, %v7198_v40, %v7240_v47  ;;  %v8986_v40 = vld [vmem:[%s13248_s22 + $0x20] ss:$12 sps:$4 sm:$0xff]  }
0x18a1   : > { %vm7227_vm5 = vcmp.ge.f32.partialorder %v7204_v10, 0.0  ;;  %v7243_v18 = vmul.f32 0.01, %v7204_v10  ;;  %v7257_v38 = vsel %vm7225_vm2, %v7200_v59, %v7241_v6 }
0x18a2   : > { %v7276_v19 = vmax.f32 %v7256_v51, %v7257_v38  ;;  %v7258_v14 = vsel %vm7226_vm0, %v7202_v4, %v7242_v7  ;;  %v13737_v4 = vmov 0.0  }
0x18a3   : > { %v7207_v62 = vpop.f32.mrb[112].mxu1  ;;  %v7259_v5 = vsel %vm7227_vm5, %v7204_v10, %v7243_v18  ;;  %v8991_v10 = vld [vmem:[%s13248_s22 + $0x50] ss:$12 sps:$4 sm:$0xff]  }
0x18a4   : > { %v7208_v36 = vadd.f32 %v7207_v62, %v12965_v53  ;;  %v7209_v26 = vpop.f32.mrb[113].mxu1  ;;  %7277 = vmax.xlane.f32.xlu1 %v7276_v19  ;;  %v7279_v44 = vmax.f32 %v7258_v14, %v7259_v5 }
0x18a5   : > { %v7210_v15 = vadd.f32 %v7209_v26, %v12965_v53  ;;  %v7211_v41 = vpop.f32.mrb[114].mxu1 }
0x18a6   : > { %vm7228_vm1 = vcmp.ge.f32.partialorder %v7208_v36, 0.0  ;;  %v7244_v16 = vmul.f32 0.01, %v7208_v36  ;;  %v7212_v20 = vadd.f32 %v7211_v41, %v12963_v32  ;;  %v7213_v11 = vpop.f32.mrb[115].mxu1  ;;  %7280 = vmax.xlane.f32.xlu0 %v7279_v44 }
0x18a7   : > { %vm7229_vm10 = vcmp.ge.f32.partialorder %v7210_v15, 0.0  ;;  %v7245_v61 = vmul.f32 0.01, %v7210_v15  ;;  %v7214_v54 = vadd.f32 %v7213_v11, %v12963_v32  ;;  %v8981_v32 = vld [vmem:[%s13248_s22 + $0x18] ss:$12 sps:$4 sm:$0xff]  }
0x18a8   : > { %vm7230_vm3 = vcmp.ge.f32.partialorder %v7212_v20, 0.0  ;;  %v7246_v46 = vmul.f32 0.01, %v7212_v20  ;;  %v7260_v29 = vsel %vm7228_vm1, %v7208_v36, %v7244_v16  ;;  %7494 = vmatmul.mubr.bf16.gmra.mrb[104].mxu0 %v8981_v32 }
0x18a9   : > { %vm7231_vm15 = vcmp.ge.f32.partialorder %v7214_v54, 0.0  ;;  %v7247_v57 = vmul.f32 0.01, %v7214_v54  ;;  %v7261_v12 = vsel %vm7229_vm10, %v7210_v15, %v7245_v61  ;;  %7501 = vmatprep.mubr.bf16.mxu0 %v8982_v25 }
0x18aa   : > { %v7282_v43 = vmax.f32 %v7260_v29, %v7261_v12  ;;  %v7262_v17 = vsel %vm7230_vm3, %v7212_v20, %v7246_v46  ;;  %v7607_v46 = vld [vmem:[%s13249_s23] sm:$0xf]  ;;  %v8362_v29 = vld [vmem:[%s13247_s21 + $0x150] sm:$0xff]  ;;  %v8363_v12 = vld [vmem:[%s13247_s21 + $0x158] sm:$0xff] }
0x18ab   : > { %v7263_v53 = vsel %vm7231_vm15, %v7214_v54, %v7247_v57  ;;  %v8360_v57 = vld [vmem:[%s13247_s21 + $0x140] sm:$0xff] }
0x18ac   : > { %7283 = vmax.xlane.f32.xlu1 %v7282_v43  ;;  %v7285_v31 = vmax.f32 %v7262_v17, %v7263_v53  ;;  %v8361_v17 = vld [vmem:[%s13247_s21 + $0x148] sm:$0xff] }
0x18ae   : > { %7286 = vmax.xlane.f32.xlu0 %v7285_v31 }
0x18b0   : > { %7502 = vmatmul.mubr.bf16.gmra.mrb[108].mxu0 %v8985_v30 }
0x18b1   : > { %7509 = vmatprep.mubr.bf16.mxu0 %v8987_v33  ;;  %v8366_v33 = vld [vmem:[%s13247_s21 + $0x170] sm:$0xff] }
0x18b8   : > { %7510 = vmatmul.mubr.bf16.gmra.mrb[112].mxu0 %v8990_v42 }
0x18b9   : > { %7696 = vmatprep.mubr.bf16.mxu0 %v13675_v45 }
0x18c0   : > { %8385 = vmatmul.mubr.msk.bf16.vlgmr.msra.gmra.mrb[116].mxu0 %vm13741_vm9, %v7607_v46 }
0x18c4   : > { %7708 = vperm.xlu0 %8908, %v7705_v37  }
0x1921   : > { %v7266_v13 = vpop.xlane.xlu1 %7265 }
0x1922   : > { %7288 = vst.msk [vmem:[#allocation2 + $0x100] sm:$0xff] %vm6415_vm6, %v7266_v13 }
0x1923   : > { %v7269_v28 = vpop.xlane.xlu0 %7268 }
0x1924   : > { %7289 = vst.msk [vmem:[#allocation2 + $0x108] sm:$0xff] %vm6415_vm6, %v7269_v28 }
0x1929   : > { %v7272_v35 = vpop.xlane.xlu1 %7271  ;;  %v7344_v8 = vld [vmem:[#allocation2 + $0x100] sm:$0xff] }
0x192a   : > { %7290 = vst.msk [vmem:[#allocation2 + $0x110] sm:$0xff] %vm6415_vm6, %v7272_v35 }
0x192b   : > { %v7275_v34 = vpop.xlane.xlu0 %7274  ;;  %v7345_v50 = vld [vmem:[#allocation2 + $0x108] sm:$0xff] }
0x192c   : > { %7291 = vst.msk [vmem:[#allocation2 + $0x118] sm:$0xff] %vm6415_vm6, %v7275_v34  ;;  %v7368_v60 = vpack.c.bf16 %v7345_v50, %v7344_v8  ;;  %v8367_v8 = vld [vmem:[%s13247_s21 + $0x178] sm:$0xff] }
0x192e   : > { %8825 = vmatprep.subr.bf16.mxu1 %v7368_v60 }
0x192f   : > { %8826 = vmatpush3.bf16.msra.mxu1 %v7368_v60 }
0x1931   : > { %v7278_v24 = vpop.xlane.xlu1 %7277  ;;  %v7346_v3 = vld [vmem:[#allocation2 + $0x110] sm:$0xff] }
0x1932   : > { %7292 = vst.msk [vmem:[#allocation2 + $0x120] sm:$0xff] %vm6415_vm6, %v7278_v24  ;;  %v8364_v24 = vld [vmem:[%s13247_s21 + $0x160] sm:$0xff] }
0x1933   : > { %v7281_v45 = vpop.xlane.xlu0 %7280  ;;  %v7347_v48 = vld [vmem:[#allocation2 + $0x118] sm:$0xff] }
0x1934   : > { %7293 = vst.msk [vmem:[#allocation2 + $0x128] sm:$0xff] %vm6415_vm6, %v7281_v45  ;;  %v7369_v0 = vpack.c.bf16 %v7347_v48, %v7346_v3  ;;  %v8365_v48 = vld [vmem:[%s13247_s21 + $0x168] sm:$0xff] }
0x1936   : > { %8827 = vmatprep.subr.bf16.mxu1 %v7369_v0 }
0x1937   : > { %8828 = vmatpush3.bf16.msra.mxu1 %v7369_v0 }
0x1939   : > { %v7284_v23 = vpop.xlane.xlu1 %7283  ;;  %v7348_v22 = vld [vmem:[#allocation2 + $0x120] sm:$0xff] }
0x193a   : > { %7294 = vst.msk [vmem:[#allocation2 + $0x130] sm:$0xff] %vm6415_vm6, %v7284_v23 }
0x193b   : > { %v7287_v39 = vpop.xlane.xlu0 %7286  ;;  %v7349_v1 = vld [vmem:[#allocation2 + $0x128] sm:$0xff] }
0x193c   : > { %7295 = vst.msk [vmem:[#allocation2 + $0x138] sm:$0xff] %vm6415_vm6, %v7287_v39  ;;  %v7370_v56 = vpack.c.bf16 %v7349_v1, %v7348_v22  ;;  %vm13738_vm6 = vmmov %vm13736_vm12 }
0x193d   : > { %vm13739_vm8 = vmmov %vm13738_vm6 }
0x193e   : > { %8829 = vmatprep.subr.bf16.mxu1 %v7370_v56  ;;  %vm13740_vm11 = vmmov %vm13738_vm6 }
0x193f   : > { %8830 = vmatpush3.bf16.msra.mxu1 %v7370_v56  ;;  %vm13742_vm3 = vmmov %vm13738_vm6 }
0x1941   : > { %v7350_v63 = vld [vmem:[#allocation2 + $0x130] sm:$0xff] }
0x1943   : > { %v7351_v58 = vld [vmem:[#allocation2 + $0x138] sm:$0xff] }
0x1944   : > { %v7371_v55 = vpack.c.bf16 %v7351_v58, %v7350_v63 }
0x1946   : > { %8831 = vmatprep.subr.bf16.mxu1 %v7371_v55  ;;  %v8543_v9 = vpop.f32.mrb[100].mxu0 }
0x1947   : > { %8832 = vmatpush3.bf16.msra.mxu1 %v7371_v55  ;;  %v8544_v59 = vpop.f32.mrb[101].mxu0 }
0x1948   : > { %v8545_v2 = vadd.f32 %v8544_v59, %v8543_v9  ;;  %v8546_v47 = vpop.f32.mrb[102].mxu0  ;;  %8841 = vmatprep.subr.bf16.mxu1 %v13737_v4 }
0x1949   : > { %v8547_v52 = vpop.f32.mrb[103].mxu0 }
0x194a   : > { %8834 = vmatmul.mubr.msk.bf16.vlgmr.msra.gmra.mrb[116].mxu1 %vm13738_vm6, %v8986_v40  ;;  %v8548_v6 = vadd.f32 %v8547_v52, %v8546_v47  ;;  %v7488_v31 = vadd.f32 %v8545_v2, %v8360_v57 }
0x194b   : > { %8837 = vmatprep.mubr.msk.bf16.mxu1 %vm13739_vm8, %v8989_v27 }
0x194c   : > { %v7491_v30 = vadd.f32 %v8548_v6, %v8361_v17 }
0x1952   : > { %8838 = vmatmul.mubr.msk.bf16.gmra.mrb[120].mxu1 %vm13740_vm11, %v8991_v10 }
0x1953   : > { %8849 = vmatprep.mubr.msk.bf16.mxu1 %vm9134_vm13, %v13737_v4 }
0x197b   : > { %v8549_v7 = vpop.f32.mrb[104].mxu0 }
0x197c   : > { %v8550_v51 = vpop.f32.mrb[105].mxu0 }
0x197d   : > { %v8551_v18 = vadd.f32 %v8550_v51, %v8549_v7  ;;  %v8552_v38 = vpop.f32.mrb[106].mxu0 }
0x197e   : > { %v8553_v19 = vpop.f32.mrb[107].mxu0 }
0x197f   : > { %v8554_v14 = vadd.f32 %v8553_v19, %v8552_v38  ;;  %v7496_v43 = vadd.f32 %v8551_v18, %v8362_v29 }
0x1981   : > { %v7499_v37 = vadd.f32 %v8554_v14, %v8363_v12 }
0x1983   : > { %v8555_v62 = vpop.f32.mrb[108].mxu0 }
0x1984   : > { %v8556_v5 = vpop.f32.mrb[109].mxu0 }
0x1985   : > { %v8557_v36 = vadd.f32 %v8556_v5, %v8555_v62  ;;  %v8558_v26 = vpop.f32.mrb[110].mxu0 }
0x1986   : > { %v8559_v44 = vpop.f32.mrb[111].mxu0 }
0x1987   : > { %v8560_v15 = vadd.f32 %v8559_v44, %v8558_v26  ;;  %v7504_v56 = vadd.f32 %v8557_v36, %v8364_v24  ;;  %v7608_v36 = vld [vmem:[%s13250_s24] sm:$0xf] }
0x1989   : > { %v7507_v59 = vadd.f32 %v8560_v15, %v8365_v48 }
0x198b   : > { %v8561_v41 = vpop.f32.mrb[112].mxu0 }
0x198c   : > { %v8562_v16 = vpop.f32.mrb[113].mxu0 }
0x198d   : > { %v8563_v20 = vadd.f32 %v8562_v16, %v8561_v41  ;;  %v8564_v11 = vpop.f32.mrb[114].mxu0 }
0x198e   : > { %v8565_v61 = vpop.f32.mrb[115].mxu0 }
0x198f   : > { %v8566_v54 = vadd.f32 %v8565_v61, %v8564_v11  ;;  %v7512_v60 = vadd.f32 %v8563_v20, %v8366_v33 }
0x1991   : > { %v7515_v3 = vadd.f32 %v8566_v54, %v8367_v8 }
0x1993   : > { %v7698_v26 = vpop.f32.mrb[116].mxu0 }
0x1994   : > { %v7700_v44 = vpop.f32.mrb[117].mxu0 }
0x1995   : > { %v7702_v15 = vpop.f32.mrb[118].mxu0 }
0x1996   : > { %v7703_v41 = vpop.f32.mrb[119].mxu0 }
0x1a1d   : > { %v8835_v53 = vpop.f32.mrb[116].mxu1 }
0x1a1e   : > { %v7561_v49 = vadd.f32 %v8835_v53, %v7496_v43  ;;  %v7552_v32 = vpop.f32.mrb[117].mxu1 }
0x1a1f   : > { %v7553_v25 = vadd.f32 %v7552_v32, %v7488_v31  ;;  %v8836_v21 = vpop.f32.mrb[118].mxu1 }
0x1a20   : > { %v7593_v42 = vmul.f32 0.01, %v7561_v49  ;;  %v7564_v13 = vadd.f32 %v8836_v21, %v7499_v37  ;;  %v7555_v28 = vpop.f32.mrb[119].mxu1  ;;  %vm7585_vm7 = vcmp.ge.f32.partialorder %v7561_v49, 0.0 }
0x1a21   : > { %v7591_v35 = vmul.f32 0.01, %v7553_v25  ;;  %v7556_v34 = vadd.f32 %v7555_v28, %v7491_v30  ;;  %vm7583_vm4 = vcmp.ge.f32.partialorder %v7553_v25, 0.0 }
0x1a22   : > { %vm7586_vm14 = vcmp.ge.f32.partialorder %v7564_v13, 0.0  ;;  %v7594_v50 = vmul.f32 0.01, %v7564_v13  ;;  %v7601_v0 = vsel %vm7585_vm7, %v7561_v49, %v7593_v42 }
0x1a23   : > { %vm7584_vm2 = vcmp.ge.f32.partialorder %v7556_v34, 0.0  ;;  %v7592_v45 = vmul.f32 0.01, %v7556_v34  ;;  %v7599_v39 = vsel %vm7583_vm4, %v7553_v25, %v7591_v35 }
0x1a24   : > { %v7602_v23 = vsel %vm7586_vm14, %v7564_v13, %v7594_v50 }
0x1a25   : > { %v7600_v22 = vsel %vm7584_vm2, %v7556_v34, %v7592_v45  ;;  %v8839_v1 = vpop.f32.mrb[120].mxu1  ;;  %v7610_v63 = vpack.c.bf16 %v7602_v23, %v7601_v0 }
0x1a26   : > { %v7609_v58 = vpack.c.bf16 %v7600_v22, %v7599_v39  ;;  %v7577_v55 = vadd.f32 %v8839_v1, %v7512_v60  ;;  %v7568_v40 = vpop.f32.mrb[121].mxu1 }
0x1a27   : > { %v7569_v9 = vadd.f32 %v7568_v40, %v7504_v56  ;;  %v8840_v27 = vpop.f32.mrb[122].mxu1 }
0x1a28   : > { %v7597_v2 = vmul.f32 0.01, %v7577_v55  ;;  %v7580_v47 = vadd.f32 %v8840_v27, %v7515_v3  ;;  %v7571_v52 = vpop.f32.mrb[123].mxu1  ;;  %8842 = vmatpush3.bf16.msra.mxu1 %v7609_v58  ;;  %vm7589_vm0 = vcmp.ge.f32.partialorder %v7577_v55, 0.0 }
0x1a29   : > { %v7595_v6 = vmul.f32 0.01, %v7569_v9  ;;  %v7572_v10 = vadd.f32 %v7571_v52, %v7507_v59  ;;  %8843 = vmatprep.subr.bf16.mxu1 %v13737_v4  ;;  %vm7587_vm5 = vcmp.ge.f32.partialorder %v7569_v9, 0.0 }
0x1a2a   : > { %vm7590_vm1 = vcmp.ge.f32.partialorder %v7580_v47, 0.0  ;;  %v7598_v7 = vmul.f32 0.01, %v7580_v47  ;;  %v7605_v18 = vsel %vm7589_vm0, %v7577_v55, %v7597_v2 }
0x1a2b   : > { %vm7588_vm10 = vcmp.ge.f32.partialorder %v7572_v10, 0.0  ;;  %v7596_v51 = vmul.f32 0.01, %v7572_v10  ;;  %v7603_v19 = vsel %vm7587_vm5, %v7569_v9, %v7595_v6 }
0x1a2c   : > { %8844 = vmatpush3.bf16.msra.mxu1 %v7610_v63  ;;  %v7606_v38 = vsel %vm7590_vm1, %v7580_v47, %v7598_v7 }
0x1a2d   : > { %v7604_v14 = vsel %vm7588_vm10, %v7572_v10, %v7596_v51  ;;  %8845 = vmatprep.subr.bf16.mxu1 %v13737_v4  ;;  %v7612_v62 = vpack.c.bf16 %v7606_v38, %v7605_v18 }
0x1a2e   : > { %v7611_v5 = vpack.c.bf16 %v7604_v14, %v7603_v19 }
0x1a30   : > { %8846 = vmatpush3.bf16.msra.mxu1 %v7611_v5 }
0x1a31   : > { %8847 = vmatprep.subr.bf16.mxu1 %v13737_v4  ;;  %v7709_v4 = vpop.permute.xlu0 %7708 }
0x1a34   : > { %8848 = vmatpush3.bf16.msra.mxu1 %v7612_v62 }
0x1a37   : > { %8850 = vmatmul.mubr.msk.bf16.vlgmr.msra.gmra.mrb[124].mxu1 %vm13742_vm3, %v7608_v36 }
0x1b0a   : > { %v7650_v16 = vpop.f32.mrb[124].mxu1 }
0x1b0b   : > { %7658 = vperm.xlu1 %8907, %v7650_v16   ;;  %v8851_v20 = vpop.f32.mrb[125].mxu1 }
0x1b0c   : > { %v7653_v11 = vpop.f32.mrb[126].mxu1 }
0x1b0d   : > { %v8852_v61 = vpop.f32.mrb[127].mxu1 }
0x1b8a   : > { %v7659_v54 = vpop.permute.xlu1 %7658 }
0x1b8b   : > { %v7699_v46 = vadd.f32 %v7698_v26, %v7659_v54  ;;  %v7701_v29 = vadd.f32 %v7700_v44, %v7659_v54 }
0x1b8d   : > { %v7711_v57 = vadd.f32 %v7709_v4, %v7699_v46  ;;  %v7712_v12 = vadd.f32 %v7709_v4, %v7701_v29 }
0x1b8f   : > { %v7713_v43 = vrot.slane %v7711_v57, 4  ;;  %v7719_v17 = vrot.slane %v7712_v12, 4 }
0x1b91   : > { %v7714_v53 = vmax.f32 %v7711_v57, %v7713_v43  ;;  %v7720_v31 = vmax.f32 %v7712_v12, %v7719_v17 }
0x1b93   : > { %v7715_v49 = vrot.slane %v7714_v53, 2  ;;  %v7721_v32 = vrot.slane %v7720_v31, 2 }
0x1b95   : > { %v7716_v37 = vmax.f32 %v7714_v53, %v7715_v49  ;;  %v7722_v25 = vmax.f32 %v7720_v31, %v7721_v32 }
0x1b97   : > { %v7717_v21 = vrot.slane %v7716_v37, 1  ;;  %v7723_v30 = vrot.slane %v7722_v25, 1 }
0x1b99   : > { %v7718_v33 = vmax.f32 %v7716_v37, %v7717_v21  ;;  %v7724_v42 = vmax.f32 %v7722_v25, %v7723_v30 }
0x1b9b   : > { %v7725_v13 = vsub.f32 %v7711_v57, %v7718_v33  ;;  %v7726_v28 = vsub.f32 %v7712_v12, %v7724_v42 }
0x1b9d   : > { %v7727_v35 = vmul.f32 1.442695, %v7725_v13  ;;  %v7729_v34 = vmul.f32 1.442695, %v7726_v28 }
0x1b9f   : > { %9032 = vpow2.f32 %v7727_v35 }
0x1ba0   : > { %9034 = vpow2.f32 %v7729_v34 }
0x1ba9   : > { %v9033_v8 = vpop.eup %9032 }
0x1baa   : > { %v9035_v50 = vpop.eup %9034  ;;  %v7731_v60 = vrot.slane %v9033_v8, 4 }
0x1bab   : > { %v7737_v24 = vrot.slane %v9035_v50, 4 }
0x1bac   : > { %v7732_v45 = vadd.f32 %v9033_v8, %v7731_v60 }
0x1bad   : > { %v7738_v3 = vadd.f32 %v9035_v50, %v7737_v24 }
0x1bae   : > { %v7733_v48 = vrot.slane %v7732_v45, 2 }
0x1baf   : > { %v7739_v0 = vrot.slane %v7738_v3, 2 }
0x1bb0   : > { %v7734_v23 = vadd.f32 %v7733_v48, %v7732_v45 }
0x1bb1   : > { %v7740_v39 = vadd.f32 %v7739_v0, %v7738_v3 }
0x1bb2   : > { %v7735_v22 = vrot.slane %v7734_v23, 1 }
0x1bb3   : > { %v7741_v1 = vrot.slane %v7740_v39, 1 }
0x1bb4   : > { %v7736_v56 = vadd.f32 %v7735_v22, %v7734_v23 }
0x1bb5   : > { %v7742_v63 = vadd.f32 %v7741_v1, %v7740_v39 }
0x1bb6   : > { %9036 = vlog2.f32 %v7736_v56 }
0x1bb7   : > { %9038 = vlog2.f32 %v7742_v63 }
0x1bc0   : > { %v9037_v58 = vpop.eup %9036 }
0x1bc1   : > { %v9039_v55 = vpop.eup %9038  ;;  %v7744_v40 = vmul.f32 0.6931472, %v9037_v58 }
0x1bc2   : > { %v7746_v9 = vmul.f32 0.6931472, %v9039_v55 }
0x1bc3   : > { %v7747_v27 = vsub.f32 %v7725_v13, %v7744_v40 }
0x1bc4   : > { %v7748_v59 = vsub.f32 %v7726_v28, %v7746_v9 }
0x1bc5   : > { %7749 = vst [vmem:[%s943_s5] sm:$0xff] %v7747_v27 }
0x1bc6   : > { %7750 = vst [vmem:[%s943_s5 + $0x8] sm:$0xff] %v7748_v59 }
0x1bc7   : > { %9081 = shalt.err (!%p9078_p3)
}
0x1bc8   : > { %s9082_s9 = scalar_lea.hbm %s13184_s7, 256  ;;  %s9086_s27 = scalar_lea.hbm %s13744_s4, 512 }
0x1bc9   : > { %p9083_p4 = scmp.ne.s32.totalorder %s13184_s7, %s9082_s9  ;;  %p9087_p9 = scmp.lt.u32.totalorder %s13184_s7, %s13744_s4 }
0x1bca   : > { %p9088_p10 = scmp.lt.u32.totalorder %s9086_s27, %s9082_s9  ;;  %p9090_p12 = scmp.lt.u32.totalorder %s9082_s9, %s13184_s7 }
0x1bcb   : > { %p9084_p7 = pnand %p9083_p4, %p9309_p5 }
0x1bcc   : > { %p9089_p11 = por %p9088_p10, %p9087_p9 }
0x1bcd   : > { %p9085_p8 = pneg %p9084_p7 }
0x1bce   : > { %p9091_p13 = por %p9090_p12, %p9089_p11 }
0x1bd0   : > { %p9092_p0 = pnand %p9091_p13, %p9085_p8 }
0x1bd2   : > { %9095 = shalt.err (!%p9092_p0)
}
0x1bd3   : > { %8865 = dma.vmem_to_hbm [thread:$0]  (%p9309_p5), %s13186_s6, 256, %s13184_s7, %s7752_s13  }
0x1bd4 PF: > { %s13745_s10 = sld [smem:[#allocation8_spill]]  ;;  %s13746_s1 = sld [smem:[#allocation6_spill]] }
0x1bda   : > { %p8871_p1 = scmp.ge.s32.totalorder %s13745_s10, 2  ;;  %s7778_s8 = sand.u32 1, %s13746_s1  }
0x1bdb   : > { %s7779_s15 = scalar_lea.sflag [#allocation4], %s7778_s8 }
0x1bdc   : > { %p8868_p2 = pnand %p8871_p1, %p9313_p6 }
0x1bde   : > { %9113 = dma.done.wait (!%p8868_p2), %s7779_s15, 256  }
0x1bdf   : > { %9115 = vsyncadd (!%p8868_p2), %s7779_s15, 4294967040  ;;  %s13748_s28 = sld [smem:[#allocation9_spill]]  ;;  %s13749_s29 = sld [smem:[#allocation7_spill]] }
0x1be0   : > { %s13750_s7 = sld [smem:[#allocation10_spill]]  ;;  %s13751_s27 = smov %s9122_s3 }
0x1be5   : > { %p36_p3 = scmp.ge.s32.totalorder %s13748_s28, 4   ;;  %s13752_s3 = smov %s13749_s29 }
0x1be7   :  { %38 = sbr.rel (!%p36_p3) target bundleno = 18 (0x12), region = 236 }
0x1bee   :  { %7784 = vsyncpa [#allocation4], 1 }
0x1bef   :  { %7786 = vsyncpa [#allocation4 + $0x1], 1 }

</bundles_post_ra>
